<compile_context>
chip_gen: v5e
topology: v5e:2x2
jax: 0.10.0
libtpu: 0.0.40
codegen_flags: <defaults>
</compile_context>

<pallas_src>
import jax
import jax.numpy as jnp
from jax.experimental import pallas as pl
from jax.experimental.pallas import tpu as pltpu

_EPS = 1e-5
_COL0 = 8  # sublane-aligned column at which real data sits inside padded scratch


# --------------------------------------------------------------------------
# In-kernel building blocks (traced inside the Pallas kernels)
# --------------------------------------------------------------------------

def _write_padded(pad_ref, val4d):
    """Zero a padded scratch buffer and write `val4d` into its interior.

    pad_ref: (N, H+2, W+9, C) VMEM scratch.  Data lives at rows [1, H] and columns
    [_COL0, _COL0+W); everything else stays zero (the conv padding).  _COL0 = 8
    keeps the data store sublane-aligned; tap reads may be unaligned (cheap).
    """
    N, H, W, C = val4d.shape
    pad_ref[...] = jnp.zeros(pad_ref.shape, jnp.float32)
    pad_ref[:, 1:1 + H, _COL0:_COL0 + W, :] = val4d


def _conv3x3_s1(pad_ref, w_ref, b_ref, *, H, W, act):
    """3x3 stride-1 conv (+ folded BN bias, optional ReLU) from padded VMEM scratch.

    pad_ref: (N, H+2, W+9, Cin) f32
    w_ref  : (9*Cin, Cout) bf16, rows ordered (dy, dx, cin)
    b_ref  : (1, Cout) f32
    Returns (N*H*W, Cout) f32.  The 9 taps are sliced out of VMEM and accumulated
    through the MXU (bf16 operands, f32 accumulation).
    """
    N = pad_ref.shape[0]
    Cin = pad_ref.shape[3]
    M = N * H * W
    acc = None
    for dy in range(3):
        for dx in range(3):
            t = dy * 3 + dx
            a = pad_ref[:, dy:dy + H, _COL0 - 1 + dx:_COL0 - 1 + dx + W, :]
            a = a.reshape(M, Cin).astype(jnp.bfloat16)
            d = jnp.dot(a, w_ref[t * Cin:(t + 1) * Cin, :],
                        preferred_element_type=jnp.float32)
            acc = d if acc is None else acc + d
    acc = acc + b_ref[...]
    return jnp.maximum(acc, 0.0) if act else acc


def _se_add_relu(out2d, res2d, f1wT_ref, f1b_ref, f2w_ref, f2b_ref, *, N, HW):
    """relu( out * sigmoid(fc2(relu(fc1(mean_hw(out))))) + res ).

    The squeeze/excite matmuls are tiny (Cr = 2 or 4), so they run on the VPU/XLU
    (multiply + cross-lane reduce) instead of occupying the MXU with a 2-wide op.
    """
    f1wT = f1wT_ref[...]            # (Cr, C)
    f1b = f1b_ref[...]              # (Cr, 1)
    f2w = f2w_ref[...]              # (Cr, C)
    f2b = f2b_ref[...]              # (1, C)
    Cr = f1wT.shape[0]
    outs = []
    for n in range(N):
        xb = out2d[n * HW:(n + 1) * HW, :]                               # (HW, C)
        rb = res2d[n * HW:(n + 1) * HW, :]
        y = jnp.mean(xb, axis=0, keepdims=True)                          # (1, C)
        acc = f2b
        for r in range(Cr):
            hr = jnp.sum(y * f1wT[r:r + 1, :], axis=-1, keepdims=True)   # (1, 1)
            hr = jnp.maximum(hr + f1b[r:r + 1, :], 0.0)
            acc = acc + hr * f2w[r:r + 1, :]
        scale = jax.nn.sigmoid(acc)                                      # (1, C)
        outs.append(jnp.maximum(xb * scale + rb, 0.0))
    return jnp.concatenate(outs, axis=0)                                 # (N*HW, C)


# --------------------------------------------------------------------------
# Fused kernels
# --------------------------------------------------------------------------

def _stage_a_kernel(
    stem_a, stem_w, stem_b,
    l1c1w, l1c1b, l1c2w, l1c2b, l1scw, l1scb, l1f1w, l1f1b, l1f2w, l1f2b,
    l2c1w, l2c1b, l2c2w, l2c2b, l2scw, l2scb, l2f1w, l2f1b, l2f2w, l2f2b,
    x2_ref,
    pad_s, pad_a, pad_b, pad_c,
):
    """stem (3x3 s2 + BN + ReLU) -> ResidualBlock(16->32, SE) -> ResidualBlock(32->64, SE)."""
    N, H, W, _ = x2_ref.shape
    HW = H * W

    # stem (im2col of the raw 3-channel input was done in the wrapper)
    x0 = jnp.dot(stem_a[...], stem_w[...], preferred_element_type=jnp.float32)
    x0 = jnp.maximum(x0 + stem_b[...], 0.0)                               # (N*HW, 16)

    # layer1: ResidualBlock(16 -> 32)
    res1 = jnp.dot(x0.astype(jnp.bfloat16), l1scw[...],
                   preferred_element_type=jnp.float32) + l1scb[...]       # 1x1 shortcut + BN
    _write_padded(pad_s, x0.reshape(N, H, W, -1))
    h1 = _conv3x3_s1(pad_s, l1c1w, l1c1b, H=H, W=W, act=True)
    _write_padded(pad_a, h1.reshape(N, H, W, -1))
    o1 = _conv3x3_s1(pad_a, l1c2w, l1c2b, H=H, W=W, act=False)
    x1 = _se_add_relu(o1, res1, l1f1w, l1f1b, l1f2w, l1f2b, N=N, HW=HW)   # (N*HW, 32)

    # layer2: ResidualBlock(32 -> 64)
    res2 = jnp.dot(x1.astype(jnp.bfloat16), l2scw[...],
                   preferred_element_type=jnp.float32) + l2scb[...]
    _write_padded(pad_b, x1.reshape(N, H, W, -1))
    h2 = _conv3x3_s1(pad_b, l2c1w, l2c1b, H=H, W=W, act=True)
    _write_padded(pad_c, h2.reshape(N, H, W, -1))
    o2 = _conv3x3_s1(pad_c, l2c2w, l2c2b, H=H, W=W, act=False)
    x2 = _se_add_relu(o2, res2, l2f1w, l2f1b, l2f2w, l2f2b, N=N, HW=HW)   # (N*HW, 64)

    x2_ref[...] = x2.reshape(N, H, W, -1)


def _stage_b_kernel(
    ghost_a, gpw, gpb, ggw, ggb,
    ir1w, ir1b, dww, dwb, ir2w, ir2b,
    x3_ref, x4_ref,
    dw_pad, dw_out,
):
    """GhostConv(64->128, s2) -> InvertedResidualBlock(128->256, s2)."""
    N, Hg, Wg, _ = x3_ref.shape
    Ho, Wo = Hg // 2, Wg // 2
    Ch = dww.shape[1]                                # IR hidden channels (512)

    # GhostConv: primary 3x3 s2 (+BN), ghost 1x1 (+BN) on the VMEM-resident primary,
    # concat along channels (lane-dense 128-wide x3 store).
    primary = jnp.dot(ghost_a[...], gpw[...],
                      preferred_element_type=jnp.float32) + gpb[...]      # (N*Hg*Wg, 32)
    ghost = jnp.dot(primary.astype(jnp.bfloat16), ggw[...],
                    preferred_element_type=jnp.float32) + ggb[...]        # (N*Hg*Wg, 96)
    x3 = jnp.concatenate([primary, ghost], axis=1)                        # (N*Hg*Wg, 128)
    x3_ref[...] = x3.reshape(N, Hg, Wg, -1)

    # InvertedResidual: 1x1 expand (+BN, ReLU)
    h = jnp.dot(x3.astype(jnp.bfloat16), ir1w[...],
                preferred_element_type=jnp.float32) + ir1b[...]
    h = jnp.maximum(h, 0.0)                                               # (N*Hg*Wg, 512)

    # depthwise 3x3 stride-2 conv (+BN, ReLU): 9-tap VPU MAC on padded VMEM scratch
    _write_padded(dw_pad, h.reshape(N, Hg, Wg, -1))
    wv = dww[...]                                                         # (9, Ch)
    for i in range(Ho):
        for j in range(Wo):
            acc = jnp.zeros((N, 1, 1, Ch), jnp.float32)
            for dy in range(3):
                for dx in range(3):
                    r = 2 * i + dy
                    c = _COL0 - 1 + 2 * j + dx
                    t = dy * 3 + dx
                    acc = acc + dw_pad[:, r:r + 1, c:c + 1, :] * wv[t:t + 1, :]
            acc = jnp.maximum(acc.reshape(N, Ch) + dwb[...], 0.0)
            dw_out[:, i * Wo + j, :] = acc

    # 1x1 project (+BN, no ReLU).  stride=2 => spatial dims differ => PyTorch forward
    # returns `out` without the shortcut add (the module's unused shortcut conv is omitted).
    d = dw_out[...].reshape(N * Ho * Wo, Ch).astype(jnp.bfloat16)
    x4 = jnp.dot(d, ir2w[...], preferred_element_type=jnp.float32) + ir2b[...]
    x4_ref[...] = x4.reshape(N, Ho, Wo, -1)


# --------------------------------------------------------------------------
# pallas_call wrappers (grid over batch, "parallel" for the v7x dual TensorCores)
# --------------------------------------------------------------------------

def _resident_spec(shape):
    nd = len(shape)
    return pl.BlockSpec(shape, lambda b, _nd=nd: (0,) * _nd)


def _stage_a_call(stem_a, p, N, H, W):
    l1, l2 = p["l1"], p["l2"]
    weights = (
        p["stem_w"], p["stem_b"],
        l1["c1w"], l1["c1b"], l1["c2w"], l1["c2b"], l1["scw"], l1["scb"],
        l1["f1wT"], l1["f1b"], l1["f2w"], l1["f2b"],
        l2["c1w"], l2["c1b"], l2["c2w"], l2["c2b"], l2["scw"], l2["scb"],
        l2["f1wT"], l2["f1b"], l2["f2w"], l2["f2b"],
    )
    HW = H * W
    in_specs = [pl.BlockSpec((HW, stem_a.shape[1]), lambda b: (b, 0))]
    in_specs += [_resident_spec(w.shape) for w in weights]
    return pl.pallas_call(
        _stage_a_kernel,
        grid=(N,),
        out_shape=jax.ShapeDtypeStruct((N, H, W, 64), jnp.float32),
        in_specs=in_specs,
        out_specs=pl.BlockSpec((1, H, W, 64), lambda b: (b, 0, 0, 0)),
        scratch_shapes=[
            pltpu.VMEM((1, H + 2, W + 9, 16), jnp.float32),
            pltpu.VMEM((1, H + 2, W + 9, 32), jnp.float32),
            pltpu.VMEM((1, H + 2, W + 9, 32), jnp.float32),
            pltpu.VMEM((1, H + 2, W + 9, 64), jnp.float32),
        ],
        compiler_params=pltpu.CompilerParams(dimension_semantics=("parallel",)),
    )(stem_a, *weights)


def _stage_b_call(ghost_a, p, N, Hg, Wg):
    l3, l4 = p["l3"], p["l4"]
    weights = (
        l3["pw"], l3["pb"], l3["gw"], l3["gb"],
        l4["c1w"], l4["c1b"], l4["dww"], l4["dwb"], l4["c2w"], l4["c2b"],
    )
    Mg = Hg * Wg
    Ho, Wo = Hg // 2, Wg // 2
    in_specs = [pl.BlockSpec((Mg, ghost_a.shape[1]), lambda b: (b, 0))]
    in_specs += [_resident_spec(w.shape) for w in weights]
    return pl.pallas_call(
        _stage_b_kernel,
        grid=(N,),
        out_shape=(
            jax.ShapeDtypeStruct((N, Hg, Wg, 128), jnp.float32),
            jax.ShapeDtypeStruct((N, Ho, Wo, 256), jnp.float32),
        ),
        in_specs=in_specs,
        out_specs=(
            pl.BlockSpec((1, Hg, Wg, 128), lambda b: (b, 0, 0, 0)),
            pl.BlockSpec((1, Ho, Wo, 256), lambda b: (b, 0, 0, 0)),
        ),
        scratch_shapes=[
            pltpu.VMEM((1, Hg + 2, Wg + 9, 512), jnp.float32),
            pltpu.VMEM((1, Ho * Wo, 512), jnp.float32),
        ],
        compiler_params=pltpu.CompilerParams(dimension_semantics=("parallel",)),
    )(ghost_a, *weights)


# --------------------------------------------------------------------------
# Wrapper-side layout glue (only for the two stride-2 dense 3x3 convs; tiny inputs)
# --------------------------------------------------------------------------

def _im2col_s2_3x3(x):
    """3x3 / stride-2 / pad-1 patches in (dy, dx, cin) column order.  x: NHWC."""
    N, H, W, C = x.shape
    Ho, Wo = (H + 2 - 3) // 2 + 1, (W + 2 - 3) // 2 + 1
    xp = jnp.pad(x, ((0, 0), (1, 1), (1, 1), (0, 0)))
    taps = [xp[:, dy:dy + 2 * Ho:2, dx:dx + 2 * Wo:2, :]
            for dy in range(3) for dx in range(3)]
    cols = jnp.concatenate(taps, axis=-1)          # (N, Ho, Wo, 9*C)
    return cols.reshape(N * Ho * Wo, 9 * C)


# --------------------------------------------------------------------------
# Deterministic parameter init (BN folded, conv weights bf16 for the MXU)
# --------------------------------------------------------------------------

def _conv_bn_params(key, k, cin, cout):
    k1, k2, k3, k4, k5 = jax.random.split(key, 5)
    w = jax.random.normal(k1, (k, k, cin, cout), jnp.float32) * 0.1
    gamma = jax.random.uniform(k2, (cout,), jnp.float32, 0.5, 1.5)
    beta = jax.random.normal(k3, (cout,), jnp.float32) * 0.1
    mean = jax.random.normal(k4, (cout,), jnp.float32) * 0.1
    var = jax.random.uniform(k5, (cout,), jnp.float32, 0.5, 1.5)
    scale = gamma / jnp.sqrt(var + _EPS)
    w_f = (w * scale).reshape(k * k * cin, cout).astype(jnp.bfloat16)  # rows (dy, dx, cin)
    b_f = (beta - mean * scale).reshape(1, cout)
    return w_f, b_f


def _dwconv_bn_params(key, c):
    k1, k2, k3, k4, k5 = jax.random.split(key, 5)
    w = jax.random.normal(k1, (3, 3, c), jnp.float32) * 0.1
    gamma = jax.random.uniform(k2, (c,), jnp.float32, 0.5, 1.5)
    beta = jax.random.normal(k3, (c,), jnp.float32) * 0.1
    mean = jax.random.normal(k4, (c,), jnp.float32) * 0.1
    var = jax.random.uniform(k5, (c,), jnp.float32, 0.5, 1.5)
    scale = gamma / jnp.sqrt(var + _EPS)
    w_f = (w * scale).reshape(9, c)                 # f32, VPU path
    b_f = (beta - mean * scale).reshape(1, c)
    return w_f, b_f


def _se_params(key, c, reduction=16):
    k1, k2, k3, k4 = jax.random.split(key, 4)
    cr = c // reduction
    fc1_w = jax.random.normal(k1, (c, cr), jnp.float32) * 0.1
    fc1_b = jax.random.normal(k2, (cr,), jnp.float32) * 0.1
    fc2_w = jax.random.normal(k3, (cr, c), jnp.float32) * 0.1
    fc2_b = jax.random.normal(k4, (c,), jnp.float32) * 0.1
    return dict(f1wT=fc1_w.T, f1b=fc1_b.reshape(cr, 1),
                f2w=fc2_w, f2b=fc2_b.reshape(1, c))


def _residual_block_params(key, cin, cout):
    k1, k2, k3, k4 = jax.random.split(key, 4)
    d = {}
    d["c1w"], d["c1b"] = _conv_bn_params(k1, 3, cin, cout)
    d["c2w"], d["c2b"] = _conv_bn_params(k2, 3, cout, cout)
    d["scw"], d["scb"] = _conv_bn_params(k3, 1, cin, cout)
    d.update(_se_params(k4, cout))
    return d


def init_params(key, out_channels=256):
    ks = jax.random.split(key, 7)
    p = {}
    p["stem_w"], p["stem_b"] = _conv_bn_params(ks[0], 3, 3, 16)
    p["l1"] = _residual_block_params(ks[1], 16, 32)
    p["l2"] = _residual_block_params(ks[2], 32, 64)
    hidden = 128 // 4                                # GhostConv ratio=4
    l3 = {}
    l3["pw"], l3["pb"] = _conv_bn_params(ks[3], 3, 64, hidden)
    l3["gw"], l3["gb"] = _conv_bn_params(ks[4], 1, hidden, 128 - hidden)
    p["l3"] = l3
    hid = 128 * 4                                    # InvertedResidual expansion=4
    l4 = {}
    l4["c1w"], l4["c1b"] = _conv_bn_params(ks[5], 1, 128, hid)
    kdw, kc2 = jax.random.split(ks[6])
    l4["dww"], l4["dwb"] = _dwconv_bn_params(kdw, hid)
    l4["c2w"], l4["c2b"] = _conv_bn_params(kc2, 1, hid, out_channels)
    p["l4"] = l4
    return p


# --------------------------------------------------------------------------
# Forward pass (NCHW in / NCHW out, like the PyTorch module)
# --------------------------------------------------------------------------

def custom_backbone_forward(x_nchw, params):
    x = jnp.transpose(x_nchw, (0, 2, 3, 1))                    # NCHW -> NHWC
    N, H, W, _ = x.shape
    stem_a = _im2col_s2_3x3(x).astype(jnp.bfloat16)            # (N*H/2*W/2, 27)
    x2 = _stage_a_call(stem_a, params, N, H // 2, W // 2)      # (N, 8, 8, 64)
    ghost_a = _im2col_s2_3x3(x2).astype(jnp.bfloat16)          # (N*H/4*W/4, 576)
    x3, x4 = _stage_b_call(ghost_a, params, N, H // 4, W // 4)
    return [jnp.transpose(t, (0, 3, 1, 2)) for t in (x2, x3, x4)]


# --------------------------------------------------------------------------
# main
# --------------------------------------------------------------------------

if __name__ == "__main__":
    key = jax.random.PRNGKey(0)
    kp, kx = jax.random.split(key)
    params = init_params(kp, out_channels=256)
    x = jax.random.normal(kx, (2, 3, 16, 16), jnp.float32)      # NCHW input [B, 3, H, W]

    fwd = jax.jit(lambda inp: custom_backbone_forward(inp, params))
    outs = jax.block_until_ready(fwd(x))

    assert outs[0].shape == (2, 64, 8, 8), outs[0].shape
    assert outs[1].shape == (2, 128, 4, 4), outs[1].shape
    assert outs[2].shape == (2, 256, 2, 2), outs[2].shape
    assert all(bool(jnp.isfinite(o).all()) for o in outs)

    print("KERNEL_OK")
</pallas_src>

<mosaic_0001>
module attributes {stable_mosaic.version = 11 : i64} {
  func.func @_stage_a_kernel(%arg0: i32, %arg1: memref<64x27xbf16, #tpu.memory_space<vmem>>, %arg2: memref<27x16xbf16, #tpu.memory_space<vmem>>, %arg3: memref<1x16xf32, #tpu.memory_space<vmem>>, %arg4: memref<144x32xbf16, #tpu.memory_space<vmem>>, %arg5: memref<1x32xf32, #tpu.memory_space<vmem>>, %arg6: memref<288x32xbf16, #tpu.memory_space<vmem>>, %arg7: memref<1x32xf32, #tpu.memory_space<vmem>>, %arg8: memref<16x32xbf16, #tpu.memory_space<vmem>>, %arg9: memref<1x32xf32, #tpu.memory_space<vmem>>, %arg10: memref<2x32xf32, #tpu.memory_space<vmem>>, %arg11: memref<2x1xf32, #tpu.memory_space<vmem>>, %arg12: memref<2x32xf32, #tpu.memory_space<vmem>>, %arg13: memref<1x32xf32, #tpu.memory_space<vmem>>, %arg14: memref<288x64xbf16, #tpu.memory_space<vmem>>, %arg15: memref<1x64xf32, #tpu.memory_space<vmem>>, %arg16: memref<576x64xbf16, #tpu.memory_space<vmem>>, %arg17: memref<1x64xf32, #tpu.memory_space<vmem>>, %arg18: memref<32x64xbf16, #tpu.memory_space<vmem>>, %arg19: memref<1x64xf32, #tpu.memory_space<vmem>>, %arg20: memref<4x64xf32, #tpu.memory_space<vmem>>, %arg21: memref<4x1xf32, #tpu.memory_space<vmem>>, %arg22: memref<4x64xf32, #tpu.memory_space<vmem>>, %arg23: memref<1x64xf32, #tpu.memory_space<vmem>>, %arg24: memref<1x8x8x64xf32, #tpu.memory_space<vmem>>, %arg25: memref<1x10x17x16xf32, #tpu.memory_space<vmem>>, %arg26: memref<1x10x17x32xf32, #tpu.memory_space<vmem>>, %arg27: memref<1x10x17x32xf32, #tpu.memory_space<vmem>>, %arg28: memref<1x10x17x64xf32, #tpu.memory_space<vmem>>) attributes {dimension_semantics = [#tpu.dimension_semantics<parallel>], iteration_bounds = array<i64: 2>, scalar_prefetch = 0 : i64, scratch_operands = 4 : i64, tpu.core_type = #tpu.core_type<tc>, window_params = [{transform_indices = @transform_0, window_bounds = array<i64: 64, 27>}, {pipeline_mode = #tpu.pipeline_mode<synchronous>, transform_indices = @transform_1, window_bounds = array<i64: 27, 16>}, {pipeline_mode = #tpu.pipeline_mode<synchronous>, transform_indices = @transform_2, window_bounds = array<i64: 1, 16>}, {pipeline_mode = #tpu.pipeline_mode<synchronous>, transform_indices = @transform_3, window_bounds = array<i64: 144, 32>}, {pipeline_mode = #tpu.pipeline_mode<synchronous>, transform_indices = @transform_4, window_bounds = array<i64: 1, 32>}, {pipeline_mode = #tpu.pipeline_mode<synchronous>, transform_indices = @transform_5, window_bounds = array<i64: 288, 32>}, {pipeline_mode = #tpu.pipeline_mode<synchronous>, transform_indices = @transform_6, window_bounds = array<i64: 1, 32>}, {pipeline_mode = #tpu.pipeline_mode<synchronous>, transform_indices = @transform_7, window_bounds = array<i64: 16, 32>}, {pipeline_mode = #tpu.pipeline_mode<synchronous>, transform_indices = @transform_8, window_bounds = array<i64: 1, 32>}, {pipeline_mode = #tpu.pipeline_mode<synchronous>, transform_indices = @transform_9, window_bounds = array<i64: 2, 32>}, {pipeline_mode = #tpu.pipeline_mode<synchronous>, transform_indices = @transform_10, window_bounds = array<i64: 2, 1>}, {pipeline_mode = #tpu.pipeline_mode<synchronous>, transform_indices = @transform_11, window_bounds = array<i64: 2, 32>}, {pipeline_mode = #tpu.pipeline_mode<synchronous>, transform_indices = @transform_12, window_bounds = array<i64: 1, 32>}, {pipeline_mode = #tpu.pipeline_mode<synchronous>, transform_indices = @transform_13, window_bounds = array<i64: 288, 64>}, {pipeline_mode = #tpu.pipeline_mode<synchronous>, transform_indices = @transform_14, window_bounds = array<i64: 1, 64>}, {pipeline_mode = #tpu.pipeline_mode<synchronous>, transform_indices = @transform_15, window_bounds = array<i64: 576, 64>}, {pipeline_mode = #tpu.pipeline_mode<synchronous>, transform_indices = @transform_16, window_bounds = array<i64: 1, 64>}, {pipeline_mode = #tpu.pipeline_mode<synchronous>, transform_indices = @transform_17, window_bounds = array<i64: 32, 64>}, {pipeline_mode = #tpu.pipeline_mode<synchronous>, transform_indices = @transform_18, window_bounds = array<i64: 1, 64>}, {pipeline_mode = #tpu.pipeline_mode<synchronous>, transform_indices = @transform_19, window_bounds = array<i64: 4, 64>}, {pipeline_mode = #tpu.pipeline_mode<synchronous>, transform_indices = @transform_20, window_bounds = array<i64: 4, 1>}, {pipeline_mode = #tpu.pipeline_mode<synchronous>, transform_indices = @transform_21, window_bounds = array<i64: 4, 64>}, {pipeline_mode = #tpu.pipeline_mode<synchronous>, transform_indices = @transform_22, window_bounds = array<i64: 1, 64>}, {transform_indices = @transform_23, window_bounds = array<i64: 1, 8, 8, 64>}]} {
    %c0 = arith.constant 0 : index
    %c0_0 = arith.constant 0 : index
    %0 = vector.load %arg1[%c0, %c0_0] : memref<64x27xbf16, #tpu.memory_space<vmem>>, vector<64x27xbf16>
    %c0_1 = arith.constant 0 : index
    %c0_2 = arith.constant 0 : index
    %1 = vector.load %arg2[%c0_1, %c0_2] : memref<27x16xbf16, #tpu.memory_space<vmem>>, vector<27x16xbf16>
    %cst = arith.constant dense<0.000000e+00> : vector<64x16xf32>
    %2 = tpu.matmul %0, %1, %cst {dimension_numbers = #tpu.dot_dimension_numbers<[1], [0], [0], [1], [0, 0, 1, 1], [], []>} : vector<64x27xbf16>, vector<27x16xbf16>, vector<64x16xf32> -> vector<64x16xf32>
    %c0_3 = arith.constant 0 : index
    %c0_4 = arith.constant 0 : index
    %3 = vector.load %arg3[%c0_3, %c0_4] : memref<1x16xf32, #tpu.memory_space<vmem>>, vector<1x16xf32>
    %4 = vector.broadcast %3 : vector<1x16xf32> to vector<64x16xf32>
    %5 = arith.addf %2, %4 : vector<64x16xf32>
    %cst_5 = arith.constant 0.000000e+00 : f32
    %6 = vector.broadcast %cst_5 : f32 to vector<64x16xf32>
    %7 = arith.maximumf %5, %6 : vector<64x16xf32>
    %8 = arith.truncf %7 : vector<64x16xf32> to vector<64x16xbf16>
    %c0_6 = arith.constant 0 : index
    %c0_7 = arith.constant 0 : index
    %9 = vector.load %arg8[%c0_6, %c0_7] : memref<16x32xbf16, #tpu.memory_space<vmem>>, vector<16x32xbf16>
    %cst_8 = arith.constant dense<0.000000e+00> : vector<64x32xf32>
    %10 = tpu.matmul %8, %9, %cst_8 {dimension_numbers = #tpu.dot_dimension_numbers<[1], [0], [0], [1], [0, 0, 1, 1], [], []>} : vector<64x16xbf16>, vector<16x32xbf16>, vector<64x32xf32> -> vector<64x32xf32>
    %c0_9 = arith.constant 0 : index
    %c0_10 = arith.constant 0 : index
    %11 = vector.load %arg9[%c0_9, %c0_10] : memref<1x32xf32, #tpu.memory_space<vmem>>, vector<1x32xf32>
    %12 = vector.broadcast %11 : vector<1x32xf32> to vector<64x32xf32>
    %13 = arith.addf %10, %12 : vector<64x32xf32>
    %14 = vector.shape_cast %7 : vector<64x16xf32> to vector<1x8x8x16xf32>
    %cst_11 = arith.constant 0.000000e+00 : f32
    %15 = vector.broadcast %cst_11 : f32 to vector<1x10x17x16xf32>
    %c0_12 = arith.constant 0 : index
    %c0_13 = arith.constant 0 : index
    %c0_14 = arith.constant 0 : index
    %c0_15 = arith.constant 0 : index
    %16 = vector.load %arg25[%c0_12, %c0_13, %c0_14, %c0_15] : memref<1x10x17x16xf32, #tpu.memory_space<vmem>>, vector<1x10x17x16xf32>
    tpu.vector_store %arg25[%c0_12, %c0_13, %c0_14, %c0_15], %15 {strides = array<i32>} : memref<1x10x17x16xf32, #tpu.memory_space<vmem>>, vector<1x10x17x16xf32>,
    %c0_16 = arith.constant 0 : index
    %c1 = arith.constant 1 : index
    %c8 = arith.constant 8 : index
    %c0_17 = arith.constant 0 : index
    %17 = vector.load %arg25[%c0_16, %c1, %c8, %c0_17] : memref<1x10x17x16xf32, #tpu.memory_space<vmem>>, vector<1x8x8x16xf32>
    tpu.vector_store %arg25[%c0_16, %c1, %c8, %c0_17], %14 {strides = array<i32>} : memref<1x10x17x16xf32, #tpu.memory_space<vmem>>, vector<1x8x8x16xf32>,
    %c0_18 = arith.constant 0 : index
    %c0_19 = arith.constant 0 : index
    %c7 = arith.constant 7 : index
    %c0_20 = arith.constant 0 : index
    %18 = vector.load %arg25[%c0_18, %c0_19, %c7, %c0_20] : memref<1x10x17x16xf32, #tpu.memory_space<vmem>>, vector<1x8x8x16xf32>
    %19 = vector.shape_cast %18 : vector<1x8x8x16xf32> to vector<64x16xf32>
    %20 = arith.truncf %19 : vector<64x16xf32> to vector<64x16xbf16>
    %c0_21 = arith.constant 0 : index
    %c0_22 = arith.constant 0 : index
    %21 = vector.load %arg4[%c0_21, %c0_22] : memref<144x32xbf16, #tpu.memory_space<vmem>>, vector<16x32xbf16>
    %cst_23 = arith.constant dense<0.000000e+00> : vector<64x32xf32>
    %22 = tpu.matmul %20, %21, %cst_23 {dimension_numbers = #tpu.dot_dimension_numbers<[1], [0], [0], [1], [0, 0, 1, 1], [], []>} : vector<64x16xbf16>, vector<16x32xbf16>, vector<64x32xf32> -> vector<64x32xf32>
    %c0_24 = arith.constant 0 : index
    %c0_25 = arith.constant 0 : index
    %c8_26 = arith.constant 8 : index
    %c0_27 = arith.constant 0 : index
    %23 = vector.load %arg25[%c0_24, %c0_25, %c8_26, %c0_27] : memref<1x10x17x16xf32, #tpu.memory_space<vmem>>, vector<1x8x8x16xf32>
    %24 = vector.shape_cast %23 : vector<1x8x8x16xf32> to vector<64x16xf32>
    %25 = arith.truncf %24 : vector<64x16xf32> to vector<64x16xbf16>
    %c16 = arith.constant 16 : index
    %c0_28 = arith.constant 0 : index
    %26 = vector.load %arg4[%c16, %c0_28] : memref<144x32xbf16, #tpu.memory_space<vmem>>, vector<16x32xbf16>
    %cst_29 = arith.constant dense<0.000000e+00> : vector<64x32xf32>
    %27 = tpu.matmul %25, %26, %cst_29 {dimension_numbers = #tpu.dot_dimension_numbers<[1], [0], [0], [1], [0, 0, 1, 1], [], []>} : vector<64x16xbf16>, vector<16x32xbf16>, vector<64x32xf32> -> vector<64x32xf32>
    %28 = arith.addf %22, %27 : vector<64x32xf32>
    %c0_30 = arith.constant 0 : index
    %c0_31 = arith.constant 0 : index
    %c9 = arith.constant 9 : index
    %c0_32 = arith.constant 0 : index
    %29 = vector.load %arg25[%c0_30, %c0_31, %c9, %c0_32] : memref<1x10x17x16xf32, #tpu.memory_space<vmem>>, vector<1x8x8x16xf32>
    %30 = vector.shape_cast %29 : vector<1x8x8x16xf32> to vector<64x16xf32>
    %31 = arith.truncf %30 : vector<64x16xf32> to vector<64x16xbf16>
    %c32 = arith.constant 32 : index
    %c0_33 = arith.constant 0 : index
    %32 = vector.load %arg4[%c32, %c0_33] : memref<144x32xbf16, #tpu.memory_space<vmem>>, vector<16x32xbf16>
    %cst_34 = arith.constant dense<0.000000e+00> : vector<64x32xf32>
    %33 = tpu.matmul %31, %32, %cst_34 {dimension_numbers = #tpu.dot_dimension_numbers<[1], [0], [0], [1], [0, 0, 1, 1], [], []>} : vector<64x16xbf16>, vector<16x32xbf16>, vector<64x32xf32> -> vector<64x32xf32>
    %34 = arith.addf %28, %33 : vector<64x32xf32>
    %c0_35 = arith.constant 0 : index
    %c1_36 = arith.constant 1 : index
    %c7_37 = arith.constant 7 : index
    %c0_38 = arith.constant 0 : index
    %35 = vector.load %arg25[%c0_35, %c1_36, %c7_37, %c0_38] : memref<1x10x17x16xf32, #tpu.memory_space<vmem>>, vector<1x8x8x16xf32>
    %36 = vector.shape_cast %35 : vector<1x8x8x16xf32> to vector<64x16xf32>
    %37 = arith.truncf %36 : vector<64x16xf32> to vector<64x16xbf16>
    %c48 = arith.constant 48 : index
    %c0_39 = arith.constant 0 : index
    %38 = vector.load %arg4[%c48, %c0_39] : memref<144x32xbf16, #tpu.memory_space<vmem>>, vector<16x32xbf16>
    %cst_40 = arith.constant dense<0.000000e+00> : vector<64x32xf32>
    %39 = tpu.matmul %37, %38, %cst_40 {dimension_numbers = #tpu.dot_dimension_numbers<[1], [0], [0], [1], [0, 0, 1, 1], [], []>} : vector<64x16xbf16>, vector<16x32xbf16>, vector<64x32xf32> -> vector<64x32xf32>
    %40 = arith.addf %34, %39 : vector<64x32xf32>
    %c0_41 = arith.constant 0 : index
    %c1_42 = arith.constant 1 : index
    %c8_43 = arith.constant 8 : index
    %c0_44 = arith.constant 0 : index
    %41 = vector.load %arg25[%c0_41, %c1_42, %c8_43, %c0_44] : memref<1x10x17x16xf32, #tpu.memory_space<vmem>>, vector<1x8x8x16xf32>
    %42 = vector.shape_cast %41 : vector<1x8x8x16xf32> to vector<64x16xf32>
    %43 = arith.truncf %42 : vector<64x16xf32> to vector<64x16xbf16>
    %c64 = arith.constant 64 : index
    %c0_45 = arith.constant 0 : index
    %44 = vector.load %arg4[%c64, %c0_45] : memref<144x32xbf16, #tpu.memory_space<vmem>>, vector<16x32xbf16>
    %cst_46 = arith.constant dense<0.000000e+00> : vector<64x32xf32>
    %45 = tpu.matmul %43, %44, %cst_46 {dimension_numbers = #tpu.dot_dimension_numbers<[1], [0], [0], [1], [0, 0, 1, 1], [], []>} : vector<64x16xbf16>, vector<16x32xbf16>, vector<64x32xf32> -> vector<64x32xf32>
    %46 = arith.addf %40, %45 : vector<64x32xf32>
    %c0_47 = arith.constant 0 : index
    %c1_48 = arith.constant 1 : index
    %c9_49 = arith.constant 9 : index
    %c0_50 = arith.constant 0 : index
    %47 = vector.load %arg25[%c0_47, %c1_48, %c9_49, %c0_50] : memref<1x10x17x16xf32, #tpu.memory_space<vmem>>, vector<1x8x8x16xf32>
    %48 = vector.shape_cast %47 : vector<1x8x8x16xf32> to vector<64x16xf32>
    %49 = arith.truncf %48 : vector<64x16xf32> to vector<64x16xbf16>
    %c80 = arith.constant 80 : index
    %c0_51 = arith.constant 0 : index
    %50 = vector.load %arg4[%c80, %c0_51] : memref<144x32xbf16, #tpu.memory_space<vmem>>, vector<16x32xbf16>
    %cst_52 = arith.constant dense<0.000000e+00> : vector<64x32xf32>
    %51 = tpu.matmul %49, %50, %cst_52 {dimension_numbers = #tpu.dot_dimension_numbers<[1], [0], [0], [1], [0, 0, 1, 1], [], []>} : vector<64x16xbf16>, vector<16x32xbf16>, vector<64x32xf32> -> vector<64x32xf32>
    %52 = arith.addf %46, %51 : vector<64x32xf32>
    %c0_53 = arith.constant 0 : index
    %c2 = arith.constant 2 : index
    %c7_54 = arith.constant 7 : index
    %c0_55 = arith.constant 0 : index
    %53 = vector.load %arg25[%c0_53, %c2, %c7_54, %c0_55] : memref<1x10x17x16xf32, #tpu.memory_space<vmem>>, vector<1x8x8x16xf32>
    %54 = vector.shape_cast %53 : vector<1x8x8x16xf32> to vector<64x16xf32>
    %55 = arith.truncf %54 : vector<64x16xf32> to vector<64x16xbf16>
    %c96 = arith.constant 96 : index
    %c0_56 = arith.constant 0 : index
    %56 = vector.load %arg4[%c96, %c0_56] : memref<144x32xbf16, #tpu.memory_space<vmem>>, vector<16x32xbf16>
    %cst_57 = arith.constant dense<0.000000e+00> : vector<64x32xf32>
    %57 = tpu.matmul %55, %56, %cst_57 {dimension_numbers = #tpu.dot_dimension_numbers<[1], [0], [0], [1], [0, 0, 1, 1], [], []>} : vector<64x16xbf16>, vector<16x32xbf16>, vector<64x32xf32> -> vector<64x32xf32>
    %58 = arith.addf %52, %57 : vector<64x32xf32>
    %c0_58 = arith.constant 0 : index
    %c2_59 = arith.constant 2 : index
    %c8_60 = arith.constant 8 : index
    %c0_61 = arith.constant 0 : index
    %59 = vector.load %arg25[%c0_58, %c2_59, %c8_60, %c0_61] : memref<1x10x17x16xf32, #tpu.memory_space<vmem>>, vector<1x8x8x16xf32>
    %60 = vector.shape_cast %59 : vector<1x8x8x16xf32> to vector<64x16xf32>
    %61 = arith.truncf %60 : vector<64x16xf32> to vector<64x16xbf16>
    %c112 = arith.constant 112 : index
    %c0_62 = arith.constant 0 : index
    %62 = vector.load %arg4[%c112, %c0_62] : memref<144x32xbf16, #tpu.memory_space<vmem>>, vector<16x32xbf16>
    %cst_63 = arith.constant dense<0.000000e+00> : vector<64x32xf32>
    %63 = tpu.matmul %61, %62, %cst_63 {dimension_numbers = #tpu.dot_dimension_numbers<[1], [0], [0], [1], [0, 0, 1, 1], [], []>} : vector<64x16xbf16>, vector<16x32xbf16>, vector<64x32xf32> -> vector<64x32xf32>
    %64 = arith.addf %58, %63 : vector<64x32xf32>
    %c0_64 = arith.constant 0 : index
    %c2_65 = arith.constant 2 : index
    %c9_66 = arith.constant 9 : index
    %c0_67 = arith.constant 0 : index
    %65 = vector.load %arg25[%c0_64, %c2_65, %c9_66, %c0_67] : memref<1x10x17x16xf32, #tpu.memory_space<vmem>>, vector<1x8x8x16xf32>
    %66 = vector.shape_cast %65 : vector<1x8x8x16xf32> to vector<64x16xf32>
    %67 = arith.truncf %66 : vector<64x16xf32> to vector<64x16xbf16>
    %c128 = arith.constant 128 : index
    %c0_68 = arith.constant 0 : index
    %68 = vector.load %arg4[%c128, %c0_68] : memref<144x32xbf16, #tpu.memory_space<vmem>>, vector<16x32xbf16>
    %cst_69 = arith.constant dense<0.000000e+00> : vector<64x32xf32>
    %69 = tpu.matmul %67, %68, %cst_69 {dimension_numbers = #tpu.dot_dimension_numbers<[1], [0], [0], [1], [0, 0, 1, 1], [], []>} : vector<64x16xbf16>, vector<16x32xbf16>, vector<64x32xf32> -> vector<64x32xf32>
    %70 = arith.addf %64, %69 : vector<64x32xf32>
    %c0_70 = arith.constant 0 : index
    %c0_71 = arith.constant 0 : index
    %71 = vector.load %arg5[%c0_70, %c0_71] : memref<1x32xf32, #tpu.memory_space<vmem>>, vector<1x32xf32>
    %72 = vector.broadcast %71 : vector<1x32xf32> to vector<64x32xf32>
    %73 = arith.addf %70, %72 : vector<64x32xf32>
    %cst_72 = arith.constant 0.000000e+00 : f32
    %74 = vector.broadcast %cst_72 : f32 to vector<64x32xf32>
    %75 = arith.maximumf %73, %74 : vector<64x32xf32>
    %76 = vector.shape_cast %75 : vector<64x32xf32> to vector<1x8x8x32xf32>
    %cst_73 = arith.constant 0.000000e+00 : f32
    %77 = vector.broadcast %cst_73 : f32 to vector<1x10x17x32xf32>
    %c0_74 = arith.constant 0 : index
    %c0_75 = arith.constant 0 : index
    %c0_76 = arith.constant 0 : index
    %c0_77 = arith.constant 0 : index
    %78 = vector.load %arg26[%c0_74, %c0_75, %c0_76, %c0_77] : memref<1x10x17x32xf32, #tpu.memory_space<vmem>>, vector<1x10x17x32xf32>
    tpu.vector_store %arg26[%c0_74, %c0_75, %c0_76, %c0_77], %77 {strides = array<i32>} : memref<1x10x17x32xf32, #tpu.memory_space<vmem>>, vector<1x10x17x32xf32>,
    %c0_78 = arith.constant 0 : index
    %c1_79 = arith.constant 1 : index
    %c8_80 = arith.constant 8 : index
    %c0_81 = arith.constant 0 : index
    %79 = vector.load %arg26[%c0_78, %c1_79, %c8_80, %c0_81] : memref<1x10x17x32xf32, #tpu.memory_space<vmem>>, vector<1x8x8x32xf32>
    tpu.vector_store %arg26[%c0_78, %c1_79, %c8_80, %c0_81], %76 {strides = array<i32>} : memref<1x10x17x32xf32, #tpu.memory_space<vmem>>, vector<1x8x8x32xf32>,
    %c0_82 = arith.constant 0 : index
    %c0_83 = arith.constant 0 : index
    %c7_84 = arith.constant 7 : index
    %c0_85 = arith.constant 0 : index
    %80 = vector.load %arg26[%c0_82, %c0_83, %c7_84, %c0_85] : memref<1x10x17x32xf32, #tpu.memory_space<vmem>>, vector<1x8x8x32xf32>
    %81 = vector.shape_cast %80 : vector<1x8x8x32xf32> to vector<64x32xf32>
    %82 = arith.truncf %81 : vector<64x32xf32> to vector<64x32xbf16>
    %c0_86 = arith.constant 0 : index
    %c0_87 = arith.constant 0 : index
    %83 = vector.load %arg6[%c0_86, %c0_87] : memref<288x32xbf16, #tpu.memory_space<vmem>>, vector<32x32xbf16>
    %cst_88 = arith.constant dense<0.000000e+00> : vector<64x32xf32>
    %84 = tpu.matmul %82, %83, %cst_88 {dimension_numbers = #tpu.dot_dimension_numbers<[1], [0], [0], [1], [0, 0, 1, 1], [], []>} : vector<64x32xbf16>, vector<32x32xbf16>, vector<64x32xf32> -> vector<64x32xf32>
    %c0_89 = arith.constant 0 : index
    %c0_90 = arith.constant 0 : index
    %c8_91 = arith.constant 8 : index
    %c0_92 = arith.constant 0 : index
    %85 = vector.load %arg26[%c0_89, %c0_90, %c8_91, %c0_92] : memref<1x10x17x32xf32, #tpu.memory_space<vmem>>, vector<1x8x8x32xf32>
    %86 = vector.shape_cast %85 : vector<1x8x8x32xf32> to vector<64x32xf32>
    %87 = arith.truncf %86 : vector<64x32xf32> to vector<64x32xbf16>
    %c32_93 = arith.constant 32 : index
    %c0_94 = arith.constant 0 : index
    %88 = vector.load %arg6[%c32_93, %c0_94] : memref<288x32xbf16, #tpu.memory_space<vmem>>, vector<32x32xbf16>
    %cst_95 = arith.constant dense<0.000000e+00> : vector<64x32xf32>
    %89 = tpu.matmul %87, %88, %cst_95 {dimension_numbers = #tpu.dot_dimension_numbers<[1], [0], [0], [1], [0, 0, 1, 1], [], []>} : vector<64x32xbf16>, vector<32x32xbf16>, vector<64x32xf32> -> vector<64x32xf32>
    %90 = arith.addf %84, %89 : vector<64x32xf32>
    %c0_96 = arith.constant 0 : index
    %c0_97 = arith.constant 0 : index
    %c9_98 = arith.constant 9 : index
    %c0_99 = arith.constant 0 : index
    %91 = vector.load %arg26[%c0_96, %c0_97, %c9_98, %c0_99] : memref<1x10x17x32xf32, #tpu.memory_space<vmem>>, vector<1x8x8x32xf32>
    %92 = vector.shape_cast %91 : vector<1x8x8x32xf32> to vector<64x32xf32>
    %93 = arith.truncf %92 : vector<64x32xf32> to vector<64x32xbf16>
    %c64_100 = arith.constant 64 : index
    %c0_101 = arith.constant 0 : index
    %94 = vector.load %arg6[%c64_100, %c0_101] : memref<288x32xbf16, #tpu.memory_space<vmem>>, vector<32x32xbf16>
    %cst_102 = arith.constant dense<0.000000e+00> : vector<64x32xf32>
    %95 = tpu.matmul %93, %94, %cst_102 {dimension_numbers = #tpu.dot_dimension_numbers<[1], [0], [0], [1], [0, 0, 1, 1], [], []>} : vector<64x32xbf16>, vector<32x32xbf16>, vector<64x32xf32> -> vector<64x32xf32>
    %96 = arith.addf %90, %95 : vector<64x32xf32>
    %c0_103 = arith.constant 0 : index
    %c1_104 = arith.constant 1 : index
    %c7_105 = arith.constant 7 : index
    %c0_106 = arith.constant 0 : index
    %97 = vector.load %arg26[%c0_103, %c1_104, %c7_105, %c0_106] : memref<1x10x17x32xf32, #tpu.memory_space<vmem>>, vector<1x8x8x32xf32>
    %98 = vector.shape_cast %97 : vector<1x8x8x32xf32> to vector<64x32xf32>
    %99 = arith.truncf %98 : vector<64x32xf32> to vector<64x32xbf16>
    %c96_107 = arith.constant 96 : index
    %c0_108 = arith.constant 0 : index
    %100 = vector.load %arg6[%c96_107, %c0_108] : memref<288x32xbf16, #tpu.memory_space<vmem>>, vector<32x32xbf16>
    %cst_109 = arith.constant dense<0.000000e+00> : vector<64x32xf32>
    %101 = tpu.matmul %99, %100, %cst_109 {dimension_numbers = #tpu.dot_dimension_numbers<[1], [0], [0], [1], [0, 0, 1, 1], [], []>} : vector<64x32xbf16>, vector<32x32xbf16>, vector<64x32xf32> -> vector<64x32xf32>
    %102 = arith.addf %96, %101 : vector<64x32xf32>
    %c0_110 = arith.constant 0 : index
    %c1_111 = arith.constant 1 : index
    %c8_112 = arith.constant 8 : index
    %c0_113 = arith.constant 0 : index
    %103 = vector.load %arg26[%c0_110, %c1_111, %c8_112, %c0_113] : memref<1x10x17x32xf32, #tpu.memory_space<vmem>>, vector<1x8x8x32xf32>
    %104 = vector.shape_cast %103 : vector<1x8x8x32xf32> to vector<64x32xf32>
    %105 = arith.truncf %104 : vector<64x32xf32> to vector<64x32xbf16>
    %c128_114 = arith.constant 128 : index
    %c0_115 = arith.constant 0 : index
    %106 = vector.load %arg6[%c128_114, %c0_115] : memref<288x32xbf16, #tpu.memory_space<vmem>>, vector<32x32xbf16>
    %cst_116 = arith.constant dense<0.000000e+00> : vector<64x32xf32>
    %107 = tpu.matmul %105, %106, %cst_116 {dimension_numbers = #tpu.dot_dimension_numbers<[1], [0], [0], [1], [0, 0, 1, 1], [], []>} : vector<64x32xbf16>, vector<32x32xbf16>, vector<64x32xf32> -> vector<64x32xf32>
    %108 = arith.addf %102, %107 : vector<64x32xf32>
    %c0_117 = arith.constant 0 : index
    %c1_118 = arith.constant 1 : index
    %c9_119 = arith.constant 9 : index
    %c0_120 = arith.constant 0 : index
    %109 = vector.load %arg26[%c0_117, %c1_118, %c9_119, %c0_120] : memref<1x10x17x32xf32, #tpu.memory_space<vmem>>, vector<1x8x8x32xf32>
    %110 = vector.shape_cast %109 : vector<1x8x8x32xf32> to vector<64x32xf32>
    %111 = arith.truncf %110 : vector<64x32xf32> to vector<64x32xbf16>
    %c160 = arith.constant 160 : index
    %c0_121 = arith.constant 0 : index
    %112 = vector.load %arg6[%c160, %c0_121] : memref<288x32xbf16, #tpu.memory_space<vmem>>, vector<32x32xbf16>
    %cst_122 = arith.constant dense<0.000000e+00> : vector<64x32xf32>
    %113 = tpu.matmul %111, %112, %cst_122 {dimension_numbers = #tpu.dot_dimension_numbers<[1], [0], [0], [1], [0, 0, 1, 1], [], []>} : vector<64x32xbf16>, vector<32x32xbf16>, vector<64x32xf32> -> vector<64x32xf32>
    %114 = arith.addf %108, %113 : vector<64x32xf32>
    %c0_123 = arith.constant 0 : index
    %c2_124 = arith.constant 2 : index
    %c7_125 = arith.constant 7 : index
    %c0_126 = arith.constant 0 : index
    %115 = vector.load %arg26[%c0_123, %c2_124, %c7_125, %c0_126] : memref<1x10x17x32xf32, #tpu.memory_space<vmem>>, vector<1x8x8x32xf32>
    %116 = vector.shape_cast %115 : vector<1x8x8x32xf32> to vector<64x32xf32>
    %117 = arith.truncf %116 : vector<64x32xf32> to vector<64x32xbf16>
    %c192 = arith.constant 192 : index
    %c0_127 = arith.constant 0 : index
    %118 = vector.load %arg6[%c192, %c0_127] : memref<288x32xbf16, #tpu.memory_space<vmem>>, vector<32x32xbf16>
    %cst_128 = arith.constant dense<0.000000e+00> : vector<64x32xf32>
    %119 = tpu.matmul %117, %118, %cst_128 {dimension_numbers = #tpu.dot_dimension_numbers<[1], [0], [0], [1], [0, 0, 1, 1], [], []>} : vector<64x32xbf16>, vector<32x32xbf16>, vector<64x32xf32> -> vector<64x32xf32>
    %120 = arith.addf %114, %119 : vector<64x32xf32>
    %c0_129 = arith.constant 0 : index
    %c2_130 = arith.constant 2 : index
    %c8_131 = arith.constant 8 : index
    %c0_132 = arith.constant 0 : index
    %121 = vector.load %arg26[%c0_129, %c2_130, %c8_131, %c0_132] : memref<1x10x17x32xf32, #tpu.memory_space<vmem>>, vector<1x8x8x32xf32>
    %122 = vector.shape_cast %121 : vector<1x8x8x32xf32> to vector<64x32xf32>
    %123 = arith.truncf %122 : vector<64x32xf32> to vector<64x32xbf16>
    %c224 = arith.constant 224 : index
    %c0_133 = arith.constant 0 : index
    %124 = vector.load %arg6[%c224, %c0_133] : memref<288x32xbf16, #tpu.memory_space<vmem>>, vector<32x32xbf16>
    %cst_134 = arith.constant dense<0.000000e+00> : vector<64x32xf32>
    %125 = tpu.matmul %123, %124, %cst_134 {dimension_numbers = #tpu.dot_dimension_numbers<[1], [0], [0], [1], [0, 0, 1, 1], [], []>} : vector<64x32xbf16>, vector<32x32xbf16>, vector<64x32xf32> -> vector<64x32xf32>
    %126 = arith.addf %120, %125 : vector<64x32xf32>
    %c0_135 = arith.constant 0 : index
    %c2_136 = arith.constant 2 : index
    %c9_137 = arith.constant 9 : index
    %c0_138 = arith.constant 0 : index
    %127 = vector.load %arg26[%c0_135, %c2_136, %c9_137, %c0_138] : memref<1x10x17x32xf32, #tpu.memory_space<vmem>>, vector<1x8x8x32xf32>
    %128 = vector.shape_cast %127 : vector<1x8x8x32xf32> to vector<64x32xf32>
    %129 = arith.truncf %128 : vector<64x32xf32> to vector<64x32xbf16>
    %c256 = arith.constant 256 : index
    %c0_139 = arith.constant 0 : index
    %130 = vector.load %arg6[%c256, %c0_139] : memref<288x32xbf16, #tpu.memory_space<vmem>>, vector<32x32xbf16>
    %cst_140 = arith.constant dense<0.000000e+00> : vector<64x32xf32>
    %131 = tpu.matmul %129, %130, %cst_140 {dimension_numbers = #tpu.dot_dimension_numbers<[1], [0], [0], [1], [0, 0, 1, 1], [], []>} : vector<64x32xbf16>, vector<32x32xbf16>, vector<64x32xf32> -> vector<64x32xf32>
    %132 = arith.addf %126, %131 : vector<64x32xf32>
    %c0_141 = arith.constant 0 : index
    %c0_142 = arith.constant 0 : index
    %133 = vector.load %arg7[%c0_141, %c0_142] : memref<1x32xf32, #tpu.memory_space<vmem>>, vector<1x32xf32>
    %134 = vector.broadcast %133 : vector<1x32xf32> to vector<64x32xf32>
    %135 = arith.addf %132, %134 : vector<64x32xf32>
    %c0_143 = arith.constant 0 : index
    %c0_144 = arith.constant 0 : index
    %136 = vector.load %arg10[%c0_143, %c0_144] : memref<2x32xf32, #tpu.memory_space<vmem>>, vector<2x32xf32>
    %c0_145 = arith.constant 0 : index
    %c0_146 = arith.constant 0 : index
    %137 = vector.load %arg11[%c0_145, %c0_146] : memref<2x1xf32, #tpu.memory_space<vmem>>, vector<2x1xf32>
    %c0_147 = arith.constant 0 : index
    %c0_148 = arith.constant 0 : index
    %138 = vector.load %arg12[%c0_147, %c0_148] : memref<2x32xf32, #tpu.memory_space<vmem>>, vector<2x32xf32>
    %c0_149 = arith.constant 0 : index
    %c0_150 = arith.constant 0 : index
    %139 = vector.load %arg13[%c0_149, %c0_150] : memref<1x32xf32, #tpu.memory_space<vmem>>, vector<1x32xf32>
    %cst_151 = arith.constant dense<0.000000e+00> : vector<32xf32>
    %140 = vector.multi_reduction <add>, %135, %cst_151 [0] : vector<64x32xf32> to vector<32xf32>
    %141 = vector.shape_cast %140 : vector<32xf32> to vector<1x32xf32>
    %cst_152 = arith.constant 6.400000e+01 : f32
    %142 = vector.broadcast %cst_152 : f32 to vector<1x32xf32>
    %143 = arith.divf %141, %142 : vector<1x32xf32>
    %144 = vector.extract_strided_slice %136 {offsets = [0, 0], sizes = [1, 32], strides = [1, 1]} : vector<2x32xf32> to vector<1x32xf32>
    %145 = arith.mulf %143, %144 : vector<1x32xf32>
    %cst_153 = arith.constant dense<0.000000e+00> : vector<1xf32>
    %146 = vector.multi_reduction <add>, %145, %cst_153 [1] : vector<1x32xf32> to vector<1xf32>
    %147 = vector.shape_cast %146 : vector<1xf32> to vector<1x1xf32>
    %148 = vector.extract_strided_slice %137 {offsets = [0, 0], sizes = [1, 1], strides = [1, 1]} : vector<2x1xf32> to vector<1x1xf32>
    %149 = arith.addf %147, %148 : vector<1x1xf32>
    %cst_154 = arith.constant 0.000000e+00 : f32
    %150 = vector.broadcast %cst_154 : f32 to vector<1x1xf32>
    %151 = arith.maximumf %149, %150 : vector<1x1xf32>
    %152 = vector.extract_strided_slice %138 {offsets = [0, 0], sizes = [1, 32], strides = [1, 1]} : vector<2x32xf32> to vector<1x32xf32>
    %153 = vector.broadcast %151 : vector<1x1xf32> to vector<1x32xf32>
    %154 = arith.mulf %153, %152 : vector<1x32xf32>
    %155 = arith.addf %139, %154 : vector<1x32xf32>
    %156 = vector.extract_strided_slice %136 {offsets = [1, 0], sizes = [1, 32], strides = [1, 1]} : vector<2x32xf32> to vector<1x32xf32>
    %157 = arith.mulf %143, %156 : vector<1x32xf32>
    %cst_155 = arith.constant dense<0.000000e+00> : vector<1xf32>
    %158 = vector.multi_reduction <add>, %157, %cst_155 [1] : vector<1x32xf32> to vector<1xf32>
    %159 = vector.shape_cast %158 : vector<1xf32> to vector<1x1xf32>
    %160 = vector.extract_strided_slice %137 {offsets = [1, 0], sizes = [1, 1], strides = [1, 1]} : vector<2x1xf32> to vector<1x1xf32>
    %161 = arith.addf %159, %160 : vector<1x1xf32>
    %cst_156 = arith.constant 0.000000e+00 : f32
    %162 = vector.broadcast %cst_156 : f32 to vector<1x1xf32>
    %163 = arith.maximumf %161, %162 : vector<1x1xf32>
    %164 = vector.extract_strided_slice %138 {offsets = [1, 0], sizes = [1, 32], strides = [1, 1]} : vector<2x32xf32> to vector<1x32xf32>
    %165 = vector.broadcast %163 : vector<1x1xf32> to vector<1x32xf32>
    %166 = arith.mulf %165, %164 : vector<1x32xf32>
    %167 = arith.addf %155, %166 : vector<1x32xf32>
    %168 = arith.negf %167 : vector<1x32xf32>
    %169 = math.exp %168 : vector<1x32xf32>
    %cst_157 = arith.constant 1.000000e+00 : f32
    %170 = vector.broadcast %cst_157 : f32 to vector<1x32xf32>
    %171 = arith.addf %170, %169 : vector<1x32xf32>
    %172 = arith.divf %170, %171 : vector<1x32xf32>
    %173 = vector.broadcast %172 : vector<1x32xf32> to vector<64x32xf32>
    %174 = arith.mulf %135, %173 : vector<64x32xf32>
    %175 = arith.addf %174, %13 : vector<64x32xf32>
    %cst_158 = arith.constant 0.000000e+00 : f32
    %176 = vector.broadcast %cst_158 : f32 to vector<64x32xf32>
    %177 = arith.maximumf %175, %176 : vector<64x32xf32>
    %178 = arith.truncf %177 : vector<64x32xf32> to vector<64x32xbf16>
    %c0_159 = arith.constant 0 : index
    %c0_160 = arith.constant 0 : index
    %179 = vector.load %arg18[%c0_159, %c0_160] : memref<32x64xbf16, #tpu.memory_space<vmem>>, vector<32x64xbf16>
    %cst_161 = arith.constant dense<0.000000e+00> : vector<64x64xf32>
    %180 = tpu.matmul %178, %179, %cst_161 {dimension_numbers = #tpu.dot_dimension_numbers<[1], [0], [0], [1], [0, 0, 1, 1], [], []>} : vector<64x32xbf16>, vector<32x64xbf16>, vector<64x64xf32> -> vector<64x64xf32>
    %c0_162 = arith.constant 0 : index
    %c0_163 = arith.constant 0 : index
    %181 = vector.load %arg19[%c0_162, %c0_163] : memref<1x64xf32, #tpu.memory_space<vmem>>, vector<1x64xf32>
    %182 = vector.broadcast %181 : vector<1x64xf32> to vector<64x64xf32>
    %183 = arith.addf %180, %182 : vector<64x64xf32>
    %184 = vector.shape_cast %177 : vector<64x32xf32> to vector<1x8x8x32xf32>
    %cst_164 = arith.constant 0.000000e+00 : f32
    %185 = vector.broadcast %cst_164 : f32 to vector<1x10x17x32xf32>
    %c0_165 = arith.constant 0 : index
    %c0_166 = arith.constant 0 : index
    %c0_167 = arith.constant 0 : index
    %c0_168 = arith.constant 0 : index
    %186 = vector.load %arg27[%c0_165, %c0_166, %c0_167, %c0_168] : memref<1x10x17x32xf32, #tpu.memory_space<vmem>>, vector<1x10x17x32xf32>
    tpu.vector_store %arg27[%c0_165, %c0_166, %c0_167, %c0_168], %185 {strides = array<i32>} : memref<1x10x17x32xf32, #tpu.memory_space<vmem>>, vector<1x10x17x32xf32>,
    %c0_169 = arith.constant 0 : index
    %c1_170 = arith.constant 1 : index
    %c8_171 = arith.constant 8 : index
    %c0_172 = arith.constant 0 : index
    %187 = vector.load %arg27[%c0_169, %c1_170, %c8_171, %c0_172] : memref<1x10x17x32xf32, #tpu.memory_space<vmem>>, vector<1x8x8x32xf32>
    tpu.vector_store %arg27[%c0_169, %c1_170, %c8_171, %c0_172], %184 {strides = array<i32>} : memref<1x10x17x32xf32, #tpu.memory_space<vmem>>, vector<1x8x8x32xf32>,
    %c0_173 = arith.constant 0 : index
    %c0_174 = arith.constant 0 : index
    %c7_175 = arith.constant 7 : index
    %c0_176 = arith.constant 0 : index
    %188 = vector.load %arg27[%c0_173, %c0_174, %c7_175, %c0_176] : memref<1x10x17x32xf32, #tpu.memory_space<vmem>>, vector<1x8x8x32xf32>
    %189 = vector.shape_cast %188 : vector<1x8x8x32xf32> to vector<64x32xf32>
    %190 = arith.truncf %189 : vector<64x32xf32> to vector<64x32xbf16>
    %c0_177 = arith.constant 0 : index
    %c0_178 = arith.constant 0 : index
    %191 = vector.load %arg14[%c0_177, %c0_178] : memref<288x64xbf16, #tpu.memory_space<vmem>>, vector<32x64xbf16>
    %cst_179 = arith.constant dense<0.000000e+00> : vector<64x64xf32>
    %192 = tpu.matmul %190, %191, %cst_179 {dimension_numbers = #tpu.dot_dimension_numbers<[1], [0], [0], [1], [0, 0, 1, 1], [], []>} : vector<64x32xbf16>, vector<32x64xbf16>, vector<64x64xf32> -> vector<64x64xf32>
    %c0_180 = arith.constant 0 : index
    %c0_181 = arith.constant 0 : index
    %c8_182 = arith.constant 8 : index
    %c0_183 = arith.constant 0 : index
    %193 = vector.load %arg27[%c0_180, %c0_181, %c8_182, %c0_183] : memref<1x10x17x32xf32, #tpu.memory_space<vmem>>, vector<1x8x8x32xf32>
    %194 = vector.shape_cast %193 : vector<1x8x8x32xf32> to vector<64x32xf32>
    %195 = arith.truncf %194 : vector<64x32xf32> to vector<64x32xbf16>
    %c32_184 = arith.constant 32 : index
    %c0_185 = arith.constant 0 : index
    %196 = vector.load %arg14[%c32_184, %c0_185] : memref<288x64xbf16, #tpu.memory_space<vmem>>, vector<32x64xbf16>
    %cst_186 = arith.constant dense<0.000000e+00> : vector<64x64xf32>
    %197 = tpu.matmul %195, %196, %cst_186 {dimension_numbers = #tpu.dot_dimension_numbers<[1], [0], [0], [1], [0, 0, 1, 1], [], []>} : vector<64x32xbf16>, vector<32x64xbf16>, vector<64x64xf32> -> vector<64x64xf32>
    %198 = arith.addf %192, %197 : vector<64x64xf32>
    %c0_187 = arith.constant 0 : index
    %c0_188 = arith.constant 0 : index
    %c9_189 = arith.constant 9 : index
    %c0_190 = arith.constant 0 : index
    %199 = vector.load %arg27[%c0_187, %c0_188, %c9_189, %c0_190] : memref<1x10x17x32xf32, #tpu.memory_space<vmem>>, vector<1x8x8x32xf32>
    %200 = vector.shape_cast %199 : vector<1x8x8x32xf32> to vector<64x32xf32>
    %201 = arith.truncf %200 : vector<64x32xf32> to vector<64x32xbf16>
    %c64_191 = arith.constant 64 : index
    %c0_192 = arith.constant 0 : index
    %202 = vector.load %arg14[%c64_191, %c0_192] : memref<288x64xbf16, #tpu.memory_space<vmem>>, vector<32x64xbf16>
    %cst_193 = arith.constant dense<0.000000e+00> : vector<64x64xf32>
    %203 = tpu.matmul %201, %202, %cst_193 {dimension_numbers = #tpu.dot_dimension_numbers<[1], [0], [0], [1], [0, 0, 1, 1], [], []>} : vector<64x32xbf16>, vector<32x64xbf16>, vector<64x64xf32> -> vector<64x64xf32>
    %204 = arith.addf %198, %203 : vector<64x64xf32>
    %c0_194 = arith.constant 0 : index
    %c1_195 = arith.constant 1 : index
    %c7_196 = arith.constant 7 : index
    %c0_197 = arith.constant 0 : index
    %205 = vector.load %arg27[%c0_194, %c1_195, %c7_196, %c0_197] : memref<1x10x17x32xf32, #tpu.memory_space<vmem>>, vector<1x8x8x32xf32>
    %206 = vector.shape_cast %205 : vector<1x8x8x32xf32> to vector<64x32xf32>
    %207 = arith.truncf %206 : vector<64x32xf32> to vector<64x32xbf16>
    %c96_198 = arith.constant 96 : index
    %c0_199 = arith.constant 0 : index
    %208 = vector.load %arg14[%c96_198, %c0_199] : memref<288x64xbf16, #tpu.memory_space<vmem>>, vector<32x64xbf16>
    %cst_200 = arith.constant dense<0.000000e+00> : vector<64x64xf32>
    %209 = tpu.matmul %207, %208, %cst_200 {dimension_numbers = #tpu.dot_dimension_numbers<[1], [0], [0], [1], [0, 0, 1, 1], [], []>} : vector<64x32xbf16>, vector<32x64xbf16>, vector<64x64xf32> -> vector<64x64xf32>
    %210 = arith.addf %204, %209 : vector<64x64xf32>
    %c0_201 = arith.constant 0 : index
    %c1_202 = arith.constant 1 : index
    %c8_203 = arith.constant 8 : index
    %c0_204 = arith.constant 0 : index
    %211 = vector.load %arg27[%c0_201, %c1_202, %c8_203, %c0_204] : memref<1x10x17x32xf32, #tpu.memory_space<vmem>>, vector<1x8x8x32xf32>
    %212 = vector.shape_cast %211 : vector<1x8x8x32xf32> to vector<64x32xf32>
    %213 = arith.truncf %212 : vector<64x32xf32> to vector<64x32xbf16>
    %c128_205 = arith.constant 128 : index
    %c0_206 = arith.constant 0 : index
    %214 = vector.load %arg14[%c128_205, %c0_206] : memref<288x64xbf16, #tpu.memory_space<vmem>>, vector<32x64xbf16>
    %cst_207 = arith.constant dense<0.000000e+00> : vector<64x64xf32>
    %215 = tpu.matmul %213, %214, %cst_207 {dimension_numbers = #tpu.dot_dimension_numbers<[1], [0], [0], [1], [0, 0, 1, 1], [], []>} : vector<64x32xbf16>, vector<32x64xbf16>, vector<64x64xf32> -> vector<64x64xf32>
    %216 = arith.addf %210, %215 : vector<64x64xf32>
    %c0_208 = arith.constant 0 : index
    %c1_209 = arith.constant 1 : index
    %c9_210 = arith.constant 9 : index
    %c0_211 = arith.constant 0 : index
    %217 = vector.load %arg27[%c0_208, %c1_209, %c9_210, %c0_211] : memref<1x10x17x32xf32, #tpu.memory_space<vmem>>, vector<1x8x8x32xf32>
    %218 = vector.shape_cast %217 : vector<1x8x8x32xf32> to vector<64x32xf32>
    %219 = arith.truncf %218 : vector<64x32xf32> to vector<64x32xbf16>
    %c160_212 = arith.constant 160 : index
    %c0_213 = arith.constant 0 : index
    %220 = vector.load %arg14[%c160_212, %c0_213] : memref<288x64xbf16, #tpu.memory_space<vmem>>, vector<32x64xbf16>
    %cst_214 = arith.constant dense<0.000000e+00> : vector<64x64xf32>
    %221 = tpu.matmul %219, %220, %cst_214 {dimension_numbers = #tpu.dot_dimension_numbers<[1], [0], [0], [1], [0, 0, 1, 1], [], []>} : vector<64x32xbf16>, vector<32x64xbf16>, vector<64x64xf32> -> vector<64x64xf32>
    %222 = arith.addf %216, %221 : vector<64x64xf32>
    %c0_215 = arith.constant 0 : index
    %c2_216 = arith.constant 2 : index
    %c7_217 = arith.constant 7 : index
    %c0_218 = arith.constant 0 : index
    %223 = vector.load %arg27[%c0_215, %c2_216, %c7_217, %c0_218] : memref<1x10x17x32xf32, #tpu.memory_space<vmem>>, vector<1x8x8x32xf32>
    %224 = vector.shape_cast %223 : vector<1x8x8x32xf32> to vector<64x32xf32>
    %225 = arith.truncf %224 : vector<64x32xf32> to vector<64x32xbf16>
    %c192_219 = arith.constant 192 : index
    %c0_220 = arith.constant 0 : index
    %226 = vector.load %arg14[%c192_219, %c0_220] : memref<288x64xbf16, #tpu.memory_space<vmem>>, vector<32x64xbf16>
    %cst_221 = arith.constant dense<0.000000e+00> : vector<64x64xf32>
    %227 = tpu.matmul %225, %226, %cst_221 {dimension_numbers = #tpu.dot_dimension_numbers<[1], [0], [0], [1], [0, 0, 1, 1], [], []>} : vector<64x32xbf16>, vector<32x64xbf16>, vector<64x64xf32> -> vector<64x64xf32>
    %228 = arith.addf %222, %227 : vector<64x64xf32>
    %c0_222 = arith.constant 0 : index
    %c2_223 = arith.constant 2 : index
    %c8_224 = arith.constant 8 : index
    %c0_225 = arith.constant 0 : index
    %229 = vector.load %arg27[%c0_222, %c2_223, %c8_224, %c0_225] : memref<1x10x17x32xf32, #tpu.memory_space<vmem>>, vector<1x8x8x32xf32>
    %230 = vector.shape_cast %229 : vector<1x8x8x32xf32> to vector<64x32xf32>
    %231 = arith.truncf %230 : vector<64x32xf32> to vector<64x32xbf16>
    %c224_226 = arith.constant 224 : index
    %c0_227 = arith.constant 0 : index
    %232 = vector.load %arg14[%c224_226, %c0_227] : memref<288x64xbf16, #tpu.memory_space<vmem>>, vector<32x64xbf16>
    %cst_228 = arith.constant dense<0.000000e+00> : vector<64x64xf32>
    %233 = tpu.matmul %231, %232, %cst_228 {dimension_numbers = #tpu.dot_dimension_numbers<[1], [0], [0], [1], [0, 0, 1, 1], [], []>} : vector<64x32xbf16>, vector<32x64xbf16>, vector<64x64xf32> -> vector<64x64xf32>
    %234 = arith.addf %228, %233 : vector<64x64xf32>
    %c0_229 = arith.constant 0 : index
    %c2_230 = arith.constant 2 : index
    %c9_231 = arith.constant 9 : index
    %c0_232 = arith.constant 0 : index
    %235 = vector.load %arg27[%c0_229, %c2_230, %c9_231, %c0_232] : memref<1x10x17x32xf32, #tpu.memory_space<vmem>>, vector<1x8x8x32xf32>
    %236 = vector.shape_cast %235 : vector<1x8x8x32xf32> to vector<64x32xf32>
    %237 = arith.truncf %236 : vector<64x32xf32> to vector<64x32xbf16>
    %c256_233 = arith.constant 256 : index
    %c0_234 = arith.constant 0 : index
    %238 = vector.load %arg14[%c256_233, %c0_234] : memref<288x64xbf16, #tpu.memory_space<vmem>>, vector<32x64xbf16>
    %cst_235 = arith.constant dense<0.000000e+00> : vector<64x64xf32>
    %239 = tpu.matmul %237, %238, %cst_235 {dimension_numbers = #tpu.dot_dimension_numbers<[1], [0], [0], [1], [0, 0, 1, 1], [], []>} : vector<64x32xbf16>, vector<32x64xbf16>, vector<64x64xf32> -> vector<64x64xf32>
    %240 = arith.addf %234, %239 : vector<64x64xf32>
    %c0_236 = arith.constant 0 : index
    %c0_237 = arith.constant 0 : index
    %241 = vector.load %arg15[%c0_236, %c0_237] : memref<1x64xf32, #tpu.memory_space<vmem>>, vector<1x64xf32>
    %242 = vector.broadcast %241 : vector<1x64xf32> to vector<64x64xf32>
    %243 = arith.addf %240, %242 : vector<64x64xf32>
    %cst_238 = arith.constant 0.000000e+00 : f32
    %244 = vector.broadcast %cst_238 : f32 to vector<64x64xf32>
    %245 = arith.maximumf %243, %244 : vector<64x64xf32>
    %246 = vector.shape_cast %245 : vector<64x64xf32> to vector<1x8x8x64xf32>
    %cst_239 = arith.constant 0.000000e+00 : f32
    %247 = vector.broadcast %cst_239 : f32 to vector<1x10x17x64xf32>
    %c0_240 = arith.constant 0 : index
    %c0_241 = arith.constant 0 : index
    %c0_242 = arith.constant 0 : index
    %c0_243 = arith.constant 0 : index
    %248 = vector.load %arg28[%c0_240, %c0_241, %c0_242, %c0_243] : memref<1x10x17x64xf32, #tpu.memory_space<vmem>>, vector<1x10x17x64xf32>
    tpu.vector_store %arg28[%c0_240, %c0_241, %c0_242, %c0_243], %247 {strides = array<i32>} : memref<1x10x17x64xf32, #tpu.memory_space<vmem>>, vector<1x10x17x64xf32>,
    %c0_244 = arith.constant 0 : index
    %c1_245 = arith.constant 1 : index
    %c8_246 = arith.constant 8 : index
    %c0_247 = arith.constant 0 : index
    %249 = vector.load %arg28[%c0_244, %c1_245, %c8_246, %c0_247] : memref<1x10x17x64xf32, #tpu.memory_space<vmem>>, vector<1x8x8x64xf32>
    tpu.vector_store %arg28[%c0_244, %c1_245, %c8_246, %c0_247], %246 {strides = array<i32>} : memref<1x10x17x64xf32, #tpu.memory_space<vmem>>, vector<1x8x8x64xf32>,
    %c0_248 = arith.constant 0 : index
    %c0_249 = arith.constant 0 : index
    %c7_250 = arith.constant 7 : index
    %c0_251 = arith.constant 0 : index
    %250 = vector.load %arg28[%c0_248, %c0_249, %c7_250, %c0_251] : memref<1x10x17x64xf32, #tpu.memory_space<vmem>>, vector<1x8x8x64xf32>
    %251 = vector.shape_cast %250 : vector<1x8x8x64xf32> to vector<64x64xf32>
    %252 = arith.truncf %251 : vector<64x64xf32> to vector<64x64xbf16>
    %c0_252 = arith.constant 0 : index
    %c0_253 = arith.constant 0 : index
    %253 = vector.load %arg16[%c0_252, %c0_253] : memref<576x64xbf16, #tpu.memory_space<vmem>>, vector<64x64xbf16>
    %cst_254 = arith.constant dense<0.000000e+00> : vector<64x64xf32>
    %254 = tpu.matmul %252, %253, %cst_254 {dimension_numbers = #tpu.dot_dimension_numbers<[1], [0], [0], [1], [0, 0, 1, 1], [], []>} : vector<64x64xbf16>, vector<64x64xbf16>, vector<64x64xf32> -> vector<64x64xf32>
    %c0_255 = arith.constant 0 : index
    %c0_256 = arith.constant 0 : index
    %c8_257 = arith.constant 8 : index
    %c0_258 = arith.constant 0 : index
    %255 = vector.load %arg28[%c0_255, %c0_256, %c8_257, %c0_258] : memref<1x10x17x64xf32, #tpu.memory_space<vmem>>, vector<1x8x8x64xf32>
    %256 = vector.shape_cast %255 : vector<1x8x8x64xf32> to vector<64x64xf32>
    %257 = arith.truncf %256 : vector<64x64xf32> to vector<64x64xbf16>
    %c64_259 = arith.constant 64 : index
    %c0_260 = arith.constant 0 : index
    %258 = vector.load %arg16[%c64_259, %c0_260] : memref<576x64xbf16, #tpu.memory_space<vmem>>, vector<64x64xbf16>
    %cst_261 = arith.constant dense<0.000000e+00> : vector<64x64xf32>
    %259 = tpu.matmul %257, %258, %cst_261 {dimension_numbers = #tpu.dot_dimension_numbers<[1], [0], [0], [1], [0, 0, 1, 1], [], []>} : vector<64x64xbf16>, vector<64x64xbf16>, vector<64x64xf32> -> vector<64x64xf32>
    %260 = arith.addf %254, %259 : vector<64x64xf32>
    %c0_262 = arith.constant 0 : index
    %c0_263 = arith.constant 0 : index
    %c9_264 = arith.constant 9 : index
    %c0_265 = arith.constant 0 : index
    %261 = vector.load %arg28[%c0_262, %c0_263, %c9_264, %c0_265] : memref<1x10x17x64xf32, #tpu.memory_space<vmem>>, vector<1x8x8x64xf32>
    %262 = vector.shape_cast %261 : vector<1x8x8x64xf32> to vector<64x64xf32>
    %263 = arith.truncf %262 : vector<64x64xf32> to vector<64x64xbf16>
    %c128_266 = arith.constant 128 : index
    %c0_267 = arith.constant 0 : index
    %264 = vector.load %arg16[%c128_266, %c0_267] : memref<576x64xbf16, #tpu.memory_space<vmem>>, vector<64x64xbf16>
    %cst_268 = arith.constant dense<0.000000e+00> : vector<64x64xf32>
    %265 = tpu.matmul %263, %264, %cst_268 {dimension_numbers = #tpu.dot_dimension_numbers<[1], [0], [0], [1], [0, 0, 1, 1], [], []>} : vector<64x64xbf16>, vector<64x64xbf16>, vector<64x64xf32> -> vector<64x64xf32>
    %266 = arith.addf %260, %265 : vector<64x64xf32>
    %c0_269 = arith.constant 0 : index
    %c1_270 = arith.constant 1 : index
    %c7_271 = arith.constant 7 : index
    %c0_272 = arith.constant 0 : index
    %267 = vector.load %arg28[%c0_269, %c1_270, %c7_271, %c0_272] : memref<1x10x17x64xf32, #tpu.memory_space<vmem>>, vector<1x8x8x64xf32>
    %268 = vector.shape_cast %267 : vector<1x8x8x64xf32> to vector<64x64xf32>
    %269 = arith.truncf %268 : vector<64x64xf32> to vector<64x64xbf16>
    %c192_273 = arith.constant 192 : index
    %c0_274 = arith.constant 0 : index
    %270 = vector.load %arg16[%c192_273, %c0_274] : memref<576x64xbf16, #tpu.memory_space<vmem>>, vector<64x64xbf16>
    %cst_275 = arith.constant dense<0.000000e+00> : vector<64x64xf32>
    %271 = tpu.matmul %269, %270, %cst_275 {dimension_numbers = #tpu.dot_dimension_numbers<[1], [0], [0], [1], [0, 0, 1, 1], [], []>} : vector<64x64xbf16>, vector<64x64xbf16>, vector<64x64xf32> -> vector<64x64xf32>
    %272 = arith.addf %266, %271 : vector<64x64xf32>
    %c0_276 = arith.constant 0 : index
    %c1_277 = arith.constant 1 : index
    %c8_278 = arith.constant 8 : index
    %c0_279 = arith.constant 0 : index
    %273 = vector.load %arg28[%c0_276, %c1_277, %c8_278, %c0_279] : memref<1x10x17x64xf32, #tpu.memory_space<vmem>>, vector<1x8x8x64xf32>
    %274 = vector.shape_cast %273 : vector<1x8x8x64xf32> to vector<64x64xf32>
    %275 = arith.truncf %274 : vector<64x64xf32> to vector<64x64xbf16>
    %c256_280 = arith.constant 256 : index
    %c0_281 = arith.constant 0 : index
    %276 = vector.load %arg16[%c256_280, %c0_281] : memref<576x64xbf16, #tpu.memory_space<vmem>>, vector<64x64xbf16>
    %cst_282 = arith.constant dense<0.000000e+00> : vector<64x64xf32>
    %277 = tpu.matmul %275, %276, %cst_282 {dimension_numbers = #tpu.dot_dimension_numbers<[1], [0], [0], [1], [0, 0, 1, 1], [], []>} : vector<64x64xbf16>, vector<64x64xbf16>, vector<64x64xf32> -> vector<64x64xf32>
    %278 = arith.addf %272, %277 : vector<64x64xf32>
    %c0_283 = arith.constant 0 : index
    %c1_284 = arith.constant 1 : index
    %c9_285 = arith.constant 9 : index
    %c0_286 = arith.constant 0 : index
    %279 = vector.load %arg28[%c0_283, %c1_284, %c9_285, %c0_286] : memref<1x10x17x64xf32, #tpu.memory_space<vmem>>, vector<1x8x8x64xf32>
    %280 = vector.shape_cast %279 : vector<1x8x8x64xf32> to vector<64x64xf32>
    %281 = arith.truncf %280 : vector<64x64xf32> to vector<64x64xbf16>
    %c320 = arith.constant 320 : index
    %c0_287 = arith.constant 0 : index
    %282 = vector.load %arg16[%c320, %c0_287] : memref<576x64xbf16, #tpu.memory_space<vmem>>, vector<64x64xbf16>
    %cst_288 = arith.constant dense<0.000000e+00> : vector<64x64xf32>
    %283 = tpu.matmul %281, %282, %cst_288 {dimension_numbers = #tpu.dot_dimension_numbers<[1], [0], [0], [1], [0, 0, 1, 1], [], []>} : vector<64x64xbf16>, vector<64x64xbf16>, vector<64x64xf32> -> vector<64x64xf32>
    %284 = arith.addf %278, %283 : vector<64x64xf32>
    %c0_289 = arith.constant 0 : index
    %c2_290 = arith.constant 2 : index
    %c7_291 = arith.constant 7 : index
    %c0_292 = arith.constant 0 : index
    %285 = vector.load %arg28[%c0_289, %c2_290, %c7_291, %c0_292] : memref<1x10x17x64xf32, #tpu.memory_space<vmem>>, vector<1x8x8x64xf32>
    %286 = vector.shape_cast %285 : vector<1x8x8x64xf32> to vector<64x64xf32>
    %287 = arith.truncf %286 : vector<64x64xf32> to vector<64x64xbf16>
    %c384 = arith.constant 384 : index
    %c0_293 = arith.constant 0 : index
    %288 = vector.load %arg16[%c384, %c0_293] : memref<576x64xbf16, #tpu.memory_space<vmem>>, vector<64x64xbf16>
    %cst_294 = arith.constant dense<0.000000e+00> : vector<64x64xf32>
    %289 = tpu.matmul %287, %288, %cst_294 {dimension_numbers = #tpu.dot_dimension_numbers<[1], [0], [0], [1], [0, 0, 1, 1], [], []>} : vector<64x64xbf16>, vector<64x64xbf16>, vector<64x64xf32> -> vector<64x64xf32>
    %290 = arith.addf %284, %289 : vector<64x64xf32>
    %c0_295 = arith.constant 0 : index
    %c2_296 = arith.constant 2 : index
    %c8_297 = arith.constant 8 : index
    %c0_298 = arith.constant 0 : index
    %291 = vector.load %arg28[%c0_295, %c2_296, %c8_297, %c0_298] : memref<1x10x17x64xf32, #tpu.memory_space<vmem>>, vector<1x8x8x64xf32>
    %292 = vector.shape_cast %291 : vector<1x8x8x64xf32> to vector<64x64xf32>
    %293 = arith.truncf %292 : vector<64x64xf32> to vector<64x64xbf16>
    %c448 = arith.constant 448 : index
    %c0_299 = arith.constant 0 : index
    %294 = vector.load %arg16[%c448, %c0_299] : memref<576x64xbf16, #tpu.memory_space<vmem>>, vector<64x64xbf16>
    %cst_300 = arith.constant dense<0.000000e+00> : vector<64x64xf32>
    %295 = tpu.matmul %293, %294, %cst_300 {dimension_numbers = #tpu.dot_dimension_numbers<[1], [0], [0], [1], [0, 0, 1, 1], [], []>} : vector<64x64xbf16>, vector<64x64xbf16>, vector<64x64xf32> -> vector<64x64xf32>
    %296 = arith.addf %290, %295 : vector<64x64xf32>
    %c0_301 = arith.constant 0 : index
    %c2_302 = arith.constant 2 : index
    %c9_303 = arith.constant 9 : index
    %c0_304 = arith.constant 0 : index
    %297 = vector.load %arg28[%c0_301, %c2_302, %c9_303, %c0_304] : memref<1x10x17x64xf32, #tpu.memory_space<vmem>>, vector<1x8x8x64xf32>
    %298 = vector.shape_cast %297 : vector<1x8x8x64xf32> to vector<64x64xf32>
    %299 = arith.truncf %298 : vector<64x64xf32> to vector<64x64xbf16>
    %c512 = arith.constant 512 : index
    %c0_305 = arith.constant 0 : index
    %300 = vector.load %arg16[%c512, %c0_305] : memref<576x64xbf16, #tpu.memory_space<vmem>>, vector<64x64xbf16>
    %cst_306 = arith.constant dense<0.000000e+00> : vector<64x64xf32>
    %301 = tpu.matmul %299, %300, %cst_306 {dimension_numbers = #tpu.dot_dimension_numbers<[1], [0], [0], [1], [0, 0, 1, 1], [], []>} : vector<64x64xbf16>, vector<64x64xbf16>, vector<64x64xf32> -> vector<64x64xf32>
    %302 = arith.addf %296, %301 : vector<64x64xf32>
    %c0_307 = arith.constant 0 : index
    %c0_308 = arith.constant 0 : index
    %303 = vector.load %arg17[%c0_307, %c0_308] : memref<1x64xf32, #tpu.memory_space<vmem>>, vector<1x64xf32>
    %304 = vector.broadcast %303 : vector<1x64xf32> to vector<64x64xf32>
    %305 = arith.addf %302, %304 : vector<64x64xf32>
    %c0_309 = arith.constant 0 : index
    %c0_310 = arith.constant 0 : index
    %306 = vector.load %arg20[%c0_309, %c0_310] : memref<4x64xf32, #tpu.memory_space<vmem>>, vector<4x64xf32>
    %c0_311 = arith.constant 0 : index
    %c0_312 = arith.constant 0 : index
    %307 = vector.load %arg21[%c0_311, %c0_312] : memref<4x1xf32, #tpu.memory_space<vmem>>, vector<4x1xf32>
    %c0_313 = arith.constant 0 : index
    %c0_314 = arith.constant 0 : index
    %308 = vector.load %arg22[%c0_313, %c0_314] : memref<4x64xf32, #tpu.memory_space<vmem>>, vector<4x64xf32>
    %c0_315 = arith.constant 0 : index
    %c0_316 = arith.constant 0 : index
    %309 = vector.load %arg23[%c0_315, %c0_316] : memref<1x64xf32, #tpu.memory_space<vmem>>, vector<1x64xf32>
    %cst_317 = arith.constant dense<0.000000e+00> : vector<64xf32>
    %310 = vector.multi_reduction <add>, %305, %cst_317 [0] : vector<64x64xf32> to vector<64xf32>
    %311 = vector.shape_cast %310 : vector<64xf32> to vector<1x64xf32>
    %cst_318 = arith.constant 6.400000e+01 : f32
    %312 = vector.broadcast %cst_318 : f32 to vector<1x64xf32>
    %313 = arith.divf %311, %312 : vector<1x64xf32>
    %314 = vector.extract_strided_slice %306 {offsets = [0, 0], sizes = [1, 64], strides = [1, 1]} : vector<4x64xf32> to vector<1x64xf32>
    %315 = arith.mulf %313, %314 : vector<1x64xf32>
    %cst_319 = arith.constant dense<0.000000e+00> : vector<1xf32>
    %316 = vector.multi_reduction <add>, %315, %cst_319 [1] : vector<1x64xf32> to vector<1xf32>
    %317 = vector.shape_cast %316 : vector<1xf32> to vector<1x1xf32>
    %318 = vector.extract_strided_slice %307 {offsets = [0, 0], sizes = [1, 1], strides = [1, 1]} : vector<4x1xf32> to vector<1x1xf32>
    %319 = arith.addf %317, %318 : vector<1x1xf32>
    %cst_320 = arith.constant 0.000000e+00 : f32
    %320 = vector.broadcast %cst_320 : f32 to vector<1x1xf32>
    %321 = arith.maximumf %319, %320 : vector<1x1xf32>
    %322 = vector.extract_strided_slice %308 {offsets = [0, 0], sizes = [1, 64], strides = [1, 1]} : vector<4x64xf32> to vector<1x64xf32>
    %323 = vector.broadcast %321 : vector<1x1xf32> to vector<1x64xf32>
    %324 = arith.mulf %323, %322 : vector<1x64xf32>
    %325 = arith.addf %309, %324 : vector<1x64xf32>
    %326 = vector.extract_strided_slice %306 {offsets = [1, 0], sizes = [1, 64], strides = [1, 1]} : vector<4x64xf32> to vector<1x64xf32>
    %327 = arith.mulf %313, %326 : vector<1x64xf32>
    %cst_321 = arith.constant dense<0.000000e+00> : vector<1xf32>
    %328 = vector.multi_reduction <add>, %327, %cst_321 [1] : vector<1x64xf32> to vector<1xf32>
    %329 = vector.shape_cast %328 : vector<1xf32> to vector<1x1xf32>
    %330 = vector.extract_strided_slice %307 {offsets = [1, 0], sizes = [1, 1], strides = [1, 1]} : vector<4x1xf32> to vector<1x1xf32>
    %331 = arith.addf %329, %330 : vector<1x1xf32>
    %cst_322 = arith.constant 0.000000e+00 : f32
    %332 = vector.broadcast %cst_322 : f32 to vector<1x1xf32>
    %333 = arith.maximumf %331, %332 : vector<1x1xf32>
    %334 = vector.extract_strided_slice %308 {offsets = [1, 0], sizes = [1, 64], strides = [1, 1]} : vector<4x64xf32> to vector<1x64xf32>
    %335 = vector.broadcast %333 : vector<1x1xf32> to vector<1x64xf32>
    %336 = arith.mulf %335, %334 : vector<1x64xf32>
    %337 = arith.addf %325, %336 : vector<1x64xf32>
    %338 = vector.extract_strided_slice %306 {offsets = [2, 0], sizes = [1, 64], strides = [1, 1]} : vector<4x64xf32> to vector<1x64xf32>
    %339 = arith.mulf %313, %338 : vector<1x64xf32>
    %cst_323 = arith.constant dense<0.000000e+00> : vector<1xf32>
    %340 = vector.multi_reduction <add>, %339, %cst_323 [1] : vector<1x64xf32> to vector<1xf32>
    %341 = vector.shape_cast %340 : vector<1xf32> to vector<1x1xf32>
    %342 = vector.extract_strided_slice %307 {offsets = [2, 0], sizes = [1, 1], strides = [1, 1]} : vector<4x1xf32> to vector<1x1xf32>
    %343 = arith.addf %341, %342 : vector<1x1xf32>
    %cst_324 = arith.constant 0.000000e+00 : f32
    %344 = vector.broadcast %cst_324 : f32 to vector<1x1xf32>
    %345 = arith.maximumf %343, %344 : vector<1x1xf32>
    %346 = vector.extract_strided_slice %308 {offsets = [2, 0], sizes = [1, 64], strides = [1, 1]} : vector<4x64xf32> to vector<1x64xf32>
    %347 = vector.broadcast %345 : vector<1x1xf32> to vector<1x64xf32>
    %348 = arith.mulf %347, %346 : vector<1x64xf32>
    %349 = arith.addf %337, %348 : vector<1x64xf32>
    %350 = vector.extract_strided_slice %306 {offsets = [3, 0], sizes = [1, 64], strides = [1, 1]} : vector<4x64xf32> to vector<1x64xf32>
    %351 = arith.mulf %313, %350 : vector<1x64xf32>
    %cst_325 = arith.constant dense<0.000000e+00> : vector<1xf32>
    %352 = vector.multi_reduction <add>, %351, %cst_325 [1] : vector<1x64xf32> to vector<1xf32>
    %353 = vector.shape_cast %352 : vector<1xf32> to vector<1x1xf32>
    %354 = vector.extract_strided_slice %307 {offsets = [3, 0], sizes = [1, 1], strides = [1, 1]} : vector<4x1xf32> to vector<1x1xf32>
    %355 = arith.addf %353, %354 : vector<1x1xf32>
    %cst_326 = arith.constant 0.000000e+00 : f32
    %356 = vector.broadcast %cst_326 : f32 to vector<1x1xf32>
    %357 = arith.maximumf %355, %356 : vector<1x1xf32>
    %358 = vector.extract_strided_slice %308 {offsets = [3, 0], sizes = [1, 64], strides = [1, 1]} : vector<4x64xf32> to vector<1x64xf32>
    %359 = vector.broadcast %357 : vector<1x1xf32> to vector<1x64xf32>
    %360 = arith.mulf %359, %358 : vector<1x64xf32>
    %361 = arith.addf %349, %360 : vector<1x64xf32>
    %362 = arith.negf %361 : vector<1x64xf32>
    %363 = math.exp %362 : vector<1x64xf32>
    %cst_327 = arith.constant 1.000000e+00 : f32
    %364 = vector.broadcast %cst_327 : f32 to vector<1x64xf32>
    %365 = arith.addf %364, %363 : vector<1x64xf32>
    %366 = arith.divf %364, %365 : vector<1x64xf32>
    %367 = vector.broadcast %366 : vector<1x64xf32> to vector<64x64xf32>
    %368 = arith.mulf %305, %367 : vector<64x64xf32>
    %369 = arith.addf %368, %183 : vector<64x64xf32>
    %cst_328 = arith.constant 0.000000e+00 : f32
    %370 = vector.broadcast %cst_328 : f32 to vector<64x64xf32>
    %371 = arith.maximumf %369, %370 : vector<64x64xf32>
    %372 = vector.shape_cast %371 : vector<64x64xf32> to vector<1x8x8x64xf32>
    %c0_329 = arith.constant 0 : index
    %c0_330 = arith.constant 0 : index
    %c0_331 = arith.constant 0 : index
    %c0_332 = arith.constant 0 : index
    %373 = vector.load %arg24[%c0_329, %c0_330, %c0_331, %c0_332] : memref<1x8x8x64xf32, #tpu.memory_space<vmem>>, vector<1x8x8x64xf32>
    tpu.vector_store %arg24[%c0_329, %c0_330, %c0_331, %c0_332], %372 {strides = array<i32>} : memref<1x8x8x64xf32, #tpu.memory_space<vmem>>, vector<1x8x8x64xf32>,
    return
  }
  func.func @transform_0(%arg0: i32) -> (i32, i32) {
    %c0_i32 = arith.constant 0 : i32
    %c0_i32_0 = arith.constant 0 : i32
    return %arg0, %c0_i32 : i32, i32
  }
  func.func @transform_1(%arg0: i32) -> (i32, i32) {
    %c0_i32 = arith.constant 0 : i32
    %c0_i32_0 = arith.constant 0 : i32
    %c0_i32_1 = arith.constant 0 : i32
    return %c0_i32, %c0_i32_0 : i32, i32
  }
  func.func @transform_2(%arg0: i32) -> (i32, i32) {
    %c0_i32 = arith.constant 0 : i32
    %c0_i32_0 = arith.constant 0 : i32
    %c0_i32_1 = arith.constant 0 : i32
    return %c0_i32, %c0_i32_0 : i32, i32
  }
  func.func @transform_3(%arg0: i32) -> (i32, i32) {
    %c0_i32 = arith.constant 0 : i32
    %c0_i32_0 = arith.constant 0 : i32
    %c0_i32_1 = arith.constant 0 : i32
    return %c0_i32, %c0_i32_0 : i32, i32
  }
  func.func @transform_4(%arg0: i32) -> (i32, i32) {
    %c0_i32 = arith.constant 0 : i32
    %c0_i32_0 = arith.constant 0 : i32
    %c0_i32_1 = arith.constant 0 : i32
    return %c0_i32, %c0_i32_0 : i32, i32
  }
  func.func @transform_5(%arg0: i32) -> (i32, i32) {
    %c0_i32 = arith.constant 0 : i32
    %c0_i32_0 = arith.constant 0 : i32
    %c0_i32_1 = arith.constant 0 : i32
    return %c0_i32, %c0_i32_0 : i32, i32
  }
  func.func @transform_6(%arg0: i32) -> (i32, i32) {
    %c0_i32 = arith.constant 0 : i32
    %c0_i32_0 = arith.constant 0 : i32
    %c0_i32_1 = arith.constant 0 : i32
    return %c0_i32, %c0_i32_0 : i32, i32
  }
  func.func @transform_7(%arg0: i32) -> (i32, i32) {
    %c0_i32 = arith.constant 0 : i32
    %c0_i32_0 = arith.constant 0 : i32
    %c0_i32_1 = arith.constant 0 : i32
    return %c0_i32, %c0_i32_0 : i32, i32
  }
  func.func @transform_8(%arg0: i32) -> (i32, i32) {
    %c0_i32 = arith.constant 0 : i32
    %c0_i32_0 = arith.constant 0 : i32
    %c0_i32_1 = arith.constant 0 : i32
    return %c0_i32, %c0_i32_0 : i32, i32
  }
  func.func @transform_9(%arg0: i32) -> (i32, i32) {
    %c0_i32 = arith.constant 0 : i32
    %c0_i32_0 = arith.constant 0 : i32
    %c0_i32_1 = arith.constant 0 : i32
    return %c0_i32, %c0_i32_0 : i32, i32
  }
  func.func @transform_10(%arg0: i32) -> (i32, i32) {
    %c0_i32 = arith.constant 0 : i32
    %c0_i32_0 = arith.constant 0 : i32
    %c0_i32_1 = arith.constant 0 : i32
    return %c0_i32, %c0_i32_0 : i32, i32
  }
  func.func @transform_11(%arg0: i32) -> (i32, i32) {
    %c0_i32 = arith.constant 0 : i32
    %c0_i32_0 = arith.constant 0 : i32
    %c0_i32_1 = arith.constant 0 : i32
    return %c0_i32, %c0_i32_0 : i32, i32
  }
  func.func @transform_12(%arg0: i32) -> (i32, i32) {
    %c0_i32 = arith.constant 0 : i32
    %c0_i32_0 = arith.constant 0 : i32
    %c0_i32_1 = arith.constant 0 : i32
    return %c0_i32, %c0_i32_0 : i32, i32
  }
  func.func @transform_13(%arg0: i32) -> (i32, i32) {
    %c0_i32 = arith.constant 0 : i32
    %c0_i32_0 = arith.constant 0 : i32
    %c0_i32_1 = arith.constant 0 : i32
    return %c0_i32, %c0_i32_0 : i32, i32
  }
  func.func @transform_14(%arg0: i32) -> (i32, i32) {
    %c0_i32 = arith.constant 0 : i32
    %c0_i32_0 = arith.constant 0 : i32
    %c0_i32_1 = arith.constant 0 : i32
    return %c0_i32, %c0_i32_0 : i32, i32
  }
  func.func @transform_15(%arg0: i32) -> (i32, i32) {
    %c0_i32 = arith.constant 0 : i32
    %c0_i32_0 = arith.constant 0 : i32
    %c0_i32_1 = arith.constant 0 : i32
    return %c0_i32, %c0_i32_0 : i32, i32
  }
  func.func @transform_16(%arg0: i32) -> (i32, i32) {
    %c0_i32 = arith.constant 0 : i32
    %c0_i32_0 = arith.constant 0 : i32
    %c0_i32_1 = arith.constant 0 : i32
    return %c0_i32, %c0_i32_0 : i32, i32
  }
  func.func @transform_17(%arg0: i32) -> (i32, i32) {
    %c0_i32 = arith.constant 0 : i32
    %c0_i32_0 = arith.constant 0 : i32
    %c0_i32_1 = arith.constant 0 : i32
    return %c0_i32, %c0_i32_0 : i32, i32
  }
  func.func @transform_18(%arg0: i32) -> (i32, i32) {
    %c0_i32 = arith.constant 0 : i32
    %c0_i32_0 = arith.constant 0 : i32
    %c0_i32_1 = arith.constant 0 : i32
    return %c0_i32, %c0_i32_0 : i32, i32
  }
  func.func @transform_19(%arg0: i32) -> (i32, i32) {
    %c0_i32 = arith.constant 0 : i32
    %c0_i32_0 = arith.constant 0 : i32
    %c0_i32_1 = arith.constant 0 : i32
    return %c0_i32, %c0_i32_0 : i32, i32
  }
  func.func @transform_20(%arg0: i32) -> (i32, i32) {
    %c0_i32 = arith.constant 0 : i32
    %c0_i32_0 = arith.constant 0 : i32
    %c0_i32_1 = arith.constant 0 : i32
    return %c0_i32, %c0_i32_0 : i32, i32
  }
  func.func @transform_21(%arg0: i32) -> (i32, i32) {
    %c0_i32 = arith.constant 0 : i32
    %c0_i32_0 = arith.constant 0 : i32
    %c0_i32_1 = arith.constant 0 : i32
    return %c0_i32, %c0_i32_0 : i32, i32
  }
  func.func @transform_22(%arg0: i32) -> (i32, i32) {
    %c0_i32 = arith.constant 0 : i32
    %c0_i32_0 = arith.constant 0 : i32
    %c0_i32_1 = arith.constant 0 : i32
    return %c0_i32, %c0_i32_0 : i32, i32
  }
  func.func @transform_23(%arg0: i32) -> (i32, i32, i32, i32) {
    %c0_i32 = arith.constant 0 : i32
    %c0_i32_0 = arith.constant 0 : i32
    %c0_i32_1 = arith.constant 0 : i32
    %c0_i32_2 = arith.constant 0 : i32
    return %arg0, %c0_i32, %c0_i32_0, %c0_i32_1 : i32, i32, i32, i32
  }
}

module attributes {stable_mosaic.version = 11 : i64} {
  func.func @_stage_b_kernel(%arg0: i32, %arg1: memref<16x576xbf16, #tpu.memory_space<vmem>>, %arg2: memref<576x32xbf16, #tpu.memory_space<vmem>>, %arg3: memref<1x32xf32, #tpu.memory_space<vmem>>, %arg4: memref<32x96xbf16, #tpu.memory_space<vmem>>, %arg5: memref<1x96xf32, #tpu.memory_space<vmem>>, %arg6: memref<128x512xbf16, #tpu.memory_space<vmem>>, %arg7: memref<1x512xf32, #tpu.memory_space<vmem>>, %arg8: memref<9x512xf32, #tpu.memory_space<vmem>>, %arg9: memref<1x512xf32, #tpu.memory_space<vmem>>, %arg10: memref<512x256xbf16, #tpu.memory_space<vmem>>, %arg11: memref<1x256xf32, #tpu.memory_space<vmem>>, %arg12: memref<1x4x4x128xf32, #tpu.memory_space<vmem>>, %arg13: memref<1x2x2x256xf32, #tpu.memory_space<vmem>>, %arg14: memref<1x6x13x512xf32, #tpu.memory_space<vmem>>, %arg15: memref<1x4x512xf32, #tpu.memory_space<vmem>>) attributes {dimension_semantics = [#tpu.dimension_semantics<parallel>], iteration_bounds = array<i64: 2>, scalar_prefetch = 0 : i64, scratch_operands = 2 : i64, tpu.core_type = #tpu.core_type<tc>, window_params = [{transform_indices = @transform_0, window_bounds = array<i64: 16, 576>}, {pipeline_mode = #tpu.pipeline_mode<synchronous>, transform_indices = @transform_1, window_bounds = array<i64: 576, 32>}, {pipeline_mode = #tpu.pipeline_mode<synchronous>, transform_indices = @transform_2, window_bounds = array<i64: 1, 32>}, {pipeline_mode = #tpu.pipeline_mode<synchronous>, transform_indices = @transform_3, window_bounds = array<i64: 32, 96>}, {pipeline_mode = #tpu.pipeline_mode<synchronous>, transform_indices = @transform_4, window_bounds = array<i64: 1, 96>}, {pipeline_mode = #tpu.pipeline_mode<synchronous>, transform_indices = @transform_5, window_bounds = array<i64: 128, 512>}, {pipeline_mode = #tpu.pipeline_mode<synchronous>, transform_indices = @transform_6, window_bounds = array<i64: 1, 512>}, {pipeline_mode = #tpu.pipeline_mode<synchronous>, transform_indices = @transform_7, window_bounds = array<i64: 9, 512>}, {pipeline_mode = #tpu.pipeline_mode<synchronous>, transform_indices = @transform_8, window_bounds = array<i64: 1, 512>}, {pipeline_mode = #tpu.pipeline_mode<synchronous>, transform_indices = @transform_9, window_bounds = array<i64: 512, 256>}, {pipeline_mode = #tpu.pipeline_mode<synchronous>, transform_indices = @transform_10, window_bounds = array<i64: 1, 256>}, {transform_indices = @transform_11, window_bounds = array<i64: 1, 4, 4, 128>}, {transform_indices = @transform_12, window_bounds = array<i64: 1, 2, 2, 256>}]} {
    %c0 = arith.constant 0 : index
    %c0_0 = arith.constant 0 : index
    %0 = vector.load %arg1[%c0, %c0_0] : memref<16x576xbf16, #tpu.memory_space<vmem>>, vector<16x576xbf16>
    %c0_1 = arith.constant 0 : index
    %c0_2 = arith.constant 0 : index
    %1 = vector.load %arg2[%c0_1, %c0_2] : memref<576x32xbf16, #tpu.memory_space<vmem>>, vector<576x32xbf16>
    %cst = arith.constant dense<0.000000e+00> : vector<16x32xf32>
    %2 = tpu.matmul %0, %1, %cst {dimension_numbers = #tpu.dot_dimension_numbers<[1], [0], [0], [1], [0, 0, 1, 1], [], []>} : vector<16x576xbf16>, vector<576x32xbf16>, vector<16x32xf32> -> vector<16x32xf32>
    %c0_3 = arith.constant 0 : index
    %c0_4 = arith.constant 0 : index
    %3 = vector.load %arg3[%c0_3, %c0_4] : memref<1x32xf32, #tpu.memory_space<vmem>>, vector<1x32xf32>
    %4 = vector.broadcast %3 : vector<1x32xf32> to vector<16x32xf32>
    %5 = arith.addf %2, %4 : vector<16x32xf32>
    %6 = arith.truncf %5 : vector<16x32xf32> to vector<16x32xbf16>
    %c0_5 = arith.constant 0 : index
    %c0_6 = arith.constant 0 : index
    %7 = vector.load %arg4[%c0_5, %c0_6] : memref<32x96xbf16, #tpu.memory_space<vmem>>, vector<32x96xbf16>
    %cst_7 = arith.constant dense<0.000000e+00> : vector<16x96xf32>
    %8 = tpu.matmul %6, %7, %cst_7 {dimension_numbers = #tpu.dot_dimension_numbers<[1], [0], [0], [1], [0, 0, 1, 1], [], []>} : vector<16x32xbf16>, vector<32x96xbf16>, vector<16x96xf32> -> vector<16x96xf32>
    %c0_8 = arith.constant 0 : index
    %c0_9 = arith.constant 0 : index
    %9 = vector.load %arg5[%c0_8, %c0_9] : memref<1x96xf32, #tpu.memory_space<vmem>>, vector<1x96xf32>
    %10 = vector.broadcast %9 : vector<1x96xf32> to vector<16x96xf32>
    %11 = arith.addf %8, %10 : vector<16x96xf32>
    %12 = tpu.concatenate %5, %11 in 1 : vector<16x32xf32>, vector<16x96xf32> -> vector<16x128xf32>
    %13 = vector.shape_cast %12 : vector<16x128xf32> to vector<1x4x4x128xf32>
    %c0_10 = arith.constant 0 : index
    %c0_11 = arith.constant 0 : index
    %c0_12 = arith.constant 0 : index
    %c0_13 = arith.constant 0 : index
    %14 = vector.load %arg12[%c0_10, %c0_11, %c0_12, %c0_13] : memref<1x4x4x128xf32, #tpu.memory_space<vmem>>, vector<1x4x4x128xf32>
    tpu.vector_store %arg12[%c0_10, %c0_11, %c0_12, %c0_13], %13 {strides = array<i32>} : memref<1x4x4x128xf32, #tpu.memory_space<vmem>>, vector<1x4x4x128xf32>,
    %15 = arith.truncf %12 : vector<16x128xf32> to vector<16x128xbf16>
    %c0_14 = arith.constant 0 : index
    %c0_15 = arith.constant 0 : index
    %16 = vector.load %arg6[%c0_14, %c0_15] : memref<128x512xbf16, #tpu.memory_space<vmem>>, vector<128x512xbf16>
    %cst_16 = arith.constant dense<0.000000e+00> : vector<16x512xf32>
    %17 = tpu.matmul %15, %16, %cst_16 {dimension_numbers = #tpu.dot_dimension_numbers<[1], [0], [0], [1], [0, 0, 1, 1], [], []>} : vector<16x128xbf16>, vector<128x512xbf16>, vector<16x512xf32> -> vector<16x512xf32>
    %c0_17 = arith.constant 0 : index
    %c0_18 = arith.constant 0 : index
    %18 = vector.load %arg7[%c0_17, %c0_18] : memref<1x512xf32, #tpu.memory_space<vmem>>, vector<1x512xf32>
    %19 = vector.broadcast %18 : vector<1x512xf32> to vector<16x512xf32>
    %20 = arith.addf %17, %19 : vector<16x512xf32>
    %cst_19 = arith.constant 0.000000e+00 : f32
    %21 = vector.broadcast %cst_19 : f32 to vector<16x512xf32>
    %22 = arith.maximumf %20, %21 : vector<16x512xf32>
    %23 = vector.shape_cast %22 : vector<16x512xf32> to vector<1x4x4x512xf32>
    %cst_20 = arith.constant 0.000000e+00 : f32
    %24 = vector.broadcast %cst_20 : f32 to vector<1x6x13x512xf32>
    %c0_21 = arith.constant 0 : index
    %c0_22 = arith.constant 0 : index
    %c0_23 = arith.constant 0 : index
    %c0_24 = arith.constant 0 : index
    %25 = vector.load %arg14[%c0_21, %c0_22, %c0_23, %c0_24] : memref<1x6x13x512xf32, #tpu.memory_space<vmem>>, vector<1x6x13x512xf32>
    tpu.vector_store %arg14[%c0_21, %c0_22, %c0_23, %c0_24], %24 {strides = array<i32>} : memref<1x6x13x512xf32, #tpu.memory_space<vmem>>, vector<1x6x13x512xf32>,
    %c0_25 = arith.constant 0 : index
    %c1 = arith.constant 1 : index
    %c8 = arith.constant 8 : index
    %c0_26 = arith.constant 0 : index
    %26 = vector.load %arg14[%c0_25, %c1, %c8, %c0_26] : memref<1x6x13x512xf32, #tpu.memory_space<vmem>>, vector<1x4x4x512xf32>
    tpu.vector_store %arg14[%c0_25, %c1, %c8, %c0_26], %23 {strides = array<i32>} : memref<1x6x13x512xf32, #tpu.memory_space<vmem>>, vector<1x4x4x512xf32>,
    %c0_27 = arith.constant 0 : index
    %c0_28 = arith.constant 0 : index
    %27 = vector.load %arg8[%c0_27, %c0_28] : memref<9x512xf32, #tpu.memory_space<vmem>>, vector<9x512xf32>
    %cst_29 = arith.constant 0.000000e+00 : f32
    %28 = vector.broadcast %cst_29 : f32 to vector<1x1x1x512xf32>
    %c0_30 = arith.constant 0 : index
    %c0_31 = arith.constant 0 : index
    %c7 = arith.constant 7 : index
    %c0_32 = arith.constant 0 : index
    %29 = vector.load %arg14[%c0_30, %c0_31, %c7, %c0_32] : memref<1x6x13x512xf32, #tpu.memory_space<vmem>>, vector<1x1x1x512xf32>
    %30 = vector.extract_strided_slice %27 {offsets = [0, 0], sizes = [1, 512], strides = [1, 1]} : vector<9x512xf32> to vector<1x512xf32>
    %31 = vector.shape_cast %30 : vector<1x512xf32> to vector<1x1x1x512xf32>
    %32 = arith.mulf %29, %31 : vector<1x1x1x512xf32>
    %33 = arith.addf %28, %32 : vector<1x1x1x512xf32>
    %c0_33 = arith.constant 0 : index
    %c0_34 = arith.constant 0 : index
    %c8_35 = arith.constant 8 : index
    %c0_36 = arith.constant 0 : index
    %34 = vector.load %arg14[%c0_33, %c0_34, %c8_35, %c0_36] : memref<1x6x13x512xf32, #tpu.memory_space<vmem>>, vector<1x1x1x512xf32>
    %35 = vector.extract_strided_slice %27 {offsets = [1, 0], sizes = [1, 512], strides = [1, 1]} : vector<9x512xf32> to vector<1x512xf32>
    %36 = vector.shape_cast %35 : vector<1x512xf32> to vector<1x1x1x512xf32>
    %37 = arith.mulf %34, %36 : vector<1x1x1x512xf32>
    %38 = arith.addf %33, %37 : vector<1x1x1x512xf32>
    %c0_37 = arith.constant 0 : index
    %c0_38 = arith.constant 0 : index
    %c9 = arith.constant 9 : index
    %c0_39 = arith.constant 0 : index
    %39 = vector.load %arg14[%c0_37, %c0_38, %c9, %c0_39] : memref<1x6x13x512xf32, #tpu.memory_space<vmem>>, vector<1x1x1x512xf32>
    %40 = vector.extract_strided_slice %27 {offsets = [2, 0], sizes = [1, 512], strides = [1, 1]} : vector<9x512xf32> to vector<1x512xf32>
    %41 = vector.shape_cast %40 : vector<1x512xf32> to vector<1x1x1x512xf32>
    %42 = arith.mulf %39, %41 : vector<1x1x1x512xf32>
    %43 = arith.addf %38, %42 : vector<1x1x1x512xf32>
    %c0_40 = arith.constant 0 : index
    %c1_41 = arith.constant 1 : index
    %c7_42 = arith.constant 7 : index
    %c0_43 = arith.constant 0 : index
    %44 = vector.load %arg14[%c0_40, %c1_41, %c7_42, %c0_43] : memref<1x6x13x512xf32, #tpu.memory_space<vmem>>, vector<1x1x1x512xf32>
    %45 = vector.extract_strided_slice %27 {offsets = [3, 0], sizes = [1, 512], strides = [1, 1]} : vector<9x512xf32> to vector<1x512xf32>
    %46 = vector.shape_cast %45 : vector<1x512xf32> to vector<1x1x1x512xf32>
    %47 = arith.mulf %44, %46 : vector<1x1x1x512xf32>
    %48 = arith.addf %43, %47 : vector<1x1x1x512xf32>
    %c0_44 = arith.constant 0 : index
    %c1_45 = arith.constant 1 : index
    %c8_46 = arith.constant 8 : index
    %c0_47 = arith.constant 0 : index
    %49 = vector.load %arg14[%c0_44, %c1_45, %c8_46, %c0_47] : memref<1x6x13x512xf32, #tpu.memory_space<vmem>>, vector<1x1x1x512xf32>
    %50 = vector.extract_strided_slice %27 {offsets = [4, 0], sizes = [1, 512], strides = [1, 1]} : vector<9x512xf32> to vector<1x512xf32>
    %51 = vector.shape_cast %50 : vector<1x512xf32> to vector<1x1x1x512xf32>
    %52 = arith.mulf %49, %51 : vector<1x1x1x512xf32>
    %53 = arith.addf %48, %52 : vector<1x1x1x512xf32>
    %c0_48 = arith.constant 0 : index
    %c1_49 = arith.constant 1 : index
    %c9_50 = arith.constant 9 : index
    %c0_51 = arith.constant 0 : index
    %54 = vector.load %arg14[%c0_48, %c1_49, %c9_50, %c0_51] : memref<1x6x13x512xf32, #tpu.memory_space<vmem>>, vector<1x1x1x512xf32>
    %55 = vector.extract_strided_slice %27 {offsets = [5, 0], sizes = [1, 512], strides = [1, 1]} : vector<9x512xf32> to vector<1x512xf32>
    %56 = vector.shape_cast %55 : vector<1x512xf32> to vector<1x1x1x512xf32>
    %57 = arith.mulf %54, %56 : vector<1x1x1x512xf32>
    %58 = arith.addf %53, %57 : vector<1x1x1x512xf32>
    %c0_52 = arith.constant 0 : index
    %c2 = arith.constant 2 : index
    %c7_53 = arith.constant 7 : index
    %c0_54 = arith.constant 0 : index
    %59 = vector.load %arg14[%c0_52, %c2, %c7_53, %c0_54] : memref<1x6x13x512xf32, #tpu.memory_space<vmem>>, vector<1x1x1x512xf32>
    %60 = vector.extract_strided_slice %27 {offsets = [6, 0], sizes = [1, 512], strides = [1, 1]} : vector<9x512xf32> to vector<1x512xf32>
    %61 = vector.shape_cast %60 : vector<1x512xf32> to vector<1x1x1x512xf32>
    %62 = arith.mulf %59, %61 : vector<1x1x1x512xf32>
    %63 = arith.addf %58, %62 : vector<1x1x1x512xf32>
    %c0_55 = arith.constant 0 : index
    %c2_56 = arith.constant 2 : index
    %c8_57 = arith.constant 8 : index
    %c0_58 = arith.constant 0 : index
    %64 = vector.load %arg14[%c0_55, %c2_56, %c8_57, %c0_58] : memref<1x6x13x512xf32, #tpu.memory_space<vmem>>, vector<1x1x1x512xf32>
    %65 = vector.extract_strided_slice %27 {offsets = [7, 0], sizes = [1, 512], strides = [1, 1]} : vector<9x512xf32> to vector<1x512xf32>
    %66 = vector.shape_cast %65 : vector<1x512xf32> to vector<1x1x1x512xf32>
    %67 = arith.mulf %64, %66 : vector<1x1x1x512xf32>
    %68 = arith.addf %63, %67 : vector<1x1x1x512xf32>
    %c0_59 = arith.constant 0 : index
    %c2_60 = arith.constant 2 : index
    %c9_61 = arith.constant 9 : index
    %c0_62 = arith.constant 0 : index
    %69 = vector.load %arg14[%c0_59, %c2_60, %c9_61, %c0_62] : memref<1x6x13x512xf32, #tpu.memory_space<vmem>>, vector<1x1x1x512xf32>
    %70 = vector.extract_strided_slice %27 {offsets = [8, 0], sizes = [1, 512], strides = [1, 1]} : vector<9x512xf32> to vector<1x512xf32>
    %71 = vector.shape_cast %70 : vector<1x512xf32> to vector<1x1x1x512xf32>
    %72 = arith.mulf %69, %71 : vector<1x1x1x512xf32>
    %73 = arith.addf %68, %72 : vector<1x1x1x512xf32>
    %74 = vector.shape_cast %73 : vector<1x1x1x512xf32> to vector<1x512xf32>
    %c0_63 = arith.constant 0 : index
    %c0_64 = arith.constant 0 : index
    %75 = vector.load %arg9[%c0_63, %c0_64] : memref<1x512xf32, #tpu.memory_space<vmem>>, vector<1x512xf32>
    %76 = arith.addf %74, %75 : vector<1x512xf32>
    %cst_65 = arith.constant 0.000000e+00 : f32
    %77 = vector.broadcast %cst_65 : f32 to vector<1x512xf32>
    %78 = arith.maximumf %76, %77 : vector<1x512xf32>
    %c0_66 = arith.constant 0 : index
    %c0_67 = arith.constant 0 : index
    %c0_68 = arith.constant 0 : index
    %79 = vector.load %arg15[%c0_66, %c0_67, %c0_68] : memref<1x4x512xf32, #tpu.memory_space<vmem>>, vector<1x1x512xf32>
    %80 = vector.shape_cast %79 : vector<1x1x512xf32> to vector<1x512xf32>
    %81 = vector.shape_cast %78 : vector<1x512xf32> to vector<1x1x512xf32>
    tpu.vector_store %arg15[%c0_66, %c0_67, %c0_68], %81 {strides = array<i32>} : memref<1x4x512xf32, #tpu.memory_space<vmem>>, vector<1x1x512xf32>,
    %cst_69 = arith.constant 0.000000e+00 : f32
    %82 = vector.broadcast %cst_69 : f32 to vector<1x1x1x512xf32>
    %c0_70 = arith.constant 0 : index
    %c0_71 = arith.constant 0 : index
    %c9_72 = arith.constant 9 : index
    %c0_73 = arith.constant 0 : index
    %83 = vector.load %arg14[%c0_70, %c0_71, %c9_72, %c0_73] : memref<1x6x13x512xf32, #tpu.memory_space<vmem>>, vector<1x1x1x512xf32>
    %84 = vector.extract_strided_slice %27 {offsets = [0, 0], sizes = [1, 512], strides = [1, 1]} : vector<9x512xf32> to vector<1x512xf32>
    %85 = vector.shape_cast %84 : vector<1x512xf32> to vector<1x1x1x512xf32>
    %86 = arith.mulf %83, %85 : vector<1x1x1x512xf32>
    %87 = arith.addf %82, %86 : vector<1x1x1x512xf32>
    %c0_74 = arith.constant 0 : index
    %c0_75 = arith.constant 0 : index
    %c10 = arith.constant 10 : index
    %c0_76 = arith.constant 0 : index
    %88 = vector.load %arg14[%c0_74, %c0_75, %c10, %c0_76] : memref<1x6x13x512xf32, #tpu.memory_space<vmem>>, vector<1x1x1x512xf32>
    %89 = vector.extract_strided_slice %27 {offsets = [1, 0], sizes = [1, 512], strides = [1, 1]} : vector<9x512xf32> to vector<1x512xf32>
    %90 = vector.shape_cast %89 : vector<1x512xf32> to vector<1x1x1x512xf32>
    %91 = arith.mulf %88, %90 : vector<1x1x1x512xf32>
    %92 = arith.addf %87, %91 : vector<1x1x1x512xf32>
    %c0_77 = arith.constant 0 : index
    %c0_78 = arith.constant 0 : index
    %c11 = arith.constant 11 : index
    %c0_79 = arith.constant 0 : index
    %93 = vector.load %arg14[%c0_77, %c0_78, %c11, %c0_79] : memref<1x6x13x512xf32, #tpu.memory_space<vmem>>, vector<1x1x1x512xf32>
    %94 = vector.extract_strided_slice %27 {offsets = [2, 0], sizes = [1, 512], strides = [1, 1]} : vector<9x512xf32> to vector<1x512xf32>
    %95 = vector.shape_cast %94 : vector<1x512xf32> to vector<1x1x1x512xf32>
    %96 = arith.mulf %93, %95 : vector<1x1x1x512xf32>
    %97 = arith.addf %92, %96 : vector<1x1x1x512xf32>
    %c0_80 = arith.constant 0 : index
    %c1_81 = arith.constant 1 : index
    %c9_82 = arith.constant 9 : index
    %c0_83 = arith.constant 0 : index
    %98 = vector.load %arg14[%c0_80, %c1_81, %c9_82, %c0_83] : memref<1x6x13x512xf32, #tpu.memory_space<vmem>>, vector<1x1x1x512xf32>
    %99 = vector.extract_strided_slice %27 {offsets = [3, 0], sizes = [1, 512], strides = [1, 1]} : vector<9x512xf32> to vector<1x512xf32>
    %100 = vector.shape_cast %99 : vector<1x512xf32> to vector<1x1x1x512xf32>
    %101 = arith.mulf %98, %100 : vector<1x1x1x512xf32>
    %102 = arith.addf %97, %101 : vector<1x1x1x512xf32>
    %c0_84 = arith.constant 0 : index
    %c1_85 = arith.constant 1 : index
    %c10_86 = arith.constant 10 : index
    %c0_87 = arith.constant 0 : index
    %103 = vector.load %arg14[%c0_84, %c1_85, %c10_86, %c0_87] : memref<1x6x13x512xf32, #tpu.memory_space<vmem>>, vector<1x1x1x512xf32>
    %104 = vector.extract_strided_slice %27 {offsets = [4, 0], sizes = [1, 512], strides = [1, 1]} : vector<9x512xf32> to vector<1x512xf32>
    %105 = vector.shape_cast %104 : vector<1x512xf32> to vector<1x1x1x512xf32>
    %106 = arith.mulf %103, %105 : vector<1x1x1x512xf32>
    %107 = arith.addf %102, %106 : vector<1x1x1x512xf32>
    %c0_88 = arith.constant 0 : index
    %c1_89 = arith.constant 1 : index
    %c11_90 = arith.constant 11 : index
    %c0_91 = arith.constant 0 : index
    %108 = vector.load %arg14[%c0_88, %c1_89, %c11_90, %c0_91] : memref<1x6x13x512xf32, #tpu.memory_space<vmem>>, vector<1x1x1x512xf32>
    %109 = vector.extract_strided_slice %27 {offsets = [5, 0], sizes = [1, 512], strides = [1, 1]} : vector<9x512xf32> to vector<1x512xf32>
    %110 = vector.shape_cast %109 : vector<1x512xf32> to vector<1x1x1x512xf32>
    %111 = arith.mulf %108, %110 : vector<1x1x1x512xf32>
    %112 = arith.addf %107, %111 : vector<1x1x1x512xf32>
    %c0_92 = arith.constant 0 : index
    %c2_93 = arith.constant 2 : index
    %c9_94 = arith.constant 9 : index
    %c0_95 = arith.constant 0 : index
    %113 = vector.load %arg14[%c0_92, %c2_93, %c9_94, %c0_95] : memref<1x6x13x512xf32, #tpu.memory_space<vmem>>, vector<1x1x1x512xf32>
    %114 = vector.extract_strided_slice %27 {offsets = [6, 0], sizes = [1, 512], strides = [1, 1]} : vector<9x512xf32> to vector<1x512xf32>
    %115 = vector.shape_cast %114 : vector<1x512xf32> to vector<1x1x1x512xf32>
    %116 = arith.mulf %113, %115 : vector<1x1x1x512xf32>
    %117 = arith.addf %112, %116 : vector<1x1x1x512xf32>
    %c0_96 = arith.constant 0 : index
    %c2_97 = arith.constant 2 : index
    %c10_98 = arith.constant 10 : index
    %c0_99 = arith.constant 0 : index
    %118 = vector.load %arg14[%c0_96, %c2_97, %c10_98, %c0_99] : memref<1x6x13x512xf32, #tpu.memory_space<vmem>>, vector<1x1x1x512xf32>
    %119 = vector.extract_strided_slice %27 {offsets = [7, 0], sizes = [1, 512], strides = [1, 1]} : vector<9x512xf32> to vector<1x512xf32>
    %120 = vector.shape_cast %119 : vector<1x512xf32> to vector<1x1x1x512xf32>
    %121 = arith.mulf %118, %120 : vector<1x1x1x512xf32>
    %122 = arith.addf %117, %121 : vector<1x1x1x512xf32>
    %c0_100 = arith.constant 0 : index
    %c2_101 = arith.constant 2 : index
    %c11_102 = arith.constant 11 : index
    %c0_103 = arith.constant 0 : index
    %123 = vector.load %arg14[%c0_100, %c2_101, %c11_102, %c0_103] : memref<1x6x13x512xf32, #tpu.memory_space<vmem>>, vector<1x1x1x512xf32>
    %124 = vector.extract_strided_slice %27 {offsets = [8, 0], sizes = [1, 512], strides = [1, 1]} : vector<9x512xf32> to vector<1x512xf32>
    %125 = vector.shape_cast %124 : vector<1x512xf32> to vector<1x1x1x512xf32>
    %126 = arith.mulf %123, %125 : vector<1x1x1x512xf32>
    %127 = arith.addf %122, %126 : vector<1x1x1x512xf32>
    %128 = vector.shape_cast %127 : vector<1x1x1x512xf32> to vector<1x512xf32>
    %c0_104 = arith.constant 0 : index
    %c0_105 = arith.constant 0 : index
    %129 = vector.load %arg9[%c0_104, %c0_105] : memref<1x512xf32, #tpu.memory_space<vmem>>, vector<1x512xf32>
    %130 = arith.addf %128, %129 : vector<1x512xf32>
    %cst_106 = arith.constant 0.000000e+00 : f32
    %131 = vector.broadcast %cst_106 : f32 to vector<1x512xf32>
    %132 = arith.maximumf %130, %131 : vector<1x512xf32>
    %c0_107 = arith.constant 0 : index
    %c1_108 = arith.constant 1 : index
    %c0_109 = arith.constant 0 : index
    %133 = vector.load %arg15[%c0_107, %c1_108, %c0_109] : memref<1x4x512xf32, #tpu.memory_space<vmem>>, vector<1x1x512xf32>
    %134 = vector.shape_cast %133 : vector<1x1x512xf32> to vector<1x512xf32>
    %135 = vector.shape_cast %132 : vector<1x512xf32> to vector<1x1x512xf32>
    tpu.vector_store %arg15[%c0_107, %c1_108, %c0_109], %135 {strides = array<i32>} : memref<1x4x512xf32, #tpu.memory_space<vmem>>, vector<1x1x512xf32>,
    %cst_110 = arith.constant 0.000000e+00 : f32
    %136 = vector.broadcast %cst_110 : f32 to vector<1x1x1x512xf32>
    %c0_111 = arith.constant 0 : index
    %c2_112 = arith.constant 2 : index
    %c7_113 = arith.constant 7 : index
    %c0_114 = arith.constant 0 : index
    %137 = vector.load %arg14[%c0_111, %c2_112, %c7_113, %c0_114] : memref<1x6x13x512xf32, #tpu.memory_space<vmem>>, vector<1x1x1x512xf32>
    %138 = vector.extract_strided_slice %27 {offsets = [0, 0], sizes = [1, 512], strides = [1, 1]} : vector<9x512xf32> to vector<1x512xf32>
    %139 = vector.shape_cast %138 : vector<1x512xf32> to vector<1x1x1x512xf32>
    %140 = arith.mulf %137, %139 : vector<1x1x1x512xf32>
    %141 = arith.addf %136, %140 : vector<1x1x1x512xf32>
    %c0_115 = arith.constant 0 : index
    %c2_116 = arith.constant 2 : index
    %c8_117 = arith.constant 8 : index
    %c0_118 = arith.constant 0 : index
    %142 = vector.load %arg14[%c0_115, %c2_116, %c8_117, %c0_118] : memref<1x6x13x512xf32, #tpu.memory_space<vmem>>, vector<1x1x1x512xf32>
    %143 = vector.extract_strided_slice %27 {offsets = [1, 0], sizes = [1, 512], strides = [1, 1]} : vector<9x512xf32> to vector<1x512xf32>
    %144 = vector.shape_cast %143 : vector<1x512xf32> to vector<1x1x1x512xf32>
    %145 = arith.mulf %142, %144 : vector<1x1x1x512xf32>
    %146 = arith.addf %141, %145 : vector<1x1x1x512xf32>
    %c0_119 = arith.constant 0 : index
    %c2_120 = arith.constant 2 : index
    %c9_121 = arith.constant 9 : index
    %c0_122 = arith.constant 0 : index
    %147 = vector.load %arg14[%c0_119, %c2_120, %c9_121, %c0_122] : memref<1x6x13x512xf32, #tpu.memory_space<vmem>>, vector<1x1x1x512xf32>
    %148 = vector.extract_strided_slice %27 {offsets = [2, 0], sizes = [1, 512], strides = [1, 1]} : vector<9x512xf32> to vector<1x512xf32>
    %149 = vector.shape_cast %148 : vector<1x512xf32> to vector<1x1x1x512xf32>
    %150 = arith.mulf %147, %149 : vector<1x1x1x512xf32>
    %151 = arith.addf %146, %150 : vector<1x1x1x512xf32>
    %c0_123 = arith.constant 0 : index
    %c3 = arith.constant 3 : index
    %c7_124 = arith.constant 7 : index
    %c0_125 = arith.constant 0 : index
    %152 = vector.load %arg14[%c0_123, %c3, %c7_124, %c0_125] : memref<1x6x13x512xf32, #tpu.memory_space<vmem>>, vector<1x1x1x512xf32>
    %153 = vector.extract_strided_slice %27 {offsets = [3, 0], sizes = [1, 512], strides = [1, 1]} : vector<9x512xf32> to vector<1x512xf32>
    %154 = vector.shape_cast %153 : vector<1x512xf32> to vector<1x1x1x512xf32>
    %155 = arith.mulf %152, %154 : vector<1x1x1x512xf32>
    %156 = arith.addf %151, %155 : vector<1x1x1x512xf32>
    %c0_126 = arith.constant 0 : index
    %c3_127 = arith.constant 3 : index
    %c8_128 = arith.constant 8 : index
    %c0_129 = arith.constant 0 : index
    %157 = vector.load %arg14[%c0_126, %c3_127, %c8_128, %c0_129] : memref<1x6x13x512xf32, #tpu.memory_space<vmem>>, vector<1x1x1x512xf32>
    %158 = vector.extract_strided_slice %27 {offsets = [4, 0], sizes = [1, 512], strides = [1, 1]} : vector<9x512xf32> to vector<1x512xf32>
    %159 = vector.shape_cast %158 : vector<1x512xf32> to vector<1x1x1x512xf32>
    %160 = arith.mulf %157, %159 : vector<1x1x1x512xf32>
    %161 = arith.addf %156, %160 : vector<1x1x1x512xf32>
    %c0_130 = arith.constant 0 : index
    %c3_131 = arith.constant 3 : index
    %c9_132 = arith.constant 9 : index
    %c0_133 = arith.constant 0 : index
    %162 = vector.load %arg14[%c0_130, %c3_131, %c9_132, %c0_133] : memref<1x6x13x512xf32, #tpu.memory_space<vmem>>, vector<1x1x1x512xf32>
    %163 = vector.extract_strided_slice %27 {offsets = [5, 0], sizes = [1, 512], strides = [1, 1]} : vector<9x512xf32> to vector<1x512xf32>
    %164 = vector.shape_cast %163 : vector<1x512xf32> to vector<1x1x1x512xf32>
    %165 = arith.mulf %162, %164 : vector<1x1x1x512xf32>
    %166 = arith.addf %161, %165 : vector<1x1x1x512xf32>
    %c0_134 = arith.constant 0 : index
    %c4 = arith.constant 4 : index
    %c7_135 = arith.constant 7 : index
    %c0_136 = arith.constant 0 : index
    %167 = vector.load %arg14[%c0_134, %c4, %c7_135, %c0_136] : memref<1x6x13x512xf32, #tpu.memory_space<vmem>>, vector<1x1x1x512xf32>
    %168 = vector.extract_strided_slice %27 {offsets = [6, 0], sizes = [1, 512], strides = [1, 1]} : vector<9x512xf32> to vector<1x512xf32>
    %169 = vector.shape_cast %168 : vector<1x512xf32> to vector<1x1x1x512xf32>
    %170 = arith.mulf %167, %169 : vector<1x1x1x512xf32>
    %171 = arith.addf %166, %170 : vector<1x1x1x512xf32>
    %c0_137 = arith.constant 0 : index
    %c4_138 = arith.constant 4 : index
    %c8_139 = arith.constant 8 : index
    %c0_140 = arith.constant 0 : index
    %172 = vector.load %arg14[%c0_137, %c4_138, %c8_139, %c0_140] : memref<1x6x13x512xf32, #tpu.memory_space<vmem>>, vector<1x1x1x512xf32>
    %173 = vector.extract_strided_slice %27 {offsets = [7, 0], sizes = [1, 512], strides = [1, 1]} : vector<9x512xf32> to vector<1x512xf32>
    %174 = vector.shape_cast %173 : vector<1x512xf32> to vector<1x1x1x512xf32>
    %175 = arith.mulf %172, %174 : vector<1x1x1x512xf32>
    %176 = arith.addf %171, %175 : vector<1x1x1x512xf32>
    %c0_141 = arith.constant 0 : index
    %c4_142 = arith.constant 4 : index
    %c9_143 = arith.constant 9 : index
    %c0_144 = arith.constant 0 : index
    %177 = vector.load %arg14[%c0_141, %c4_142, %c9_143, %c0_144] : memref<1x6x13x512xf32, #tpu.memory_space<vmem>>, vector<1x1x1x512xf32>
    %178 = vector.extract_strided_slice %27 {offsets = [8, 0], sizes = [1, 512], strides = [1, 1]} : vector<9x512xf32> to vector<1x512xf32>
    %179 = vector.shape_cast %178 : vector<1x512xf32> to vector<1x1x1x512xf32>
    %180 = arith.mulf %177, %179 : vector<1x1x1x512xf32>
    %181 = arith.addf %176, %180 : vector<1x1x1x512xf32>
    %182 = vector.shape_cast %181 : vector<1x1x1x512xf32> to vector<1x512xf32>
    %c0_145 = arith.constant 0 : index
    %c0_146 = arith.constant 0 : index
    %183 = vector.load %arg9[%c0_145, %c0_146] : memref<1x512xf32, #tpu.memory_space<vmem>>, vector<1x512xf32>
    %184 = arith.addf %182, %183 : vector<1x512xf32>
    %cst_147 = arith.constant 0.000000e+00 : f32
    %185 = vector.broadcast %cst_147 : f32 to vector<1x512xf32>
    %186 = arith.maximumf %184, %185 : vector<1x512xf32>
    %c0_148 = arith.constant 0 : index
    %c2_149 = arith.constant 2 : index
    %c0_150 = arith.constant 0 : index
    %187 = vector.load %arg15[%c0_148, %c2_149, %c0_150] : memref<1x4x512xf32, #tpu.memory_space<vmem>>, vector<1x1x512xf32>
    %188 = vector.shape_cast %187 : vector<1x1x512xf32> to vector<1x512xf32>
    %189 = vector.shape_cast %186 : vector<1x512xf32> to vector<1x1x512xf32>
    tpu.vector_store %arg15[%c0_148, %c2_149, %c0_150], %189 {strides = array<i32>} : memref<1x4x512xf32, #tpu.memory_space<vmem>>, vector<1x1x512xf32>,
    %cst_151 = arith.constant 0.000000e+00 : f32
    %190 = vector.broadcast %cst_151 : f32 to vector<1x1x1x512xf32>
    %c0_152 = arith.constant 0 : index
    %c2_153 = arith.constant 2 : index
    %c9_154 = arith.constant 9 : index
    %c0_155 = arith.constant 0 : index
    %191 = vector.load %arg14[%c0_152, %c2_153, %c9_154, %c0_155] : memref<1x6x13x512xf32, #tpu.memory_space<vmem>>, vector<1x1x1x512xf32>
    %192 = vector.extract_strided_slice %27 {offsets = [0, 0], sizes = [1, 512], strides = [1, 1]} : vector<9x512xf32> to vector<1x512xf32>
    %193 = vector.shape_cast %192 : vector<1x512xf32> to vector<1x1x1x512xf32>
    %194 = arith.mulf %191, %193 : vector<1x1x1x512xf32>
    %195 = arith.addf %190, %194 : vector<1x1x1x512xf32>
    %c0_156 = arith.constant 0 : index
    %c2_157 = arith.constant 2 : index
    %c10_158 = arith.constant 10 : index
    %c0_159 = arith.constant 0 : index
    %196 = vector.load %arg14[%c0_156, %c2_157, %c10_158, %c0_159] : memref<1x6x13x512xf32, #tpu.memory_space<vmem>>, vector<1x1x1x512xf32>
    %197 = vector.extract_strided_slice %27 {offsets = [1, 0], sizes = [1, 512], strides = [1, 1]} : vector<9x512xf32> to vector<1x512xf32>
    %198 = vector.shape_cast %197 : vector<1x512xf32> to vector<1x1x1x512xf32>
    %199 = arith.mulf %196, %198 : vector<1x1x1x512xf32>
    %200 = arith.addf %195, %199 : vector<1x1x1x512xf32>
    %c0_160 = arith.constant 0 : index
    %c2_161 = arith.constant 2 : index
    %c11_162 = arith.constant 11 : index
    %c0_163 = arith.constant 0 : index
    %201 = vector.load %arg14[%c0_160, %c2_161, %c11_162, %c0_163] : memref<1x6x13x512xf32, #tpu.memory_space<vmem>>, vector<1x1x1x512xf32>
    %202 = vector.extract_strided_slice %27 {offsets = [2, 0], sizes = [1, 512], strides = [1, 1]} : vector<9x512xf32> to vector<1x512xf32>
    %203 = vector.shape_cast %202 : vector<1x512xf32> to vector<1x1x1x512xf32>
    %204 = arith.mulf %201, %203 : vector<1x1x1x512xf32>
    %205 = arith.addf %200, %204 : vector<1x1x1x512xf32>
    %c0_164 = arith.constant 0 : index
    %c3_165 = arith.constant 3 : index
    %c9_166 = arith.constant 9 : index
    %c0_167 = arith.constant 0 : index
    %206 = vector.load %arg14[%c0_164, %c3_165, %c9_166, %c0_167] : memref<1x6x13x512xf32, #tpu.memory_space<vmem>>, vector<1x1x1x512xf32>
    %207 = vector.extract_strided_slice %27 {offsets = [3, 0], sizes = [1, 512], strides = [1, 1]} : vector<9x512xf32> to vector<1x512xf32>
    %208 = vector.shape_cast %207 : vector<1x512xf32> to vector<1x1x1x512xf32>
    %209 = arith.mulf %206, %208 : vector<1x1x1x512xf32>
    %210 = arith.addf %205, %209 : vector<1x1x1x512xf32>
    %c0_168 = arith.constant 0 : index
    %c3_169 = arith.constant 3 : index
    %c10_170 = arith.constant 10 : index
    %c0_171 = arith.constant 0 : index
    %211 = vector.load %arg14[%c0_168, %c3_169, %c10_170, %c0_171] : memref<1x6x13x512xf32, #tpu.memory_space<vmem>>, vector<1x1x1x512xf32>
    %212 = vector.extract_strided_slice %27 {offsets = [4, 0], sizes = [1, 512], strides = [1, 1]} : vector<9x512xf32> to vector<1x512xf32>
    %213 = vector.shape_cast %212 : vector<1x512xf32> to vector<1x1x1x512xf32>
    %214 = arith.mulf %211, %213 : vector<1x1x1x512xf32>
    %215 = arith.addf %210, %214 : vector<1x1x1x512xf32>
    %c0_172 = arith.constant 0 : index
    %c3_173 = arith.constant 3 : index
    %c11_174 = arith.constant 11 : index
    %c0_175 = arith.constant 0 : index
    %216 = vector.load %arg14[%c0_172, %c3_173, %c11_174, %c0_175] : memref<1x6x13x512xf32, #tpu.memory_space<vmem>>, vector<1x1x1x512xf32>
    %217 = vector.extract_strided_slice %27 {offsets = [5, 0], sizes = [1, 512], strides = [1, 1]} : vector<9x512xf32> to vector<1x512xf32>
    %218 = vector.shape_cast %217 : vector<1x512xf32> to vector<1x1x1x512xf32>
    %219 = arith.mulf %216, %218 : vector<1x1x1x512xf32>
    %220 = arith.addf %215, %219 : vector<1x1x1x512xf32>
    %c0_176 = arith.constant 0 : index
    %c4_177 = arith.constant 4 : index
    %c9_178 = arith.constant 9 : index
    %c0_179 = arith.constant 0 : index
    %221 = vector.load %arg14[%c0_176, %c4_177, %c9_178, %c0_179] : memref<1x6x13x512xf32, #tpu.memory_space<vmem>>, vector<1x1x1x512xf32>
    %222 = vector.extract_strided_slice %27 {offsets = [6, 0], sizes = [1, 512], strides = [1, 1]} : vector<9x512xf32> to vector<1x512xf32>
    %223 = vector.shape_cast %222 : vector<1x512xf32> to vector<1x1x1x512xf32>
    %224 = arith.mulf %221, %223 : vector<1x1x1x512xf32>
    %225 = arith.addf %220, %224 : vector<1x1x1x512xf32>
    %c0_180 = arith.constant 0 : index
    %c4_181 = arith.constant 4 : index
    %c10_182 = arith.constant 10 : index
    %c0_183 = arith.constant 0 : index
    %226 = vector.load %arg14[%c0_180, %c4_181, %c10_182, %c0_183] : memref<1x6x13x512xf32, #tpu.memory_space<vmem>>, vector<1x1x1x512xf32>
    %227 = vector.extract_strided_slice %27 {offsets = [7, 0], sizes = [1, 512], strides = [1, 1]} : vector<9x512xf32> to vector<1x512xf32>
    %228 = vector.shape_cast %227 : vector<1x512xf32> to vector<1x1x1x512xf32>
    %229 = arith.mulf %226, %228 : vector<1x1x1x512xf32>
    %230 = arith.addf %225, %229 : vector<1x1x1x512xf32>
    %c0_184 = arith.constant 0 : index
    %c4_185 = arith.constant 4 : index
    %c11_186 = arith.constant 11 : index
    %c0_187 = arith.constant 0 : index
    %231 = vector.load %arg14[%c0_184, %c4_185, %c11_186, %c0_187] : memref<1x6x13x512xf32, #tpu.memory_space<vmem>>, vector<1x1x1x512xf32>
    %232 = vector.extract_strided_slice %27 {offsets = [8, 0], sizes = [1, 512], strides = [1, 1]} : vector<9x512xf32> to vector<1x512xf32>
    %233 = vector.shape_cast %232 : vector<1x512xf32> to vector<1x1x1x512xf32>
    %234 = arith.mulf %231, %233 : vector<1x1x1x512xf32>
    %235 = arith.addf %230, %234 : vector<1x1x1x512xf32>
    %236 = vector.shape_cast %235 : vector<1x1x1x512xf32> to vector<1x512xf32>
    %c0_188 = arith.constant 0 : index
    %c0_189 = arith.constant 0 : index
    %237 = vector.load %arg9[%c0_188, %c0_189] : memref<1x512xf32, #tpu.memory_space<vmem>>, vector<1x512xf32>
    %238 = arith.addf %236, %237 : vector<1x512xf32>
    %cst_190 = arith.constant 0.000000e+00 : f32
    %239 = vector.broadcast %cst_190 : f32 to vector<1x512xf32>
    %240 = arith.maximumf %238, %239 : vector<1x512xf32>
    %c0_191 = arith.constant 0 : index
    %c3_192 = arith.constant 3 : index
    %c0_193 = arith.constant 0 : index
    %241 = vector.load %arg15[%c0_191, %c3_192, %c0_193] : memref<1x4x512xf32, #tpu.memory_space<vmem>>, vector<1x1x512xf32>
    %242 = vector.shape_cast %241 : vector<1x1x512xf32> to vector<1x512xf32>
    %243 = vector.shape_cast %240 : vector<1x512xf32> to vector<1x1x512xf32>
    tpu.vector_store %arg15[%c0_191, %c3_192, %c0_193], %243 {strides = array<i32>} : memref<1x4x512xf32, #tpu.memory_space<vmem>>, vector<1x1x512xf32>,
    %c0_194 = arith.constant 0 : index
    %c0_195 = arith.constant 0 : index
    %c0_196 = arith.constant 0 : index
    %244 = vector.load %arg15[%c0_194, %c0_195, %c0_196] : memref<1x4x512xf32, #tpu.memory_space<vmem>>, vector<1x4x512xf32>
    %245 = vector.shape_cast %244 : vector<1x4x512xf32> to vector<4x512xf32>
    %246 = arith.truncf %245 : vector<4x512xf32> to vector<4x512xbf16>
    %c0_197 = arith.constant 0 : index
    %c0_198 = arith.constant 0 : index
    %247 = vector.load %arg10[%c0_197, %c0_198] : memref<512x256xbf16, #tpu.memory_space<vmem>>, vector<512x256xbf16>
    %cst_199 = arith.constant dense<0.000000e+00> : vector<4x256xf32>
    %248 = tpu.matmul %246, %247, %cst_199 {dimension_numbers = #tpu.dot_dimension_numbers<[1], [0], [0], [1], [0, 0, 1, 1], [], []>} : vector<4x512xbf16>, vector<512x256xbf16>, vector<4x256xf32> -> vector<4x256xf32>
    %c0_200 = arith.constant 0 : index
    %c0_201 = arith.constant 0 : index
    %249 = vector.load %arg11[%c0_200, %c0_201] : memref<1x256xf32, #tpu.memory_space<vmem>>, vector<1x256xf32>
    %250 = vector.broadcast %249 : vector<1x256xf32> to vector<4x256xf32>
    %251 = arith.addf %248, %250 : vector<4x256xf32>
    %252 = vector.shape_cast %251 : vector<4x256xf32> to vector<1x2x2x256xf32>
    %c0_202 = arith.constant 0 : index
    %c0_203 = arith.constant 0 : index
    %c0_204 = arith.constant 0 : index
    %c0_205 = arith.constant 0 : index
    %253 = vector.load %arg13[%c0_202, %c0_203, %c0_204, %c0_205] : memref<1x2x2x256xf32, #tpu.memory_space<vmem>>, vector<1x2x2x256xf32>
    tpu.vector_store %arg13[%c0_202, %c0_203, %c0_204, %c0_205], %252 {strides = array<i32>} : memref<1x2x2x256xf32, #tpu.memory_space<vmem>>, vector<1x2x2x256xf32>,
    return
  }
  func.func @transform_0(%arg0: i32) -> (i32, i32) {
    %c0_i32 = arith.constant 0 : i32
    %c0_i32_0 = arith.constant 0 : i32
    return %arg0, %c0_i32 : i32, i32
  }
  func.func @transform_1(%arg0: i32) -> (i32, i32) {
    %c0_i32 = arith.constant 0 : i32
    %c0_i32_0 = arith.constant 0 : i32
    %c0_i32_1 = arith.constant 0 : i32
    return %c0_i32, %c0_i32_0 : i32, i32
  }
  func.func @transform_2(%arg0: i32) -> (i32, i32) {
    %c0_i32 = arith.constant 0 : i32
    %c0_i32_0 = arith.constant 0 : i32
    %c0_i32_1 = arith.constant 0 : i32
    return %c0_i32, %c0_i32_0 : i32, i32
  }
  func.func @transform_3(%arg0: i32) -> (i32, i32) {
    %c0_i32 = arith.constant 0 : i32
    %c0_i32_0 = arith.constant 0 : i32
    %c0_i32_1 = arith.constant 0 : i32
    return %c0_i32, %c0_i32_0 : i32, i32
  }
  func.func @transform_4(%arg0: i32) -> (i32, i32) {
    %c0_i32 = arith.constant 0 : i32
    %c0_i32_0 = arith.constant 0 : i32
    %c0_i32_1 = arith.constant 0 : i32
    return %c0_i32, %c0_i32_0 : i32, i32
  }
  func.func @transform_5(%arg0: i32) -> (i32, i32) {
    %c0_i32 = arith.constant 0 : i32
    %c0_i32_0 = arith.constant 0 : i32
    %c0_i32_1 = arith.constant 0 : i32
    return %c0_i32, %c0_i32_0 : i32, i32
  }
  func.func @transform_6(%arg0: i32) -> (i32, i32) {
    %c0_i32 = arith.constant 0 : i32
    %c0_i32_0 = arith.constant 0 : i32
    %c0_i32_1 = arith.constant 0 : i32
    return %c0_i32, %c0_i32_0 : i32, i32
  }
  func.func @transform_7(%arg0: i32) -> (i32, i32) {
    %c0_i32 = arith.constant 0 : i32
    %c0_i32_0 = arith.constant 0 : i32
    %c0_i32_1 = arith.constant 0 : i32
    return %c0_i32, %c0_i32_0 : i32, i32
  }
  func.func @transform_8(%arg0: i32) -> (i32, i32) {
    %c0_i32 = arith.constant 0 : i32
    %c0_i32_0 = arith.constant 0 : i32
    %c0_i32_1 = arith.constant 0 : i32
    return %c0_i32, %c0_i32_0 : i32, i32
  }
  func.func @transform_9(%arg0: i32) -> (i32, i32) {
    %c0_i32 = arith.constant 0 : i32
    %c0_i32_0 = arith.constant 0 : i32
    %c0_i32_1 = arith.constant 0 : i32
    return %c0_i32, %c0_i32_0 : i32, i32
  }
  func.func @transform_10(%arg0: i32) -> (i32, i32) {
    %c0_i32 = arith.constant 0 : i32
    %c0_i32_0 = arith.constant 0 : i32
    %c0_i32_1 = arith.constant 0 : i32
    return %c0_i32, %c0_i32_0 : i32, i32
  }
  func.func @transform_11(%arg0: i32) -> (i32, i32, i32, i32) {
    %c0_i32 = arith.constant 0 : i32
    %c0_i32_0 = arith.constant 0 : i32
    %c0_i32_1 = arith.constant 0 : i32
    %c0_i32_2 = arith.constant 0 : i32
    return %arg0, %c0_i32, %c0_i32_0, %c0_i32_1 : i32, i32, i32, i32
  }
  func.func @transform_12(%arg0: i32) -> (i32, i32, i32, i32) {
    %c0_i32 = arith.constant 0 : i32
    %c0_i32_0 = arith.constant 0 : i32
    %c0_i32_1 = arith.constant 0 : i32
    %c0_i32_2 = arith.constant 0 : i32
    return %arg0, %c0_i32, %c0_i32_0, %c0_i32_1 : i32, i32, i32, i32
  }
}

</mosaic_0001>

<bundles_post_ra>
// kernel: _lambda_.3
= control target key start
LH: loop header
LB: loop body
LE: loop exit
PB: predicated region body
PF: predicated region fallthrough
CT: control target
= control target key end

     0   :  { %s4391_s0 = inlined_call_operand.vmem [shape: bf16[32,576], index: 0, kind: input, shape index: {}]   ;;  %s4392_s1 = inlined_call_operand.vmem [shape: bf16[576,32], index: 1, kind: input, shape index: {}]   ;;  %s4393_s2 = inlined_call_operand.vmem [shape: f32[1,32], index: 2, kind: input, shape index: {}]   ;;  %s4394_s3 = inlined_call_operand.vmem [shape: bf16[32,96], index: 3, kind: input, shape index: {}]   ;;  %s4395_s4 = inlined_call_operand.vmem [shape: f32[1,96], index: 4, kind: input, shape index: {}]   ;;  %s4396_s5 = inlined_call_operand.vmem [shape: bf16[128,512], index: 5, kind: input, shape index: {}]   ;;  %s4397_s6 = inlined_call_operand.vmem [shape: f32[1,512], index: 6, kind: input, shape index: {}]   ;;  %s4398_s7 = inlined_call_operand.vmem [shape: f32[9,512], index: 7, kind: input, shape index: {}]   ;;  %s4399_s8 = inlined_call_operand.vmem [shape: f32[1,512], index: 8, kind: input, shape index: {}]   ;;  %s4400_s9 = inlined_call_operand.vmem [shape: bf16[512,256], index: 9, kind: input, shape index: {}]   ;;  %s4401_s10 = inlined_call_operand.vmem [shape: f32[1,256], index: 10, kind: input, shape index: {}]   ;;  %s4402_s11 = inlined_call_operand.hbm [shape: f32[2,4,4,128], index: 11, kind: output, shape index: {0}]   ;;  %s4403_s12 = inlined_call_operand.hbm [shape: f32[2,2,2,256], index: 12, kind: output, shape index: {1}]  }
   0x1   :  { %4407 = sst [smem:[#allocation13_spill]] %s4391_s0 }
   0x2   :  { %4408 = sst [smem:[#allocation14_spill]] %s4392_s1 }
   0x3   :  { %4409 = sst [smem:[#allocation15_spill]] %s4393_s2 }
   0x4   :  { %18 = vsyncpa [#allocation5], 0 }
   0x5   :  { %20 = vsyncpa [#allocation5 + $0x1], 0 }
   0x6   :  { %21 = vsyncpa [#allocation7], 0 }
   0x7   :  { %23 = vsyncpa [#allocation7 + $0x1], 0  ;;  %s3281_s21 = smov 0   ;;  %s3283_s22 = smov 0  }
   0x8   :  { %s3285_s23 = smov 0   ;;  %s3287_s24 = smov 0  }
   0x9 LB: > { %4410 = sst [smem:[#allocation10_spill]] %s3206_s23  ;;  %s3302_s25 = sadd.s32 4294967295, %s3210_s24   ;;  %s3210_s24 = sphi %s3287_s24, %s4420_s24   ;;  %s3206_s23 = sphi %s3285_s23, %s4422_s23   ;;  %s3202_s22 = sphi %s3283_s22, %s4424_s22   ;;  %s3198_s21 = sphi %s3281_s21, %s4423_s21  }
   0xa   : > { %s2350_s26 = sadd.s32 4294967294, %s3210_s24   ;;  %s3306_s27 = sadd.s32 1, %s3210_s24  }
   0xb   : > { %4411 = sst [smem:[#allocation11_spill]] %s3306_s27  ;;  %s272_s28 = sadd.s32 1, %s3206_s23 }
   0xc   : > { %s269_s29 = ssub.s32 %s3210_s24, %s3306_s27  ;;  %p282_p0 = scmp.ne.s32.totalorder %s3206_s23, %s3202_s22 }
   0xd   : > { %p270_p1 = scmp.eq.s32.totalorder %s269_s29, 0  ;;  %p283_p2 = scmp.eq.s32.totalorder %s3302_s25, 1 }
   0xe   : > { %p288_p3 = scmp.ne.s32.totalorder %s3202_s22, %s3198_s21  ;;  %p289_p4 = scmp.eq.s32.totalorder %s2350_s26, 1 }
   0xf   : > { %s3317_s30 = scalar_select %p270_p1, %s3206_s23, %s272_s28  }
  0x10   : > { %p3319_p5 = por %p283_p2, %p282_p0  ;;  %p3323_p6 = por %p289_p4, %p288_p3 }
  0x11   : > { %4412 = sst [smem:[#allocation12_spill]] %s3317_s30  ;;  %p2353_p7 = scmp.ge.s32.totalorder %s3210_s24, 1 }
  0x12   : > { %p373_p8 = scmp.lt.s32.totalorder %s3210_s24, 3 }
  0x14   : > { %p374_p9 = pnand %p2353_p7, %p373_p8 }
  0x15   : > { %s4415_s1 = sld [smem:[#allocation14_spill]] (!%p374_p9)  ;;  %s2356_s19 = sshll.u32 (!%p374_p9), %s3302_s25, 1 }
  0x16   : > { %377 = sbr.rel (%p374_p9) target bundleno = 1138 (0x472), region = 64  ;;  %p422_p10 = scmp.lt.s32.totalorder (!%p374_p9), %s2356_s19, 3 }
  0x17   : > { %s4416_s0 = sld [smem:[#allocation13_spill]] (!%p374_p9)  ;;  %s3212_s30 = smov (!%p374_p9), 32  }
  0x18   : > { %s4417_s2 = sld [smem:[#allocation15_spill]] (!%p374_p9) }
  0x1b   : > { %v2936_v0 = vld [vmem:[%s4415_s1 + $0x38] sm:$0xff]  ;;  %v2935_v4 = vld [vmem:[%s4415_s1 + $0x30] sm:$0xff]  ;;  %v2934_v8 = vld [vmem:[%s4415_s1 + $0x28] sm:$0xff]  ;;  %s4426_s19 = smov (!%p422_p10, %s2356_s19), 3  ;;  %vm752_vm0 = vcmask 523264   ;;  %vm847_vm1 = vcmask 261120  }
  0x1c   : > { %v2952_v1 = vld [vmem:[%s4415_s1 + $0xb8] sm:$0xff]  ;;  %756 = vmatpush.bf16.msra.mxu0 %v2936_v0  ;;  %v2951_v5 = vld [vmem:[%s4415_s1 + $0xb0] sm:$0xff]  ;;  %v2950_v9 = vld [vmem:[%s4415_s1 + $0xa8] sm:$0xff]  ;;  %s3065_s26 = smul.u32 20, %s4426_s19  ;;  %vm1164_vm2 = vcmask 1043456   ;;  %vm1302_vm3 = vcmask 1040384  }
  0x1d   : > { %v2960_v2 = vld [vmem:[%s4415_s1 + $0xf8] sm:$0xff]  ;;  %784 = vmatpush.bf16.msra.mxu2 %v2952_v1  ;;  %v2959_v6 = vld [vmem:[%s4415_s1 + $0xf0] sm:$0xff]  ;;  %v2958_v10 = vld [vmem:[%s4415_s1 + $0xe8] sm:$0xff]  ;;  %vm1304_vm4 = vcmask 1042434   ;;  %vm1306_vm5 = vcmask 1041408  }
  0x1e   : > { %v2944_v3 = vld [vmem:[%s4415_s1 + $0x78] sm:$0xff]  ;;  %798 = vmatpush.bf16.msra.mxu3 %v2960_v2  ;;  %v2943_v7 = vld [vmem:[%s4415_s1 + $0x70] sm:$0xff]  ;;  %v2942_v11 = vld [vmem:[%s4415_s1 + $0x68] sm:$0xff]  ;;  %s3411_s27 = scalar_lea.vmem %s4416_s0, %s3065_s26 }
  0x1f   : > { %770 = vmatpush.bf16.msra.mxu1 %v2944_v3  ;;  %v2933_v12 = vld [vmem:[%s4415_s1 + $0x20] sm:$0xff]  ;;  %v2932_v16 = vld [vmem:[%s4415_s1 + $0x18] sm:$0xff]  ;;  %v2931_v20 = vld [vmem:[%s4415_s1 + $0x10] sm:$0xff] }
  0x20   : > { %757 = vmatpush.bf16.msra.mxu0 %v2935_v4  ;;  %v2949_v13 = vld [vmem:[%s4415_s1 + $0xa0] sm:$0xff]  ;;  %v2948_v17 = vld [vmem:[%s4415_s1 + $0x98] sm:$0xff]  ;;  %v2947_v21 = vld [vmem:[%s4415_s1 + $0x90] sm:$0xff] }
  0x21   : > { %785 = vmatpush.bf16.msra.mxu2 %v2951_v5  ;;  %v2957_v14 = vld [vmem:[%s4415_s1 + $0xe0] sm:$0xff]  ;;  %v2956_v18 = vld [vmem:[%s4415_s1 + $0xd8] sm:$0xff]  ;;  %v2955_v22 = vld [vmem:[%s4415_s1 + $0xd0] sm:$0xff] }
  0x22   : > { %799 = vmatpush.bf16.msra.mxu3 %v2959_v6  ;;  %v2941_v15 = vld [vmem:[%s4415_s1 + $0x60] sm:$0xff]  ;;  %v2940_v19 = vld [vmem:[%s4415_s1 + $0x58] sm:$0xff]  ;;  %v2939_v23 = vld [vmem:[%s4415_s1 + $0x50] sm:$0xff] }
  0x23   : > { %771 = vmatpush.bf16.msra.mxu1 %v2943_v7  ;;  %v2930_v24 = vld [vmem:[%s4415_s1 + $0x8] sm:$0xff]  ;;  %v2929_v28 = vld [vmem:[%s4415_s1] sm:$0xff]  ;;  %v2926_v33 = vld [vmem:[%s3411_s27 + $0x10] sm:$0xf0] }
  0x24   : > { %758 = vmatpush.bf16.msra.mxu0 %v2934_v8  ;;  %v2946_v25 = vld [vmem:[%s4415_s1 + $0x88] sm:$0xff]  ;;  %v2945_v29 = vld [vmem:[%s4415_s1 + $0x80] sm:$0xff]  ;;  %v2927_v35 = vld [vmem:[%s3411_s27 + $0x18] sm:$0xf0] }
  0x25   : > { %786 = vmatpush.bf16.msra.mxu2 %v2950_v9  ;;  %v2954_v26 = vld [vmem:[%s4415_s1 + $0xc8] sm:$0xff]  ;;  %v2953_v30 = vld [vmem:[%s4415_s1 + $0xc0] sm:$0xff]  ;;  %v2362_v39 = vld [vmem:[%s3411_s27 + $0x14] sm:$0xf0] }
  0x26   : > { %800 = vmatpush.bf16.msra.mxu3 %v2958_v10  ;;  %v2938_v27 = vld [vmem:[%s4415_s1 + $0x48] sm:$0xff]  ;;  %v2937_v31 = vld [vmem:[%s4415_s1 + $0x40] sm:$0xff]  ;;  %v2964_v40 = vld [vmem:[%s4415_s1 + $0x118] sm:$0xff] }
  0x27   : > { %772 = vmatpush.bf16.msra.mxu1 %v2942_v11  ;;  %v2360_v32 = vld [vmem:[%s3411_s27] sm:$0xf]  ;;  %v2368_v34 = vld [vmem:[%s3411_s27 + $0x8] sm:$0xf]  ;;  %v2925_v36 = vld [vmem:[%s3411_s27 + $0xc] sm:$0xf] }
  0x28   : > { %759 = vmatpush.bf16.msra.mxu0 %v2933_v12  ;;  %v2370_v37 = vld [vmem:[%s3411_s27 + $0x1c] sm:$0xf0]  ;;  %v2924_v38 = vld [vmem:[%s3411_s27 + $0x4] sm:$0xf]  ;;  %v2361_v41 = vor.u32 %v2926_v33, %v2360_v32  ;;  %v2369_v42 = vor.u32 %v2927_v35, %v2368_v34  ;;  %v2963_v45 = vld [vmem:[%s4415_s1 + $0x110] sm:$0xff] }
  0x29   : > { %787 = vmatpush.bf16.msra.mxu2 %v2949_v13  ;;  %v2373_v43 = vor.u32 %v2925_v36, %v2370_v37  ;;  %v2365_v44 = vor.u32 %v2924_v38, %v2362_v39  ;;  %v2962_v46 = vld [vmem:[%s4415_s1 + $0x108] sm:$0xff]  ;;  %v2961_v47 = vld [vmem:[%s4415_s1 + $0x100] sm:$0xff]  ;;  %v2376_v48 = vld [vmem:[%s3411_s27 + $0x10] sm:$0xf] }
  0x2a   : > { %801 = vmatpush.bf16.msra.mxu3 %v2957_v14  ;;  %v2928_v49 = vld [vmem:[%s3411_s27 + $0x20] sm:$0xf0]  ;;  %v2966_v51 = vld [vmem:[%s4394_s3 + $0x8] sm:$0xff]  ;;  %v3114_v57 = vld [vmem:[%s4417_s2] ss:$0 sm:$0xff]  ;;  %s3665_s27 = sand.u32 1, %s3202_s22  }
  0x2b   : > { %773 = vmatpush.bf16.msra.mxu1 %v2941_v15  ;;  %v2377_v50 = vor.u32 %v2928_v49, %v2376_v48  ;;  %v2965_v52 = vld [vmem:[%s4394_s3] sm:$0xff]  ;;  %v2997_v12 = vld [vmem:[%s4396_s5 + $0xec] sm:$0xf0]  ;;  %v2648_v15 = vld [vmem:[%s4396_s5 + $0xf0] sm:$0xf0]  ;;  %s2354_s29 = sshll.u32 %s3665_s27, 4 }
  0x2c   : > { %760 = vmatpush.bf16.msra.mxu0 %v2932_v16  ;;  %v2646_v11 = vld [vmem:[%s4396_s5 + $0xe0] sm:$0xf]  ;;  %v2995_v13 = vld [vmem:[%s4396_s5 + $0xe4] sm:$0xf]  ;;  %v2654_v16 = vld [vmem:[%s4396_s5 + $0xe8] sm:$0xf] }
  0x2d   : > { %788 = vmatpush.bf16.msra.mxu2 %v2948_v17  ;;  %v2647_v14 = vor.u32 %v2997_v12, %v2646_v11  ;;  %v2998_v17 = vld [vmem:[%s4396_s5 + $0xf4] sm:$0xf0]  ;;  %v2640_v33 = vld [vmem:[%s4396_s5 + $0xd8] sm:$0xf0]  ;;  %v2614_v34 = vld [vmem:[%s4396_s5 + $0xa0] sm:$0xf] }
  0x2e   : > { %802 = vmatpush.bf16.msra.mxu3 %v2956_v18  ;;  %v2651_v18 = vor.u32 %v2995_v13, %v2648_v15  ;;  %v2989_v35 = vld [vmem:[%s4396_s5 + $0xac] sm:$0xf0]  ;;  %v2987_v37 = vld [vmem:[%s4396_s5 + $0xa4] sm:$0xf]  ;;  %v2616_v38 = vld [vmem:[%s4396_s5 + $0xb0] sm:$0xf0] }
  0x2f   : > { %774 = vmatpush.bf16.msra.mxu1 %v2940_v19  ;;  %v2655_v19 = vor.u32 %v2998_v17, %v2654_v16  ;;  %v2622_v39 = vld [vmem:[%s4396_s5 + $0xa8] sm:$0xf]  ;;  %v2983_v48 = vld [vmem:[%s4396_s5 + $0x84] sm:$0xf]  ;;  %v2977_v15 = vld [vmem:[%s4396_s5 + $0x4c] sm:$0xf0] }
  0x30   : > { %761 = vmatpush.bf16.msra.mxu0 %v2931_v20  ;;  %v2996_v20 = vld [vmem:[%s4396_s5 + $0xec] sm:$0xf]  ;;  %v2975_v16 = vld [vmem:[%s4396_s5 + $0x44] sm:$0xf]  ;;  %s3670_s15 = scalar_lea.vmem [#allocation4], %s2354_s29  ;;  %s2198_s17 = scalar_lea.sflag [#allocation5], %s3665_s27 }
  0x31   : > { %789 = vmatpush.bf16.msra.mxu2 %v2947_v21  ;;  %v2656_v21 = vld [vmem:[%s4396_s5 + $0xf8] sm:$0xf0]  ;;  %s2215_s1 = sshll.u32 %s3670_s15, 4  ;;  %s2216_s1 = int_to_ptr.vmem [resolvable:$true] %s2215_s1 }
  0x32   : > { %803 = vmatpush.bf16.msra.mxu3 %v2955_v22  ;;  %v2630_v22 = vld [vmem:[%s4396_s5 + $0xc0] sm:$0xf] }
  0x33   : > { %775 = vmatpush.bf16.msra.mxu1 %v2939_v23  ;;  %v2659_v23 = vor.u32 %v2996_v20, %v2656_v21  ;;  %v2978_v20 = vld [vmem:[%s4396_s5 + $0x54] sm:$0xf0] }
  0x34   : > { %762 = vmatpush.bf16.msra.mxu0 %v2930_v24  ;;  %v2993_v24 = vld [vmem:[%s4396_s5 + $0xcc] sm:$0xf0] }
  0x35   : > { %790 = vmatpush.bf16.msra.mxu2 %v2946_v25  ;;  %v2991_v25 = vld [vmem:[%s4396_s5 + $0xc4] sm:$0xf] }
  0x36   : > { %804 = vmatpush.bf16.msra.mxu3 %v2954_v26  ;;  %v2632_v26 = vld [vmem:[%s4396_s5 + $0xd0] sm:$0xf0] }
  0x37   : > { %776 = vmatpush.bf16.msra.mxu1 %v2938_v27  ;;  %v2631_v27 = vor.u32 %v2993_v24, %v2630_v22  ;;  %v2576_v24 = vld [vmem:[%s4396_s5 + $0x58] sm:$0xf0] }
  0x38   : > { %763 = vmatpush.bf16.msra.mxu0 %v2929_v28  ;;  %v2635_v28 = vor.u32 %v2991_v25, %v2632_v26  ;;  %v2550_v26 = vld [vmem:[%s4396_s5 + $0x20] sm:$0xf] }
  0x39   : > { %791 = vmatpush.bf16.msra.mxu2 %v2945_v29  ;;  %v2638_v29 = vld [vmem:[%s4396_s5 + $0xc8] sm:$0xf] }
  0x3a   : > { %805 = vmatpush.bf16.msra.mxu3 %v2953_v30  ;;  %v2994_v30 = vld [vmem:[%s4396_s5 + $0xd4] sm:$0xf0] }
  0x3b   : > { %777 = vmatpush.bf16.msra.mxu1 %v2937_v31  ;;  %764 = vmatmul.bf16.vlgmr.msra.gmra.mxu0 %v2361_v41  ;;  %v2992_v31 = vld [vmem:[%s4396_s5 + $0xcc] sm:$0xf]  ;;  %v2639_v32 = vor.u32 %v2994_v30, %v2638_v29  ;;  %v2990_v41 = vld [vmem:[%s4396_s5 + $0xb4] sm:$0xf0]  ;;  %v2552_v30 = vld [vmem:[%s4396_s5 + $0x30] sm:$0xf0] }
  0x3c   : > { %816 = vmatpush.bf16.msrb.mxu0 %v2964_v40  ;;  %792 = vmatmul.bf16.vlgmr.msra.gmra.mxu2 %v2369_v42  ;;  %v2643_v36 = vor.u32 %v2992_v31, %v2640_v33  ;;  %v2615_v40 = vor.u32 %v2989_v35, %v2614_v34  ;;  %v2988_v42 = vld [vmem:[%s4396_s5 + $0xac] sm:$0xf]  ;;  %v2558_v31 = vld [vmem:[%s4396_s5 + $0x28] sm:$0xf] }
  0x3d   : > { %806 = vmatmul.bf16.vlgmr.msra.gmra.mxu3 %v2373_v43  ;;  %1088 = vmatpush.bf16.msrb.mxu2 %v2647_v14  ;;  %v2624_v43 = vld [vmem:[%s4396_s5 + $0xb8] sm:$0xf0]  ;;  %v2566_v14 = vld [vmem:[%s4396_s5 + $0x40] sm:$0xf]  ;;  %v2972_v35 = vld [vmem:[%s4396_s5 + $0x2c] sm:$0xf] }
  0x3e   : > { %778 = vmatmul.bf16.vlgmr.msra.gmra.mxu1 %v2365_v44  ;;  %1102 = vmatpush.bf16.msrb.mxu3 %v2651_v18  ;;  %v2619_v44 = vor.u32 %v2987_v37, %v2616_v38  ;;  %v2627_v49 = vor.u32 %v2988_v42, %v2624_v43  ;;  %v2567_v17 = vor.u32 %v2977_v15, %v2566_v14  ;;  %v2568_v18 = vld [vmem:[%s4396_s5 + $0x50] sm:$0xf0]  ;;  %v2534_v38 = vld [vmem:[%s4396_s5] sm:$0xf]  ;;  %v2542_v43 = vld [vmem:[%s4396_s5 + $0x8] sm:$0xf] }
  0x3f   : > { %857 = vmatpush.bf16.msrb.mxu1 %v2966_v51  ;;  %v2606_v51 = vld [vmem:[%s4396_s5 + $0x88] sm:$0xf]  ;;  %v2571_v21 = vor.u32 %v2975_v16, %v2568_v18  ;;  %v2536_v42 = vld [vmem:[%s4396_s5 + $0x10] sm:$0xf0] }
  0x40   : > { %817 = vmatpush.bf16.msrb.mxu0 %v2963_v45  ;;  %v2623_v45 = vor.u32 %v2990_v41, %v2622_v39  ;;  %v2969_v39 = vld [vmem:[%s4396_s5 + $0xc] sm:$0xf0] }
  0x41   : > { %1089 = vmatpush.bf16.msrb.mxu2 %v2631_v27  ;;  %v2973_v27 = vld [vmem:[%s4396_s5 + $0x2c] sm:$0xf0]  ;;  %v2535_v41 = vor.u32 %v2969_v39, %v2534_v38 }
  0x42   : > { %1103 = vmatpush.bf16.msrb.mxu3 %v2635_v28  ;;  %v2971_v28 = vld [vmem:[%s4396_s5 + $0x24] sm:$0xf]  ;;  %v2551_v29 = vor.u32 %v2973_v27, %v2550_v26 }
  0x43   : > { %858 = vmatpush.bf16.msrb.mxu1 %v2965_v52  ;;  %v2986_v52 = vld [vmem:[%s4396_s5 + $0x94] sm:$0xf0]  ;;  %v2555_v33 = vor.u32 %v2971_v28, %v2552_v30 }
  0x44   : > { %818 = vmatpush.bf16.msrb.mxu0 %v2962_v46  ;;  %v2598_v46 = vld [vmem:[%s4396_s5 + $0x80] sm:$0xf] }
  0x45   : > { %1090 = vmatpush.bf16.msrb.mxu2 %v2615_v40  ;;  %v2967_v40 = vld [vmem:[%s4396_s5 + $0x4] sm:$0xf] }
  0x46   : > { %1104 = vmatpush.bf16.msrb.mxu3 %v2619_v44  ;;  %v2970_v44 = vld [vmem:[%s4396_s5 + $0x14] sm:$0xf0] }
  0x47   : > { %1130 = vmatpush.bf16.msra.mxu1 %v2659_v23  ;;  %v2976_v23 = vld [vmem:[%s4396_s5 + $0x4c] sm:$0xf] }
  0x48   : > { %819 = vmatpush.bf16.msrb.mxu0 %v2961_v47  ;;  %v2985_v47 = vld [vmem:[%s4396_s5 + $0x8c] sm:$0xf0]  ;;  %v2579_v25 = vor.u32 %v2976_v23, %v2576_v24 }
  0x4b   : > { %2522 = vmatmul.msk.bf16.vlgmr.msrb.gmra.mxu0 %vm752_vm0, %v2377_v50  ;;  %1131 = vmatpush.bf16.msra.mxu1 %v2643_v36  ;;  %v2600_v50 = vld [vmem:[%s4396_s5 + $0x90] sm:$0xf0]  ;;  %v2560_v36 = vld [vmem:[%s4396_s5 + $0x38] sm:$0xf0] }
  0x4c   : > { %1116 = vmatpush.bf16.msra.mxu0 %v2655_v19  ;;  %v2574_v19 = vld [vmem:[%s4396_s5 + $0x48] sm:$0xf]  ;;  %v2563_v37 = vor.u32 %v2972_v35, %v2560_v36 }
  0x4d   : > { %v2575_v22 = vor.u32 %v2978_v20, %v2574_v19 }
  0x4f   : > { %1132 = vmatpush.bf16.msra.mxu1 %v2627_v49 }
  0x50   : > { %1117 = vmatpush.bf16.msra.mxu0 %v2639_v32  ;;  %v2974_v32 = vld [vmem:[%s4396_s5 + $0x34] sm:$0xf0] }
  0x51   : > { %v2559_v34 = vor.u32 %v2974_v32, %v2558_v31 }
  0x54   : > { %1118 = vmatpush.bf16.msra.mxu0 %v2623_v45  ;;  %v2539_v45 = vor.u32 %v2967_v40, %v2536_v42 }
  0xb8   : > { %v765_v53 = vpop.f32.mrf.mxu0 }
  0xb9   : > { %v766_v59 = vadd.f32 %v3114_v57, %v765_v53  ;;  %v2984_v53 = vld [vmem:[%s4396_s5 + $0x8c] sm:$0xf] }
  0xbb   : > { %v779_v54 = vpop.f32.mrf.mxu1 }
  0xbc   : > { %v780_v0 = vadd.f32 %v779_v54, %v766_v59  ;;  %v2608_v54 = vld [vmem:[%s4396_s5 + $0x98] sm:$0xf0]  ;;  %v2981_v59 = vld [vmem:[%s4396_s5 + $0x6c] sm:$0xf0] }
  0xbf   : > { %v793_v55 = vpop.f32.mrf.mxu2 }
  0xc0   : > { %v767_v56 = vpop.f32.mrf.mxu0  ;;  %v807_v58 = vpop.f32.mrf.mxu3  ;;  %v794_v2 = vadd.f32 %v793_v55, %v780_v0  ;;  %v2599_v55 = vor.u32 %v2985_v47, %v2598_v46  ;;  %v2982_v0 = vld [vmem:[%s4396_s5 + $0x74] sm:$0xf0]  ;;  %v2543_v46 = vor.u32 %v2970_v44, %v2542_v43  ;;  %v2968_v47 = vld [vmem:[%s4396_s5 + $0xc] sm:$0xf] }
  0xc1   : > { %v768_v60 = vadd.f32 %v3114_v57, %v767_v56  ;;  %v2603_v56 = vor.u32 %v2983_v48, %v2600_v50  ;;  %v2607_v57 = vor.u32 %v2986_v52, %v2606_v51  ;;  %v2544_v48 = vld [vmem:[%s4396_s5 + $0x18] sm:$0xf0] }
  0xc2   : > { %v808_v5 = vadd.f32 %v807_v58, %v794_v2  ;;  %v2582_v58 = vld [vmem:[%s4396_s5 + $0x60] sm:$0xf]  ;;  %v2592_v2 = vld [vmem:[%s4396_s5 + $0x78] sm:$0xf0]  ;;  %1091 = vmatpush.bf16.msrb.mxu2 %v2599_v55  ;;  %v2547_v49 = vor.u32 %v2968_v47, %v2544_v48 }
  0xc3   : > { %v781_v61 = vpop.f32.mrf.mxu1  ;;  %1105 = vmatpush.bf16.msrb.mxu3 %v2603_v56  ;;  %1119 = vmatpush.bf16.msra.mxu0 %v2607_v57 }
  0xc4   : > { %v782_v1 = vadd.f32 %v781_v61, %v768_v60  ;;  %v2979_v60 = vld [vmem:[%s4396_s5 + $0x64] sm:$0xf]  ;;  %v2611_v61 = vor.u32 %v2984_v53, %v2608_v54 }
  0xc6   : > { %1133 = vmatpush.bf16.msra.mxu1 %v2611_v61 }
  0xc7   : > { %v795_v62 = vpop.f32.mrf.mxu2 }
  0xc8   : > { %v821_v63 = vpop.f32.mrf.mxu0  ;;  %v796_v3 = vadd.f32 %v795_v62, %v782_v1  ;;  %v809_v4 = vpop.f32.mrf.mxu3  ;;  %v2584_v62 = vld [vmem:[%s4396_s5 + $0x70] sm:$0xf0]  ;;  %v2980_v1 = vld [vmem:[%s4396_s5 + $0x6c] sm:$0xf] }
  0xc9   : > { %v3462_v8 = vadd.f32 %v821_v63, %v808_v5  ;;  %v2590_v63 = vld [vmem:[%s4396_s5 + $0x68] sm:$0xf] }
  0xca   : > { %v810_v6 = vadd.f32 %v809_v4, %v796_v3  ;;  %v2583_v3 = vor.u32 %v2981_v59, %v2582_v58  ;;  %v2587_v4 = vor.u32 %v2979_v60, %v2584_v62  ;;  %v2591_v5 = vor.u32 %v2982_v0, %v2590_v63 }
  0xcc   : > { %1092 = vmatpush.bf16.msrb.mxu2 %v2583_v3  ;;  %1106 = vmatpush.bf16.msrb.mxu3 %v2587_v4 }
  0xcd   : > { %1120 = vmatpush.bf16.msra.mxu0 %v2591_v5 }
  0xd0   : > { %v823_v7 = vpop.f32.mrf.mxu0  ;;  %1093 = vmatpush.bf16.msrb.mxu2 %v2567_v17  ;;  %1107 = vmatpush.bf16.msrb.mxu3 %v2571_v21 }
  0xd1   : > { %v3464_v9 = vadd.f32 %v823_v7, %v810_v6  ;;  %v2595_v6 = vor.u32 %v2980_v1, %v2592_v2  ;;  %v3115_v7 = vld [vmem:[%s4395_s4] ss:$0 sm:$0xff]  ;;  %1121 = vmatpush.bf16.msra.mxu0 %v2575_v22 }
  0xd3   : > { %v826_v10 = vpack.c.bf16 %v3464_v9, %v3462_v8  ;;  %1134 = vmatpush.bf16.msra.mxu1 %v2595_v6 }
  0xd4   : > { %1094 = vmatpush.bf16.msrb.mxu2 %v2551_v29  ;;  %1108 = vmatpush.bf16.msrb.mxu3 %v2555_v33 }
  0xd5   : > { %2531 = vmatmul.msk.bf16.vlgmr.msrb.gmra.mxu1 %vm847_vm1, %v826_v10  ;;  %1122 = vmatpush.bf16.msra.mxu0 %v2559_v34 }
  0xd7   : > { %1135 = vmatpush.bf16.msra.mxu1 %v2579_v25 }
  0xd8   : > { %1095 = vmatpush.bf16.msrb.mxu2 %v2535_v41  ;;  %1109 = vmatpush.bf16.msrb.mxu3 %v2539_v45 }
  0xd9   : > { %1123 = vmatpush.bf16.msra.mxu0 %v2543_v46 }
  0xdb   : > { %1136 = vmatpush.bf16.msra.mxu1 %v2563_v37  ;;  %v3732_v37 = vld [vmem:[%s4398_s7 + $0x10] sm:$0xff] }
  0xdf   : > { %1137 = vmatpush.bf16.msra.mxu1 %v2547_v49 }
 0x152   : > { %v860_v10 = vpop.f32.mrf.mxu1 }
 0x153   : > { %v861_v11 = vadd.f32 %v3115_v7, %v860_v10 }
 0x155   : > { %867 = vrot.lane.b32.xlu0 %v861_v11, %s3212_s30 }
 0x15a   : > { %v862_v12 = vpop.f32.mrf.mxu1 }
 0x15b   : > { %v863_v13 = vadd.f32 %v3115_v7, %v862_v12 }
 0x15d   : > { %869 = vrot.lane.b32.xlu0 %v863_v13, %s3212_s30  ;;  %s3063_s30 = sshll.u32 %s3302_s25, 4 }
 0x15e   : > { %s2214_s0 = scalar_lea.hbm %s4402_s11, %s3063_s30 }
 0x15f   : > { %s2217_s16 = sshll.u32 %s2214_s0, 4  ;;  %s2218_s16 = int_to_ptr.hbm [resolvable:$true] %s2217_s16 }
 0x160   : > { %s3130_s18 = sshra.s32 %s2218_s16, 4  ;;  %s3131_s18 = int_to_ptr.hbm [resolvable:$true] %s3130_s18 }
 0x161   : > { %s3132_s19 = scalar_lea.hbm %s3131_s18, 16  ;;  %p3137_p0 = scmp.lt.s32.totalorder %s3131_s18, %s4402_s11 }
 0x162   : > { %p3133_p11 = scmp.ne.s32.totalorder %s3131_s18, %s3132_s19 }
 0x164   : > { %p3134_p12 = pnand %p3133_p11, %p3319_p5 }
 0x166   : > { %p3135_p13 = pneg %p3134_p12 }
 0x1c7   : > { %v868_v50 = vpop.permute.xlu0 %867 }
 0x1c8   : > { %v873_v51 = vsel %vm847_vm1, %v3462_v8, %v868_v50  ;;  %v3213_v8 = vmov 0.0  }
 0x1c9   : > { %v877_v52 = vrot.slane %v873_v51, 4  ;;  %881 = vst [vmem:[%s3670_s15] sm:$0xf] %v873_v51 }
 0x1ca   : > { %1199 = vst [vmem:[#allocation2 + $0xb0] sm:$0x1f] %v3213_v8 }
 0x1cb   : > { %882 = vst [vmem:[%s3670_s15 + $0x4] sm:$0xf] %v877_v52 }
 0x1cc   : > { %1200 = vst [vmem:[#allocation2 + $0xb8] sm:$0x1f] %v3213_v8 }
 0x1cd   : > { %1215 = vst [vmem:[#allocation2 + $0x130] sm:$0x1f] %v3213_v8 }
 0x1ce   : > { %1216 = vst [vmem:[#allocation2 + $0x138] sm:$0x1f] %v3213_v8 }
 0x1cf   : > { %v870_v53 = vpop.permute.xlu0 %869  ;;  %1177 = vst [vmem:[#allocation2] sm:$0xff] %v3213_v8 }
 0x1d0   : > { %v874_v54 = vsel %vm847_vm1, %v3464_v9, %v870_v53  ;;  %1178 = vst [vmem:[#allocation2 + $0x8] sm:$0xff] %v3213_v8  ;;  %v3692_v9 = vld [vmem:[%s4397_s6] sm:$0xf] }
 0x1d1   : > { %v878_v55 = vrot.slane %v874_v54, 4  ;;  %883 = vst [vmem:[%s3670_s15 + $0x8] sm:$0xf] %v874_v54  ;;  %v885_v56 = vpack.c.bf16 %v874_v54, %v873_v51  ;;  %v922_v57 = vperm.slane %v3692_v9, 2  ;;  %v923_v58 = vperm.slane %v3692_v9, 3 }
 0x1d2   : > { %1179 = vst [vmem:[#allocation2 + $0x10] sm:$0xff] %v3213_v8  ;;  %v920_v63 = vperm.slane %v3692_v9, 0  ;;  %v921_v0 = vperm.slane %v3692_v9, 1  ;;  %v3763_v9 = vld [vmem:[%s4398_s7 + $0x18] sm:$0xff] }
 0x1d3   : > { %884 = vst [vmem:[%s3670_s15 + $0xc] sm:$0xf] %v878_v55  ;;  %1096 = vmatmul.bf16.vlgmr.msrb.gmra.mxu2 %v885_v56  ;;  %1110 = vmatmul.bf16.vlgmr.msrb.gmra.mxu3 %v885_v56  ;;  %s3136_s15 = scalar_lea.hbm %s4402_s11, 32 }
 0x1d4   : > { %1124 = vmatmul.bf16.vlgmr.msra.gmra.mxu0 %v885_v56  ;;  %1138 = vmatmul.bf16.vlgmr.msra.gmra.mxu1 %v885_v56  ;;  %1180 = vst [vmem:[#allocation2 + $0x18] sm:$0xff] %v3213_v8  ;;  %v3752_v56 = vld [vmem:[%s4398_s7] sm:$0xff]  ;;  %p3138_p1 = scmp.lt.s32.totalorder %s3136_s15, %s3132_s19 }
 0x1d5   : > { %1181 = vst [vmem:[#allocation2 + $0x20] sm:$0x1f] %v3213_v8 }
 0x1d6   : > { %1182 = vst [vmem:[#allocation2 + $0x28] sm:$0x1f] %v3213_v8  ;;  %p3139_p2 = por %p3138_p1, %p3137_p0 }
 0x1d7   : > { %1183 = vst [vmem:[#allocation2 + $0x30] sm:$0x1f] %v3213_v8 }
 0x1d8   : > { %1184 = vst [vmem:[#allocation2 + $0x38] sm:$0x1f] %v3213_v8  ;;  %p3140_p3 = pnand %p3139_p2, %p3135_p13 }
 0x1d9   : > { %1185 = vst [vmem:[#allocation2 + $0x40] sm:$0xff] %v3213_v8 }
 0x1da   : > { %1186 = vst [vmem:[#allocation2 + $0x48] sm:$0xff] %v3213_v8 }
 0x1db   : > { %1187 = vst [vmem:[#allocation2 + $0x50] sm:$0xff] %v3213_v8 }
 0x1dc   : > { %1188 = vst [vmem:[#allocation2 + $0x58] sm:$0xff] %v3213_v8 }
 0x1dd   : > { %1189 = vst [vmem:[#allocation2 + $0x60] sm:$0x1f] %v3213_v8 }
 0x1de   : > { %1190 = vst [vmem:[#allocation2 + $0x68] sm:$0x1f] %v3213_v8 }
 0x1df   : > { %1191 = vst [vmem:[#allocation2 + $0x70] sm:$0x1f] %v3213_v8 }
 0x1e0   : > { %1192 = vst [vmem:[#allocation2 + $0x78] sm:$0x1f] %v3213_v8 }
 0x1e1   : > { %1193 = vst [vmem:[#allocation2 + $0x80] sm:$0xff] %v3213_v8 }
 0x1e2   : > { %1194 = vst [vmem:[#allocation2 + $0x88] sm:$0xff] %v3213_v8 }
 0x1e3   : > { %1195 = vst [vmem:[#allocation2 + $0x90] sm:$0xff] %v3213_v8 }
 0x1e4   : > { %1196 = vst [vmem:[#allocation2 + $0x98] sm:$0xff] %v3213_v8 }
 0x1e5   : > { %1197 = vst [vmem:[#allocation2 + $0xa0] sm:$0x1f] %v3213_v8 }
 0x1e6   : > { %1198 = vst [vmem:[#allocation2 + $0xa8] sm:$0x1f] %v3213_v8 }
 0x1e7   : > { %1201 = vst [vmem:[#allocation2 + $0xc0] sm:$0xff] %v3213_v8 }
 0x1e8   : > { %1202 = vst [vmem:[#allocation2 + $0xc8] sm:$0xff] %v3213_v8 }
 0x1e9   : > { %1203 = vst [vmem:[#allocation2 + $0xd0] sm:$0xff] %v3213_v8 }
 0x1ea   : > { %1204 = vst [vmem:[#allocation2 + $0xd8] sm:$0xff] %v3213_v8 }
 0x1eb   : > { %1205 = vst [vmem:[#allocation2 + $0xe0] sm:$0x1f] %v3213_v8 }
 0x1ec   : > { %1206 = vst [vmem:[#allocation2 + $0xe8] sm:$0x1f] %v3213_v8 }
 0x1ed   : > { %1207 = vst [vmem:[#allocation2 + $0xf0] sm:$0x1f] %v3213_v8 }
 0x1ee   : > { %1208 = vst [vmem:[#allocation2 + $0xf8] sm:$0x1f] %v3213_v8 }
 0x1ef   : > { %1209 = vst [vmem:[#allocation2 + $0x100] sm:$0xff] %v3213_v8 }
 0x1f0   : > { %1210 = vst [vmem:[#allocation2 + $0x108] sm:$0xff] %v3213_v8 }
 0x1f1   : > { %1211 = vst [vmem:[#allocation2 + $0x110] sm:$0xff] %v3213_v8 }
 0x1f2   : > { %1212 = vst [vmem:[#allocation2 + $0x118] sm:$0xff] %v3213_v8 }
 0x1f3   : > { %1213 = vst [vmem:[#allocation2 + $0x120] sm:$0x1f] %v3213_v8 }
 0x1f4   : > { %1214 = vst [vmem:[#allocation2 + $0x128] sm:$0x1f] %v3213_v8  ;;  %v3757_v8 = vld [vmem:[%s4398_s7 + $0x8] sm:$0xff] }
 0x251   : > { %v1125_v59 = vpop.f32.mrf.mxu0  ;;  %v1139_v60 = vpop.f32.mrf.mxu1 }
 0x252   : > { %v1126_v61 = vadd.f32 %v1125_v59, %v922_v57  ;;  %v1140_v62 = vadd.f32 %v1139_v60, %v923_v58 }
 0x254   : > { %v1147_v1 = vmax.f32 %v1140_v62, 0.0  ;;  %v1146_v2 = vmax.f32 %v1126_v61, 0.0  ;;  %v1299_v62 = vrot.slane %v3757_v8, 7 }
 0x256   : > { %v1161_v3 = vrot.slane %v1147_v1, 4  ;;  %v1097_v4 = vpop.f32.mrf.mxu2  ;;  %v1111_v5 = vpop.f32.mrf.mxu3  ;;  %v1303_v1 = vsel %vm1302_vm3, %v3752_v56, %v1299_v62 }
 0x257   : > { %v1098_v6 = vadd.f32 %v1097_v4, %v920_v63  ;;  %v1112_v7 = vadd.f32 %v1111_v5, %v921_v0  ;;  %v1312_v4 = vld [vmem:[#allocation2 + $0x20] ss:$8 sm:$0xf] }
 0x258   : > { %v1166_v10 = vsel %vm1164_vm2, %v1146_v2, %v1161_v3  ;;  %v1169_v11 = vsel %vm1164_vm2, %v1161_v3, %v1146_v2  ;;  %v1294_v3 = vld [vmem:[#allocation2 + $0x7] ss:$8 sm:$0xf] }
 0x259   : > { %v1170_v12 = vrot.slane %v1169_v11, 4  ;;  %1227 = vst [vmem:[#allocation1 + $0x10] ss:$2 sm:$0xff] %v1166_v10  ;;  %v1145_v13 = vmax.f32 %v1112_v7, 0.0  ;;  %v1127_v14 = vpop.f32.mrf.mxu0  ;;  %v1141_v15 = vpop.f32.mrf.mxu1  ;;  %v1144_v18 = vmax.f32 %v1098_v6, 0.0 }
 0x25a   : > { %v1128_v16 = vadd.f32 %v1127_v14, %v922_v57  ;;  %v1142_v17 = vadd.f32 %v1141_v15, %v923_v58  ;;  %v1323_v6 = vld [vmem:[#allocation2 + $0x21] ss:$8 sm:$0xf]  ;;  %v1334_v11 = vld [vmem:[#allocation2 + $0x47] ss:$8 sm:$0xf] }
 0x25b   : > { %1235 = vst [vmem:[#allocation1 + $0x30] ss:$2 sm:$0xff] %v1170_v12  ;;  %v1160_v19 = vrot.slane %v1145_v13, 4  ;;  %v1290_v12 = vld [vmem:[%s4398_s7 + $0x28] sm:$0x1] }
 0x25c   : > { %v1151_v20 = vmax.f32 %v1142_v17, 0.0  ;;  %v1150_v24 = vmax.f32 %v1128_v16, 0.0  ;;  %v1291_v15 = vld [vmem:[%s4398_s7 + $0x30] sm:$0x1]  ;;  %v1292_v16 = vld [vmem:[%s4398_s7 + $0x38] sm:$0x1] }
 0x25d   : > { %v1165_v21 = vsel %vm1164_vm2, %v1144_v18, %v1160_v19  ;;  %v1167_v22 = vsel %vm1164_vm2, %v1160_v19, %v1144_v18 }
 0x25e   : > { %v1168_v23 = vrot.slane %v1167_v22, 4  ;;  %1225 = vst [vmem:[#allocation1] ss:$2 sm:$0xff] %v1165_v21  ;;  %v1163_v25 = vrot.slane %v1151_v20, 4  ;;  %v1113_v38 = vpop.f32.mrf.mxu3  ;;  %v1099_v40 = vpop.f32.mrf.mxu2  ;;  %v1395_v20 = vrot.slane %v1290_v12, 7 }
 0x25f   : > { %v1114_v39 = vadd.f32 %v1113_v38, %v921_v0  ;;  %v1100_v42 = vadd.f32 %v1099_v40, %v920_v63  ;;  %v1300_v63 = vrot.slane %v3732_v37, 6  ;;  %v1301_v0 = vrot.slane %v3763_v9, 5  ;;  %v1289_v21 = vld [vmem:[%s4398_s7 + $0x20] sm:$0x1] }
 0x260   : > { %v1230_v26 = vld.sshfl [vmem:[#allocation1 + $0x10] sm:$0xff pattern:$0x75316420]  ;;  %v1231_v27 = vld.sshfl [vmem:[#allocation1 + $0x18] sm:$0xff pattern:$0x75316420]  ;;  %v1172_v28 = vsel %vm1164_vm2, %v1150_v24, %v1163_v25  ;;  %v1175_v29 = vsel %vm1164_vm2, %v1163_v25, %v1150_v24 }
 0x261   : > { %1233 = vst [vmem:[#allocation1 + $0x20] ss:$2 sm:$0xff] %v1168_v23  ;;  %v1176_v30 = vrot.slane %v1175_v29, 4  ;;  %v1149_v41 = vmax.f32 %v1114_v39, 0.0  ;;  %v1148_v45 = vmax.f32 %v1100_v42, 0.0  ;;  %v1305_v2 = vsel %vm1304_vm4, %v1300_v63, %v1301_v0 }
 0x262   : > { %v1238_v31 = vld.sshfl [vmem:[#allocation1 + $0x30] sm:$0xff pattern:$0x75316420]  ;;  %v1239_v32 = vld.sshfl [vmem:[#allocation1 + $0x38] sm:$0xff pattern:$0x75316420]  ;;  %v3794_v5 = vsel %vm1306_vm5, %v1303_v1, %v1305_v2 }
 0x263   : > { %1241 = vst [vmem:[#allocation1 + $0x10] ss:$2 sm:$0xff] %v1172_v28  ;;  %v1162_v43 = vrot.slane %v1149_v41, 4  ;;  %v1309_v7 = vmul.f32 %v3794_v5, %v1294_v3  ;;  %v1396_v24 = vrot.slane %v1291_v15, 6  ;;  %v1397_v25 = vrot.slane %v1292_v16, 5 }
 0x264   : > { %1247 = vst [vmem:[#allocation1 + $0x30] ss:$2 sm:$0xff] %v1176_v30 }
 0x265   : > { %1275 = vst [vmem:[#allocation2 + $0xb0] sm:$0xf] %v1238_v31  ;;  %v1229_v44 = vld.sshfl [vmem:[#allocation1 + $0x8] sm:$0xff pattern:$0x75316420]  ;;  %v1173_v47 = vsel %vm1164_vm2, %v1162_v43, %v1148_v45  ;;  %v1171_v48 = vsel %vm1164_vm2, %v1148_v45, %v1162_v43  ;;  %v1407_v45 = vlaneseq }
 0x266   : > { %1276 = vst [vmem:[#allocation2 + $0xb8] sm:$0xf] %v1239_v32  ;;  %v1174_v49 = vrot.slane %v1173_v47, 4  ;;  %v1228_v50 = vld.sshfl [vmem:[#allocation1] sm:$0xff pattern:$0x75316420]  ;;  %v1398_v32 = vsel %vm1302_vm3, %v1289_v21, %v1395_v20 }
 0x267   : > { %1270 = vst [vmem:[#allocation2 + $0x68] sm:$0xf] %v1229_v44  ;;  %v1404_v44 = vld [vmem:[%s4399_s8] sm:$0xf]  ;;  %vm3826_vm6 = vcmp.lt.s32.totalorder %v1407_v45, 512 }
 0x268   : > { %v1236_v46 = vld.sshfl [vmem:[#allocation1 + $0x20] sm:$0xff pattern:$0x75316420]  ;;  %1271 = vst [vmem:[#allocation2 + $0x70] sm:$0xf] %v1230_v26 }
 0x269   : > { %1272 = vst [vmem:[#allocation2 + $0x78] sm:$0xf] %v1231_v27  ;;  %v1237_v51 = vld.sshfl [vmem:[#allocation1 + $0x28] sm:$0xff pattern:$0x75316420] }
 0x26a   : > { %v1244_v35 = vld.sshfl [vmem:[#allocation1 + $0x10] sm:$0xff pattern:$0x75316420]  ;;  %v1245_v36 = vld.sshfl [vmem:[#allocation1 + $0x18] sm:$0xff pattern:$0x75316420] }
 0x26b   : > { %v1250_v33 = vld.sshfl [vmem:[#allocation1 + $0x30] sm:$0xff pattern:$0x75316420]  ;;  %v1251_v34 = vld.sshfl [vmem:[#allocation1 + $0x38] sm:$0xff pattern:$0x75316420] }
 0x26c   : > { %1283 = vst [vmem:[#allocation2 + $0x130] sm:$0xf] %v1250_v33  ;;  %v1368_v27 = vld [vmem:[#allocation2 + $0x87] ss:$8 sm:$0xf]  ;;  %v1399_v33 = vsel %vm1304_vm4, %v1396_v24, %v1397_v25 }
 0x26d   : > { %1284 = vst [vmem:[#allocation2 + $0x138] sm:$0xf] %v1251_v34  ;;  %v3816_v39 = vsel %vm1306_vm5, %v1398_v32, %v1399_v33 }
 0x26e   : > { %1315 = vst [vmem:[#allocation1 + $0x12] sm:$0xff] %v3732_v37 }
 0x26f   : > { %1273 = vst [vmem:[#allocation2 + $0xa0] sm:$0xf] %v1236_v46 }
 0x270   : > { %1279 = vst [vmem:[#allocation2 + $0xf0] sm:$0xf] %v1244_v35 }
 0x271   : > { %1280 = vst [vmem:[#allocation2 + $0xf8] sm:$0xf] %v1245_v36 }
 0x272   : > { %1240 = vst [vmem:[#allocation1] ss:$2 sm:$0xff] %v1171_v48 }
 0x273   : > { %1246 = vst [vmem:[#allocation1 + $0x20] ss:$2 sm:$0xff] %v1174_v49 }
 0x274   : > { %1269 = vst [vmem:[#allocation2 + $0x60] sm:$0xf] %v1228_v50 }
 0x275   : > { %1274 = vst [vmem:[#allocation2 + $0xa8] sm:$0xf] %v1237_v51 }
 0x279   : > { %v1242_v52 = vld.sshfl [vmem:[#allocation1] sm:$0xff pattern:$0x75316420]  ;;  %v1243_v53 = vld.sshfl [vmem:[#allocation1 + $0x8] sm:$0xff pattern:$0x75316420] }
 0x27a   : > { %v1248_v54 = vld.sshfl [vmem:[#allocation1 + $0x20] sm:$0xff pattern:$0x75316420]  ;;  %v1249_v55 = vld.sshfl [vmem:[#allocation1 + $0x28] sm:$0xff pattern:$0x75316420] }
 0x27b   : > { %1277 = vst [vmem:[#allocation2 + $0xe0] sm:$0xf] %v1242_v52  ;;  %v1345_v19 = vld [vmem:[#allocation2 + $0x60] ss:$8 sm:$0xf] }
 0x27c   : > { %1278 = vst [vmem:[#allocation2 + $0xe8] sm:$0xf] %v1243_v53  ;;  %v1356_v26 = vld [vmem:[#allocation2 + $0x61] ss:$8 sm:$0xf] }
 0x27d   : > { %1281 = vst [vmem:[#allocation2 + $0x120] sm:$0xf] %v1248_v54  ;;  %v1379_v35 = vld [vmem:[#allocation2 + $0xa0] ss:$8 sm:$0xf] }
 0x27e   : > { %1282 = vst [vmem:[#allocation2 + $0x128] sm:$0xf] %v1249_v55  ;;  %v1390_v38 = vld [vmem:[#allocation2 + $0xa1] ss:$8 sm:$0xf] }
 0x27f   : > { %1313 = vst [vmem:[#allocation1] sm:$0xff] %v3752_v56  ;;  %v1402_v43 = vmul.f32 %v3816_v39, %v1390_v38  ;;  %v1412_v55 = vld [vmem:[#allocation2 + $0x21] ss:$8 sm:$0xf] }
 0x280   : > { %1314 = vst [vmem:[#allocation1 + $0x9] sm:$0xff] %v3757_v8  ;;  %v1437_v63 = vld [vmem:[#allocation2 + $0x61] ss:$8 sm:$0xf] }
 0x281   : > { %1316 = vst [vmem:[#allocation1 + $0x1b] sm:$0xff] %v3763_v9  ;;  %v1448_v2 = vld [vmem:[#allocation2 + $0x62] ss:$8 sm:$0xf] }
 0x282   : > { %v1480_v15 = vld [vmem:[#allocation2 + $0xa2] ss:$8 sm:$0xf]  ;;  %v1502_v32 = vld [vmem:[#allocation2 + $0xa0] ss:$8 sm:$0xf] }
 0x288   : > { %v1318_v57 = vld [vmem:[#allocation1 + $0x1] ss:$9 sm:$0xff] }
 0x289   : > { %1324 = vst [vmem:[#allocation1] sm:$0xff] %v3752_v56  ;;  %v1320_v10 = vmul.f32 %v1318_v57, %v1312_v4  ;;  %v1416_v57 = vld [vmem:[#allocation2 + $0x22] ss:$8 sm:$0xf] }
 0x28a   : > { %1325 = vst [vmem:[#allocation1 + $0x9] sm:$0xff] %v3757_v8 }
 0x28b   : > { %1326 = vst [vmem:[#allocation1 + $0x12] sm:$0xff] %v3732_v37  ;;  %v1321_v17 = vadd.f32 %v1320_v10, %v1309_v7 }
 0x28c   : > { %1327 = vst [vmem:[#allocation1 + $0x1b] sm:$0xff] %v3763_v9 }
 0x293   : > { %v1329_v58 = vld [vmem:[#allocation1 + $0x2] ss:$9 sm:$0xff] }
 0x294   : > { %1335 = vst [vmem:[#allocation1] sm:$0xff] %v3752_v56  ;;  %v1331_v13 = vmul.f32 %v1329_v58, %v1323_v6  ;;  %v1427_v58 = vld [vmem:[#allocation2 + $0x23] ss:$8 sm:$0xf] }
 0x295   : > { %1336 = vst [vmem:[#allocation1 + $0x9] sm:$0xff] %v3757_v8  ;;  %v1459_v6 = vld [vmem:[#allocation2 + $0x63] ss:$8 sm:$0xf] }
 0x296   : > { %1337 = vst [vmem:[#allocation1 + $0x12] sm:$0xff] %v3732_v37  ;;  %v1332_v22 = vadd.f32 %v1331_v13, %v1321_v17  ;;  %v1491_v17 = vld [vmem:[#allocation2 + $0xa3] ss:$8 sm:$0xf] }
 0x297   : > { %1338 = vst [vmem:[#allocation1 + $0x1b] sm:$0xff] %v3763_v9  ;;  %v1492_v21 = vmul.f32 %v1491_v17, %v3816_v39  ;;  %v3062_v17 = vld [vmem:[%s4400_s9 + $0x1f4] sm:$0xf0] }
 0x29e   : > { %v1340_v59 = vld [vmem:[#allocation1 + $0x3] ss:$9 sm:$0xff] }
 0x29f   : > { %1346 = vst [vmem:[#allocation1] sm:$0xff] %v3752_v56  ;;  %v1342_v18 = vmul.f32 %v1340_v59, %v1334_v11  ;;  %v1413_v59 = vmul.f32 %v1412_v55, %v3794_v5  ;;  %v1469_v11 = vld [vmem:[#allocation2 + $0xa1] ss:$8 sm:$0xf] }
 0x2a0   : > { %1347 = vst [vmem:[#allocation1 + $0x9] sm:$0xff] %v3757_v8 }
 0x2a1   : > { %1348 = vst [vmem:[#allocation1 + $0x12] sm:$0xff] %v3732_v37  ;;  %v1343_v28 = vadd.f32 %v1342_v18, %v1332_v22  ;;  %v1494_v22 = vld [vmem:[%s4399_s8] sm:$0xf] }
 0x2a2   : > { %1349 = vst [vmem:[#allocation1 + $0x1b] sm:$0xff] %v3763_v9 }
 0x2a9   : > { %v1351_v60 = vld [vmem:[#allocation1 + $0x4] ss:$9 sm:$0xff] }
 0x2aa   : > { %1357 = vst [vmem:[#allocation1] sm:$0xff] %v3752_v56  ;;  %v1353_v23 = vmul.f32 %v1351_v60, %v1345_v19 }
 0x2ab   : > { %1358 = vst [vmem:[#allocation1 + $0x9] sm:$0xff] %v3757_v8 }
 0x2ac   : > { %1359 = vst [vmem:[#allocation1 + $0x12] sm:$0xff] %v3732_v37  ;;  %v1354_v30 = vadd.f32 %v1353_v23, %v1343_v28 }
 0x2ad   : > { %1360 = vst [vmem:[#allocation1 + $0x1b] sm:$0xff] %v3763_v9 }
 0x2b4   : > { %v1362_v61 = vld [vmem:[#allocation1 + $0x5] ss:$9 sm:$0xff] }
 0x2b5   : > { %1369 = vst [vmem:[#allocation1] sm:$0xff] %v3752_v56  ;;  %v1364_v29 = vmul.f32 %v1362_v61, %v1356_v26 }
 0x2b6   : > { %1370 = vst [vmem:[#allocation1 + $0x9] sm:$0xff] %v3757_v8 }
 0x2b7   : > { %1371 = vst [vmem:[#allocation1 + $0x12] sm:$0xff] %v3732_v37  ;;  %v1365_v34 = vadd.f32 %v1364_v29, %v1354_v30 }
 0x2b8   : > { %1372 = vst [vmem:[#allocation1 + $0x1b] sm:$0xff] %v3763_v9 }
 0x2bf   : > { %v1374_v14 = vld [vmem:[#allocation1 + $0x6] ss:$9 sm:$0xff] }
 0x2c0   : > { %1380 = vst [vmem:[#allocation1] sm:$0xff] %v3752_v56  ;;  %v1376_v31 = vmul.f32 %v1374_v14, %v1368_v27 }
 0x2c1   : > { %1381 = vst [vmem:[#allocation1 + $0x9] sm:$0xff] %v3757_v8 }
 0x2c2   : > { %1382 = vst [vmem:[#allocation1 + $0x12] sm:$0xff] %v3732_v37  ;;  %v1377_v40 = vadd.f32 %v1376_v31, %v1365_v34  ;;  %v1499_v31 = vld [vmem:[#allocation2 + $0x87] ss:$8 sm:$0xf] }
 0x2c3   : > { %1383 = vst [vmem:[#allocation1 + $0x1b] sm:$0xff] %v3763_v9  ;;  %v1500_v33 = vmul.f32 %v1499_v31, %v3794_v5 }
 0x2ca   : > { %v1385_v36 = vld [vmem:[#allocation1 + $0x7] ss:$9 sm:$0xff] }
 0x2cb   : > { %v1387_v41 = vmul.f32 %v1385_v36, %v1379_v35  ;;  %1417 = vst [vmem:[#allocation1] sm:$0xff] %v3752_v56  ;;  %v1512_v35 = vld [vmem:[#allocation2 + $0xa1] ss:$8 sm:$0xf] }
 0x2cc   : > { %1418 = vst [vmem:[#allocation1 + $0x9] sm:$0xff] %v3757_v8  ;;  %v1524_v36 = vld [vmem:[#allocation2 + $0xc7] ss:$8 sm:$0xf] }
 0x2cd   : > { %v1388_v42 = vadd.f32 %v1387_v41, %v1377_v40  ;;  %1419 = vst [vmem:[#allocation1 + $0x12] sm:$0xff] %v3732_v37 }
 0x2ce   : > { %1420 = vst [vmem:[#allocation1 + $0x1b] sm:$0xff] %v3763_v9 }
 0x2cf   : > { %v1403_v46 = vadd.f32 %v1402_v43, %v1388_v42  ;;  %v1535_v43 = vld [vmem:[#allocation2 + $0xe0] ss:$8 sm:$0xf] }
 0x2d1   : > { %v1405_v47 = vadd.f32 %v1404_v44, %v1403_v46  ;;  %v1546_v46 = vld [vmem:[#allocation2 + $0xe1] ss:$8 sm:$0xf] }
 0x2d3   : > { %v1406_v49 = vmax.f32 %v1405_v47, 0.0  ;;  %v1558_v47 = vld [vmem:[#allocation2 + $0x107] ss:$8 sm:$0xf] }
 0x2d5   : > { %1411 = vst.msk [vmem:[#allocation3] ss:$4 sm:$0xf] %vm3826_vm6, %v1406_v49  ;;  %v1422_v50 = vld [vmem:[#allocation1 + $0x1] ss:$9 sm:$0xff] }
 0x2d6   : > { %1428 = vst [vmem:[#allocation1] sm:$0xff] %v3752_v56  ;;  %v1424_v60 = vmul.f32 %v1422_v50, %v1416_v57  ;;  %v1580_v57 = vld [vmem:[#allocation2 + $0x121] ss:$8 sm:$0xf] }
 0x2d7   : > { %1429 = vst [vmem:[#allocation1 + $0x9] sm:$0xff] %v3757_v8 }
 0x2d8   : > { %1430 = vst [vmem:[#allocation1 + $0x12] sm:$0xff] %v3732_v37  ;;  %v1425_v0 = vadd.f32 %v1424_v60, %v1413_v59 }
 0x2d9   : > { %1431 = vst [vmem:[#allocation1 + $0x1b] sm:$0xff] %v3763_v9 }
 0x2e0   : > { %v1433_v51 = vld [vmem:[#allocation1 + $0x2] ss:$9 sm:$0xff] }
 0x2e1   : > { %1438 = vst [vmem:[#allocation1] sm:$0xff] %v3752_v56  ;;  %v1435_v61 = vmul.f32 %v1433_v51, %v1427_v58 }
 0x2e2   : > { %1439 = vst [vmem:[#allocation1 + $0x9] sm:$0xff] %v3757_v8 }
 0x2e3   : > { %1440 = vst [vmem:[#allocation1 + $0x12] sm:$0xff] %v3732_v37  ;;  %v1436_v3 = vadd.f32 %v1435_v61, %v1425_v0  ;;  %v1581_v61 = vmul.f32 %v1580_v57, %v3816_v39 }
 0x2e4   : > { %1441 = vst [vmem:[#allocation1 + $0x1b] sm:$0xff] %v3763_v9 }
 0x2eb   : > { %v1443_v52 = vld [vmem:[#allocation1 + $0x3] ss:$9 sm:$0xff] }
 0x2ec   : > { %1449 = vst [vmem:[#allocation1] sm:$0xff] %v3752_v56  ;;  %v1445_v1 = vmul.f32 %v1443_v52, %v1437_v63 }
 0x2ed   : > { %1450 = vst [vmem:[#allocation1 + $0x9] sm:$0xff] %v3757_v8 }
 0x2ee   : > { %1451 = vst [vmem:[#allocation1 + $0x12] sm:$0xff] %v3732_v37  ;;  %v1446_v7 = vadd.f32 %v1445_v1, %v1436_v3 }
 0x2ef   : > { %1452 = vst [vmem:[#allocation1 + $0x1b] sm:$0xff] %v3763_v9 }
 0x2f6   : > { %v1454_v53 = vld [vmem:[#allocation1 + $0x4] ss:$9 sm:$0xff] }
 0x2f7   : > { %1460 = vst [vmem:[#allocation1] sm:$0xff] %v3752_v56  ;;  %v1456_v4 = vmul.f32 %v1454_v53, %v1448_v2 }
 0x2f8   : > { %1461 = vst [vmem:[#allocation1 + $0x9] sm:$0xff] %v3757_v8 }
 0x2f9   : > { %1462 = vst [vmem:[#allocation1 + $0x12] sm:$0xff] %v3732_v37  ;;  %v1457_v12 = vadd.f32 %v1456_v4, %v1446_v7  ;;  %v2718_v4 = vld [vmem:[%s4400_s9 + $0x70] sm:$0xf] }
 0x2fa   : > { %1463 = vst [vmem:[#allocation1 + $0x1b] sm:$0xff] %v3763_v9  ;;  %v2782_v7 = vld [vmem:[%s4400_s9 + $0xf0] sm:$0xf] }
 0x301   : > { %v1465_v54 = vld [vmem:[#allocation1 + $0x5] ss:$9 sm:$0xff] }
 0x302   : > { %1470 = vst [vmem:[#allocation1] sm:$0xff] %v3752_v56  ;;  %v1467_v10 = vmul.f32 %v1465_v54, %v1459_v6  ;;  %v1569_v54 = vld [vmem:[#allocation2 + $0x120] ss:$8 sm:$0xf] }
 0x303   : > { %1471 = vst [vmem:[#allocation1 + $0x9] sm:$0xff] %v3757_v8  ;;  %v3014_v6 = vld [vmem:[%s4400_s9 + $0x74] sm:$0xf0] }
 0x304   : > { %1472 = vst [vmem:[#allocation1 + $0x12] sm:$0xff] %v3732_v37  ;;  %v1468_v14 = vadd.f32 %v1467_v10, %v1457_v12  ;;  %v2719_v10 = vor.u32 %v3014_v6, %v2718_v4  ;;  %v2846_v12 = vld [vmem:[%s4400_s9 + $0x170] sm:$0xf]  ;;  %v3038_v6 = vld [vmem:[%s4400_s9 + $0x134] sm:$0xf0] }
 0x305   : > { %1473 = vst [vmem:[#allocation1 + $0x1b] sm:$0xff] %v3763_v9 }
 0x306   : > { %2082 = vmatpush.bf16.msra.mxu2 %v2719_v10  ;;  %v3054_v10 = vld [vmem:[%s4400_s9 + $0x1b4] sm:$0xf0] }
 0x30c   : > { %v1475_v62 = vld [vmem:[#allocation1 + $0x6] ss:$9 sm:$0xff] }
 0x30d   : > { %1481 = vst [vmem:[#allocation1] sm:$0xff] %v3752_v56  ;;  %v1477_v13 = vmul.f32 %v1475_v62, %v1469_v11  ;;  %v1583_v62 = vld [vmem:[%s4399_s8] sm:$0xf]  ;;  %v3030_v11 = vld [vmem:[%s4400_s9 + $0xf4] sm:$0xf0] }
 0x30e   : > { %1482 = vst [vmem:[#allocation1 + $0x9] sm:$0xff] %v3757_v8 }
 0x30f   : > { %1483 = vst [vmem:[#allocation1 + $0x12] sm:$0xff] %v3732_v37  ;;  %v1478_v18 = vadd.f32 %v1477_v13, %v1468_v14  ;;  %v3046_v13 = vld [vmem:[%s4400_s9 + $0x174] sm:$0xf0]  ;;  %v2783_v14 = vor.u32 %v3030_v11, %v2782_v7  ;;  %v2878_v7 = vld [vmem:[%s4400_s9 + $0x1b0] sm:$0xf] }
 0x310   : > { %1484 = vst [vmem:[#allocation1 + $0x1b] sm:$0xff] %v3763_v9 }
 0x311   : > { %2095 = vmatpush.bf16.msra.mxu3 %v2783_v14  ;;  %v3004_v14 = vld [vmem:[%s4400_s9 + $0x24] sm:$0xf0] }
 0x317   : > { %v1486_v16 = vld [vmem:[#allocation1 + $0x7] ss:$9 sm:$0xff] }
 0x318   : > { %v1488_v19 = vmul.f32 %v1486_v16, %v1480_v15  ;;  %1503 = vst [vmem:[#allocation1] sm:$0xff] %v3752_v56  ;;  %v2847_v15 = vor.u32 %v3046_v13, %v2846_v12  ;;  %v2910_v16 = vld [vmem:[%s4400_s9 + $0x1f0] sm:$0xf]  ;;  %v2678_v13 = vld [vmem:[%s4400_s9 + $0x20] sm:$0xf] }
 0x319   : > { %1504 = vst [vmem:[#allocation1 + $0x9] sm:$0xff] %v3757_v8 }
 0x31a   : > { %v1489_v20 = vadd.f32 %v1488_v19, %v1478_v18  ;;  %1505 = vst [vmem:[#allocation1 + $0x12] sm:$0xff] %v3732_v37  ;;  %v2911_v18 = vor.u32 %v3062_v17, %v2910_v16  ;;  %2108 = vmatpush.bf16.msrb.mxu0 %v2847_v15  ;;  %v2710_v19 = vld [vmem:[%s4400_s9 + $0x60] sm:$0xf]  ;;  %v2879_v15 = vor.u32 %v3054_v10, %v2878_v7  ;;  %v3020_v17 = vld [vmem:[%s4400_s9 + $0xa4] sm:$0xf0] }
 0x31b   : > { %1506 = vst [vmem:[#allocation1 + $0x1b] sm:$0xff] %v3763_v9  ;;  %v2742_v16 = vld [vmem:[%s4400_s9 + $0xa0] sm:$0xf]  ;;  %v2712_v7 = vld [vmem:[%s4400_s9 + $0x68] sm:$0xf0] }
 0x31c   : > { %v1493_v23 = vadd.f32 %v1492_v21, %v1489_v20  ;;  %v3012_v20 = vld [vmem:[%s4400_s9 + $0x64] sm:$0xf0]  ;;  %v2774_v21 = vld [vmem:[%s4400_s9 + $0xe0] sm:$0xf]  ;;  %2121 = vmatpush.bf16.msrb.mxu1 %v2911_v18  ;;  %v2679_v18 = vor.u32 %v3004_v14, %v2678_v13  ;;  %v2776_v13 = vld [vmem:[%s4400_s9 + $0xe8] sm:$0xf0] }
 0x31e   : > { %v1495_v24 = vadd.f32 %v1494_v22, %v1493_v23  ;;  %v2711_v22 = vor.u32 %v3012_v20, %v2710_v19  ;;  %v3028_v23 = vld [vmem:[%s4400_s9 + $0xe4] sm:$0xf0]  ;;  %v2806_v19 = vld [vmem:[%s4400_s9 + $0x120] sm:$0xf] }
 0x31f   : > { %v3036_v20 = vld [vmem:[%s4400_s9 + $0x124] sm:$0xf0] }
 0x320   : > { %v1496_v25 = vmax.f32 %v1495_v24, 0.0  ;;  %v2838_v24 = vld [vmem:[%s4400_s9 + $0x160] sm:$0xf]  ;;  %2083 = vmatpush.bf16.msra.mxu2 %v2711_v22 }
 0x321   : > { %v2870_v22 = vld [vmem:[%s4400_s9 + $0x1a0] sm:$0xf] }
 0x322   : > { %1498 = vst.msk [vmem:[#allocation3 + $0x1] ss:$4 sm:$0xf] %vm3826_vm6, %v1496_v25  ;;  %v1508_v26 = vld [vmem:[#allocation1 + $0x1] ss:$9 sm:$0xff] }
 0x323   : > { %1513 = vst [vmem:[#allocation1] sm:$0xff] %v3752_v56  ;;  %v1510_v34 = vmul.f32 %v1508_v26, %v1502_v32  ;;  %v3044_v25 = vld [vmem:[%s4400_s9 + $0x164] sm:$0xf0]  ;;  %v2702_v32 = vld [vmem:[%s4400_s9 + $0x50] sm:$0xf] }
 0x324   : > { %1514 = vst [vmem:[#allocation1 + $0x9] sm:$0xff] %v3757_v8 }
 0x325   : > { %1515 = vst [vmem:[#allocation1 + $0x12] sm:$0xff] %v3732_v37  ;;  %v1511_v41 = vadd.f32 %v1510_v34, %v1500_v33  ;;  %v3010_v33 = vld [vmem:[%s4400_s9 + $0x54] sm:$0xf0] }
 0x326   : > { %1516 = vst [vmem:[#allocation1 + $0x1b] sm:$0xff] %v3763_v9  ;;  %v2703_v34 = vor.u32 %v3010_v33, %v2702_v32  ;;  %v3034_v33 = vld [vmem:[%s4400_s9 + $0x114] sm:$0xf0] }
 0x328   : > { %2084 = vmatpush.bf16.msra.mxu2 %v2703_v34  ;;  %v2862_v34 = vld [vmem:[%s4400_s9 + $0x190] sm:$0xf] }
 0x32d   : > { %v1518_v27 = vld [vmem:[#allocation1 + $0x2] ss:$9 sm:$0xff] }
 0x32e   : > { %1525 = vst [vmem:[#allocation1] sm:$0xff] %v3752_v56  ;;  %v1520_v38 = vmul.f32 %v1518_v27, %v1512_v35  ;;  %v2775_v27 = vor.u32 %v3028_v23, %v2774_v21  ;;  %v2766_v35 = vld [vmem:[%s4400_s9 + $0xd0] sm:$0xf]  ;;  %v2743_v21 = vor.u32 %v3020_v17, %v2742_v16  ;;  %v3052_v23 = vld [vmem:[%s4400_s9 + $0x1a4] sm:$0xf0] }
 0x32f   : > { %1526 = vst [vmem:[#allocation1 + $0x9] sm:$0xff] %v3757_v8  ;;  %v2840_v16 = vld [vmem:[%s4400_s9 + $0x168] sm:$0xf0] }
 0x330   : > { %1527 = vst [vmem:[#allocation1 + $0x12] sm:$0xff] %v3732_v37  ;;  %v1521_v44 = vadd.f32 %v1520_v38, %v1511_v41  ;;  %2096 = vmatpush.bf16.msra.mxu3 %v2775_v27  ;;  %v3042_v41 = vld [vmem:[%s4400_s9 + $0x154] sm:$0xf0] }
 0x331   : > { %1528 = vst [vmem:[#allocation1 + $0x1b] sm:$0xff] %v3763_v9  ;;  %v3002_v27 = vld [vmem:[%s4400_s9 + $0x14] sm:$0xf0] }
 0x338   : > { %v1530_v28 = vld [vmem:[#allocation1 + $0x3] ss:$9 sm:$0xff] }
 0x339   : > { %1536 = vst [vmem:[#allocation1] sm:$0xff] %v3752_v56  ;;  %v1532_v42 = vmul.f32 %v1530_v28, %v1524_v36  ;;  %v2839_v28 = vor.u32 %v3044_v25, %v2838_v24  ;;  %v3026_v36 = vld [vmem:[%s4400_s9 + $0xd4] sm:$0xf0]  ;;  %v2807_v24 = vor.u32 %v3036_v20, %v2806_v19  ;;  %v2670_v25 = vld [vmem:[%s4400_s9 + $0x10] sm:$0xf] }
 0x33a   : > { %1537 = vst [vmem:[#allocation1 + $0x9] sm:$0xff] %v3757_v8  ;;  %v2767_v38 = vor.u32 %v3026_v36, %v2766_v35  ;;  %v2671_v32 = vor.u32 %v3002_v27, %v2670_v25  ;;  %v3050_v35 = vld [vmem:[%s4400_s9 + $0x194] sm:$0xf0]  ;;  %v2904_v19 = vld [vmem:[%s4400_s9 + $0x1e8] sm:$0xf0] }
 0x33b   : > { %1538 = vst [vmem:[#allocation1 + $0x12] sm:$0xff] %v3732_v37  ;;  %v1533_v49 = vadd.f32 %v1532_v42, %v1521_v44  ;;  %2109 = vmatpush.bf16.msrb.mxu0 %v2839_v28  ;;  %v3058_v44 = vld [vmem:[%s4400_s9 + $0x1d4] sm:$0xf0]  ;;  %v2871_v28 = vor.u32 %v3052_v23, %v2870_v22  ;;  %v3009_v20 = vld [vmem:[%s4400_s9 + $0x54] sm:$0xf] }
 0x33c   : > { %1539 = vst [vmem:[#allocation1 + $0x1b] sm:$0xff] %v3763_v9  ;;  %2097 = vmatpush.bf16.msra.mxu3 %v2767_v38  ;;  %v2662_v38 = vld [vmem:[%s4400_s9] sm:$0xf]  ;;  %v3025_v25 = vld [vmem:[%s4400_s9 + $0xd4] sm:$0xf] }
 0x33d   : > { %v1591_v22 = vld [vmem:[#allocation2 + $0xa2] ss:$8 sm:$0xf]  ;;  %v2768_v27 = vld [vmem:[%s4400_s9 + $0xd8] sm:$0xf0] }
 0x343   : > { %v1541_v29 = vld [vmem:[#allocation1 + $0x4] ss:$9 sm:$0xff] }
 0x344   : > { %1547 = vst [vmem:[#allocation1] sm:$0xff] %v3752_v56  ;;  %v1543_v45 = vmul.f32 %v1541_v29, %v1535_v43  ;;  %v2902_v29 = vld [vmem:[%s4400_s9 + $0x1e0] sm:$0xf]  ;;  %v2894_v43 = vld [vmem:[%s4400_s9 + $0x1d0] sm:$0xf] }
 0x345   : > { %1548 = vst [vmem:[#allocation1 + $0x9] sm:$0xff] %v3757_v8 }
 0x346   : > { %1549 = vst [vmem:[#allocation1 + $0x12] sm:$0xff] %v3732_v37  ;;  %v1544_v51 = vadd.f32 %v1543_v45, %v1533_v49  ;;  %v2694_v45 = vld [vmem:[%s4400_s9 + $0x40] sm:$0xf] }
 0x347   : > { %1550 = vst [vmem:[#allocation1 + $0x1b] sm:$0xff] %v3763_v9  ;;  %v2758_v49 = vld [vmem:[%s4400_s9 + $0xc0] sm:$0xf] }
 0x34e   : > { %v1552_v30 = vld [vmem:[#allocation1 + $0x5] ss:$9 sm:$0xff] }
 0x34f   : > { %1559 = vst [vmem:[#allocation1] sm:$0xff] %v3752_v56  ;;  %v1554_v50 = vmul.f32 %v1552_v30, %v1546_v46  ;;  %v3060_v30 = vld [vmem:[%s4400_s9 + $0x1e4] sm:$0xf0]  ;;  %v2895_v46 = vor.u32 %v3058_v44, %v2894_v43  ;;  %v2790_v44 = vld [vmem:[%s4400_s9 + $0x100] sm:$0xf] }
 0x350   : > { %1560 = vst [vmem:[#allocation1 + $0x9] sm:$0xff] %v3757_v8  ;;  %v2903_v31 = vor.u32 %v3060_v30, %v2902_v29  ;;  %v2734_v29 = vld [vmem:[%s4400_s9 + $0x90] sm:$0xf]  ;;  %v3018_v30 = vld [vmem:[%s4400_s9 + $0x94] sm:$0xf0] }
 0x351   : > { %1561 = vst [vmem:[#allocation1 + $0x12] sm:$0xff] %v3732_v37  ;;  %v1555_v53 = vadd.f32 %v1554_v50, %v1544_v51  ;;  %v3024_v50 = vld [vmem:[%s4400_s9 + $0xc4] sm:$0xf0]  ;;  %v2735_v36 = vor.u32 %v3018_v30, %v2734_v29  ;;  %v3041_v29 = vld [vmem:[%s4400_s9 + $0x154] sm:$0xf] }
 0x352   : > { %1562 = vst [vmem:[#allocation1 + $0x1b] sm:$0xff] %v3763_v9  ;;  %2122 = vmatpush.bf16.msrb.mxu1 %v2903_v31  ;;  %v2798_v31 = vld [vmem:[%s4400_s9 + $0x110] sm:$0xf]  ;;  %v3016_v43 = vld [vmem:[%s4400_s9 + $0x84] sm:$0xf0] }
 0x353   : > { %v2832_v30 = vld [vmem:[%s4400_s9 + $0x158] sm:$0xf0] }
 0x356   : > { %2123 = vmatpush.bf16.msrb.mxu1 %v2895_v46  ;;  %v2863_v46 = vor.u32 %v3050_v35, %v2862_v34  ;;  %v2896_v34 = vld [vmem:[%s4400_s9 + $0x1d8] sm:$0xf0] }
 0x359   : > { %v1564_v40 = vld [vmem:[#allocation1 + $0x6] ss:$9 sm:$0xff] }
 0x35a   : > { %1570 = vst [vmem:[#allocation1] sm:$0xff] %v3752_v56  ;;  %v1566_v52 = vmul.f32 %v1564_v40, %v1558_v47  ;;  %v2830_v40 = vld [vmem:[%s4400_s9 + $0x150] sm:$0xf]  ;;  %v3008_v47 = vld [vmem:[%s4400_s9 + $0x44] sm:$0xf0] }
 0x35b   : > { %1571 = vst [vmem:[#allocation1 + $0x9] sm:$0xff] %v3757_v8  ;;  %v2831_v42 = vor.u32 %v3042_v41, %v2830_v40  ;;  %v2695_v51 = vor.u32 %v3008_v47, %v2694_v45  ;;  %v3000_v40 = vld [vmem:[%s4400_s9 + $0x4] sm:$0xf0]  ;;  %v2726_v41 = vld [vmem:[%s4400_s9 + $0x80] sm:$0xf] }
 0x35c   : > { %1572 = vst [vmem:[#allocation1 + $0x12] sm:$0xff] %v3732_v37  ;;  %v1567_v58 = vadd.f32 %v1566_v52, %v1555_v53  ;;  %v2759_v52 = vor.u32 %v3024_v50, %v2758_v49  ;;  %v2822_v53 = vld [vmem:[%s4400_s9 + $0x140] sm:$0xf]  ;;  %v3032_v45 = vld [vmem:[%s4400_s9 + $0x104] sm:$0xf0] }
 0x35d   : > { %1573 = vst [vmem:[#allocation1 + $0x1b] sm:$0xff] %v3763_v9  ;;  %2110 = vmatpush.bf16.msrb.mxu0 %v2831_v42  ;;  %2085 = vmatpush.bf16.msra.mxu2 %v2695_v51  ;;  %v2799_v42 = vor.u32 %v3034_v33, %v2798_v31  ;;  %v2854_v47 = vld [vmem:[%s4400_s9 + $0x180] sm:$0xf]  ;;  %v3048_v49 = vld [vmem:[%s4400_s9 + $0x184] sm:$0xf0]  ;;  %v2663_v51 = vor.u32 %v3000_v40, %v2662_v38 }
 0x35e   : > { %2098 = vmatpush.bf16.msra.mxu3 %v2759_v52  ;;  %v3013_v50 = vld [vmem:[%s4400_s9 + $0x74] sm:$0xf]  ;;  %v2720_v52 = vld [vmem:[%s4400_s9 + $0x78] sm:$0xf0]  ;;  %v3007_v38 = vld [vmem:[%s4400_s9 + $0x44] sm:$0xf] }
 0x35f   : > { %v1601_v31 = vld [vmem:[#allocation2 + $0xa3] ss:$8 sm:$0xf]  ;;  %v3057_v33 = vld [vmem:[%s4400_s9 + $0x1d4] sm:$0xf] }
 0x360   : > { %v2696_v40 = vld [vmem:[%s4400_s9 + $0x48] sm:$0xf0] }
 0x364   : > { %v1575_v55 = vld [vmem:[#allocation1 + $0x7] ss:$9 sm:$0xff] }
 0x365   : > { %v1577_v59 = vmul.f32 %v1575_v55, %v1569_v54  ;;  %1592 = vst [vmem:[#allocation1] sm:$0xff] %v3752_v56  ;;  %v3040_v54 = vld [vmem:[%s4400_s9 + $0x144] sm:$0xf0]  ;;  %v2886_v55 = vld [vmem:[%s4400_s9 + $0x1c0] sm:$0xf] }
 0x366   : > { %1593 = vst [vmem:[#allocation1 + $0x9] sm:$0xff] %v3757_v8  ;;  %v2823_v57 = vor.u32 %v3040_v54, %v2822_v53  ;;  %v3029_v53 = vld [vmem:[%s4400_s9 + $0xf4] sm:$0xf]  ;;  %v2784_v54 = vld [vmem:[%s4400_s9 + $0xf8] sm:$0xf0] }
 0x367   : > { %v1578_v60 = vadd.f32 %v1577_v59, %v1567_v58  ;;  %1594 = vst [vmem:[#allocation1 + $0x12] sm:$0xff] %v3732_v37  ;;  %v3056_v58 = vld [vmem:[%s4400_s9 + $0x1c4] sm:$0xf0]  ;;  %v2686_v59 = vld [vmem:[%s4400_s9 + $0x30] sm:$0xf] }
 0x368   : > { %1595 = vst [vmem:[#allocation1 + $0x1b] sm:$0xff] %v3763_v9  ;;  %2111 = vmatpush.bf16.msrb.mxu0 %v2823_v57  ;;  %v2727_v57 = vor.u32 %v3016_v43, %v2726_v41  ;;  %v1611_v41 = vld [vmem:[#allocation2 + $0xe1] ss:$8 sm:$0xf]  ;;  %v3023_v43 = vld [vmem:[%s4400_s9 + $0xc4] sm:$0xf] }
 0x369   : > { %v1582_v63 = vadd.f32 %v1581_v61, %v1578_v60  ;;  %v3006_v60 = vld [vmem:[%s4400_s9 + $0x34] sm:$0xf0]  ;;  %v2887_v61 = vor.u32 %v3056_v58, %v2886_v55  ;;  %v2723_v58 = vor.u32 %v3013_v50, %v2720_v52  ;;  %v2824_v50 = vld [vmem:[%s4400_s9 + $0x148] sm:$0xf0] }
 0x36b   : > { %v1584_v0 = vadd.f32 %v1583_v62, %v1582_v63  ;;  %v2687_v62 = vor.u32 %v3006_v60, %v2686_v59  ;;  %v2750_v63 = vld [vmem:[%s4400_s9 + $0xb0] sm:$0xf]  ;;  %2124 = vmatpush.bf16.msrb.mxu1 %v2887_v61  ;;  %v3045_v59 = vld [vmem:[%s4400_s9 + $0x174] sm:$0xf]  ;;  %v2848_v60 = vld [vmem:[%s4400_s9 + $0x178] sm:$0xf0]  ;;  %v2791_v61 = vor.u32 %v3032_v45, %v2790_v44 }
 0x36d   : > { %v1585_v1 = vmax.f32 %v1584_v0, 0.0  ;;  %v3022_v0 = vld [vmem:[%s4400_s9 + $0xb4] sm:$0xf0]  ;;  %2086 = vmatpush.bf16.msra.mxu2 %v2687_v62  ;;  %v2787_v62 = vor.u32 %v3029_v53, %v2784_v54 }
 0x36e   : > { %v2751_v4 = vor.u32 %v3022_v0, %v2750_v63  ;;  %v3061_v63 = vld [vmem:[%s4400_s9 + $0x1f4] sm:$0xf]  ;;  %v2912_v0 = vld [vmem:[%s4400_s9 + $0x1f8] sm:$0xf0] }
 0x36f   : > { %1587 = vst.msk [vmem:[#allocation3 + $0x2] ss:$4 sm:$0xf] %vm3826_vm6, %v1585_v1  ;;  %v3902_v2 = vld [vmem:[#allocation1 + $0x1] ss:$9 sm:$0xff]  ;;  %2125 = vmatpush.bf16.msrb.mxu1 %v2879_v15  ;;  %v2915_v10 = vor.u32 %v3061_v63, %v2912_v0 }
 0x370   : > { %1602 = vst [vmem:[#allocation1] sm:$0xff] %v3752_v56  ;;  %v2814_v1 = vld [vmem:[%s4400_s9 + $0x130] sm:$0xf]  ;;  %2099 = vmatpush.bf16.msra.mxu3 %v2751_v4  ;;  %v2851_v4 = vor.u32 %v3045_v59, %v2848_v60  ;;  %v3043_v15 = vld [vmem:[%s4400_s9 + $0x164] sm:$0xf]  ;;  %v1599_v35 = vmul.f32 %v3902_v2, %v1591_v22 }
 0x371   : > { %1603 = vst [vmem:[#allocation1 + $0x9] sm:$0xff] %v3757_v8  ;;  %v2815_v12 = vor.u32 %v3038_v6, %v2814_v1  ;;  %2087 = vmatpush.bf16.msra.mxu2 %v2679_v18  ;;  %v2855_v1 = vor.u32 %v3048_v49, %v2854_v47  ;;  %v3011_v6 = vld [vmem:[%s4400_s9 + $0x64] sm:$0xf]  ;;  %v2843_v23 = vor.u32 %v3043_v15, %v2840_v16  ;;  %v2760_v2 = vld [vmem:[%s4400_s9 + $0xc8] sm:$0xf0] }
 0x372   : > { %1604 = vst [vmem:[#allocation1 + $0x12] sm:$0xff] %v3732_v37  ;;  %v2715_v14 = vor.u32 %v3011_v6, %v2712_v7  ;;  %v3059_v18 = vld [vmem:[%s4400_s9 + $0x1e4] sm:$0xf]  ;;  %v2899_v47 = vor.u32 %v3057_v33, %v2896_v34  ;;  %v2763_v54 = vor.u32 %v3023_v43, %v2760_v2  ;;  %v2816_v6 = vld [vmem:[%s4400_s9 + $0x138] sm:$0xf0] }
 0x373   : > { %1605 = vst [vmem:[#allocation1 + $0x1b] sm:$0xff] %v3763_v9  ;;  %2112 = vmatpush.bf16.msrb.mxu0 %v2815_v12  ;;  %2126 = vmatpush.bf16.msrb.mxu1 %v2871_v28  ;;  %v3027_v12 = vld [vmem:[%s4400_s9 + $0xe4] sm:$0xf]  ;;  %v2907_v28 = vor.u32 %v3059_v18, %v2904_v19  ;;  %v1665_v7 = vld [vmem:[#allocation2 + $0x123] ss:$8 sm:$0xf] }
 0x374   : > { %2100 = vmatpush.bf16.msra.mxu3 %v2743_v21  ;;  %v2779_v17 = vor.u32 %v3027_v12, %v2776_v13  ;;  %v1588_v21 = vld [vmem:[#allocation2 + $0xa1] ss:$8 sm:$0xf]  ;;  %v3039_v49 = vld [vmem:[%s4400_s9 + $0x144] sm:$0xf] }
 0x375   : > { %2088 = vmatpush.bf16.msra.mxu2 %v2671_v32  ;;  %v1589_v44 = vmul.f32 %v1588_v21, %v3794_v5  ;;  %v3055_v5 = vld [vmem:[%s4400_s9 + $0x1c4] sm:$0xf]  ;;  %v2880_v15 = vld [vmem:[%s4400_s9 + $0x1b8] sm:$0xf0]  ;;  %v2680_v19 = vld [vmem:[%s4400_s9 + $0x28] sm:$0xf0] }
 0x376   : > { %v3003_v16 = vld [vmem:[%s4400_s9 + $0x24] sm:$0xf]  ;;  %v2744_v21 = vld [vmem:[%s4400_s9 + $0xa8] sm:$0xf0]  ;;  %v3001_v33 = vld [vmem:[%s4400_s9 + $0x14] sm:$0xf] }
 0x377   : > { %2113 = vmatpush.bf16.msrb.mxu0 %v2807_v24  ;;  %2127 = vmatpush.bf16.msrb.mxu1 %v2863_v46  ;;  %v2704_v24 = vld [vmem:[%s4400_s9 + $0x58] sm:$0xf0]  ;;  %v1600_v52 = vadd.f32 %v1599_v35, %v1589_v44  ;;  %v1668_v34 = vld [vmem:[%s4399_s8] sm:$0xf]  ;;  %v3033_v2 = vld [vmem:[%s4400_s9 + $0x114] sm:$0xf] }
 0x378   : > { %2101 = vmatpush.bf16.msra.mxu3 %v2735_v36  ;;  %v2707_v32 = vor.u32 %v3009_v20, %v2704_v24  ;;  %v2771_v36 = vor.u32 %v3025_v25, %v2768_v27  ;;  %v3019_v20 = vld [vmem:[%s4400_s9 + $0xa4] sm:$0xf]  ;;  %v2808_v27 = vld [vmem:[%s4400_s9 + $0x128] sm:$0xf0]  ;;  %v2800_v44 = vld [vmem:[%s4400_s9 + $0x118] sm:$0xf0] }
 0x379   : > { %2089 = vmatpush.bf16.msra.mxu2 %v2663_v51  ;;  %v2699_v51 = vor.u32 %v3007_v38, %v2696_v40  ;;  %v2747_v24 = vor.u32 %v3019_v20, %v2744_v21  ;;  %v3035_v25 = vld [vmem:[%s4400_s9 + $0x124] sm:$0xf]  ;;  %v3017_v38 = vld [vmem:[%s4400_s9 + $0x94] sm:$0xf]  ;;  %v2736_v40 = vld [vmem:[%s4400_s9 + $0x98] sm:$0xf0] }
 0x37a   : > { %v3908_v3 = vld [vmem:[#allocation1 + $0x2] ss:$9 sm:$0xff] }
 0x37b   : > { %1612 = vst [vmem:[#allocation1] sm:$0xff] %v3752_v56  ;;  %2114 = vmatpush.bf16.msrb.mxu0 %v2799_v42  ;;  %2128 = vmatpush.bf16.msrb.mxu1 %v2855_v1  ;;  %v2835_v42 = vor.u32 %v3041_v29, %v2832_v30  ;;  %v1609_v45 = vmul.f32 %v3908_v3, %v1601_v31  ;;  %v2888_v3 = vld [vmem:[%s4400_s9 + $0x1c8] sm:$0xf0]  ;;  %v3051_v31 = vld [vmem:[%s4400_s9 + $0x1a4] sm:$0xf] }
 0x37c   : > { %1613 = vst [vmem:[#allocation1 + $0x9] sm:$0xff] %v3757_v8  ;;  %2102 = vmatpush.bf16.msra.mxu3 %v2727_v57  ;;  %v1622_v57 = vld [vmem:[#allocation2 + $0xe2] ss:$8 sm:$0xf]  ;;  %v2891_v60 = vor.u32 %v3055_v5, %v2888_v3  ;;  %v2811_v30 = vor.u32 %v3035_v25, %v2808_v27  ;;  %v3015_v3 = vld [vmem:[%s4400_s9 + $0x84] sm:$0xf] }
 0x37d   : > { %1614 = vst [vmem:[#allocation1 + $0x12] sm:$0xff] %v3732_v37  ;;  %2134 = vmatpush.bf16.msrb.mxu2 %v2723_v58  ;;  %v1610_v58 = vadd.f32 %v1609_v45, %v1600_v52  ;;  %v3049_v45 = vld [vmem:[%s4400_s9 + $0x194] sm:$0xf]  ;;  %v2728_v52 = vld [vmem:[%s4400_s9 + $0x88] sm:$0xf0] }
 0x37e   : > { %1615 = vst [vmem:[#allocation1 + $0x1b] sm:$0xff] %v3763_v9 }
 0x37f   : > { %2115 = vmatpush.bf16.msrb.mxu0 %v2791_v61  ;;  %2173 = vmatpush.bf16.msra.mxu1 %v2915_v10  ;;  %v1633_v61 = vld [vmem:[#allocation2 + $0xe3] ss:$8 sm:$0xf]  ;;  %v1654_v10 = vld [vmem:[#allocation2 + $0x122] ss:$8 sm:$0xf] }
 0x380   : > { %2147 = vmatpush.bf16.msrb.mxu3 %v2787_v62 }
 0x381   : > { %2135 = vmatpush.bf16.msrb.mxu2 %v2715_v14  ;;  %v3053_v14 = vld [vmem:[%s4400_s9 + $0x1b4] sm:$0xf] }
 0x382   : > { %v2883_v18 = vor.u32 %v3053_v14, %v2880_v15 }
 0x383   : > { %2160 = vmatpush.bf16.msra.mxu0 %v2851_v4  ;;  %2174 = vmatpush.bf16.msra.mxu1 %v2907_v28  ;;  %v3037_v4 = vld [vmem:[%s4400_s9 + $0x134] sm:$0xf] }
 0x384   : > { %2148 = vmatpush.bf16.msrb.mxu3 %v2779_v17  ;;  %v2819_v13 = vor.u32 %v3037_v4, %v2816_v6 }
 0x385   : > { %v3956_v26 = vld [vmem:[#allocation1 + $0x3] ss:$9 sm:$0xff]  ;;  %2136 = vmatpush.bf16.msrb.mxu2 %v2707_v32 }
 0x386   : > { %1623 = vst [vmem:[#allocation1] sm:$0xff] %v3752_v56  ;;  %v1619_v53 = vmul.f32 %v3956_v26, %v1611_v41  ;;  %v2872_v32 = vld [vmem:[%s4400_s9 + $0x1a8] sm:$0xf0]  ;;  %v1666_v41 = vmul.f32 %v1665_v7, %v3816_v39  ;;  %v2864_v39 = vld [vmem:[%s4400_s9 + $0x198] sm:$0xf0] }
 0x387   : > { %1624 = vst [vmem:[#allocation1 + $0x9] sm:$0xff] %v3757_v8  ;;  %2161 = vmatpush.bf16.msra.mxu0 %v2843_v23  ;;  %2175 = vmatpush.bf16.msra.mxu1 %v2899_v47  ;;  %v2683_v23 = vor.u32 %v3003_v16, %v2680_v19  ;;  %v2875_v35 = vor.u32 %v3051_v31, %v2872_v32 }
 0x388   : > { %1625 = vst [vmem:[#allocation1 + $0x12] sm:$0xff] %v3732_v37  ;;  %2149 = vmatpush.bf16.msrb.mxu3 %v2771_v36  ;;  %v1620_v62 = vadd.f32 %v1619_v53, %v1610_v58  ;;  %v2672_v36 = vld [vmem:[%s4400_s9 + $0x18] sm:$0xf0]  ;;  %v2803_v47 = vor.u32 %v3033_v2, %v2800_v44  ;;  %v2867_v5 = vor.u32 %v3049_v45, %v2864_v39  ;;  %v3031_v53 = vld [vmem:[%s4400_s9 + $0x104] sm:$0xf] }
 0x389   : > { %1626 = vst [vmem:[#allocation1 + $0x1b] sm:$0xff] %v3763_v9  ;;  %2137 = vmatpush.bf16.msrb.mxu2 %v2699_v51  ;;  %v2675_v43 = vor.u32 %v3001_v33, %v2672_v36 }
 0x38b   : > { %2162 = vmatpush.bf16.msra.mxu0 %v2835_v42  ;;  %2176 = vmatpush.bf16.msra.mxu1 %v2891_v60  ;;  %v2731_v60 = vor.u32 %v3015_v3, %v2728_v52 }
 0x38c   : > { %2150 = vmatpush.bf16.msrb.mxu3 %v2763_v54  ;;  %v2792_v54 = vld [vmem:[%s4400_s9 + $0x108] sm:$0xf0] }
 0x38f   : > { %2177 = vmatpush.bf16.msra.mxu1 %v2883_v18 }
 0x390   : > { %v4040_v11 = vld [vmem:[#allocation1 + $0x4] ss:$9 sm:$0xff] }
 0x391   : > { %1634 = vst [vmem:[#allocation1] sm:$0xff] %v3752_v56  ;;  %v1630_v59 = vmul.f32 %v4040_v11, %v1622_v57  ;;  %v2688_v11 = vld [vmem:[%s4400_s9 + $0x38] sm:$0xf0]  ;;  %v3047_v57 = vld [vmem:[%s4400_s9 + $0x184] sm:$0xf] }
 0x392   : > { %1635 = vst [vmem:[#allocation1 + $0x9] sm:$0xff] %v3757_v8 }
 0x393   : > { %1636 = vst [vmem:[#allocation1 + $0x12] sm:$0xff] %v3732_v37  ;;  %v1631_v63 = vadd.f32 %v1630_v59, %v1620_v62  ;;  %2178 = vmatpush.bf16.msra.mxu1 %v2875_v35 }
 0x394   : > { %1637 = vst [vmem:[#allocation1 + $0x1b] sm:$0xff] %v3763_v9 }
 0x397   : > { %2179 = vmatpush.bf16.msra.mxu1 %v2867_v5 }
 0x39b   : > { %v4130_v55 = vld [vmem:[#allocation1 + $0x5] ss:$9 sm:$0xff] }
 0x39c   : > { %1644 = vst [vmem:[#allocation1] sm:$0xff] %v3752_v56  ;;  %v1641_v26 = vmul.f32 %v4130_v55, %v1633_v61  ;;  %v2752_v55 = vld [vmem:[%s4400_s9 + $0xb8] sm:$0xf0]  ;;  %v2795_v61 = vor.u32 %v3031_v53, %v2792_v54 }
 0x39d   : > { %1645 = vst [vmem:[#allocation1 + $0x9] sm:$0xff] %v3757_v8 }
 0x39e   : > { %1646 = vst [vmem:[#allocation1 + $0x12] sm:$0xff] %v3732_v37  ;;  %v1642_v17 = vadd.f32 %v1641_v26, %v1631_v63 }
 0x39f   : > { %1647 = vst [vmem:[#allocation1 + $0x1b] sm:$0xff] %v3763_v9 }
 0x3a6   : > { %v1649_v46 = vld [vmem:[#allocation1 + $0x6] ss:$9 sm:$0xff] }
 0x3a7   : > { %1655 = vst [vmem:[#allocation1] sm:$0xff] %v3752_v56  ;;  %v2827_v56 = vor.u32 %v3039_v49, %v2824_v50  ;;  %v2999_v49 = vld [vmem:[%s4400_s9 + $0x4] sm:$0xf]  ;;  %v2664_v50 = vld [vmem:[%s4400_s9 + $0x8] sm:$0xf0] }
 0x3a8   : > { %1656 = vst [vmem:[#allocation1 + $0x9] sm:$0xff] %v3757_v8  ;;  %v1643_v8 = vld [vmem:[#allocation2 + $0x121] ss:$8 sm:$0xf]  ;;  %v2667_v59 = vor.u32 %v2999_v49, %v2664_v50 }
 0x3a9   : > { %1657 = vst [vmem:[#allocation1 + $0x12] sm:$0xff] %v3732_v37  ;;  %2163 = vmatpush.bf16.msra.mxu0 %v2827_v56  ;;  %v3005_v37 = vld [vmem:[%s4400_s9 + $0x34] sm:$0xf]  ;;  %v1651_v0 = vmul.f32 %v1649_v46, %v1643_v8  ;;  %v2739_v46 = vor.u32 %v3017_v38, %v2736_v40  ;;  %v2856_v56 = vld [vmem:[%s4400_s9 + $0x188] sm:$0xf0] }
 0x3aa   : > { %1658 = vst [vmem:[#allocation1 + $0x1b] sm:$0xff] %v3763_v9  ;;  %v3021_v9 = vld [vmem:[%s4400_s9 + $0xb4] sm:$0xf]  ;;  %v2691_v1 = vor.u32 %v3005_v37, %v2688_v11  ;;  %v2859_v26 = vor.u32 %v3047_v57, %v2856_v56 }
 0x3ab   : > { %v2755_v12 = vor.u32 %v3021_v9, %v2752_v55  ;;  %v1652_v28 = vadd.f32 %v1651_v0, %v1642_v17 }
 0x3ac   : > { %2138 = vmatpush.bf16.msrb.mxu2 %v2691_v1  ;;  %2180 = vmatpush.bf16.msra.mxu1 %v2859_v26 }
 0x3ad   : > { %2151 = vmatpush.bf16.msrb.mxu3 %v2755_v12  ;;  %2164 = vmatpush.bf16.msra.mxu0 %v2819_v13 }
 0x3b0   : > { %2139 = vmatpush.bf16.msrb.mxu2 %v2683_v23 }
 0x3b1   : > { %v1660_v22 = vld [vmem:[#allocation1 + $0x7] ss:$9 sm:$0xff]  ;;  %2152 = vmatpush.bf16.msrb.mxu3 %v2747_v24  ;;  %2165 = vmatpush.bf16.msra.mxu0 %v2811_v30 }
 0x3b2   : > { %v1662_v29 = vmul.f32 %v1660_v22, %v1654_v10 }
 0x3b4   : > { %v1663_v42 = vadd.f32 %v1662_v29, %v1652_v28  ;;  %2140 = vmatpush.bf16.msrb.mxu2 %v2675_v43 }
 0x3b5   : > { %2153 = vmatpush.bf16.msrb.mxu3 %v2739_v46  ;;  %2166 = vmatpush.bf16.msra.mxu0 %v2803_v47 }
 0x3b6   : > { %v1667_v51 = vadd.f32 %v1666_v41, %v1663_v42 }
 0x3b8   : > { %v1669_v58 = vadd.f32 %v1668_v34, %v1667_v51  ;;  %2141 = vmatpush.bf16.msrb.mxu2 %v2667_v59 }
 0x3b9   : > { %2154 = vmatpush.bf16.msrb.mxu3 %v2731_v60  ;;  %2167 = vmatpush.bf16.msra.mxu0 %v2795_v61 }
 0x3ba   : > { %v1670_v62 = vmax.f32 %v1669_v58, 0.0 }
 0x3bc   : > { %1672 = vst.msk [vmem:[#allocation3 + $0x3] ss:$4 sm:$0xf] %vm3826_vm6, %v1670_v62 }
 0x3c3   : > { %v1673_v8 = vld [vmem:[#allocation3] sm:$0xff]  ;;  %v1674_v37 = vld [vmem:[#allocation3 + $0x8] sm:$0xff] }
 0x3c4   : > { %1677 = vst [vmem:[#allocation1] ss:$2 sm:$0xff] %v1673_v8 }
 0x3c5   : > { %1679 = vst [vmem:[#allocation1 + $0x10] ss:$2 sm:$0xff] %v1674_v37 }
 0x3cb   : > { %v1680_v11 = vld.sshfl [vmem:[#allocation1] sm:$0xff pattern:$0x75316420]  ;;  %v1681_v9 = vld.sshfl [vmem:[#allocation1 + $0x8] sm:$0xff pattern:$0x75316420] }
 0x3cc   : > { %v1688_v63 = vpack.c.bf16 %v1680_v11, %v1680_v11  ;;  %v1689_v0 = vpack.c.bf16 %v1681_v9, %v1681_v9  ;;  %v1682_v1 = vld.sshfl [vmem:[#allocation1 + $0x10] sm:$0xff pattern:$0x75316420]  ;;  %v1683_v55 = vld.sshfl [vmem:[#allocation1 + $0x18] sm:$0xff pattern:$0x75316420] }
 0x3cd   : > { %v1690_v4 = vpack.c.bf16 %v1682_v1, %v1682_v1  ;;  %v1691_v48 = vpack.c.bf16 %v1683_v55, %v1683_v55 }
 0x3ce   : > { %2090 = vmatmul.bf16.vlgmr.msra.gmra.mxu2 %v1688_v63  ;;  %2103 = vmatmul.bf16.vlgmr.msra.gmra.mxu3 %v1689_v0 }
 0x3cf   : > { %2116 = vmatmul.bf16.vlgmr.msrb.gmra.mxu0 %v1690_v4  ;;  %2129 = vmatmul.bf16.vlgmr.msrb.gmra.mxu1 %v1691_v48 }
 0x3de   : > { %2142 = vmatmul.bf16.vlgmr.msrb.gmra.mxu2 %v1688_v63  ;;  %2155 = vmatmul.bf16.vlgmr.msrb.gmra.mxu3 %v1689_v0 }
 0x3df   : > { %2168 = vmatmul.bf16.vlgmr.msra.gmra.mxu0 %v1690_v4  ;;  %2181 = vmatmul.bf16.vlgmr.msra.gmra.mxu1 %v1691_v48 }
 0x3e0   : > { %3143 = shalt.err (!%p3140_p3)
}
 0x3e1   : > { %s3214_s30 = smov 64   ;;  %s3215_s29 = smov 4   ;;  %v1756_v15 = vld [vmem:[%s4401_s10] sm:$0x3]  ;;  %vm2190_vm7 = vcmask 1043458  }
 0x3e2   : > { %3066 = dma.vmem_to_hbm [thread:$0]  (%p3319_p5), %s2216_s1, 256, %s2218_s16, %s2198_s17, %s3214_s30, %s3214_s30, %s3215_s29   ;;  %v1758_v18 = vperm.slane %v1756_v15, 0  ;;  %v1759_v22 = vperm.slane %v1756_v15, 1 }
 0x3e3   : > { %s2355_s1 = sshll.u32 %s3665_s27, 3  ;;  %s3064_s0 = sshll.u32 %s3302_s25, 3 }
 0x3e4   : > { %s2231_s18 = scalar_lea.hbm %s4403_s12, %s3064_s0  ;;  %s420_s19 = scalar_lea.vmem [#allocation6], %s2355_s1 }
 0x3e5   : > { %s2232_s20 = sshll.u32 %s420_s19, 4  ;;  %s2234_s23 = sshll.u32 %s2231_s18, 4  ;;  %s2233_s20 = int_to_ptr.vmem [resolvable:$true] %s2232_s20  ;;  %s2235_s23 = int_to_ptr.hbm [resolvable:$true] %s2234_s23 }
 0x3e6   : > { %s2203_s25 = scalar_lea.sflag [#allocation7], %s3665_s27  ;;  %s3158_s15 = sshra.s32 %s2235_s23, 4  ;;  %s3159_s15 = int_to_ptr.hbm [resolvable:$true] %s3158_s15 }
 0x3e7   : > { %s3160_s28 = scalar_lea.hbm %s3159_s15, 8  ;;  %s3164_s1 = scalar_lea.hbm %s4403_s12, 16 }
 0x3e8   : > { %p3161_p4 = scmp.ne.s32.totalorder %s3159_s15, %s3160_s28  ;;  %p3165_p9 = scmp.lt.s32.totalorder %s3159_s15, %s4403_s12 }
 0x3e9   : > { %p3166_p10 = scmp.lt.s32.totalorder %s3164_s1, %s3160_s28 }
 0x3ea   : > { %p3162_p7 = pnand %p3161_p4, %p3319_p5 }
 0x3eb   : > { %p3167_p11 = por %p3166_p10, %p3165_p9 }
 0x3ec   : > { %p3163_p8 = pneg %p3162_p7 }
 0x3ee   : > { %p3168_p12 = pnand %p3167_p11, %p3163_p8 }
 0x44c   : > { %v2117_v6 = vpop.f32.mrf.mxu0  ;;  %v2130_v7 = vpop.f32.mrf.mxu1 }
 0x451   : > { %v2091_v10 = vpop.f32.mrf.mxu2  ;;  %v2104_v12 = vpop.f32.mrf.mxu3 }
 0x452   : > { %v2092_v21 = vadd.f32 %v2091_v10, %v1758_v18 }
 0x454   : > { %v2119_v13 = vpop.f32.mrf.mxu0  ;;  %v2132_v14 = vpop.f32.mrf.mxu1  ;;  %v2105_v25 = vadd.f32 %v2104_v12, %v2092_v21 }
 0x456   : > { %v2118_v31 = vadd.f32 %v2117_v6, %v2105_v25 }
 0x458   : > { %v2131_v36 = vadd.f32 %v2130_v7, %v2118_v31 }
 0x459   : > { %v2093_v16 = vpop.f32.mrf.mxu2  ;;  %v2106_v17 = vpop.f32.mrf.mxu3 }
 0x45c   : > { %v2169_v19 = vpop.f32.mrf.mxu0  ;;  %v2182_v20 = vpop.f32.mrf.mxu1 }
 0x461   : > { %v2143_v23 = vpop.f32.mrf.mxu2  ;;  %v2156_v24 = vpop.f32.mrf.mxu3 }
 0x462   : > { %v2144_v27 = vadd.f32 %v2143_v23, %v1759_v22 }
 0x464   : > { %v2157_v28 = vadd.f32 %v2156_v24, %v2144_v27  ;;  %v2171_v29 = vpop.f32.mrf.mxu0  ;;  %v2184_v30 = vpop.f32.mrf.mxu1 }
 0x466   : > { %v2170_v32 = vadd.f32 %v2169_v19, %v2157_v28 }
 0x468   : > { %v2183_v33 = vadd.f32 %v2182_v20, %v2170_v32 }
 0x469   : > { %v2145_v34 = vpop.f32.mrf.mxu2  ;;  %v2158_v35 = vpop.f32.mrf.mxu3 }
 0x46a   : > { %v2188_v38 = vrot.slane %v2183_v33, 6 }
 0x46c   : > { %v2189_v40 = vsel %vm1306_vm5, %v2131_v36, %v2188_v38  ;;  %v2191_v41 = vsel %vm2190_vm7, %v2131_v36, %v2188_v38 }
 0x46d   : > { %v2192_v42 = vrot.slane %v2191_v41, 2  ;;  %2195 = vst [vmem:[%s420_s19] sm:$0xf] %v2189_v40 }
 0x46f   : > { %2196 = vst [vmem:[%s420_s19 + $0x4] sm:$0xf] %v2192_v42 }
 0x470   : > { %3171 = shalt.err (!%p3168_p12)
}
 0x471   : > { %3067 = dma.vmem_to_hbm [thread:$0]  (%p3319_p5), %s2233_s20, 128, %s2235_s23, %s2203_s25, %s3214_s30, %s3214_s30, %s3215_s29  }
 0x472 PF: > { %p3077_p13 = scmp.ge.s32.totalorder %s3210_s24, 2  ;;  %s2249_s27 = sand.u32 1, %s3198_s21  }
 0x473   : > { %s2250_s17 = scalar_lea.sflag [#allocation5], %s2249_s27 }
 0x474   : > { %p3071_p0 = pnand %p3077_p13, %p3323_p6 }
 0x476   : > { %p3072_p1 = pneg %p3071_p0 }
 0x478   : > { %3189 = dma.done.wait (%p3072_p1), %s2250_s17, 256  }
 0x479   : > { %3191 = vsyncadd (%p3072_p1), %s2250_s17, 4294967040  ;;  %s2260_s18 = scalar_lea.sflag [#allocation7], %s2249_s27 }
 0x47a   : > { %3193 = dma.done.wait (%p3072_p1), %s2260_s18, 128  }
 0x47b   : > { %3195 = vsyncadd (%p3072_p1), %s2260_s18, 4294967168  ;;  %s4420_s24 = sld [smem:[#allocation11_spill]]  ;;  %s4423_s21 = smov %s3202_s22 }
 0x47c   : > { %s4421_s13 = sld [smem:[#allocation10_spill]] }
 0x47d   : > { %s4422_s23 = sld [smem:[#allocation12_spill]] }
 0x481   : > { %p26_p5 = scmp.ge.s32.totalorder %s4420_s24, 4  }
 0x482   : > { %s4424_s22 = smov %s4421_s13 }
 0x483   :  { %28 = sbr.rel (!%p26_p5) target bundleno = 9 (0x9), region = 180 }
 0x488   :  { %2266 = vsyncpa [#allocation5], 1 }
 0x489   :  { %2268 = vsyncpa [#allocation5 + $0x1], 1 }
 0x48a   :  { %2269 = vsyncpa [#allocation7], 1 }
 0x48b   :  { %2271 = vsyncpa [#allocation7 + $0x1], 1 }

// kernel: _lambda_.2
= control target key start
LH: loop header
LB: loop body
LE: loop exit
PB: predicated region body
PF: predicated region fallthrough
CT: control target
= control target key end

     0   :  { %s6439_s0 = inlined_call_operand.vmem [shape: bf16[128,27], index: 0, kind: input, shape index: {}]   ;;  %s6440_s1 = inlined_call_operand.vmem [shape: bf16[27,16], index: 1, kind: input, shape index: {}]   ;;  %s6441_s2 = inlined_call_operand.vmem [shape: f32[1,16], index: 2, kind: input, shape index: {}]   ;;  %s6442_s3 = inlined_call_operand.vmem [shape: bf16[144,32], index: 3, kind: input, shape index: {}]   ;;  %s6443_s4 = inlined_call_operand.vmem [shape: f32[1,32], index: 4, kind: input, shape index: {}]   ;;  %s6444_s5 = inlined_call_operand.vmem [shape: bf16[288,32], index: 5, kind: input, shape index: {}]   ;;  %s6445_s6 = inlined_call_operand.vmem [shape: f32[1,32], index: 6, kind: input, shape index: {}]   ;;  %s6446_s7 = inlined_call_operand.vmem [shape: bf16[16,32], index: 7, kind: input, shape index: {}]   ;;  %s6447_s8 = inlined_call_operand.vmem [shape: f32[1,32], index: 8, kind: input, shape index: {}]   ;;  %s6448_s9 = inlined_call_operand.vmem [shape: f32[2,32], index: 9, kind: input, shape index: {}]   ;;  %s6449_s10 = inlined_call_operand.vmem [shape: f32[2,1], index: 10, kind: input, shape index: {}]   ;;  %s6450_s11 = inlined_call_operand.vmem [shape: f32[2,32], index: 11, kind: input, shape index: {}]   ;;  %s6451_s12 = inlined_call_operand.vmem [shape: f32[1,32], index: 12, kind: input, shape index: {}]   ;;  %s6452_s13 = inlined_call_operand.vmem [shape: bf16[288,64], index: 13, kind: input, shape index: {}]   ;;  %s6453_s14 = inlined_call_operand.vmem [shape: f32[1,64], index: 14, kind: input, shape index: {}]   ;;  %s6454_s15 = inlined_call_operand.vmem [shape: bf16[576,64], index: 15, kind: input, shape index: {}]   ;;  %s6455_s16 = inlined_call_operand.vmem [shape: f32[1,64], index: 16, kind: input, shape index: {}]   ;;  %s6456_s17 = inlined_call_operand.vmem [shape: bf16[32,64], index: 17, kind: input, shape index: {}]   ;;  %s6457_s18 = inlined_call_operand.vmem [shape: f32[1,64], index: 18, kind: input, shape index: {}]   ;;  %s6458_s19 = inlined_call_operand.vmem [shape: f32[4,64], index: 19, kind: input, shape index: {}]   ;;  %s6459_s20 = inlined_call_operand.vmem [shape: f32[4,1], index: 20, kind: input, shape index: {}]   ;;  %s6460_s21 = inlined_call_operand.vmem [shape: f32[4,64], index: 21, kind: input, shape index: {}]   ;;  %s6461_s22 = inlined_call_operand.vmem [shape: f32[1,64], index: 22, kind: input, shape index: {}]   ;;  %s6462_s23 = inlined_call_operand.vmem [shape: f32[2,8,8,64], index: 23, kind: output, shape index: {}]  }
   0x1   :  { %6468 = sst [smem:[#allocation14_spill]] %s6439_s0 }
   0x2   :  { %6469 = sst [smem:[#allocation15_spill]] %s6440_s1 }
   0x3   :  { %6470 = sst [smem:[#allocation16_spill]] %s6441_s2 }
   0x4   :  { %6471 = sst [smem:[#allocation17_spill]] %s6442_s3 }
   0x5   :  { %6472 = sst [smem:[#allocation18_spill]] %s6443_s4  ;;  %s5047_s4 = smov 0  }
   0x6   :  { %6473 = sst [smem:[#allocation19_spill]] %s6444_s5 }
   0x7   :  { %6474 = sst [smem:[#allocation20_spill]] %s6445_s6 }
   0x8   :  { %6475 = sst [smem:[#allocation21_spill]] %s6446_s7 }
   0x9 LB: > { %s5053_s30 = sadd.s32 4294967295, %s4921_s4   ;;  %p4266_p0 = scmp.ge.s32.totalorder %s4921_s4, 1  ;;  %s4921_s4 = sphi %s5047_s4, %s33_s4  }
   0xa   : > { %p638_p1 = scmp.lt.s32.totalorder %s4921_s4, 3 }
   0xc   : > { %p639_p2 = pnand %p4266_p0, %p638_p1 }
   0xe   : > { %642 = sbr.rel (%p639_p2) target bundleno = 2007 (0x7d7), region = 112 }
  0x13   : > { %s6476_s5 = sld [smem:[#allocation15_spill]]  ;;  %vm774_vm0 = vcmask 1044480   ;;  %vm775_vm1 = vcmask 1045504   ;;  %s4267_s2 = sshll.u32 %s5053_s30, 3  ;;  %v4923_v3 = vmov 65535   ;;  %vm761_vm2 = vcmask 220160  }
  0x14   : > { %v776_v4 = vsel %vm774_vm0, 4294967295, %v4923_v3  ;;  %p703_p3 = scmp.lt.s32.totalorder %s4267_s2, 15  ;;  %s6477_s3 = sld [smem:[#allocation14_spill]]  ;;  %vm834_vm3 = vcmask 130048   ;;  %v6466_v12 = vmov 0.0   ;;  %vm878_vm4 = vcmask 122880  }
  0x15   : > { %v777_v5 = vsel %vm775_vm1, %v776_v4, 0  ;;  %881 = vst.msk [vmem:[#allocation2 + $0x20] sm:$0xff] %vm834_vm3, %v6466_v12  ;;  %s6478_s1 = sld [smem:[#allocation21_spill]]  ;;  %vm1542_vm5 = vcmask 261120   ;;  %vm1545_vm6 = vcmask 253952   ;;  %vm2319_vm8 = vcmask 254977  }
  0x16   : > { %s6504_s2 = smov (!%p703_p3, %s4267_s2), 15  ;;  %876 = vst.msk [vmem:[#allocation2] sm:$0xff] %vm834_vm3, %v6466_v12  ;;  %s6479_s6 = sld [smem:[#allocation17_spill]]  ;;  %vm3185_vm13 = vcmask 523264   ;;  %vm3188_vm14 = vcmask 516096   ;;  %vm4135_vm15 = vcmask 519171  }
  0x17   : > { %s4268_s7 = sshll.u32 %s6504_s2, 2  ;;  %877 = vst.msk [vmem:[#allocation2 + $0x8] sm:$0xff] %vm834_vm3, %v6466_v12  ;;  %s6484_s2 = sld [smem:[#allocation19_spill]]  ;;  %vm4099_vm0 = vcmask 517121   ;;  %vm4117_vm1 = vcmask 518146  }
  0x18   : > { %880 = vst.msk [vmem:[#allocation2 + $0x18] sm:$0xff] %vm834_vm3, %v6466_v12  ;;  %s6490_s24 = sld [smem:[#allocation18_spill]]  ;;  %p708_p4 = scmp.lt.s32.totalorder %s5053_s30, 1 }
  0x19   : > { %v4293_v0 = vld [vmem:[%s6476_s5 + $0x8] sm:$0xf]  ;;  %v4797_v1 = vld [vmem:[%s6476_s5 + $0x8] sm:$0x30]  ;;  %v4796_v7 = vld [vmem:[%s6476_s5] sm:$0xff]  ;;  %883 = vst.msk [vmem:[#allocation2 + $0x30] sm:$0xff] %vm834_vm3, %v6466_v12 }
  0x1a   : > { %v4294_v2 = vor.u32 %v4797_v1, %v4293_v0  ;;  %s706_s0 = scalar_lea.vmem %s6477_s3, %s4268_s7  ;;  %884 = vst.msk [vmem:[#allocation2 + $0x38] sm:$0xff] %vm834_vm3, %v6466_v12  ;;  %s6491_s26 = sld [smem:[#allocation20_spill]] }
  0x1b   : > { %v4792_v8 = vld [vmem:[%s706_s0] sm:$0xff]  ;;  %v4793_v9 = vld [vmem:[%s706_s0 + $0x8] sm:$0xff]  ;;  %v4794_v10 = vld [vmem:[%s706_s0 + $0x10] sm:$0xff]  ;;  %886 = vst.msk [vmem:[#allocation2 + $0x48] sm:$0xff] %vm834_vm3, %v6466_v12  ;;  %s6506_s30 = smov (!%p708_p4, %s5053_s30), 1 }
  0x1c   : > { %v779_v6 = vand.u32 %v4294_v2, %v777_v5  ;;  %v4795_v11 = vld [vmem:[%s706_s0 + $0x18] sm:$0xff]  ;;  %v4798_v13 = vld [vmem:[%s6478_s1] sm:$0xff]  ;;  %v4800_v14 = vld [vmem:[%s6479_s6 + $0x8] sm:$0xff]  ;;  %887 = vst.msk [vmem:[#allocation2 + $0x50] sm:$0xff] %vm834_vm3, %v6466_v12  ;;  %s6480_s1 = sld [smem:[#allocation16_spill]] }
  0x1d   : > { %v4799_v15 = vld [vmem:[%s6479_s6] sm:$0xff]  ;;  %889 = vst.msk [vmem:[#allocation2 + $0x60] sm:$0xff] %vm834_vm3, %v6466_v12  ;;  %969 = vmatpush.bf16.msra.mxu2 %v4800_v14  ;;  %4882 = vmatpush.bf16.msra.mxu1 %v4798_v13  ;;  %v4802_v16 = vld [vmem:[%s6479_s6 + $0x18] sm:$0xff]  ;;  %v4804_v39 = vld [vmem:[%s6479_s6 + $0x28] sm:$0xff] }
  0x1e   : > { %787 = vmatpush.bf16.msra.mxu0 %v779_v6  ;;  %890 = vst.msk [vmem:[#allocation2 + $0x68] sm:$0xff] %vm834_vm3, %v6466_v12  ;;  %1016 = vmatpush.bf16.msra.mxu3 %v4799_v15  ;;  %v4803_v17 = vld [vmem:[%s6479_s6 + $0x20] sm:$0xff]  ;;  %v930_v24 = vld [vmem:[#allocation2 + $0x8] sm:$0xff]  ;;  %v4806_v61 = vld [vmem:[%s6479_s6 + $0x38] sm:$0xff] }
  0x1f   : > { %892 = vst.msk [vmem:[#allocation2 + $0x78] sm:$0xff] %vm834_vm3, %v6466_v12  ;;  %v916_v25 = vld [vmem:[#allocation2 + $0x7] sm:$0xff]  ;;  %v4807_v62 = vld [vmem:[%s6479_s6 + $0x40] sm:$0xff] }
  0x20   : > { %893 = vst.msk [vmem:[#allocation2 + $0x80] sm:$0xff] %vm834_vm3, %v6466_v12  ;;  %v4801_v47 = vld [vmem:[%s6479_s6 + $0x10] sm:$0xff] }
  0x21   : > { %895 = vst.msk [vmem:[#allocation2 + $0x90] sm:$0xff] %vm834_vm3, %v6466_v12  ;;  %1146 = vmatpush.bf16.msrb.mxu2 %v4802_v16  ;;  %1077 = vmatpush.bf16.msrb.mxu1 %v4801_v47  ;;  %v4805_v14 = vld [vmem:[%s6479_s6 + $0x30] sm:$0xff] }
  0x22   : > { %788 = vmatpush.bf16.msra.mxu0 %v4796_v7  ;;  %896 = vst.msk [vmem:[#allocation2 + $0x98] sm:$0xff] %vm834_vm3, %v6466_v12  ;;  %1215 = vmatpush.bf16.msrb.mxu3 %v4803_v17  ;;  %v5138_v18 = vld [vmem:[%s6480_s1] ss:$0 sm:$0xff] }
  0x23   : > { %898 = vst.msk [vmem:[#allocation2 + $0xa8] sm:$0xff] %vm834_vm3, %v6466_v12 }
  0x24   : > { %899 = vst.msk [vmem:[#allocation2 + $0xb0] sm:$0xff] %vm834_vm3, %v6466_v12 }
  0x25   : > { %4295 = vmatmul.msk.bf16.vlgmr.msra.gmra.mxu0 %vm761_vm2, %v4792_v8  ;;  %901 = vst.msk [vmem:[#allocation2 + $0xc0] sm:$0xff] %vm834_vm3, %v6466_v12 }
  0x26   : > { %854 = vmatpush.bf16.msrb.mxu0 %v4798_v13  ;;  %902 = vst.msk [vmem:[#allocation2 + $0xc8] sm:$0xff] %vm834_vm3, %v6466_v12 }
  0x27   : > { %904 = vst.msk [vmem:[#allocation2 + $0xd8] sm:$0xff] %vm834_vm3, %v6466_v12 }
  0x28   : > { %905 = vst.msk [vmem:[#allocation2 + $0xe0] sm:$0xff] %vm834_vm3, %v6466_v12 }
  0x29   : > { %882 = vst.msk [vmem:[#allocation2 + $0x28] sm:$0x1] %vm878_vm4, %v6466_v12 }
  0x2a   : > { %885 = vst.msk [vmem:[#allocation2 + $0x40] sm:$0x1] %vm878_vm4, %v6466_v12  ;;  %1284 = vmatpush.bf16.msra.mxu0 %v4804_v39 }
  0x2b   : > { %879 = vst.msk [vmem:[#allocation2 + $0x10] sm:$0x1] %vm878_vm4, %v6466_v12 }
  0x2c   : > { %888 = vst.msk [vmem:[#allocation2 + $0x58] sm:$0x1] %vm878_vm4, %v6466_v12 }
  0x2d   : > { %891 = vst.msk [vmem:[#allocation2 + $0x70] sm:$0x1] %vm878_vm4, %v6466_v12 }
  0x2e   : > { %894 = vst.msk [vmem:[#allocation2 + $0x88] sm:$0x1] %vm878_vm4, %v6466_v12 }
  0x2f   : > { %897 = vst.msk [vmem:[#allocation2 + $0xa0] sm:$0x1] %vm878_vm4, %v6466_v12 }
  0x30   : > { %900 = vst.msk [vmem:[#allocation2 + $0xb8] sm:$0x1] %vm878_vm4, %v6466_v12 }
  0x31   : > { %903 = vst.msk [vmem:[#allocation2 + $0xd0] sm:$0x1] %vm878_vm4, %v6466_v12 }
  0x32   : > { %906 = vst.msk [vmem:[#allocation2 + $0xe8] sm:$0x1] %vm878_vm4, %v6466_v12  ;;  %v1038_v16 = vld [vmem:[#allocation2 + $0x9] sm:$0xff] }
  0x33   : > { %1548 = vst.msk [vmem:[#allocation3 + $0x20] sm:$0xff] %vm1542_vm5, %v6466_v12 }
  0x34   : > { %1543 = vst.msk [vmem:[#allocation3] sm:$0xff] %vm1542_vm5, %v6466_v12 }
  0x35   : > { %4296 = vmatmul.msk.bf16.gmra.mxu0 %vm761_vm2, %v4793_v9  ;;  %1544 = vst.msk [vmem:[#allocation3 + $0x8] sm:$0xff] %vm1542_vm5, %v6466_v12 }
  0x36   : > { %1547 = vst.msk [vmem:[#allocation3 + $0x18] sm:$0xff] %vm1542_vm5, %v6466_v12 }
  0x37   : > { %1550 = vst.msk [vmem:[#allocation3 + $0x30] sm:$0xff] %vm1542_vm5, %v6466_v12 }
  0x38   : > { %1551 = vst.msk [vmem:[#allocation3 + $0x38] sm:$0xff] %vm1542_vm5, %v6466_v12 }
  0x39   : > { %1553 = vst.msk [vmem:[#allocation3 + $0x48] sm:$0xff] %vm1542_vm5, %v6466_v12 }
  0x3a   : > { %1554 = vst.msk [vmem:[#allocation3 + $0x50] sm:$0xff] %vm1542_vm5, %v6466_v12 }
  0x3b   : > { %1556 = vst.msk [vmem:[#allocation3 + $0x60] sm:$0xff] %vm1542_vm5, %v6466_v12 }
  0x3c   : > { %1557 = vst.msk [vmem:[#allocation3 + $0x68] sm:$0xff] %vm1542_vm5, %v6466_v12 }
  0x3d   : > { %1559 = vst.msk [vmem:[#allocation3 + $0x78] sm:$0xff] %vm1542_vm5, %v6466_v12 }
  0x3e   : > { %1560 = vst.msk [vmem:[#allocation3 + $0x80] sm:$0xff] %vm1542_vm5, %v6466_v12 }
  0x3f   : > { %1562 = vst.msk [vmem:[#allocation3 + $0x90] sm:$0xff] %vm1542_vm5, %v6466_v12 }
  0x40   : > { %1563 = vst.msk [vmem:[#allocation3 + $0x98] sm:$0xff] %vm1542_vm5, %v6466_v12 }
  0x41   : > { %1565 = vst.msk [vmem:[#allocation3 + $0xa8] sm:$0xff] %vm1542_vm5, %v6466_v12 }
  0x42   : > { %1566 = vst.msk [vmem:[#allocation3 + $0xb0] sm:$0xff] %vm1542_vm5, %v6466_v12 }
  0x43   : > { %1568 = vst.msk [vmem:[#allocation3 + $0xc0] sm:$0xff] %vm1542_vm5, %v6466_v12 }
  0x44   : > { %1569 = vst.msk [vmem:[#allocation3 + $0xc8] sm:$0xff] %vm1542_vm5, %v6466_v12 }
  0x45   : > { %4297 = vmatmul.msk.bf16.gmra.mxu0 %vm761_vm2, %v4794_v10  ;;  %1571 = vst.msk [vmem:[#allocation3 + $0xd8] sm:$0xff] %vm1542_vm5, %v6466_v12 }
  0x46   : > { %1572 = vst.msk [vmem:[#allocation3 + $0xe0] sm:$0xff] %vm1542_vm5, %v6466_v12 }
  0x47   : > { %2448 = vst.msk [vmem:[#allocation4] sm:$0xff] %vm1542_vm5, %v6466_v12 }
  0x48   : > { %2449 = vst.msk [vmem:[#allocation4 + $0x8] sm:$0xff] %vm1542_vm5, %v6466_v12 }
  0x49   : > { %2451 = vst.msk [vmem:[#allocation4 + $0x18] sm:$0xff] %vm1542_vm5, %v6466_v12 }
  0x4a   : > { %2452 = vst.msk [vmem:[#allocation4 + $0x20] sm:$0xff] %vm1542_vm5, %v6466_v12 }
  0x4b   : > { %2454 = vst.msk [vmem:[#allocation4 + $0x30] sm:$0xff] %vm1542_vm5, %v6466_v12 }
  0x4c   : > { %2455 = vst.msk [vmem:[#allocation4 + $0x38] sm:$0xff] %vm1542_vm5, %v6466_v12 }
  0x4d   : > { %2457 = vst.msk [vmem:[#allocation4 + $0x48] sm:$0xff] %vm1542_vm5, %v6466_v12 }
  0x4e   : > { %2458 = vst.msk [vmem:[#allocation4 + $0x50] sm:$0xff] %vm1542_vm5, %v6466_v12 }
  0x4f   : > { %2460 = vst.msk [vmem:[#allocation4 + $0x60] sm:$0xff] %vm1542_vm5, %v6466_v12 }
  0x50   : > { %2461 = vst.msk [vmem:[#allocation4 + $0x68] sm:$0xff] %vm1542_vm5, %v6466_v12 }
  0x51   : > { %2463 = vst.msk [vmem:[#allocation4 + $0x78] sm:$0xff] %vm1542_vm5, %v6466_v12 }
  0x52   : > { %2464 = vst.msk [vmem:[#allocation4 + $0x80] sm:$0xff] %vm1542_vm5, %v6466_v12 }
  0x53   : > { %2466 = vst.msk [vmem:[#allocation4 + $0x90] sm:$0xff] %vm1542_vm5, %v6466_v12 }
  0x54   : > { %2467 = vst.msk [vmem:[#allocation4 + $0x98] sm:$0xff] %vm1542_vm5, %v6466_v12 }
  0x55   : > { %4298 = vmatmul.msk.bf16.gmra.mxu0 %vm761_vm2, %v4795_v11  ;;  %2469 = vst.msk [vmem:[#allocation4 + $0xa8] sm:$0xff] %vm1542_vm5, %v6466_v12 }
  0x56   : > { %2470 = vst.msk [vmem:[#allocation4 + $0xb0] sm:$0xff] %vm1542_vm5, %v6466_v12 }
  0x57   : > { %2472 = vst.msk [vmem:[#allocation4 + $0xc0] sm:$0xff] %vm1542_vm5, %v6466_v12 }
  0x58   : > { %2473 = vst.msk [vmem:[#allocation4 + $0xc8] sm:$0xff] %vm1542_vm5, %v6466_v12 }
  0x59   : > { %2475 = vst.msk [vmem:[#allocation4 + $0xd8] sm:$0xff] %vm1542_vm5, %v6466_v12 }
  0x5a   : > { %2476 = vst.msk [vmem:[#allocation4 + $0xe0] sm:$0xff] %vm1542_vm5, %v6466_v12 }
  0x5b   : > { %1546 = vst.msk [vmem:[#allocation3 + $0x10] sm:$0x1] %vm1545_vm6, %v6466_v12 }
  0x5c   : > { %1549 = vst.msk [vmem:[#allocation3 + $0x28] sm:$0x1] %vm1545_vm6, %v6466_v12 }
  0x5d   : > { %1552 = vst.msk [vmem:[#allocation3 + $0x40] sm:$0x1] %vm1545_vm6, %v6466_v12 }
  0x5e   : > { %1555 = vst.msk [vmem:[#allocation3 + $0x58] sm:$0x1] %vm1545_vm6, %v6466_v12 }
  0x5f   : > { %1558 = vst.msk [vmem:[#allocation3 + $0x70] sm:$0x1] %vm1545_vm6, %v6466_v12 }
  0x60   : > { %1561 = vst.msk [vmem:[#allocation3 + $0x88] sm:$0x1] %vm1545_vm6, %v6466_v12 }
  0x61   : > { %1564 = vst.msk [vmem:[#allocation3 + $0xa0] sm:$0x1] %vm1545_vm6, %v6466_v12 }
  0x62   : > { %1567 = vst.msk [vmem:[#allocation3 + $0xb8] sm:$0x1] %vm1545_vm6, %v6466_v12 }
  0x63   : > { %1570 = vst.msk [vmem:[#allocation3 + $0xd0] sm:$0x1] %vm1545_vm6, %v6466_v12 }
  0x64   : > { %1573 = vst.msk [vmem:[#allocation3 + $0xe8] sm:$0x1] %vm1545_vm6, %v6466_v12 }
  0x65   : > { %2450 = vst.msk [vmem:[#allocation4 + $0x10] sm:$0x1] %vm1545_vm6, %v6466_v12 }
  0x66   : > { %2453 = vst.msk [vmem:[#allocation4 + $0x28] sm:$0x1] %vm1545_vm6, %v6466_v12 }
  0x67   : > { %2456 = vst.msk [vmem:[#allocation4 + $0x40] sm:$0x1] %vm1545_vm6, %v6466_v12 }
  0x68   : > { %2459 = vst.msk [vmem:[#allocation4 + $0x58] sm:$0x1] %vm1545_vm6, %v6466_v12 }
  0x69   : > { %2462 = vst.msk [vmem:[#allocation4 + $0x70] sm:$0x1] %vm1545_vm6, %v6466_v12 }
  0x6a   : > { %2465 = vst.msk [vmem:[#allocation4 + $0x88] sm:$0x1] %vm1545_vm6, %v6466_v12 }
  0x6b   : > { %2468 = vst.msk [vmem:[#allocation4 + $0xa0] sm:$0x1] %vm1545_vm6, %v6466_v12 }
  0x6c   : > { %2471 = vst.msk [vmem:[#allocation4 + $0xb8] sm:$0x1] %vm1545_vm6, %v6466_v12 }
  0x6d   : > { %2474 = vst.msk [vmem:[#allocation4 + $0xd0] sm:$0x1] %vm1545_vm6, %v6466_v12 }
  0x6e   : > { %2477 = vst.msk [vmem:[#allocation4 + $0xe8] sm:$0x1] %vm1545_vm6, %v6466_v12 }
  0xa2   : > { %v790_v19 = vpop.f32.mrf.mxu0 }
  0xa3   : > { %v791_v20 = vadd.f32 %v5138_v18, %v790_v19 }
  0xa5   : > { %v810_v21 = vmax.f32 %v791_v20, 0.0 }
  0xa7   : > { %908 = vst.msk [vmem:[#allocation2 + $0x20] sm:$0xff] %vm834_vm3, %v810_v21 }
  0xaa   : > { %v792_v22 = vpop.f32.mrf.mxu0 }
  0xab   : > { %v793_v23 = vadd.f32 %v5138_v18, %v792_v22 }
  0xad   : > { %v811_v26 = vmax.f32 %v793_v23, 0.0 }
  0xae   : > { %v5153_v27 = vld [vmem:[#allocation2 + $0x20] sm:$0xff] }
  0xaf   : > { %v5155_v28 = vld [vmem:[#allocation2 + $0x1f] sm:$0xff]  ;;  %v818_v29 = vpack.c.bf16 %v811_v26, %v810_v21  ;;  %909 = vst.msk [vmem:[#allocation2 + $0x38] sm:$0xff] %vm834_vm3, %v811_v26  ;;  %v938_v30 = vpack.c.bf16 %v5153_v27, %v930_v24 }
  0xb0   : > { %v924_v31 = vpack.c.bf16 %v5155_v28, %v916_v25  ;;  %v1245_v13 = vld [vmem:[#allocation2 + $0x21] sm:$0xff] }
  0xb1   : > { %4303 = vmatmul.msk.bf16.vlgmr.msrb.gmra.mxu0 %vm834_vm3, %v818_v29  ;;  %4311 = vmatmul.msk.bf16.vlgmr.msra.gmra.mxu2 %vm834_vm3, %v938_v30 }
  0xb2   : > { %4319 = vmatmul.msk.bf16.vlgmr.msra.gmra.mxu3 %vm834_vm3, %v924_v31  ;;  %v795_v32 = vpop.f32.mrf.mxu0  ;;  %1423 = vmatpush.bf16.msra.mxu2 %v4806_v61 }
  0xb3   : > { %v796_v33 = vadd.f32 %v5138_v18, %v795_v32  ;;  %1492 = vmatpush.bf16.msra.mxu3 %v4807_v62 }
  0xb5   : > { %v812_v34 = vmax.f32 %v796_v33, 0.0 }
  0xb6   : > { %v5166_v38 = vld [vmem:[#allocation2 + $0x38] sm:$0xff] }
  0xb7   : > { %910 = vst.msk [vmem:[#allocation2 + $0x50] sm:$0xff] %vm834_vm3, %v812_v34  ;;  %v5173_v41 = vld [vmem:[#allocation2 + $0x37] sm:$0xff]  ;;  %v1184_v21 = vpack.c.bf16 %v5166_v38, %v5153_v27 }
  0xb8   : > { %v1246_v5 = vld [vmem:[#allocation2 + $0x39] sm:$0xff]  ;;  %v1115_v19 = vpack.c.bf16 %v5173_v41, %v5155_v28 }
  0xb9   : > { %v1253_v15 = vpack.c.bf16 %v1246_v5, %v1245_v13 }
  0xba   : > { %v797_v35 = vpop.f32.mrf.mxu0 }
  0xbb   : > { %v798_v36 = vadd.f32 %v5138_v18, %v797_v35 }
  0xbd   : > { %v813_v37 = vmax.f32 %v798_v36, 0.0 }
  0xbe   : > { %v5171_v40 = vld [vmem:[#allocation2 + $0x50] sm:$0xff] }
  0xbf   : > { %v5175_v42 = vld [vmem:[#allocation2 + $0x4f] sm:$0xff]  ;;  %911 = vst.msk [vmem:[#allocation2 + $0x68] sm:$0xff] %vm834_vm3, %v813_v37  ;;  %v819_v43 = vpack.c.bf16 %v813_v37, %v812_v34  ;;  %v5180_v44 = vpack.c.bf16 %v5171_v40, %v5166_v38 }
  0xc0   : > { %v5184_v45 = vpack.c.bf16 %v5175_v42, %v5173_v41  ;;  %v1247_v20 = vld [vmem:[#allocation2 + $0x51] sm:$0xff] }
  0xc1   : > { %4304 = vmatmul.msk.bf16.gmra.mxu0 %vm834_vm3, %v819_v43  ;;  %4312 = vmatmul.msk.bf16.gmra.mxu2 %vm834_vm3, %v5180_v44  ;;  %v1047_v24 = vpack.c.bf16 %v1247_v20, %v1246_v5 }
  0xc2   : > { %4320 = vmatmul.msk.bf16.gmra.mxu3 %vm834_vm3, %v5184_v45  ;;  %v800_v46 = vpop.f32.mrf.mxu0 }
  0xc3   : > { %v801_v48 = vadd.f32 %v5138_v18, %v800_v46 }
  0xc5   : > { %v814_v49 = vmax.f32 %v801_v48, 0.0 }
  0xc6   : > { %v934_v53 = vld [vmem:[#allocation2 + $0x68] sm:$0xff] }
  0xc7   : > { %912 = vst.msk [vmem:[#allocation2 + $0x80] sm:$0xff] %vm834_vm3, %v814_v49  ;;  %v920_v55 = vld [vmem:[#allocation2 + $0x67] sm:$0xff]  ;;  %v1185_v28 = vpack.c.bf16 %v934_v53, %v5171_v40 }
  0xc8   : > { %v1248_v17 = vld [vmem:[#allocation2 + $0x69] sm:$0xff]  ;;  %v1116_v25 = vpack.c.bf16 %v920_v55, %v5175_v42 }
  0xc9   : > { %v1254_v22 = vpack.c.bf16 %v1248_v17, %v1247_v20  ;;  %v4810_v20 = vld [vmem:[%s6484_s2 + $0x10] sm:$0xff] }
  0xca   : > { %v802_v50 = vpop.f32.mrf.mxu0 }
  0xcb   : > { %v803_v51 = vadd.f32 %v5138_v18, %v802_v50 }
  0xcd   : > { %v815_v52 = vmax.f32 %v803_v51, 0.0 }
  0xce   : > { %v5197_v54 = vld [vmem:[#allocation2 + $0x80] sm:$0xff] }
  0xcf   : > { %v5199_v56 = vld [vmem:[#allocation2 + $0x7f] sm:$0xff]  ;;  %913 = vst.msk [vmem:[#allocation2 + $0x98] sm:$0xff] %vm834_vm3, %v815_v52  ;;  %v820_v57 = vpack.c.bf16 %v815_v52, %v814_v49  ;;  %v5203_v58 = vpack.c.bf16 %v5197_v54, %v934_v53 }
  0xd0   : > { %v5206_v59 = vpack.c.bf16 %v5199_v56, %v920_v55  ;;  %v1249_v26 = vld [vmem:[#allocation2 + $0x81] sm:$0xff] }
  0xd1   : > { %4305 = vmatmul.msk.bf16.gmra.mxu0 %vm834_vm3, %v820_v57  ;;  %4313 = vmatmul.msk.bf16.gmra.mxu2 %vm834_vm3, %v5203_v58  ;;  %v1048_v30 = vpack.c.bf16 %v1249_v26, %v1248_v17  ;;  %v1391_v55 = vld [vmem:[#allocation2 + $0xe0] sm:$0xff] }
  0xd2   : > { %4321 = vmatmul.msk.bf16.gmra.mxu3 %vm834_vm3, %v5206_v59  ;;  %v805_v60 = vpop.f32.mrf.mxu0  ;;  %v1460_v57 = vld [vmem:[#allocation2 + $0xe1] sm:$0xff] }
  0xd3   : > { %v806_v63 = vadd.f32 %v5138_v18, %v805_v60 }
  0xd5   : > { %v816_v0 = vmax.f32 %v806_v63, 0.0 }
  0xd6   : > { %v936_v4 = vld [vmem:[#allocation2 + $0x98] sm:$0xff] }
  0xd7   : > { %914 = vst.msk [vmem:[#allocation2 + $0xb0] sm:$0xff] %vm834_vm3, %v816_v0  ;;  %v922_v7 = vld [vmem:[#allocation2 + $0x97] sm:$0xff]  ;;  %v1186_v33 = vpack.c.bf16 %v936_v4, %v5197_v54  ;;  %v1322_v54 = vld [vmem:[#allocation2 + $0xdf] sm:$0xff] }
  0xd8   : > { %v1250_v23 = vld [vmem:[#allocation2 + $0x99] sm:$0xff]  ;;  %v1117_v31 = vpack.c.bf16 %v922_v7, %v5199_v56 }
  0xd9   : > { %v1255_v29 = vpack.c.bf16 %v1250_v23, %v1249_v26 }
  0xda   : > { %v807_v1 = vpop.f32.mrf.mxu0 }
  0xdb   : > { %v808_v2 = vadd.f32 %v5138_v18, %v807_v1  ;;  %v1046_v18 = vpack.c.bf16 %v1245_v13, %v1038_v16 }
  0xdd   : > { %v817_v3 = vmax.f32 %v808_v2, 0.0 }
  0xde   : > { %v937_v6 = vld [vmem:[#allocation2 + $0xb0] sm:$0xff] }
  0xdf   : > { %v923_v8 = vld [vmem:[#allocation2 + $0xaf] sm:$0xff]  ;;  %915 = vst.msk [vmem:[#allocation2 + $0xc8] sm:$0xff] %vm834_vm3, %v817_v3  ;;  %v821_v9 = vpack.c.bf16 %v817_v3, %v816_v0  ;;  %v5223_v10 = vpack.c.bf16 %v937_v6, %v936_v4 }
  0xe0   : > { %v5225_v11 = vpack.c.bf16 %v923_v8, %v922_v7  ;;  %v1251_v32 = vld [vmem:[#allocation2 + $0xb1] sm:$0xff] }
  0xe1   : > { %4306 = vmatmul.msk.bf16.vlgmr.msra.gmra.mxu1 %vm834_vm3, %v821_v9  ;;  %4314 = vmatmul.msk.bf16.gmra.mxu2 %vm834_vm3, %v5223_v10  ;;  %v1049_v37 = vpack.c.bf16 %v1251_v32, %v1250_v23  ;;  %v4811_v3 = vld [vmem:[%s6484_s2 + $0x18] sm:$0xff] }
  0xe2   : > { %4322 = vmatmul.msk.bf16.gmra.mxu3 %vm834_vm3, %v5225_v11  ;;  %4351 = vmatmul.msk.bf16.vlgmr.msra.gmra.mxu0 %vm834_vm3, %v1253_v15 }
  0xe3   : > { %1354 = vmatpush.bf16.msra.mxu1 %v4805_v14  ;;  %1645 = vmatpush.bf16.msrb.mxu0 %v4811_v3 }
  0xe6   : > { %v1252_v27 = vld [vmem:[#allocation2 + $0xc9] sm:$0xff] }
  0xe7   : > { %v1256_v34 = vpack.c.bf16 %v1252_v27, %v1251_v32  ;;  %v1114_v35 = vld [vmem:[#allocation2 + $0xc7] sm:$0xff]  ;;  %v1464_v61 = vpack.c.bf16 %v1460_v57, %v1252_v27  ;;  %1646 = vmatpush.bf16.msrb.mxu0 %v4810_v20 }
  0xe8   : > { %v1183_v36 = vld [vmem:[#allocation2 + $0xc8] sm:$0xff]  ;;  %v1118_v38 = vpack.c.bf16 %v1114_v35, %v923_v8  ;;  %v4813_v32 = vld [vmem:[%s6484_s2 + $0x28] sm:$0xff] }
  0xe9   : > { %v1187_v39 = vpack.c.bf16 %v1183_v36, %v937_v6  ;;  %v1395_v60 = vpack.c.bf16 %v1391_v55, %v1183_v36  ;;  %v4812_v36 = vld [vmem:[%s6484_s2 + $0x20] sm:$0xff] }
  0xf1   : > { %4327 = vmatmul.msk.bf16.vlgmr.msrb.gmra.mxu1 %vm834_vm3, %v1046_v18  ;;  %4335 = vmatmul.msk.bf16.vlgmr.msrb.gmra.mxu2 %vm834_vm3, %v1115_v19 }
  0xf2   : > { %4343 = vmatmul.msk.bf16.vlgmr.msrb.gmra.mxu3 %vm834_vm3, %v1184_v21  ;;  %4352 = vmatmul.msk.bf16.gmra.mxu0 %vm834_vm3, %v1254_v22 }
  0xf3   : > { %1767 = vmatpush.bf16.msrb.mxu2 %v4813_v32 }
  0xf7   : > { %1768 = vmatpush.bf16.msrb.mxu2 %v4812_v36 }
 0x101   : > { %4328 = vmatmul.msk.bf16.gmra.mxu1 %vm834_vm3, %v1047_v24  ;;  %4336 = vmatmul.msk.bf16.gmra.mxu2 %vm834_vm3, %v1116_v25 }
 0x102   : > { %4344 = vmatmul.msk.bf16.gmra.mxu3 %vm834_vm3, %v1185_v28  ;;  %4353 = vmatmul.msk.bf16.gmra.mxu0 %vm834_vm3, %v1255_v29 }
 0x111   : > { %4329 = vmatmul.msk.bf16.gmra.mxu1 %vm834_vm3, %v1048_v30  ;;  %4337 = vmatmul.msk.bf16.gmra.mxu2 %vm834_vm3, %v1117_v31 }
 0x112   : > { %4345 = vmatmul.msk.bf16.gmra.mxu3 %vm834_vm3, %v1186_v33  ;;  %4354 = vmatmul.msk.bf16.gmra.mxu0 %vm834_vm3, %v1256_v34  ;;  %v4809_v33 = vld [vmem:[%s6484_s2 + $0x8] sm:$0xff] }
 0x113   : > { %1698 = vmatpush.bf16.msrb.mxu1 %v4809_v33 }
 0x121   : > { %4330 = vmatmul.msk.bf16.gmra.mxu1 %vm834_vm3, %v1049_v37  ;;  %4338 = vmatmul.msk.bf16.gmra.mxu2 %vm834_vm3, %v1118_v38 }
 0x122   : > { %4346 = vmatmul.msk.bf16.gmra.mxu3 %vm834_vm3, %v1187_v39  ;;  %v4815_v39 = vld [vmem:[%s6484_s2 + $0x38] sm:$0xff] }
 0x123   : > { %1844 = vmatpush.bf16.msrb.mxu3 %v4815_v39 }
 0x12e   : > { %v5297_v0 = vpop.f32.mrf.mxu0 }
 0x12f   : > { %6482 = vst [vmem:[#allocation7_spill] sm:$0xff] %v5297_v0 }
 0x131   : > { %4359 = vmatmul.msk.bf16.vlgmr.msra.gmra.mxu1 %vm834_vm3, %v5184_v45  ;;  %4367 = vmatmul.msk.bf16.vlgmr.msra.gmra.mxu2 %vm834_vm3, %v5180_v44 }
 0x132   : > { %4375 = vmatmul.msk.bf16.vlgmr.msra.gmra.mxu3 %vm834_vm3, %v1047_v24 }
 0x134   : > { %v971_v40 = vpop.f32.mrf.mxu2 }
 0x135   : > { %v1018_v41 = vpop.f32.mrf.mxu3 }
 0x136   : > { %v5264_v42 = vadd.f32 %v1018_v41, %v971_v40  ;;  %v5310_v7 = vpop.f32.mrf.mxu0 }
 0x137   : > { %6485 = vst [vmem:[#allocation9_spill] sm:$0xff] %v5310_v7 }
 0x13c   : > { %v5266_v43 = vpop.f32.mrf.mxu2 }
 0x13d   : > { %v5268_v46 = vpop.f32.mrf.mxu3 }
 0x141   : > { %4360 = vmatmul.msk.bf16.gmra.mxu1 %vm834_vm3, %v5206_v59  ;;  %4368 = vmatmul.msk.bf16.gmra.mxu2 %vm834_vm3, %v5203_v58  ;;  %v1326_v59 = vpack.c.bf16 %v1322_v54, %v1114_v35  ;;  %v4808_v35 = vld [vmem:[%s6484_s2] sm:$0xff] }
 0x142   : > { %4376 = vmatmul.msk.bf16.gmra.mxu3 %vm834_vm3, %v1048_v30  ;;  %1699 = vmatpush.bf16.msrb.mxu1 %v4808_v35 }
 0x144   : > { %v976_v45 = vpop.f32.mrf.mxu2 }
 0x145   : > { %v1023_v44 = vpop.f32.mrf.mxu3 }
 0x146   : > { %v5275_v47 = vadd.f32 %v1023_v44, %v976_v45 }
 0x14c   : > { %v5277_v48 = vpop.f32.mrf.mxu2 }
 0x14d   : > { %v5279_v49 = vpop.f32.mrf.mxu3 }
 0x151   : > { %4361 = vmatmul.msk.bf16.gmra.mxu1 %vm834_vm3, %v5225_v11  ;;  %4369 = vmatmul.msk.bf16.gmra.mxu2 %vm834_vm3, %v5223_v10  ;;  %v5314_v11 = vpop.f32.mrf.mxu0 }
 0x152   : > { %4377 = vmatmul.msk.bf16.gmra.mxu3 %vm834_vm3, %v1049_v37  ;;  %6486 = vst [vmem:[#allocation10_spill] sm:$0xff] %v5314_v11 }
 0x154   : > { %v981_v50 = vpop.f32.mrf.mxu2 }
 0x155   : > { %v1028_v51 = vpop.f32.mrf.mxu3 }
 0x156   : > { %v5286_v52 = vadd.f32 %v1028_v51, %v981_v50 }
 0x159   : > { %v5322_v16 = vpop.f32.mrf.mxu0 }
 0x15a   : > { %6487 = vst [vmem:[#allocation11_spill] sm:$0xff] %v5322_v16 }
 0x15c   : > { %v5288_v53 = vpop.f32.mrf.mxu2 }
 0x15d   : > { %v5290_v56 = vpop.f32.mrf.mxu3 }
 0x15e   : > { %v5292_v58 = vpop.f32.mrf.mxu1 }
 0x15f   : > { %6481 = vst [vmem:[#allocation6_spill] sm:$0xff] %v5292_v58 }
 0x161   : > { %4362 = vmatmul.msk.bf16.gmra.mxu1 %vm834_vm3, %v1326_v59  ;;  %4370 = vmatmul.msk.bf16.gmra.mxu2 %vm834_vm3, %v1395_v60  ;;  %v5337_v23 = vpop.f32.mrf.mxu0 }
 0x162   : > { %4378 = vmatmul.msk.bf16.gmra.mxu3 %vm834_vm3, %v1464_v61  ;;  %6488 = vst [vmem:[#allocation12_spill] sm:$0xff] %v5337_v23  ;;  %v4814_v61 = vld [vmem:[%s6484_s2 + $0x30] sm:$0xff] }
 0x163   : > { %1845 = vmatpush.bf16.msrb.mxu3 %v4814_v61 }
 0x164   : > { %v986_v62 = vpop.f32.mrf.mxu2 }
 0x165   : > { %v1033_v63 = vpop.f32.mrf.mxu3 }
 0x166   : > { %v5299_v1 = vadd.f32 %v1033_v63, %v986_v62  ;;  %v5301_v2 = vpop.f32.mrf.mxu1 }
 0x167   : > { %6483 = vst [vmem:[#allocation8_spill] sm:$0xff] %v5301_v2 }
 0x169   : > { %v5347_v29 = vpop.f32.mrf.mxu0 }
 0x16a   : > { %6489 = vst [vmem:[#allocation13_spill] sm:$0xff] %v5347_v29 }
 0x16c   : > { %v5306_v4 = vpop.f32.mrf.mxu2 }
 0x16d   : > { %v5308_v5 = vpop.f32.mrf.mxu3 }
 0x16e   : > { %v1079_v6 = vpop.f32.mrf.mxu1 }
 0x16f   : > { %v1099_v41 = vadd.f32 %v1079_v6, %v5264_v42  ;;  %v1021_v42 = vadd.f32 %v5268_v46, %v5266_v43  ;;  %v5442_v6 = vld [vmem:[%s6490_s24] ss:$0 sm:$0xff]  ;;  %s4791_s24 = sshll.u32 %s6506_s30, 6 }
 0x170   : > { %s712_s1 = scalar_lea.vmem %s6462_s23, %s4791_s24 }
 0x171   : > { %v1286_v34 = vpop.f32.mrf.mxu0 }
 0x174   : > { %v1148_v8 = vpop.f32.mrf.mxu2 }
 0x175   : > { %v1217_v9 = vpop.f32.mrf.mxu3  ;;  %v1168_v45 = vadd.f32 %v1148_v8, %v1099_v41 }
 0x176   : > { %v5312_v10 = vpop.f32.mrf.mxu1 }
 0x177   : > { %v1237_v51 = vadd.f32 %v1217_v9, %v1168_v45  ;;  %v1100_v57 = vadd.f32 %v5312_v10, %v1021_v42 }
 0x179   : > { %v1288_v44 = vpop.f32.mrf.mxu0  ;;  %v1306_v46 = vadd.f32 %v1286_v34, %v1237_v51  ;;  %v1026_v34 = vadd.f32 %v5279_v49, %v5277_v48  ;;  %v1583_v51 = vld [vmem:[#allocation3 + $0x7] sm:$0xff] }
 0x17c   : > { %v5316_v13 = vpop.f32.mrf.mxu2 }
 0x17d   : > { %v5318_v14 = vpop.f32.mrf.mxu3  ;;  %v1169_v43 = vadd.f32 %v5316_v13, %v1100_v57 }
 0x17e   : > { %v5320_v15 = vpop.f32.mrf.mxu1 }
 0x17f   : > { %v1238_v62 = vadd.f32 %v5318_v14, %v1169_v43  ;;  %v1101_v10 = vadd.f32 %v5320_v15, %v5275_v47  ;;  %v4817_v47 = vld [vmem:[%s6484_s2 + $0x48] sm:$0xff] }
 0x180   : > { %1921 = vmatpush.bf16.msra.mxu0 %v4817_v47 }
 0x181   : > { %v1291_v8 = vpop.f32.mrf.mxu0  ;;  %v1307_v32 = vadd.f32 %v1288_v44, %v1238_v62 }
 0x184   : > { %v5324_v17 = vpop.f32.mrf.mxu2 }
 0x185   : > { %v5326_v18 = vpop.f32.mrf.mxu3  ;;  %v1170_v14 = vadd.f32 %v5324_v17, %v1101_v10 }
 0x186   : > { %v5328_v19 = vpop.f32.mrf.mxu1 }
 0x187   : > { %v1239_v35 = vadd.f32 %v5326_v18, %v1170_v14  ;;  %v1102_v45 = vadd.f32 %v5328_v19, %v1026_v34  ;;  %v1599_v19 = vld [vmem:[#allocation3 + $0x8] sm:$0xff] }
 0x189   : > { %v1293_v42 = vpop.f32.mrf.mxu0  ;;  %v1308_v18 = vadd.f32 %v1291_v8, %v1239_v35 }
 0x18c   : > { %v5333_v21 = vpop.f32.mrf.mxu2 }
 0x18d   : > { %v5335_v22 = vpop.f32.mrf.mxu3  ;;  %v1171_v48 = vadd.f32 %v5333_v21, %v1102_v45 }
 0x18e   : > { %v5339_v24 = vpop.f32.mrf.mxu1 }
 0x18f   : > { %v1103_v8 = vadd.f32 %v5339_v24, %v5286_v52 }
 0x191   : > { %v1296_v52 = vpop.f32.mrf.mxu0 }
 0x194   : > { %v5341_v25 = vpop.f32.mrf.mxu2 }
 0x195   : > { %v5343_v26 = vpop.f32.mrf.mxu3 }
 0x196   : > { %v5345_v28 = vpop.f32.mrf.mxu1 }
 0x19c   : > { %v5349_v27 = vpop.f32.mrf.mxu2 }
 0x19d   : > { %v5353_v30 = vpop.f32.mrf.mxu3 }
 0x19e   : > { %v5357_v31 = vpop.f32.mrf.mxu1 }
 0x1a4   : > { %v5383_v37 = vpop.f32.mrf.mxu2 }
 0x1a5   : > { %v5387_v38 = vpop.f32.mrf.mxu3 }
 0x1a6   : > { %v5394_v40 = vpop.f32.mrf.mxu1 }
 0x1ac   : > { %v5409_v50 = vpop.f32.mrf.mxu2 }
 0x1ad   : > { %v5415_v54 = vpop.f32.mrf.mxu3 }
 0x1ae   : > { %v1356_v55 = vpop.f32.mrf.mxu1 }
 0x1af   : > { %v1376_v59 = vadd.f32 %v1356_v55, %v1306_v46 }
 0x1b4   : > { %v1425_v60 = vpop.f32.mrf.mxu2 }
 0x1b5   : > { %v1445_v63 = vadd.f32 %v1425_v60, %v1376_v59  ;;  %v1494_v3 = vpop.f32.mrf.mxu3  ;;  %v1240_v59 = vadd.f32 %v5335_v22, %v1171_v48  ;;  %v1172_v22 = vadd.f32 %v5341_v25, %v1103_v8  ;;  %v1036_v8 = vadd.f32 %v5308_v5, %v5306_v4 }
 0x1b6   : > { %v1358_v9 = vpop.f32.mrf.mxu1 }
 0x1b7   : > { %v1514_v13 = vadd.f32 %v1494_v3, %v1445_v63  ;;  %v1377_v33 = vadd.f32 %v1358_v9, %v1307_v32  ;;  %v1031_v32 = vadd.f32 %v5290_v56, %v5288_v53  ;;  %v1241_v47 = vadd.f32 %v5343_v26, %v1172_v22 }
 0x1b9   : > { %v1526_v20 = vadd.f32 %v5442_v6, %v1514_v13  ;;  %v1309_v13 = vadd.f32 %v1293_v42, %v1240_v59  ;;  %v1310_v26 = vadd.f32 %v1296_v52, %v1241_v47  ;;  %v1105_v59 = vadd.f32 %v5357_v31, %v5299_v1 }
 0x1bb   : > { %v1534_v15 = vmax.f32 %v1526_v20, 0.0 }
 0x1bc   : > { %v1427_v17 = vpop.f32.mrf.mxu2 }
 0x1bd   : > { %1575 = vst.msk [vmem:[#allocation3 + $0x20] sm:$0xff] %vm1542_vm5, %v1534_v15  ;;  %v1446_v36 = vadd.f32 %v1427_v17, %v1377_v33  ;;  %v1496_v39 = vpop.f32.mrf.mxu3  ;;  %v1721_v15 = vld [vmem:[#allocation3 + $0x9] sm:$0xff] }
 0x1be   : > { %v1361_v41 = vpop.f32.mrf.mxu1 }
 0x1bf   : > { %v1515_v44 = vadd.f32 %v1496_v39, %v1446_v36  ;;  %v1378_v57 = vadd.f32 %v1361_v41, %v1308_v18  ;;  %v1104_v39 = vadd.f32 %v5345_v28, %v1031_v32  ;;  %v4816_v28 = vld [vmem:[%s6484_s2 + $0x40] sm:$0xff]  ;;  %v4821_v32 = vld [vmem:[%s6484_s2 + $0x68] sm:$0xff] }
 0x1c0   : > { %1922 = vmatpush.bf16.msra.mxu0 %v4816_v28  ;;  %2076 = vmatpush.bf16.msra.mxu2 %v4821_v32  ;;  %v4819_v28 = vld [vmem:[%s6484_s2 + $0x58] sm:$0xff] }
 0x1c1   : > { %v1527_v49 = vadd.f32 %v5442_v6, %v1515_v44  ;;  %v1173_v56 = vadd.f32 %v5349_v27, %v1104_v39  ;;  %v1298_v27 = vpop.f32.mrf.mxu0  ;;  %1998 = vmatpush.bf16.msra.mxu1 %v4819_v28 }
 0x1c3   : > { %v1535_v55 = vmax.f32 %v1527_v49, 0.0 }
 0x1c4   : > { %v1430_v21 = vpop.f32.mrf.mxu2  ;;  %v5488_v43 = vld [vmem:[#allocation3 + $0x20] sm:$0xff] }
 0x1c5   : > { %v1584_v46 = vld [vmem:[#allocation3 + $0x1f] sm:$0xff]  ;;  %1576 = vst.msk [vmem:[#allocation3 + $0x38] sm:$0xff] %vm1542_vm5, %v1535_v55  ;;  %v1447_v60 = vadd.f32 %v1430_v21, %v1378_v57  ;;  %v1499_v61 = vpop.f32.mrf.mxu3  ;;  %v1607_v62 = vpack.c.bf16 %v5488_v43, %v1599_v19  ;;  %v1242_v19 = vadd.f32 %v5353_v30, %v1173_v56 }
 0x1c6   : > { %v1591_v63 = vpack.c.bf16 %v1584_v46, %v1583_v51  ;;  %v1363_v3 = vpop.f32.mrf.mxu1  ;;  %v5517_v35 = vld [vmem:[#allocation3 + $0x21] sm:$0xff] }
 0x1c7   : > { %v1516_v9 = vadd.f32 %v1499_v61, %v1447_v60  ;;  %4387 = vmatmul.msk.bf16.vlgmr.msrb.gmra.mxu0 %vm1542_vm5, %v1607_v62  ;;  %v1379_v14 = vadd.f32 %v1363_v3, %v1309_v13  ;;  %v1729_v41 = vpack.c.bf16 %v5517_v35, %v1721_v15  ;;  %v1174_v61 = vadd.f32 %v5383_v37, %v1105_v59 }
 0x1c8   : > { %4399 = vmatmul.msk.bf16.vlgmr.msrb.gmra.mxu1 %vm1542_vm5, %v1591_v63  ;;  %v1311_v31 = vadd.f32 %v1298_v27, %v1242_v19 }
 0x1c9   : > { %v1528_v10 = vadd.f32 %v5442_v6, %v1516_v9  ;;  %4411 = vmatmul.msk.bf16.vlgmr.msrb.gmra.mxu2 %vm1542_vm5, %v1729_v41  ;;  %v1243_v22 = vadd.f32 %v5387_v38, %v1174_v61 }
 0x1cb   : > { %v1536_v24 = vmax.f32 %v1528_v10, 0.0 }
 0x1cc   : > { %v1432_v20 = vpop.f32.mrf.mxu2  ;;  %v1799_v25 = vld [vmem:[#allocation3 + $0x37] sm:$0xff] }
 0x1cd   : > { %1577 = vst.msk [vmem:[#allocation3 + $0x50] sm:$0xff] %vm1542_vm5, %v1536_v24  ;;  %v1448_v33 = vadd.f32 %v1432_v20, %v1379_v14  ;;  %v1501_v17 = vpop.f32.mrf.mxu3  ;;  %v1806_v34 = vpack.c.bf16 %v1799_v25, %v1584_v46  ;;  %v5542_v48 = vld [vmem:[#allocation3 + $0x38] sm:$0xff]  ;;  %v1301_v24 = vpop.f32.mrf.mxu0  ;;  %v1106_v14 = vadd.f32 %v5394_v40, %v1036_v8 }
 0x1ce   : > { %v1366_v36 = vpop.f32.mrf.mxu1  ;;  %v5578_v9 = vld [vmem:[#allocation3 + $0x39] sm:$0xff]  ;;  %v1312_v38 = vadd.f32 %v1301_v24, %v1243_v22  ;;  %v4825_v22 = vld [vmem:[%s6484_s2 + $0x88] sm:$0xff] }
 0x1cf   : > { %v1517_v53 = vadd.f32 %v1501_v17, %v1448_v33  ;;  %4423 = vmatmul.msk.bf16.vlgmr.msrb.gmra.mxu3 %vm1542_vm5, %v1806_v34  ;;  %v1380_v44 = vadd.f32 %v1366_v36, %v1310_v26  ;;  %v1175_v4 = vadd.f32 %v5409_v50, %v1106_v14  ;;  %2230 = vmatpush.bf16.msrb.mxu0 %v4825_v22 }
 0x1d1   : > { %v1529_v45 = vadd.f32 %v5442_v6, %v1517_v53  ;;  %v1244_v40 = vadd.f32 %v5415_v54, %v1175_v4  ;;  %v4823_v54 = vld [vmem:[%s6484_s2 + $0x78] sm:$0xff] }
 0x1d2   : > { %2153 = vmatpush.bf16.msra.mxu3 %v4823_v54 }
 0x1d3   : > { %v1537_v30 = vmax.f32 %v1529_v45, 0.0  ;;  %v4820_v45 = vld [vmem:[%s6484_s2 + $0x60] sm:$0xff] }
 0x1d4   : > { %v1435_v42 = vpop.f32.mrf.mxu2  ;;  %v5544_v49 = vld [vmem:[#allocation3 + $0x50] sm:$0xff]  ;;  %2077 = vmatpush.bf16.msra.mxu2 %v4820_v45 }
 0x1d5   : > { %v1586_v18 = vld [vmem:[#allocation3 + $0x4f] sm:$0xff]  ;;  %v1449_v51 = vadd.f32 %v1435_v42, %v1380_v44  ;;  %v1504_v55 = vpop.f32.mrf.mxu3  ;;  %v5551_v57 = vpack.c.bf16 %v5544_v49, %v5542_v48  ;;  %1578 = vst.msk [vmem:[#allocation3 + $0x68] sm:$0xff] %vm1542_vm5, %v1537_v30  ;;  %v1303_v27 = vpop.f32.mrf.mxu0 }
 0x1d6   : > { %v5553_v21 = vpack.c.bf16 %v1586_v18, %v1799_v25  ;;  %v1368_v46 = vpop.f32.mrf.mxu1  ;;  %v5573_v62 = vld [vmem:[#allocation3 + $0x51] sm:$0xff] }
 0x1d7   : > { %v1518_v60 = vadd.f32 %v1504_v55, %v1449_v51  ;;  %4388 = vmatmul.msk.bf16.gmra.mxu0 %vm1542_vm5, %v5551_v57  ;;  %v1381_v3 = vadd.f32 %v1368_v46, %v1311_v31  ;;  %v5584_v10 = vpack.c.bf16 %v5573_v62, %v5578_v9  ;;  %v1313_v51 = vadd.f32 %v1303_v27, %v1244_v40  ;;  %v2037_v40 = vld [vmem:[#allocation3 + $0xdf] sm:$0xff] }
 0x1d8   : > { %4400 = vmatmul.msk.bf16.gmra.mxu1 %vm1542_vm5, %v5553_v21 }
 0x1d9   : > { %v1530_v1 = vadd.f32 %v5442_v6, %v1518_v60  ;;  %4412 = vmatmul.msk.bf16.gmra.mxu2 %vm1542_vm5, %v5584_v10 }
 0x1db   : > { %v1538_v63 = vmax.f32 %v1530_v1, 0.0 }
 0x1dc   : > { %v1437_v37 = vpop.f32.mrf.mxu2  ;;  %v1801_v47 = vld [vmem:[#allocation3 + $0x67] sm:$0xff] }
 0x1dd   : > { %1579 = vst.msk [vmem:[#allocation3 + $0x80] sm:$0xff] %vm1542_vm5, %v1538_v63  ;;  %v1450_v13 = vadd.f32 %v1437_v37, %v1381_v3  ;;  %v1506_v52 = vpop.f32.mrf.mxu3  ;;  %v1807_v17 = vpack.c.bf16 %v1801_v47, %v1586_v18  ;;  %v5595_v36 = vld [vmem:[#allocation3 + $0x68] sm:$0xff]  ;;  %v4818_v18 = vld [vmem:[%s6484_s2 + $0x50] sm:$0xff] }
 0x1de   : > { %v1371_v20 = vpop.f32.mrf.mxu1  ;;  %v1725_v30 = vld [vmem:[#allocation3 + $0x69] sm:$0xff]  ;;  %1999 = vmatpush.bf16.msra.mxu1 %v4818_v18 }
 0x1df   : > { %v1519_v25 = vadd.f32 %v1506_v52, %v1450_v13  ;;  %v1382_v33 = vadd.f32 %v1371_v20, %v1312_v38  ;;  %4424 = vmatmul.msk.bf16.gmra.mxu3 %vm1542_vm5, %v1807_v17  ;;  %v4822_v13 = vld [vmem:[%s6484_s2 + $0x70] sm:$0xff]  ;;  %v4824_v17 = vld [vmem:[%s6484_s2 + $0x80] sm:$0xff] }
 0x1e0   : > { %2154 = vmatpush.bf16.msra.mxu3 %v4822_v13  ;;  %2231 = vmatpush.bf16.msrb.mxu0 %v4824_v17 }
 0x1e1   : > { %v1531_v5 = vadd.f32 %v5442_v6, %v1519_v25 }
 0x1e3   : > { %v1539_v15 = vmax.f32 %v1531_v5, 0.0 }
 0x1e4   : > { %v1440_v34 = vpop.f32.mrf.mxu2  ;;  %v5597_v50 = vld [vmem:[#allocation3 + $0x80] sm:$0xff] }
 0x1e5   : > { %v1588_v39 = vld [vmem:[#allocation3 + $0x7f] sm:$0xff]  ;;  %1580 = vst.msk [vmem:[#allocation3 + $0x98] sm:$0xff] %vm1542_vm5, %v1539_v15  ;;  %v1451_v41 = vadd.f32 %v1440_v34, %v1382_v33  ;;  %v1509_v53 = vpop.f32.mrf.mxu3  ;;  %v5603_v56 = vpack.c.bf16 %v5597_v50, %v5595_v36  ;;  %v1883_v15 = vpack.c.bf16 %v5542_v48, %v5488_v43  ;;  %v1960_v33 = vpack.c.bf16 %v5578_v9, %v5517_v35 }
 0x1e6   : > { %v5605_v26 = vpack.c.bf16 %v1588_v39, %v1801_v47  ;;  %v1373_v42 = vpop.f32.mrf.mxu1  ;;  %v1726_v55 = vld [vmem:[#allocation3 + $0x81] sm:$0xff]  ;;  %v1884_v43 = vpack.c.bf16 %v5595_v36, %v5544_v49  ;;  %v1961_v35 = vpack.c.bf16 %v1725_v30, %v5573_v62 }
 0x1e7   : > { %v1520_v44 = vadd.f32 %v1509_v53, %v1451_v41  ;;  %4389 = vmatmul.msk.bf16.gmra.mxu0 %vm1542_vm5, %v5603_v56  ;;  %v1383_v59 = vadd.f32 %v1373_v42, %v1313_v51  ;;  %v5625_v61 = vpack.c.bf16 %v1726_v55, %v1725_v30  ;;  %v2114_v36 = vld [vmem:[#allocation3 + $0xe0] sm:$0xff] }
 0x1e8   : > { %4401 = vmatmul.msk.bf16.gmra.mxu1 %vm1542_vm5, %v5605_v26 }
 0x1e9   : > { %v1532_v19 = vadd.f32 %v5442_v6, %v1520_v44  ;;  %4413 = vmatmul.msk.bf16.gmra.mxu2 %vm1542_vm5, %v5625_v61 }
 0x1eb   : > { %v1540_v46 = vmax.f32 %v1532_v19, 0.0 }
 0x1ec   : > { %v1442_v60 = vpop.f32.mrf.mxu2  ;;  %v1803_v63 = vld [vmem:[#allocation3 + $0x97] sm:$0xff] }
 0x1ed   : > { %1581 = vst.msk [vmem:[#allocation3 + $0xb0] sm:$0xff] %vm1542_vm5, %v1540_v46  ;;  %v1452_v1 = vadd.f32 %v1442_v60, %v1383_v59  ;;  %v1511_v31 = vpop.f32.mrf.mxu3  ;;  %v1808_v37 = vpack.c.bf16 %v1803_v63, %v1588_v39  ;;  %v1605_v24 = vld [vmem:[#allocation3 + $0x98] sm:$0xff] }
 0x1ee   : > { %v1727_v5 = vld [vmem:[#allocation3 + $0x99] sm:$0xff]  ;;  %v1885_v48 = vpack.c.bf16 %v1605_v24, %v5597_v50 }
 0x1ef   : > { %v1521_v3 = vadd.f32 %v1511_v31, %v1452_v1  ;;  %4425 = vmatmul.msk.bf16.gmra.mxu3 %vm1542_vm5, %v1808_v37 }
 0x1f1   : > { %v1533_v8 = vadd.f32 %v5442_v6, %v1521_v3 }
 0x1f3   : > { %v1541_v52 = vmax.f32 %v1533_v8, 0.0 }
 0x1f4   : > { %v1606_v14 = vld [vmem:[#allocation3 + $0xb0] sm:$0xff] }
 0x1f5   : > { %v1590_v20 = vld [vmem:[#allocation3 + $0xaf] sm:$0xff]  ;;  %1582 = vst.msk [vmem:[#allocation3 + $0xc8] sm:$0xff] %vm1542_vm5, %v1541_v52  ;;  %v1610_v6 = vpack.c.bf16 %v1606_v14, %v1605_v24 }
 0x1f6   : > { %v1594_v25 = vpack.c.bf16 %v1590_v20, %v1803_v63  ;;  %v1728_v4 = vld [vmem:[#allocation3 + $0xb1] sm:$0xff] }
 0x1f7   : > { %4390 = vmatmul.msk.bf16.gmra.mxu0 %vm1542_vm5, %v1610_v6  ;;  %v1732_v38 = vpack.c.bf16 %v1728_v4, %v1727_v5 }
 0x1f8   : > { %4402 = vmatmul.msk.bf16.gmra.mxu1 %vm1542_vm5, %v1594_v25 }
 0x1f9   : > { %4414 = vmatmul.msk.bf16.gmra.mxu2 %vm1542_vm5, %v1732_v38 }
 0x1fc   : > { %v1805_v32 = vld [vmem:[#allocation3 + $0xc7] sm:$0xff] }
 0x1fd   : > { %v1809_v47 = vpack.c.bf16 %v1805_v32, %v1590_v20  ;;  %v1882_v49 = vld [vmem:[#allocation3 + $0xc8] sm:$0xff]  ;;  %v2041_v34 = vpack.c.bf16 %v2037_v40, %v1805_v32 }
 0x1fe   : > { %v1886_v62 = vpack.c.bf16 %v1882_v49, %v1606_v14  ;;  %v2118_v50 = vpack.c.bf16 %v2114_v36, %v1882_v49 }
 0x1ff   : > { %4426 = vmatmul.msk.bf16.gmra.mxu3 %vm1542_vm5, %v1809_v47 }
 0x207   : > { %4435 = vmatmul.msk.bf16.vlgmr.msra.gmra.mxu0 %vm1542_vm5, %v1883_v15 }
 0x208   : > { %4447 = vmatmul.msk.bf16.vlgmr.msra.gmra.mxu1 %vm1542_vm5, %v1960_v33 }
 0x209   : > { %4459 = vmatmul.msk.bf16.vlgmr.msra.gmra.mxu2 %vm1542_vm5, %v5553_v21  ;;  %v1962_v21 = vpack.c.bf16 %v1727_v5, %v1726_v55 }
 0x20f   : > { %4471 = vmatmul.msk.bf16.vlgmr.msra.gmra.mxu3 %vm1542_vm5, %v5551_v57  ;;  %v1959_v57 = vld [vmem:[#allocation3 + $0xc9] sm:$0xff] }
 0x210   : > { %v1963_v9 = vpack.c.bf16 %v1959_v57, %v1728_v4 }
 0x217   : > { %4436 = vmatmul.msk.bf16.gmra.mxu0 %vm1542_vm5, %v1884_v43 }
 0x218   : > { %4448 = vmatmul.msk.bf16.gmra.mxu1 %vm1542_vm5, %v1961_v35 }
 0x219   : > { %4460 = vmatmul.msk.bf16.gmra.mxu2 %vm1542_vm5, %v5605_v26 }
 0x21f   : > { %4472 = vmatmul.msk.bf16.gmra.mxu3 %vm1542_vm5, %v5603_v56 }
 0x227   : > { %4437 = vmatmul.msk.bf16.gmra.mxu0 %vm1542_vm5, %v1885_v48 }
 0x228   : > { %4449 = vmatmul.msk.bf16.gmra.mxu1 %vm1542_vm5, %v1962_v21 }
 0x229   : > { %4461 = vmatmul.msk.bf16.gmra.mxu2 %vm1542_vm5, %v1594_v25 }
 0x22f   : > { %4473 = vmatmul.msk.bf16.gmra.mxu3 %vm1542_vm5, %v1610_v6 }
 0x237   : > { %4438 = vmatmul.msk.bf16.gmra.mxu0 %vm1542_vm5, %v1886_v62 }
 0x238   : > { %4450 = vmatmul.msk.bf16.gmra.mxu1 %vm1542_vm5, %v1963_v9 }
 0x239   : > { %4462 = vmatmul.msk.bf16.gmra.mxu2 %vm1542_vm5, %v2041_v34 }
 0x23f   : > { %4474 = vmatmul.msk.bf16.gmra.mxu3 %vm1542_vm5, %v2118_v50 }
 0x244   : > { %v1648_v39 = vpop.f32.mrf.mxu0 }
 0x245   : > { %v1701_v41 = vpop.f32.mrf.mxu1 }
 0x246   : > { %v1702_v53 = vadd.f32 %v1701_v41, %v1648_v39 }
 0x247   : > { %4483 = vmatmul.msk.bf16.vlgmr.msrb.gmra.mxu0 %vm1542_vm5, %v5584_v10 }
 0x24c   : > { %v5675_v56 = vpop.f32.mrf.mxu0  ;;  %v1770_v28 = vpop.f32.mrf.mxu2 }
 0x24d   : > { %v5677_v26 = vpop.f32.mrf.mxu1  ;;  %v1790_v44 = vadd.f32 %v1770_v28, %v1702_v53 }
 0x252   : > { %v1847_v54 = vpop.f32.mrf.mxu3 }
 0x253   : > { %v1867_v18 = vadd.f32 %v1847_v54, %v1790_v44 }
 0x254   : > { %v1653_v45 = vpop.f32.mrf.mxu0  ;;  %v5681_v19 = vpop.f32.mrf.mxu2 }
 0x255   : > { %v1706_v27 = vpop.f32.mrf.mxu1 }
 0x256   : > { %v1707_v42 = vadd.f32 %v1706_v27, %v1653_v45 }
 0x257   : > { %4484 = vmatmul.msk.bf16.gmra.mxu0 %vm1542_vm5, %v5625_v61  ;;  %v2191_v61 = vld [vmem:[#allocation3 + $0xe1] sm:$0xff] }
 0x258   : > { %v2195_v24 = vpack.c.bf16 %v2191_v61, %v1959_v57  ;;  %v1704_v61 = vadd.f32 %v5677_v26, %v5675_v56 }
 0x25a   : > { %v1849_v10 = vpop.f32.mrf.mxu3 }
 0x25c   : > { %v5683_v51 = vpop.f32.mrf.mxu0  ;;  %v1775_v46 = vpop.f32.mrf.mxu2 }
 0x25d   : > { %v5685_v55 = vpop.f32.mrf.mxu1  ;;  %v1792_v30 = vadd.f32 %v1775_v46, %v1707_v42 }
 0x262   : > { %v1852_v31 = vpop.f32.mrf.mxu3 }
 0x263   : > { %v1869_v63 = vadd.f32 %v1852_v31, %v1792_v30 }
 0x264   : > { %v1658_v59 = vpop.f32.mrf.mxu0  ;;  %v1777_v3 = vpop.f32.mrf.mxu2 }
 0x265   : > { %v1711_v60 = vpop.f32.mrf.mxu1 }
 0x266   : > { %v1712_v1 = vadd.f32 %v1711_v60, %v1658_v59 }
 0x267   : > { %4485 = vmatmul.msk.bf16.gmra.mxu0 %vm1542_vm5, %v1732_v38 }
 0x26a   : > { %v1854_v37 = vpop.f32.mrf.mxu3 }
 0x26c   : > { %v1660_v8 = vpop.f32.mrf.mxu0  ;;  %v1780_v22 = vpop.f32.mrf.mxu2 }
 0x26d   : > { %v1794_v52 = vadd.f32 %v1780_v22, %v1712_v1  ;;  %v1713_v38 = vpop.f32.mrf.mxu1 }
 0x272   : > { %v1857_v14 = vpop.f32.mrf.mxu3 }
 0x273   : > { %v1871_v20 = vadd.f32 %v1857_v14, %v1794_v52  ;;  %v1791_v52 = vadd.f32 %v5681_v19, %v1704_v61  ;;  %v1709_v14 = vadd.f32 %v5685_v55, %v5683_v51 }
 0x274   : > { %v1663_v13 = vpop.f32.mrf.mxu0  ;;  %v1782_v32 = vpop.f32.mrf.mxu2 }
 0x275   : > { %v1716_v17 = vpop.f32.mrf.mxu1 }
 0x276   : > { %v1717_v29 = vadd.f32 %v1716_v17, %v1663_v13 }
 0x277   : > { %4486 = vmatmul.msk.bf16.gmra.mxu0 %vm1542_vm5, %v2195_v24  ;;  %v1868_v24 = vadd.f32 %v1849_v10, %v1791_v52 }
 0x27a   : > { %v1859_v47 = vpop.f32.mrf.mxu3 }
 0x27c   : > { %v5689_v6 = vpop.f32.mrf.mxu0  ;;  %v1785_v43 = vpop.f32.mrf.mxu2 }
 0x27d   : > { %v1718_v49 = vpop.f32.mrf.mxu1  ;;  %v1796_v56 = vadd.f32 %v1785_v43, %v1717_v29 }
 0x282   : > { %v1862_v48 = vpop.f32.mrf.mxu3 }
 0x283   : > { %v1873_v61 = vadd.f32 %v1862_v48, %v1796_v56 }
 0x284   : > { %v1924_v25 = vpop.f32.mrf.mxu0  ;;  %v5691_v62 = vpop.f32.mrf.mxu2 }
 0x285   : > { %v1944_v4 = vadd.f32 %v1924_v25, %v1867_v18  ;;  %v2001_v34 = vpop.f32.mrf.mxu1 }
 0x287   : > { %v2021_v0 = vadd.f32 %v2001_v34, %v1944_v4 }
 0x28a   : > { %v5693_v9 = vpop.f32.mrf.mxu3 }
 0x28c   : > { %v1926_v5 = vpop.f32.mrf.mxu0  ;;  %v2079_v36 = vpop.f32.mrf.mxu2 }
 0x28d   : > { %v2003_v41 = vpop.f32.mrf.mxu1  ;;  %v1945_v25 = vadd.f32 %v1926_v5, %v1868_v24  ;;  %v2099_v52 = vadd.f32 %v2079_v36, %v2021_v0  ;;  %v4901_v0 = vld [vmem:[%s6491_s26] ss:$0 sm:$0xff] }
 0x28f   : > { %v2022_v11 = vadd.f32 %v2003_v41, %v1945_v25 }
 0x292   : > { %v2156_v50 = vpop.f32.mrf.mxu3 }
 0x294   : > { %v1929_v15 = vpop.f32.mrf.mxu0  ;;  %v2081_v53 = vpop.f32.mrf.mxu2 }
 0x295   : > { %v1946_v33 = vadd.f32 %v1929_v15, %v1869_v63  ;;  %v2006_v45 = vpop.f32.mrf.mxu1  ;;  %v2100_v19 = vadd.f32 %v2081_v53, %v2022_v11 }
 0x297   : > { %v2023_v10 = vadd.f32 %v2006_v45, %v1946_v33 }
 0x29a   : > { %v2158_v54 = vpop.f32.mrf.mxu3 }
 0x29c   : > { %v1931_v35 = vpop.f32.mrf.mxu0  ;;  %v2084_v44 = vpop.f32.mrf.mxu2 }
 0x29d   : > { %v2008_v46 = vpop.f32.mrf.mxu1  ;;  %v2101_v55 = vadd.f32 %v2084_v44, %v2023_v10 }
 0x2a2   : > { %v2161_v42 = vpop.f32.mrf.mxu3 }
 0x2a4   : > { %v1934_v21 = vpop.f32.mrf.mxu0  ;;  %v2086_v59 = vpop.f32.mrf.mxu2 }
 0x2a5   : > { %v1948_v57 = vadd.f32 %v1934_v21, %v1871_v20  ;;  %v2011_v1 = vpop.f32.mrf.mxu1  ;;  %v1793_v20 = vadd.f32 %v1777_v3, %v1709_v14  ;;  %v1714_v21 = vadd.f32 %v1713_v38, %v1660_v8  ;;  %v2177_v3 = vadd.f32 %v2158_v54, %v2100_v19 }
 0x2a6   : > { %v2176_v8 = vadd.f32 %v2156_v50, %v2099_v52 }
 0x2a7   : > { %v1870_v2 = vadd.f32 %v1854_v37, %v1793_v20  ;;  %v1795_v58 = vadd.f32 %v1782_v32, %v1714_v21  ;;  %v2178_v32 = vadd.f32 %v2161_v42, %v2101_v55  ;;  %v2025_v13 = vadd.f32 %v2011_v1, %v1948_v57 }
 0x2a8   : > { %v4925_v42 = vmov 64.0  }
 0x2a9   : > { %v1947_v7 = vadd.f32 %v1931_v35, %v1870_v2  ;;  %v1872_v26 = vadd.f32 %v1859_v47, %v1795_v58  ;;  %v1719_v2 = vadd.f32 %v1718_v49, %v5689_v6  ;;  %4905 = vrcp.f32 %v4925_v42 }
 0x2aa   : > { %v2163_v30 = vpop.f32.mrf.mxu3 }
 0x2ab   : > { %v2024_v5 = vadd.f32 %v2008_v46, %v1947_v7  ;;  %v1797_v43 = vadd.f32 %v5691_v62, %v1719_v2 }
 0x2ac   : > { %v1936_v40 = vpop.f32.mrf.mxu0  ;;  %v2089_v31 = vpop.f32.mrf.mxu2 }
 0x2ad   : > { %v2013_v15 = vpop.f32.mrf.mxu1  ;;  %v1949_v51 = vadd.f32 %v1936_v40, %v1872_v26  ;;  %v2102_v37 = vadd.f32 %v2086_v59, %v2024_v5  ;;  %v2103_v11 = vadd.f32 %v2089_v31, %v2025_v13  ;;  %v1874_v49 = vadd.f32 %v5693_v9, %v1797_v43 }
 0x2ae   : > { %v4926_v43 = vmov 0  }
 0x2af   : > { %v2026_v29 = vadd.f32 %v2013_v15, %v1949_v51  ;;  %v2179_v47 = vadd.f32 %v2163_v30, %v2102_v37  ;;  %v4906_v25 = vpop.eup %4905  ;;  %4895 = vset.pattern.permute.xlu1 %v4926_v43  ;;  %4897 = vset.pattern.permute.xlu0 %v4926_v43 }
 0x2b0   : > { %v2299_v52 = vmul.f32 64.0, %v4906_v25  ;;  %vm2303_vm7 = vweird.f32 %v4906_v25  ;;  %4896 = vset.pattern.permute.xlu2 %v4926_v43 }
 0x2b2   : > { %v2166_v63 = vpop.f32.mrf.mxu3 }
 0x2b3   : > { %v2180_v40 = vadd.f32 %v2166_v63, %v2103_v11  ;;  %v2273_v11 = vld [vmem:[%s6448_s9] sm:$0x3] }
 0x2b4   : > { %v1939_v39 = vpop.f32.mrf.mxu0  ;;  %v2091_v12 = vpop.f32.mrf.mxu2 }
 0x2b5   : > { %v1950_v38 = vadd.f32 %v1939_v39, %v1873_v61  ;;  %v2016_v17 = vpop.f32.mrf.mxu1  ;;  %v2104_v35 = vadd.f32 %v2091_v12, %v2026_v29 }
 0x2b7   : > { %v2027_v48 = vadd.f32 %v2016_v17, %v1950_v38 }
 0x2ba   : > { %v2168_v23 = vpop.f32.mrf.mxu3 }
 0x2bb   : > { %v2181_v50 = vadd.f32 %v2168_v23, %v2104_v35  ;;  %v4831_v35 = vld [vmem:[%s6452_s13 + $0x18] sm:$0xff] }
 0x2bc   : > { %v5695_v28 = vpop.f32.mrf.mxu0  ;;  %v2094_v58 = vpop.f32.mrf.mxu2  ;;  %2549 = vmatpush.bf16.msrb.mxu2 %v4831_v35 }
 0x2bd   : > { %v2105_v36 = vadd.f32 %v2094_v58, %v2027_v48  ;;  %v1951_v54 = vadd.f32 %v5695_v28, %v1874_v49  ;;  %v2018_v28 = vpop.f32.mrf.mxu1  ;;  %v2274_v48 = vld [vmem:[%s6449_s10] sm:$0x3] }
 0x2bf   : > { %v2028_v30 = vadd.f32 %v2018_v28, %v1951_v54  ;;  %v2275_v54 = vld [vmem:[%s6450_s11] sm:$0x3] }
 0x2c2   : > { %v2171_v57 = vpop.f32.mrf.mxu3 }
 0x2c3   : > { %v2182_v45 = vadd.f32 %v2171_v57, %v2105_v36 }
 0x2c4   : > { %v2233_v27 = vpop.f32.mrf.mxu0  ;;  %v2096_v46 = vpop.f32.mrf.mxu2 }
 0x2c5   : > { %v2253_v33 = vadd.f32 %v2233_v27, %v2176_v8  ;;  %v2300_v8 = vsub.f32 1.0, %v2299_v52  ;;  %v4899_v52 = vld [vmem:[%s6447_s8] ss:$0 sm:$0xff] }
 0x2c7   : > { %v5710_v39 = vadd.f32 %v4901_v0, %v2253_v33 }
 0x2c9   : > { %v2277_v23 = vsel %vm1542_vm5, %v5710_v39, 0.0 }
 0x2ca   : > { %v2173_v31 = vpop.f32.mrf.mxu3 }
 0x2cc   : > { %v2235_v18 = vpop.f32.mrf.mxu0 }
 0x2cd   : > { %v2254_v24 = vadd.f32 %v2235_v18, %v2177_v3 }
 0x2cf   : > { %v5707_v34 = vadd.f32 %v4901_v0, %v2254_v24 }
 0x2d1   : > { %v2278_v12 = vsel %vm1542_vm5, %v5707_v34, 0.0 }
 0x2d2   : > { %v2279_v59 = vadd.f32 %v2278_v12, %v2277_v23 }
 0x2d4   : > { %v2238_v60 = vpop.f32.mrf.mxu0 }
 0x2d5   : > { %v2255_v7 = vadd.f32 %v2238_v60, %v2178_v32  ;;  %v2301_v32 = vmul.f32 %v4906_v25, %v2300_v8 }
 0x2d7   : > { %v5712_v41 = vadd.f32 %v4901_v0, %v2255_v7  ;;  %v2302_v24 = vadd.f32 %v4906_v25, %v2301_v32  ;;  %v6493_v32 = vld [vmem:[#allocation9_spill] sm:$0xff] }
 0x2d9   : > { %v2280_v9 = vsel %vm1542_vm5, %v5712_v41, 0.0  ;;  %v5741_v58 = vsel %vm2303_vm7, %v4906_v25, %v2302_v24  ;;  %v4837_v25 = vld [vmem:[%s6452_s13 + $0x48] sm:$0xff] }
 0x2da   : > { %v2281_v63 = vadd.f32 %v2280_v9, %v2279_v59  ;;  %v4830_v9 = vld [vmem:[%s6452_s13 + $0x10] sm:$0xff] }
 0x2db   : > { %2550 = vmatpush.bf16.msrb.mxu2 %v4830_v9 }
 0x2dc   : > { %v2240_v22 = vpop.f32.mrf.mxu0 }
 0x2dd   : > { %v2256_v6 = vadd.f32 %v2240_v22, %v2179_v47  ;;  %v2106_v22 = vadd.f32 %v2096_v46, %v2028_v30  ;;  %v4829_v30 = vld [vmem:[%s6452_s13 + $0x8] sm:$0xff] }
 0x2de   : > { %2602 = vmatpush.bf16.msrb.mxu3 %v4829_v30  ;;  %v2625_v30 = vld [vmem:[#allocation4 + $0x9] sm:$0xff] }
 0x2df   : > { %v5717_v62 = vadd.f32 %v4901_v0, %v2256_v6  ;;  %v2183_v21 = vadd.f32 %v2173_v31, %v2106_v22  ;;  %v4832_v22 = vld [vmem:[%s6452_s13 + $0x20] sm:$0xff]  ;;  %2825 = vmatpush.bf16.msra.mxu2 %v4837_v25 }
 0x2e1   : > { %v2282_v60 = vsel %vm1542_vm5, %v5717_v62, 0.0 }
 0x2e2   : > { %v2283_v15 = vadd.f32 %v2282_v60, %v2281_v63  ;;  %v4833_v60 = vld [vmem:[%s6452_s13 + $0x28] sm:$0xff]  ;;  %v4828_v63 = vld [vmem:[%s6452_s13] sm:$0xff] }
 0x2e3   : > { %2671 = vmatpush.bf16.msra.mxu0 %v4833_v60  ;;  %2603 = vmatpush.bf16.msrb.mxu3 %v4828_v63 }
 0x2e4   : > { %v2243_v16 = vpop.f32.mrf.mxu0 }
 0x2e5   : > { %v2257_v53 = vadd.f32 %v2243_v16, %v2180_v40 }
 0x2e7   : > { %v5723_v18 = vadd.f32 %v4901_v0, %v2257_v53  ;;  %v4827_v53 = vld [vmem:[%s6456_s17 + $0x8] sm:$0xff]  ;;  %2672 = vmatpush.bf16.msra.mxu0 %v4832_v22 }
 0x2e8   : > { %2425 = vmatpush.bf16.msrb.mxu1 %v4827_v53 }
 0x2e9   : > { %v2284_v14 = vsel %vm1542_vm5, %v5723_v18, 0.0 }
 0x2ea   : > { %v2285_v26 = vadd.f32 %v2284_v14, %v2283_v15  ;;  %v4835_v15 = vld [vmem:[%s6452_s13 + $0x38] sm:$0xff] }
 0x2ec   : > { %v2245_v4 = vpop.f32.mrf.mxu0 }
 0x2ed   : > { %v2258_v44 = vadd.f32 %v2245_v4, %v2181_v50 }
 0x2ef   : > { %v5727_v1 = vadd.f32 %v4901_v0, %v2258_v44  ;;  %v2276_v44 = vld [vmem:[%s6451_s12] sm:$0x1] }
 0x2f1   : > { %v2286_v56 = vsel %vm1542_vm5, %v5727_v1, 0.0 }
 0x2f2   : > { %v2287_v51 = vadd.f32 %v2286_v56, %v2285_v26 }
 0x2f4   : > { %v2248_v27 = vpop.f32.mrf.mxu0 }
 0x2f5   : > { %v2259_v16 = vadd.f32 %v2248_v27, %v2182_v45 }
 0x2f7   : > { %v5731_v20 = vadd.f32 %v4901_v0, %v2259_v16  ;;  %v4826_v16 = vld [vmem:[%s6456_s17] sm:$0xff] }
 0x2f8   : > { %2426 = vmatpush.bf16.msrb.mxu1 %v4826_v16 }
 0x2f9   : > { %v2288_v10 = vsel %vm1542_vm5, %v5731_v20, 0.0 }
 0x2fa   : > { %v2289_v3 = vadd.f32 %v2288_v10, %v2287_v51 }
 0x2fc   : > { %v2250_v19 = vpop.f32.mrf.mxu0  ;;  %2748 = vmatpush.bf16.msra.mxu1 %v4835_v15  ;;  %v4836_v15 = vld [vmem:[%s6452_s13 + $0x40] sm:$0xff] }
 0x2fd   : > { %v2260_v61 = vadd.f32 %v2250_v19, %v2183_v21  ;;  %2826 = vmatpush.bf16.msra.mxu2 %v4836_v15 }
 0x2ff   : > { %v5737_v55 = vadd.f32 %v4901_v0, %v2260_v61 }
 0x301   : > { %v2290_v5 = vsel %vm1542_vm5, %v5737_v55, 0.0 }
 0x302   : > { %v2291_v38 = vadd.f32 %v2290_v5, %v2289_v3 }
 0x304   : > { %v2292_v37 = vrot.slane %v2291_v38, 4 }
 0x306   : > { %v2293_v13 = vadd.f32 %v2292_v37, %v2291_v38  ;;  %v6492_v38 = vld [vmem:[#allocation7_spill] sm:$0xff] }
 0x307   : > { %v857_v37 = vadd.f32 %v4899_v52, %v6492_v38 }
 0x308   : > { %v2294_v17 = vrot.slane %v2293_v13, 2 }
 0x30a   : > { %v2295_v2 = vadd.f32 %v2294_v17, %v2293_v13  ;;  %v859_v13 = vadd.f32 %v4899_v52, %v6493_v32  ;;  %v6494_v17 = vld [vmem:[#allocation10_spill] sm:$0xff] }
 0x30b   : > { %v862_v24 = vadd.f32 %v4899_v52, %v6494_v17  ;;  %v4841_v32 = vld [vmem:[%s6452_s13 + $0x68] sm:$0xff]  ;;  %v4838_v17 = vld [vmem:[%s6452_s13 + $0x50] sm:$0xff] }
 0x30c   : > { %v2296_v29 = vrot.slane %v2295_v2, 1  ;;  %2980 = vmatpush.bf16.msrb.mxu0 %v4841_v32 }
 0x30e   : > { %v2297_v4 = vadd.f32 %v2296_v29, %v2295_v2  ;;  %v6495_v29 = vld [vmem:[#allocation11_spill] sm:$0xff] }
 0x310   : > { %v2305_v47 = vmul.f32 %v5741_v58, %v2297_v4  ;;  %v864_v4 = vadd.f32 %v4899_v52, %v6495_v29 }
 0x312   : > { %v2306_v33 = vmul.f32 %v2305_v47, %v2273_v11  ;;  %v6496_v11 = vld [vmem:[#allocation12_spill] sm:$0xff] }
 0x313   : > { %v867_v47 = vadd.f32 %v4899_v52, %v6496_v11 }
 0x314   : > { %v2320_v0 = vsel %vm2319_vm8, %v2306_v33, 0.0  ;;  %v2307_v7 = vsel %vm1545_vm6, %v2306_v33, 0.0  ;;  %v6497_v33 = vld [vmem:[#allocation13_spill] sm:$0xff] }
 0x315   : > { %2321 = vadd.xlane.f32.xlu0 %v2320_v0  ;;  %v869_v0 = vadd.f32 %v4899_v52, %v6497_v33 }
 0x31d   : > { %2308 = vadd.xlane.f32.xlu0 %v2307_v7  ;;  %v6498_v7 = vld [vmem:[#allocation6_spill] sm:$0xff] }
 0x31e   : > { %v872_v43 = vadd.f32 %v4899_v52, %v6498_v7 }
 0x388   : > { %v2322_v57 = vpop.xlane.xlu0 %2321 }
 0x389   : > { %v2323_v40 = vadd.f32 %v2322_v57, %v2274_v48 }
 0x38b   : > { %v2324_v6 = vmax.f32 %v2323_v40, 0.0 }
 0x38d   : > { %2327 = vperm.xlu1 %4895, %v2324_v6  }
 0x390   : > { %v2309_v49 = vpop.xlane.xlu0 %2308 }
 0x391   : > { %v2310_v36 = vadd.f32 %v2309_v49, %v2274_v48 }
 0x393   : > { %v2311_v50 = vmax.f32 %v2310_v36, 0.0 }
 0x395   : > { %2314 = vperm.xlu1 %4895, %v2311_v50  }
 0x3ff   : > { %v2328_v45 = vpop.permute.xlu1 %2327 }
 0x400   : > { %v2330_v12 = vmul.f32 %v2328_v45, %v2275_v54 }
 0x402   : > { %2332 = vst [vmem:[#allocation1] sm:$0xff] %v2330_v12 }
 0x407   : > { %v2315_v27 = vpop.permute.xlu1 %2314 }
 0x408   : > { %v2317_v42 = vmul.f32 %v2315_v27, %v2275_v54 }
 0x409   : > { %v2334_v28 = vld [vmem:[#allocation1 + $0x1] ss:$9 sm:$0xff] }
 0x40a   : > { %v2318_v23 = vadd.f32 %v2317_v42, %v2276_v44  ;;  %v6499_v44 = vld [vmem:[#allocation8_spill] sm:$0xff] }
 0x40c   : > { %v2336_v46 = vadd.f32 %v2334_v28, %v2318_v23 }
 0x40e   : > { %v4487_v59 = vmul.f32 -1.442695, %v2336_v46  ;;  %v2503_v46 = vld [vmem:[#allocation4 + $0x8] sm:$0xff] }
 0x410   : > { %4907 = vpow2.f32 %v4487_v59  ;;  %v2487_v59 = vld [vmem:[#allocation4 + $0x7] sm:$0xff] }
 0x416   : > { %v4908_v31 = vpop.eup %4907 }
 0x417   : > { %v2340_v14 = vadd.f32 1.0, %v4908_v31 }
 0x419   : > { %4909 = vrcp.f32 %v2340_v14  ;;  %v2352_v19 = vand.u32 2147483648, %v2340_v14  ;;  %v2350_v61 = vand.u32 2147483647, %v2340_v14  ;;  %vm2346_vm10 = vweird.f32 %v2340_v14 }
 0x41b   : > { %v2353_v3 = vor.u32 1.1754944e-38, %v2352_v19  ;;  %vm2351_vm12 = vcmp.eq.f32.partialorder %v2350_v61, 8.507059e+37 }
 0x41f   : > { %v4910_v21 = vpop.eup %4909 }
 0x420   : > { %v2342_v56 = vmul.f32 %v4910_v21, %v2340_v14  ;;  %vm2347_vm9 = vweird.f32 %v4910_v21 }
 0x421   : > { %vm2348_vm11 = vmor %vm2346_vm10, %vm2347_vm9 }
 0x422   : > { %v2343_v26 = vsub.f32 1.0, %v2342_v56 }
 0x424   : > { %v2344_v10 = vmul.f32 %v4910_v21, %v2343_v26 }
 0x426   : > { %v2345_v51 = vadd.f32 %v4910_v21, %v2344_v10 }
 0x428   : > { %v2349_v5 = vsel %vm2348_vm11, %v4910_v21, %v2345_v51  ;;  %v4834_v21 = vld [vmem:[%s6452_s13 + $0x30] sm:$0xff] }
 0x429   : > { %v2354_v8 = vsel %vm2351_vm12, %v2353_v3, %v2349_v5  ;;  %2749 = vmatpush.bf16.msra.mxu1 %v4834_v21 }
 0x42a   : > { %v2357_v2 = vperm.slane %v2354_v8, 0 }
 0x42c   : > { %v2359_v35 = vmul.f32 %v2357_v2, %v5710_v39  ;;  %v2360_v48 = vmul.f32 %v2357_v2, %v5707_v34  ;;  %v2361_v57 = vmul.f32 %v2357_v2, %v5712_v41  ;;  %v2362_v40 = vmul.f32 %v2357_v2, %v5717_v62 }
 0x42d   : > { %v2363_v6 = vmul.f32 %v2357_v2, %v5723_v18  ;;  %v2364_v49 = vmul.f32 %v2357_v2, %v5727_v1  ;;  %v2365_v36 = vmul.f32 %v2357_v2, %v5731_v20  ;;  %v2366_v50 = vmul.f32 %v2357_v2, %v5737_v55 }
 0x42e   : > { %v2367_v53 = vadd.f32 %v2359_v35, %v857_v37  ;;  %v2368_v54 = vadd.f32 %v2360_v48, %v859_v13  ;;  %v2369_v45 = vadd.f32 %v2361_v57, %v862_v24  ;;  %v2370_v12 = vadd.f32 %v2362_v40, %v864_v4  ;;  %v4839_v37 = vld [vmem:[%s6452_s13 + $0x58] sm:$0xff]  ;;  %v4840_v24 = vld [vmem:[%s6452_s13 + $0x60] sm:$0xff] }
 0x42f   : > { %v874_v39 = vadd.f32 %v4899_v52, %v6499_v44  ;;  %v2371_v27 = vadd.f32 %v2363_v6, %v867_v47  ;;  %v2372_v34 = vadd.f32 %v2364_v49, %v869_v0  ;;  %v5806_v62 = vadd.f32 %v2365_v36, %v872_v43  ;;  %2902 = vmatpush.bf16.msra.mxu3 %v4839_v37  ;;  %v4845_v43 = vld [vmem:[%s6452_s13 + $0x88] sm:$0xff]  ;;  %v4843_v35 = vld [vmem:[%s6452_s13 + $0x78] sm:$0xff] }
 0x430   : > { %v2375_v42 = vmax.f32 %v2367_v53, 0.0  ;;  %v2376_v41 = vmax.f32 %v2368_v54, 0.0  ;;  %v2377_v23 = vmax.f32 %v2369_v45, 0.0  ;;  %v2378_v18 = vmax.f32 %v2370_v12, 0.0  ;;  %2981 = vmatpush.bf16.msrb.mxu0 %v4840_v24  ;;  %v3095_v37 = vld [vmem:[#allocation4 + $0xe1] sm:$0xff] }
 0x431   : > { %v5808_v9 = vadd.f32 %v2366_v50, %v874_v39  ;;  %v2379_v20 = vmax.f32 %v2371_v27, 0.0  ;;  %v2380_v55 = vmax.f32 %v2372_v34, 0.0  ;;  %v2381_v16 = vmax.f32 %v5806_v62, 0.0  ;;  %v4844_v27 = vld [vmem:[%s6452_s13 + $0x80] sm:$0xff]  ;;  %v4842_v34 = vld [vmem:[%s6452_s13 + $0x70] sm:$0xff] }
 0x432   : > { %v2383_v1 = vpack.c.bf16 %v2376_v41, %v2375_v42  ;;  %2479 = vst.msk [vmem:[#allocation4 + $0x20] sm:$0xff] %vm1542_vm5, %v2375_v42  ;;  %v2384_v56 = vpack.c.bf16 %v2378_v18, %v2377_v23 }
 0x433   : > { %2480 = vst.msk [vmem:[#allocation4 + $0x38] sm:$0xff] %vm1542_vm5, %v2376_v41  ;;  %v2382_v28 = vmax.f32 %v5808_v9, 0.0  ;;  %v2385_v38 = vpack.c.bf16 %v2380_v55, %v2379_v20  ;;  %2903 = vmatpush.bf16.msra.mxu3 %v4838_v17 }
 0x434   : > { %4496 = vmatmul.msk.bf16.vlgmr.msrb.gmra.mxu1 %vm1542_vm5, %v2383_v1  ;;  %2481 = vst.msk [vmem:[#allocation4 + $0x50] sm:$0xff] %vm1542_vm5, %v2377_v23 }
 0x435   : > { %2482 = vst.msk [vmem:[#allocation4 + $0x68] sm:$0xff] %vm1542_vm5, %v2378_v18  ;;  %3057 = vmatpush.bf16.msrb.mxu1 %v4843_v35  ;;  %v2386_v48 = vpack.c.bf16 %v2382_v28, %v2381_v16 }
 0x436   : > { %2483 = vst.msk [vmem:[#allocation4 + $0x80] sm:$0xff] %vm1542_vm5, %v2379_v20 }
 0x437   : > { %2484 = vst.msk [vmem:[#allocation4 + $0x98] sm:$0xff] %vm1542_vm5, %v2380_v55 }
 0x438   : > { %2485 = vst.msk [vmem:[#allocation4 + $0xb0] sm:$0xff] %vm1542_vm5, %v2381_v16 }
 0x439   : > { %v5822_v60 = vld [vmem:[#allocation4 + $0x20] sm:$0xff]  ;;  %2486 = vst.msk [vmem:[#allocation4 + $0xc8] sm:$0xff] %vm1542_vm5, %v2382_v28  ;;  %3058 = vmatpush.bf16.msrb.mxu1 %v4842_v34 }
 0x43a   : > { %v5824_v31 = vld [vmem:[#allocation4 + $0x1f] sm:$0xff]  ;;  %v2511_v22 = vpack.c.bf16 %v5822_v60, %v2503_v46  ;;  %v2489_v10 = vld [vmem:[#allocation4 + $0x37] sm:$0xff] }
 0x43b   : > { %v5826_v63 = vld [vmem:[#allocation4 + $0x21] sm:$0xff]  ;;  %v2495_v14 = vpack.c.bf16 %v5824_v31, %v2487_v59  ;;  %v2505_v26 = vld [vmem:[#allocation4 + $0x38] sm:$0xff]  ;;  %v5842_v19 = vld [vmem:[#allocation4 + $0x50] sm:$0xff]  ;;  %v2710_v12 = vpack.c.bf16 %v2489_v10, %v5824_v31 }
 0x43c   : > { %v2633_v25 = vpack.c.bf16 %v5826_v63, %v2625_v30  ;;  %4508 = vmatmul.msk.bf16.vlgmr.msrb.gmra.mxu2 %vm1542_vm5, %v2511_v22  ;;  %v2490_v61 = vld [vmem:[#allocation4 + $0x4f] sm:$0xff]  ;;  %v2627_v52 = vld [vmem:[#allocation4 + $0x39] sm:$0xff]  ;;  %v5847_v3 = vpack.c.bf16 %v5842_v19, %v2505_v26  ;;  %v2491_v29 = vld [vmem:[#allocation4 + $0x67] sm:$0xff]  ;;  %v2787_v44 = vpack.c.bf16 %v2505_v26, %v5822_v60 }
 0x43d   : > { %4520 = vmatmul.msk.bf16.vlgmr.msrb.gmra.mxu3 %vm1542_vm5, %v2495_v14  ;;  %v5844_v51 = vld [vmem:[#allocation4 + $0x51] sm:$0xff]  ;;  %v2496_v5 = vpack.c.bf16 %v2490_v61, %v2489_v10  ;;  %v2507_v13 = vld [vmem:[#allocation4 + $0x68] sm:$0xff]  ;;  %v2508_v2 = vld [vmem:[#allocation4 + $0x80] sm:$0xff]  ;;  %3134 = vmatpush.bf16.msrb.mxu2 %v4845_v43  ;;  %v2864_v39 = vpack.c.bf16 %v2627_v52, %v5826_v63  ;;  %v2711_v42 = vpack.c.bf16 %v2491_v29, %v2490_v61 }
 0x43e   : > { %4532 = vmatmul.msk.bf16.vlgmr.msra.gmra.mxu0 %vm1542_vm5, %v2633_v25  ;;  %v5850_v8 = vpack.c.bf16 %v5844_v51, %v2627_v52  ;;  %v2492_v4 = vld [vmem:[#allocation4 + $0x7f] sm:$0xff]  ;;  %v2629_v11 = vld [vmem:[#allocation4 + $0x69] sm:$0xff]  ;;  %v5870_v33 = vpack.c.bf16 %v2508_v2, %v2507_v13  ;;  %v2493_v6 = vld [vmem:[#allocation4 + $0x97] sm:$0xff]  ;;  %v2788_v41 = vpack.c.bf16 %v2507_v13, %v5842_v19 }
 0x43f   : > { %v2630_v47 = vld [vmem:[#allocation4 + $0x81] sm:$0xff]  ;;  %v2497_v0 = vpack.c.bf16 %v2492_v4, %v2491_v29  ;;  %v2509_v57 = vld [vmem:[#allocation4 + $0x98] sm:$0xff]  ;;  %v2510_v40 = vld [vmem:[#allocation4 + $0xb0] sm:$0xff]  ;;  %v2865_v23 = vpack.c.bf16 %v2629_v11, %v5844_v51  ;;  %v2712_v62 = vpack.c.bf16 %v2493_v6, %v2492_v4 }
 0x440   : > { %v5872_v7 = vpack.c.bf16 %v2630_v47, %v2629_v11  ;;  %v2494_v49 = vld [vmem:[#allocation4 + $0xaf] sm:$0xff]  ;;  %v2631_v36 = vld [vmem:[#allocation4 + $0x99] sm:$0xff]  ;;  %v2514_v53 = vpack.c.bf16 %v2510_v40, %v2509_v57  ;;  %v2789_v18 = vpack.c.bf16 %v2509_v57, %v2508_v2  ;;  %v2709_v1 = vld [vmem:[#allocation4 + $0xc7] sm:$0xff] }
 0x441   : > { %v2632_v50 = vld [vmem:[#allocation4 + $0xb1] sm:$0xff]  ;;  %v2498_v54 = vpack.c.bf16 %v2494_v49, %v2493_v6  ;;  %3135 = vmatpush.bf16.msrb.mxu2 %v4844_v27  ;;  %v2866_v9 = vpack.c.bf16 %v2631_v36, %v2630_v47  ;;  %v2713_v20 = vpack.c.bf16 %v2709_v1, %v2494_v49  ;;  %v2786_v55 = vld [vmem:[#allocation4 + $0xc8] sm:$0xff]  ;;  %v2941_v28 = vld [vmem:[#allocation4 + $0xdf] sm:$0xff] }
 0x442   : > { %v2636_v45 = vpack.c.bf16 %v2632_v50, %v2631_v36  ;;  %v2863_v16 = vld [vmem:[#allocation4 + $0xc9] sm:$0xff]  ;;  %v2790_v46 = vpack.c.bf16 %v2786_v55, %v2510_v40  ;;  %v2945_v30 = vpack.c.bf16 %v2941_v28, %v2709_v1  ;;  %v3018_v52 = vld [vmem:[#allocation4 + $0xe0] sm:$0xff] }
 0x443   : > { %v2867_v59 = vpack.c.bf16 %v2863_v16, %v2632_v50  ;;  %v3099_v13 = vpack.c.bf16 %v3095_v37, %v2863_v16  ;;  %v4853_v4 = vld [vmem:[%s6454_s15 + $0x38] sm:$0xff]  ;;  %v4856_v28 = vld [vmem:[%s6454_s15 + $0x50] sm:$0xff]  ;;  %v4846_v37 = vld [vmem:[%s6454_s15] sm:$0xff] }
 0x444   : > { %4497 = vmatmul.msk.bf16.gmra.mxu1 %vm1542_vm5, %v2384_v56  ;;  %3306 = vmatpush.bf16.msrb.mxu3 %v4853_v4 }
 0x44c   : > { %4509 = vmatmul.msk.bf16.gmra.mxu2 %vm1542_vm5, %v5847_v3 }
 0x44d   : > { %4521 = vmatmul.msk.bf16.gmra.mxu3 %vm1542_vm5, %v2496_v5 }
 0x44e   : > { %4533 = vmatmul.msk.bf16.gmra.mxu0 %vm1542_vm5, %v5850_v8 }
 0x454   : > { %4498 = vmatmul.msk.bf16.gmra.mxu1 %vm1542_vm5, %v2385_v38 }
 0x45c   : > { %4510 = vmatmul.msk.bf16.gmra.mxu2 %vm1542_vm5, %v5870_v33 }
 0x45d   : > { %4522 = vmatmul.msk.bf16.gmra.mxu3 %vm1542_vm5, %v2497_v0 }
 0x45e   : > { %4534 = vmatmul.msk.bf16.gmra.mxu0 %vm1542_vm5, %v5872_v7 }
 0x464   : > { %4499 = vmatmul.msk.bf16.gmra.mxu1 %vm1542_vm5, %v2386_v48  ;;  %v4852_v48 = vld [vmem:[%s6454_s15 + $0x30] sm:$0xff] }
 0x465   : > { %3307 = vmatpush.bf16.msrb.mxu3 %v4852_v48 }
 0x46c   : > { %4511 = vmatmul.msk.bf16.gmra.mxu2 %vm1542_vm5, %v2514_v53 }
 0x46d   : > { %4523 = vmatmul.msk.bf16.gmra.mxu3 %vm1542_vm5, %v2498_v54 }
 0x46e   : > { %4535 = vmatmul.msk.bf16.gmra.mxu0 %vm1542_vm5, %v2636_v45 }
 0x474   : > { %4544 = vmatmul.msk.bf16.vlgmr.msra.gmra.mxu1 %vm1542_vm5, %v2710_v12 }
 0x47c   : > { %4556 = vmatmul.msk.bf16.vlgmr.msra.gmra.mxu2 %vm1542_vm5, %v2787_v44 }
 0x47d   : > { %4568 = vmatmul.msk.bf16.vlgmr.msra.gmra.mxu3 %vm1542_vm5, %v2864_v39 }
 0x47e   : > { %4580 = vmatmul.msk.bf16.vlgmr.msrb.gmra.mxu0 %vm1542_vm5, %v2496_v5 }
 0x484   : > { %4545 = vmatmul.msk.bf16.gmra.mxu1 %vm1542_vm5, %v2711_v42 }
 0x48c   : > { %4557 = vmatmul.msk.bf16.gmra.mxu2 %vm1542_vm5, %v2788_v41 }
 0x48d   : > { %4569 = vmatmul.msk.bf16.gmra.mxu3 %vm1542_vm5, %v2865_v23  ;;  %v6501_v23 = vmov 0.0  }
 0x48e   : > { %4581 = vmatmul.msk.bf16.gmra.mxu0 %vm1542_vm5, %v2497_v0  ;;  %3191 = vst.msk [vmem:[#allocation5 + $0x20] sm:$0xff] %vm3185_vm13, %v6501_v23 }
 0x48f   : > { %3186 = vst.msk [vmem:[#allocation5] sm:$0xff] %vm3185_vm13, %v6501_v23 }
 0x490   : > { %3187 = vst.msk [vmem:[#allocation5 + $0x8] sm:$0xff] %vm3185_vm13, %v6501_v23 }
 0x491   : > { %3190 = vst.msk [vmem:[#allocation5 + $0x18] sm:$0xff] %vm3185_vm13, %v6501_v23 }
 0x492   : > { %3193 = vst.msk [vmem:[#allocation5 + $0x30] sm:$0xff] %vm3185_vm13, %v6501_v23 }
 0x493   : > { %3194 = vst.msk [vmem:[#allocation5 + $0x38] sm:$0xff] %vm3185_vm13, %v6501_v23 }
 0x494   : > { %4546 = vmatmul.msk.bf16.gmra.mxu1 %vm1542_vm5, %v2712_v62  ;;  %v4850_v62 = vld [vmem:[%s6454_s15 + $0x20] sm:$0xff]  ;;  %3196 = vst.msk [vmem:[#allocation5 + $0x48] sm:$0xff] %vm3185_vm13, %v6501_v23 }
 0x495   : > { %3197 = vst.msk [vmem:[#allocation5 + $0x50] sm:$0xff] %vm3185_vm13, %v6501_v23 }
 0x496   : > { %3199 = vst.msk [vmem:[#allocation5 + $0x60] sm:$0xff] %vm3185_vm13, %v6501_v23 }
 0x497   : > { %3200 = vst.msk [vmem:[#allocation5 + $0x68] sm:$0xff] %vm3185_vm13, %v6501_v23 }
 0x498   : > { %3202 = vst.msk [vmem:[#allocation5 + $0x78] sm:$0xff] %vm3185_vm13, %v6501_v23 }
 0x499   : > { %3203 = vst.msk [vmem:[#allocation5 + $0x80] sm:$0xff] %vm3185_vm13, %v6501_v23 }
 0x49a   : > { %3205 = vst.msk [vmem:[#allocation5 + $0x90] sm:$0xff] %vm3185_vm13, %v6501_v23 }
 0x49b   : > { %3206 = vst.msk [vmem:[#allocation5 + $0x98] sm:$0xff] %vm3185_vm13, %v6501_v23 }
 0x49c   : > { %4558 = vmatmul.msk.bf16.gmra.mxu2 %vm1542_vm5, %v2789_v18  ;;  %v4849_v18 = vld [vmem:[%s6454_s15 + $0x18] sm:$0xff]  ;;  %3208 = vst.msk [vmem:[#allocation5 + $0xa8] sm:$0xff] %vm3185_vm13, %v6501_v23 }
 0x49d   : > { %4570 = vmatmul.msk.bf16.gmra.mxu3 %vm1542_vm5, %v2866_v9  ;;  %v4857_v9 = vld [vmem:[%s6454_s15 + $0x58] sm:$0xff]  ;;  %3371 = vmatpush.bf16.msra.mxu0 %v4849_v18  ;;  %3209 = vst.msk [vmem:[#allocation5 + $0xb0] sm:$0xff] %vm3185_vm13, %v6501_v23 }
 0x49e   : > { %4582 = vmatmul.msk.bf16.gmra.mxu0 %vm1542_vm5, %v2498_v54  ;;  %v4851_v54 = vld [vmem:[%s6454_s15 + $0x28] sm:$0xff]  ;;  %3456 = vmatpush.bf16.msra.mxu1 %v4857_v9  ;;  %3211 = vst.msk [vmem:[#allocation5 + $0xc0] sm:$0xff] %vm3185_vm13, %v6501_v23 }
 0x49f   : > { %3308 = vmatpush.bf16.msrb.mxu3 %v4851_v54  ;;  %3212 = vst.msk [vmem:[#allocation5 + $0xc8] sm:$0xff] %vm3185_vm13, %v6501_v23 }
 0x4a0   : > { %3214 = vst.msk [vmem:[#allocation5 + $0xd8] sm:$0xff] %vm3185_vm13, %v6501_v23 }
 0x4a1   : > { %3215 = vst.msk [vmem:[#allocation5 + $0xe0] sm:$0xff] %vm3185_vm13, %v6501_v23 }
 0x4a2   : > { %3457 = vmatpush.bf16.msra.mxu1 %v4856_v28  ;;  %3189 = vst.msk [vmem:[#allocation5 + $0x10] sm:$0x1] %vm3188_vm14, %v6501_v23 }
 0x4a3   : > { %3309 = vmatpush.bf16.msrb.mxu3 %v4850_v62  ;;  %3192 = vst.msk [vmem:[#allocation5 + $0x28] sm:$0x1] %vm3188_vm14, %v6501_v23 }
 0x4a4   : > { %4547 = vmatmul.msk.bf16.gmra.mxu1 %vm1542_vm5, %v2713_v20  ;;  %v4848_v20 = vld [vmem:[%s6454_s15 + $0x10] sm:$0xff]  ;;  %3195 = vst.msk [vmem:[#allocation5 + $0x40] sm:$0x1] %vm3188_vm14, %v6501_v23 }
 0x4a5   : > { %3372 = vmatpush.bf16.msra.mxu0 %v4848_v20  ;;  %3198 = vst.msk [vmem:[#allocation5 + $0x58] sm:$0x1] %vm3188_vm14, %v6501_v23 }
 0x4a6   : > { %3201 = vst.msk [vmem:[#allocation5 + $0x70] sm:$0x1] %vm3188_vm14, %v6501_v23 }
 0x4a7   : > { %3204 = vst.msk [vmem:[#allocation5 + $0x88] sm:$0x1] %vm3188_vm14, %v6501_v23 }
 0x4a8   : > { %3207 = vst.msk [vmem:[#allocation5 + $0xa0] sm:$0x1] %vm3188_vm14, %v6501_v23 }
 0x4a9   : > { %3210 = vst.msk [vmem:[#allocation5 + $0xb8] sm:$0x1] %vm3188_vm14, %v6501_v23 }
 0x4aa   : > { %3213 = vst.msk [vmem:[#allocation5 + $0xd0] sm:$0x1] %vm3188_vm14, %v6501_v23 }
 0x4ab   : > { %3216 = vst.msk [vmem:[#allocation5 + $0xe8] sm:$0x1] %vm3188_vm14, %v6501_v23 }
 0x4ac   : > { %4559 = vmatmul.msk.bf16.gmra.mxu2 %vm1542_vm5, %v2790_v46 }
 0x4ad   : > { %4571 = vmatmul.msk.bf16.gmra.mxu3 %vm1542_vm5, %v2867_v59 }
 0x4ae   : > { %4583 = vmatmul.msk.bf16.gmra.mxu0 %vm1542_vm5, %v2945_v30  ;;  %v4847_v30 = vld [vmem:[%s6454_s15 + $0x8] sm:$0xff] }
 0x4af   : > { %3373 = vmatpush.bf16.msra.mxu0 %v4847_v30 }
 0x4b1   : > { %v5918_v60 = vpop.f32.mrf.mxu1 }
 0x4b3   : > { %3374 = vmatpush.bf16.msra.mxu0 %v4846_v37 }
 0x4b4   : > { %4592 = vmatmul.msk.bf16.vlgmr.msrb.gmra.mxu1 %vm1542_vm5, %v5847_v3  ;;  %v3022_v3 = vpack.c.bf16 %v3018_v52, %v2786_v55 }
 0x4b9   : > { %v5922_v31 = vpop.f32.mrf.mxu1 }
 0x4bb   : > { %v5949_v10 = vpop.f32.mrf.mxu0 }
 0x4bc   : > { %4604 = vmatmul.msk.bf16.vlgmr.msrb.gmra.mxu2 %vm1542_vm5, %v5850_v8 }
 0x4bf   : > { %v5926_v63 = vpop.f32.mrf.mxu2 }
 0x4c0   : > { %v5945_v26 = vpop.f32.mrf.mxu3 }
 0x4c1   : > { %v5928_v22 = vpop.f32.mrf.mxu1  ;;  %v2606_v46 = vadd.f32 %v5945_v26, %v5926_v63  ;;  %v4855_v63 = vld [vmem:[%s6454_s15 + $0x48] sm:$0xff]  ;;  %v4861_v26 = vld [vmem:[%s6454_s15 + $0x78] sm:$0xff] }
 0x4c2   : > { %3549 = vmatpush.bf16.msra.mxu2 %v4861_v26  ;;  %3458 = vmatpush.bf16.msra.mxu1 %v4855_v63 }
 0x4c3   : > { %v5959_v8 = vpop.f32.mrf.mxu0 }
 0x4c4   : > { %4593 = vmatmul.msk.bf16.gmra.mxu1 %vm1542_vm5, %v5870_v33 }
 0x4c7   : > { %v5932_v14 = vpop.f32.mrf.mxu2 }
 0x4c8   : > { %v5956_v5 = vpop.f32.mrf.mxu3 }
 0x4c9   : > { %v5934_v25 = vpop.f32.mrf.mxu1  ;;  %v2608_v62 = vadd.f32 %v5956_v5, %v5932_v14  ;;  %v4865_v14 = vld [vmem:[%s6454_s15 + $0x98] sm:$0xff] }
 0x4ca   : > { %3642 = vmatpush.bf16.msra.mxu3 %v4865_v14  ;;  %v4864_v14 = vld [vmem:[%s6454_s15 + $0x90] sm:$0xff] }
 0x4cb   : > { %v5970_v2 = vpop.f32.mrf.mxu0  ;;  %v2695_v9 = vadd.f32 %v5959_v8, %v2608_v62 }
 0x4cc   : > { %4605 = vmatmul.msk.bf16.gmra.mxu2 %vm1542_vm5, %v5872_v7 }
 0x4ce   : > { %3643 = vmatpush.bf16.msra.mxu3 %v4864_v14 }
 0x4cf   : > { %v5938_v15 = vpop.f32.mrf.mxu2 }
 0x4d0   : > { %v5966_v17 = vpop.f32.mrf.mxu3 }
 0x4d1   : > { %v5940_v21 = vpop.f32.mrf.mxu1  ;;  %v2611_v8 = vadd.f32 %v5966_v17, %v5938_v15 }
 0x4d3   : > { %v5983_v0 = vpop.f32.mrf.mxu0  ;;  %v2696_v17 = vadd.f32 %v5970_v2, %v2611_v8 }
 0x4d4   : > { %4594 = vmatmul.msk.bf16.gmra.mxu1 %vm1542_vm5, %v2514_v53 }
 0x4d7   : > { %v5943_v56 = vpop.f32.mrf.mxu2 }
 0x4d8   : > { %v5977_v11 = vpop.f32.mrf.mxu3 }
 0x4d9   : > { %v5947_v19 = vpop.f32.mrf.mxu1  ;;  %v2613_v2 = vadd.f32 %v5977_v11, %v5943_v56 }
 0x4db   : > { %v5994_v57 = vpop.f32.mrf.mxu0 }
 0x4dc   : > { %4606 = vmatmul.msk.bf16.gmra.mxu2 %vm1542_vm5, %v2636_v45 }
 0x4df   : > { %v5952_v61 = vpop.f32.mrf.mxu2 }
 0x4e0   : > { %v5987_v43 = vpop.f32.mrf.mxu3 }
 0x4e1   : > { %v5954_v51 = vpop.f32.mrf.mxu1  ;;  %v2616_v8 = vadd.f32 %v5987_v43, %v5952_v61 }
 0x4e3   : > { %v6002_v36 = vpop.f32.mrf.mxu0  ;;  %v2698_v61 = vadd.f32 %v5994_v57, %v2616_v8 }
 0x4e4   : > { %4595 = vmatmul.msk.bf16.gmra.mxu1 %vm1542_vm5, %v3022_v3  ;;  %v2694_v3 = vadd.f32 %v5949_v10, %v2606_v46  ;;  %v4854_v10 = vld [vmem:[%s6454_s15 + $0x40] sm:$0xff] }
 0x4e5   : > { %3459 = vmatpush.bf16.msra.mxu1 %v4854_v10  ;;  %v4858_v46 = vld [vmem:[%s6454_s15 + $0x60] sm:$0xff] }
 0x4e7   : > { %v5961_v38 = vpop.f32.mrf.mxu2 }
 0x4e8   : > { %v6000_v49 = vpop.f32.mrf.mxu3 }
 0x4e9   : > { %v5963_v32 = vpop.f32.mrf.mxu1 }
 0x4ea   : > { %6500 = vst [vmem:[#allocation7_spill] sm:$0xff] %v5963_v32 }
 0x4eb   : > { %v6015_v44 = vpop.f32.mrf.mxu0 }
 0x4ec   : > { %4607 = vmatmul.msk.bf16.gmra.mxu2 %vm1542_vm5, %v3099_v13  ;;  %v4860_v13 = vld [vmem:[%s6454_s15 + $0x70] sm:$0xff] }
 0x4ed   : > { %3550 = vmatpush.bf16.msra.mxu2 %v4860_v13 }
 0x4ef   : > { %v5968_v24 = vpop.f32.mrf.mxu2 }
 0x4f0   : > { %v6011_v45 = vpop.f32.mrf.mxu3 }
 0x4f1   : > { %v5972_v29 = vpop.f32.mrf.mxu1 }
 0x4f2   : > { %v2771_v48 = vadd.f32 %v5972_v29, %v2694_v3  ;;  %v6142_v3 = vld [vmem:[%s6453_s14] ss:$0 sm:$0xff] }
 0x4f3   : > { %v6025_v41 = vpop.f32.mrf.mxu0 }
 0x4f7   : > { %v5979_v47 = vpop.f32.mrf.mxu2 }
 0x4f8   : > { %v6019_v27 = vpop.f32.mrf.mxu3 }
 0x4f9   : > { %v5981_v33 = vpop.f32.mrf.mxu1 }
 0x4fa   : > { %v2772_v30 = vadd.f32 %v5981_v33, %v2695_v9  ;;  %v2697_v9 = vadd.f32 %v5983_v0, %v2613_v2  ;;  %v2618_v2 = vadd.f32 %v6000_v49, %v5961_v38 }
 0x4fb   : > { %v2983_v59 = vpop.f32.mrf.mxu0 }
 0x4ff   : > { %v5985_v7 = vpop.f32.mrf.mxu2 }
 0x500   : > { %v2905_v55 = vpop.f32.mrf.mxu3  ;;  %v2848_v18 = vadd.f32 %v5985_v7, %v2771_v48  ;;  %v4859_v7 = vld [vmem:[%s6454_s15 + $0x68] sm:$0xff] }
 0x501   : > { %v5989_v35 = vpop.f32.mrf.mxu1  ;;  %3551 = vmatpush.bf16.msra.mxu2 %v4859_v7 }
 0x502   : > { %v2925_v20 = vadd.f32 %v2905_v55, %v2848_v18 }
 0x503   : > { %v2985_v29 = vpop.f32.mrf.mxu0 }
 0x504   : > { %v3003_v63 = vadd.f32 %v2983_v59, %v2925_v20 }
 0x505   : > { %3552 = vmatpush.bf16.msra.mxu2 %v4858_v46  ;;  %v3226_v46 = vld [vmem:[#allocation5 + $0x7] sm:$0xff] }
 0x507   : > { %v5996_v40 = vpop.f32.mrf.mxu2 }
 0x508   : > { %v2907_v54 = vpop.f32.mrf.mxu3  ;;  %v2849_v55 = vadd.f32 %v5996_v40, %v2772_v30  ;;  %v3396_v30 = vld [vmem:[#allocation5 + $0x9] sm:$0xff] }
 0x509   : > { %v5998_v6 = vpop.f32.mrf.mxu1 }
 0x50a   : > { %v2926_v40 = vadd.f32 %v2907_v54, %v2849_v55  ;;  %v2774_v56 = vadd.f32 %v5998_v6, %v2697_v9 }
 0x50b   : > { %v2988_v59 = vpop.f32.mrf.mxu0 }
 0x50c   : > { %v3004_v54 = vadd.f32 %v2985_v29, %v2926_v40 }
 0x50f   : > { %v6004_v50 = vpop.f32.mrf.mxu2 }
 0x510   : > { %v2910_v26 = vpop.f32.mrf.mxu3 }
 0x511   : > { %v6006_v53 = vpop.f32.mrf.mxu1 }
 0x513   : > { %v2990_v11 = vpop.f32.mrf.mxu0 }
 0x517   : > { %v6013_v12 = vpop.f32.mrf.mxu2 }
 0x518   : > { %v2851_v55 = vadd.f32 %v6013_v12, %v2774_v56  ;;  %v2621_v56 = vadd.f32 %v6011_v45, %v5968_v24 }
 0x519   : > { %v6017_v39 = vpop.f32.mrf.mxu1 }
 0x51f   : > { %v6021_v34 = vpop.f32.mrf.mxu2 }
 0x521   : > { %v6023_v42 = vpop.f32.mrf.mxu1 }
 0x527   : > { %v6040_v1 = vpop.f32.mrf.mxu2 }
 0x529   : > { %v6049_v16 = vpop.f32.mrf.mxu1 }
 0x52f   : > { %v6077_v52 = vpop.f32.mrf.mxu2 }
 0x531   : > { %v3060_v4 = vpop.f32.mrf.mxu1 }
 0x532   : > { %v3080_v33 = vadd.f32 %v3060_v4, %v3003_v63  ;;  %v2773_v4 = vadd.f32 %v5989_v35, %v2696_v17  ;;  %v2912_v35 = vpop.f32.mrf.mxu3 }
 0x533   : > { %v2928_v43 = vadd.f32 %v2912_v35, %v2851_v55 }
 0x534   : > { %v2850_v48 = vadd.f32 %v6004_v50, %v2773_v4 }
 0x535   : > { %v3006_v57 = vadd.f32 %v2990_v11, %v2928_v43 }
 0x536   : > { %v2927_v20 = vadd.f32 %v2910_v26, %v2850_v48  ;;  %v2993_v48 = vpop.f32.mrf.mxu0 }
 0x537   : > { %v6112_v5 = vpop.f32.mrf.mxu2 }
 0x538   : > { %v3005_v63 = vadd.f32 %v2988_v59, %v2927_v20  ;;  %v2699_v20 = vadd.f32 %v6002_v36, %v2618_v2  ;;  %v4872_v2 = vld [vmem:[%s6454_s15 + $0xd0] sm:$0xff] }
 0x539   : > { %v3062_v28 = vpop.f32.mrf.mxu1 }
 0x53a   : > { %v3081_v18 = vadd.f32 %v3062_v28, %v3004_v54  ;;  %v3246_v28 = vld [vmem:[#allocation5 + $0x8] sm:$0xff]  ;;  %v2915_v59 = vpop.f32.mrf.mxu3  ;;  %v2776_v49 = vadd.f32 %v6017_v39, %v2699_v20 }
 0x53e   : > { %v2995_v39 = vpop.f32.mrf.mxu0 }
 0x53f   : > { %v3137_v15 = vpop.f32.mrf.mxu2 }
 0x540   : > { %v3157_v37 = vadd.f32 %v3137_v15, %v3080_v33 }
 0x541   : > { %v3065_v13 = vpop.f32.mrf.mxu1 }
 0x542   : > { %v3169_v10 = vadd.f32 %v6142_v3, %v3157_v37  ;;  %v3082_v6 = vadd.f32 %v3065_v13, %v3005_v63  ;;  %v2775_v13 = vadd.f32 %v6006_v53, %v2698_v61  ;;  %v4863_v53 = vld [vmem:[%s6454_s15 + $0x88] sm:$0xff]  ;;  %v2917_v11 = vpop.f32.mrf.mxu3  ;;  %v4873_v61 = vld [vmem:[%s6454_s15 + $0xd8] sm:$0xff] }
 0x543   : > { %3644 = vmatpush.bf16.msra.mxu3 %v4863_v53  ;;  %3829 = vmatpush.bf16.msrb.mxu1 %v4873_v61 }
 0x544   : > { %v3177_v62 = vmax.f32 %v3169_v10, 0.0  ;;  %v2852_v54 = vadd.f32 %v6021_v34, %v2775_v13 }
 0x546   : > { %3218 = vst.msk [vmem:[#allocation5 + $0x20] sm:$0xff] %vm3185_vm13, %v3177_v62  ;;  %v2998_v53 = vpop.f32.mrf.mxu0 }
 0x547   : > { %v3139_v7 = vpop.f32.mrf.mxu2  ;;  %3830 = vmatpush.bf16.msrb.mxu1 %v4872_v2 }
 0x548   : > { %v3158_v23 = vadd.f32 %v3139_v7, %v3081_v18 }
 0x549   : > { %v3067_v29 = vpop.f32.mrf.mxu1 }
 0x54a   : > { %v3170_v50 = vadd.f32 %v6142_v3, %v3158_v23  ;;  %v3083_v35 = vadd.f32 %v3067_v29, %v3006_v57  ;;  %v2929_v23 = vadd.f32 %v2915_v59, %v2852_v54  ;;  %v2623_v59 = vadd.f32 %v6019_v27, %v5979_v47  ;;  %v4867_v47 = vld [vmem:[%s6454_s15 + $0xa8] sm:$0xff] }
 0x54b   : > { %v4871_v27 = vld [vmem:[%s6454_s15 + $0xc8] sm:$0xff] }
 0x54c   : > { %v3178_v33 = vmax.f32 %v3170_v50, 0.0  ;;  %v2853_v50 = vadd.f32 %v6040_v1, %v2776_v49  ;;  %v3007_v29 = vadd.f32 %v2993_v48, %v2929_v23  ;;  %v2920_v48 = vpop.f32.mrf.mxu3  ;;  %v4876_v23 = vld [vmem:[%s6454_s15 + $0xf0] sm:$0xff]  ;;  %v4866_v49 = vld [vmem:[%s6454_s15 + $0xa0] sm:$0xff]  ;;  %3831 = vmatpush.bf16.msrb.mxu1 %v4871_v27 }
 0x54d   : > { %v6170_v0 = vld [vmem:[#allocation5 + $0x20] sm:$0xff] }
 0x54e   : > { %v3227_v26 = vld [vmem:[#allocation5 + $0x1f] sm:$0xff]  ;;  %3219 = vst.msk [vmem:[#allocation5 + $0x38] sm:$0xff] %vm3185_vm13, %v3178_v33  ;;  %v3254_v17 = vpack.c.bf16 %v6170_v0, %v3246_v28  ;;  %v2700_v33 = vadd.f32 %v6015_v44, %v2621_v56  ;;  %v3000_v61 = vpop.f32.mrf.mxu0 }
 0x54f   : > { %v6172_v15 = vld [vmem:[#allocation5 + $0x21] sm:$0xff]  ;;  %v3234_v40 = vpack.c.bf16 %v3227_v26, %v3226_v46  ;;  %v3142_v4 = vpop.f32.mrf.mxu2 }
 0x550   : > { %v3404_v37 = vpack.c.bf16 %v6172_v15, %v3396_v30  ;;  %v3159_v12 = vadd.f32 %v3142_v4, %v3082_v6  ;;  %4624 = vmatmul.msk.bf16.vlgmr.msrb.gmra.mxu3 %vm3185_vm13, %v3254_v17  ;;  %v2930_v17 = vadd.f32 %v2917_v11, %v2853_v50  ;;  %v4862_v4 = vld [vmem:[%s6454_s15 + $0x80] sm:$0xff]  ;;  %v4869_v44 = vld [vmem:[%s6454_s15 + $0xb8] sm:$0xff] }
 0x551   : > { %4644 = vmatmul.msk.bf16.vlgmr.msra.gmra.mxu0 %vm3185_vm13, %v3234_v40  ;;  %v3070_v18 = vpop.f32.mrf.mxu1  ;;  %3645 = vmatpush.bf16.msra.mxu3 %v4862_v4  ;;  %v4875_v4 = vld [vmem:[%s6454_s15 + $0xe8] sm:$0xff] }
 0x552   : > { %4664 = vmatmul.msk.bf16.vlgmr.msra.gmra.mxu1 %vm3185_vm13, %v3404_v37  ;;  %v3171_v10 = vadd.f32 %v6142_v3, %v3159_v12  ;;  %v3084_v63 = vadd.f32 %v3070_v18, %v3007_v29  ;;  %v2777_v37 = vadd.f32 %v6023_v42, %v2700_v33  ;;  %3735 = vmatpush.bf16.msrb.mxu0 %v4869_v44  ;;  %v4868_v42 = vld [vmem:[%s6454_s15 + $0xb0] sm:$0xff]  ;;  %v4870_v33 = vld [vmem:[%s6454_s15 + $0xc0] sm:$0xff] }
 0x553   : > { %v3008_v13 = vadd.f32 %v2995_v39, %v2930_v17  ;;  %3832 = vmatpush.bf16.msrb.mxu1 %v4870_v33 }
 0x554   : > { %v3179_v62 = vmax.f32 %v3171_v10, 0.0  ;;  %v2854_v12 = vadd.f32 %v6077_v52, %v2777_v37  ;;  %v4881_v37 = vld [vmem:[%s6454_s15 + $0x118] sm:$0xff] }
 0x555   : > { %v3490_v14 = vld [vmem:[#allocation5 + $0x37] sm:$0xff]  ;;  %4015 = vmatpush.bf16.msrb.mxu3 %v4881_v37 }
 0x556   : > { %3220 = vst.msk [vmem:[#allocation5 + $0x50] sm:$0xff] %vm3185_vm13, %v3179_v62  ;;  %v3497_v7 = vpack.c.bf16 %v3490_v14, %v3227_v26  ;;  %v6197_v46 = vld [vmem:[#allocation5 + $0x38] sm:$0xff]  ;;  %v2931_v62 = vadd.f32 %v2920_v48, %v2854_v12  ;;  %3736 = vmatpush.bf16.msrb.mxu0 %v4868_v42  ;;  %v4874_v12 = vld [vmem:[%s6454_s15 + $0xe0] sm:$0xff] }
 0x557   : > { %v3144_v9 = vpop.f32.mrf.mxu2  ;;  %v6199_v36 = vld [vmem:[#allocation5 + $0x39] sm:$0xff] }
 0x558   : > { %v3160_v38 = vadd.f32 %v3144_v9, %v3083_v35  ;;  %4684 = vmatmul.msk.bf16.vlgmr.msra.gmra.mxu2 %vm3185_vm13, %v3497_v7  ;;  %v4877_v7 = vld [vmem:[%s6454_s15 + $0xf8] sm:$0xff] }
 0x559   : > { %v3072_v26 = vpop.f32.mrf.mxu1  ;;  %3922 = vmatpush.bf16.msrb.mxu2 %v4877_v7 }
 0x55a   : > { %v3172_v34 = vadd.f32 %v6142_v3, %v3160_v38  ;;  %v3085_v57 = vadd.f32 %v3072_v26, %v3008_v13  ;;  %v3009_v38 = vadd.f32 %v2998_v53, %v2931_v62  ;;  %3737 = vmatpush.bf16.msrb.mxu0 %v4867_v47  ;;  %v2922_v26 = vpop.f32.mrf.mxu3 }
 0x55c   : > { %v3180_v28 = vmax.f32 %v3172_v34, 0.0 }
 0x55d   : > { %v6201_v30 = vld [vmem:[#allocation5 + $0x50] sm:$0xff]  ;;  %3923 = vmatpush.bf16.msrb.mxu2 %v4876_v23  ;;  %v3683_v23 = vpack.c.bf16 %v6199_v36, %v6172_v15 }
 0x55e   : > { %v3229_v8 = vld [vmem:[#allocation5 + $0x4f] sm:$0xff]  ;;  %3221 = vst.msk [vmem:[#allocation5 + $0x68] sm:$0xff] %vm3185_vm13, %v3180_v28  ;;  %v6208_v24 = vpack.c.bf16 %v6201_v30, %v6197_v46  ;;  %3738 = vmatpush.bf16.msrb.mxu0 %v4866_v49 }
 0x55f   : > { %v6203_v55 = vld [vmem:[#allocation5 + $0x51] sm:$0xff]  ;;  %v6210_v45 = vpack.c.bf16 %v3229_v8, %v3490_v14  ;;  %v3147_v6 = vpop.f32.mrf.mxu2  ;;  %v2701_v14 = vadd.f32 %v6025_v41, %v2623_v59 }
 0x560   : > { %v6214_v1 = vpack.c.bf16 %v6203_v55, %v6199_v36  ;;  %v3161_v40 = vadd.f32 %v3147_v6, %v3084_v63  ;;  %4625 = vmatmul.msk.bf16.gmra.mxu3 %vm3185_vm13, %v6208_v24 }
 0x561   : > { %4645 = vmatmul.msk.bf16.gmra.mxu0 %vm3185_vm13, %v6210_v45  ;;  %v3075_v9 = vpop.f32.mrf.mxu1  ;;  %v2778_v41 = vadd.f32 %v6049_v16, %v2701_v14  ;;  %3924 = vmatpush.bf16.msrb.mxu2 %v4875_v4 }
 0x562   : > { %4665 = vmatmul.msk.bf16.gmra.mxu1 %vm3185_vm13, %v6214_v1  ;;  %v3173_v43 = vadd.f32 %v6142_v3, %v3161_v40  ;;  %v3086_v16 = vadd.f32 %v3075_v9, %v3009_v38  ;;  %v4879_v38 = vld [vmem:[%s6454_s15 + $0x108] sm:$0xff] }
 0x563   : > { %v2855_v34 = vadd.f32 %v6112_v5, %v2778_v41 }
 0x564   : > { %v3181_v10 = vmax.f32 %v3173_v43, 0.0 }
 0x565   : > { %v3492_v54 = vld [vmem:[#allocation5 + $0x67] sm:$0xff]  ;;  %v2932_v17 = vadd.f32 %v2922_v26, %v2855_v34  ;;  %3925 = vmatpush.bf16.msrb.mxu2 %v4874_v12 }
 0x566   : > { %3222 = vst.msk [vmem:[#allocation5 + $0x80] sm:$0xff] %vm3185_vm13, %v3181_v10  ;;  %v3498_v52 = vpack.c.bf16 %v3492_v54, %v3229_v8  ;;  %v6264_v11 = vld [vmem:[#allocation5 + $0x68] sm:$0xff] }
 0x567   : > { %v3149_v18 = vpop.f32.mrf.mxu2  ;;  %v6266_v50 = vld [vmem:[#allocation5 + $0x69] sm:$0xff]  ;;  %v3010_v42 = vadd.f32 %v3000_v61, %v2932_v17 }
 0x568   : > { %v3162_v35 = vadd.f32 %v3149_v18, %v3085_v57  ;;  %4685 = vmatmul.msk.bf16.gmra.mxu2 %vm3185_vm13, %v3498_v52  ;;  %v3684_v15 = vpack.c.bf16 %v6266_v50, %v6203_v55 }
 0x569   : > { %v3077_v43 = vpop.f32.mrf.mxu1 }
 0x56a   : > { %v3174_v20 = vadd.f32 %v6142_v3, %v3162_v35  ;;  %v3087_v10 = vadd.f32 %v3077_v43, %v3010_v42 }
 0x56c   : > { %v3182_v56 = vmax.f32 %v3174_v20, 0.0  ;;  %v3590_v20 = vpack.c.bf16 %v6197_v46, %v6170_v0  ;;  %v3591_v0 = vpack.c.bf16 %v6264_v11, %v6201_v30  ;;  %v4878_v46 = vld [vmem:[%s6454_s15 + $0x100] sm:$0xff] }
 0x56d   : > { %v6268_v29 = vld [vmem:[#allocation5 + $0x80] sm:$0xff] }
 0x56e   : > { %v3231_v28 = vld [vmem:[#allocation5 + $0x7f] sm:$0xff]  ;;  %3223 = vst.msk [vmem:[#allocation5 + $0x98] sm:$0xff] %vm3185_vm13, %v3182_v56  ;;  %v6275_v39 = vpack.c.bf16 %v6268_v29, %v6264_v11 }
 0x56f   : > { %v6270_v8 = vld [vmem:[#allocation5 + $0x81] sm:$0xff]  ;;  %v3236_v63 = vpack.c.bf16 %v3231_v28, %v3492_v54  ;;  %v3152_v6 = vpop.f32.mrf.mxu2 }
 0x570   : > { %v6279_v5 = vpack.c.bf16 %v6270_v8, %v6266_v50  ;;  %v3163_v40 = vadd.f32 %v3152_v6, %v3086_v16  ;;  %4626 = vmatmul.msk.bf16.gmra.mxu3 %vm3185_vm13, %v6275_v39  ;;  %v3869_v11 = vld [vmem:[#allocation5 + $0xe0] sm:$0xff] }
 0x571   : > { %4646 = vmatmul.msk.bf16.gmra.mxu0 %vm3185_vm13, %v3236_v63 }
 0x572   : > { %4666 = vmatmul.msk.bf16.gmra.mxu1 %vm3185_vm13, %v6279_v5  ;;  %v3175_v44 = vadd.f32 %v6142_v3, %v3163_v40 }
 0x574   : > { %v3183_v59 = vmax.f32 %v3175_v44, 0.0 }
 0x575   : > { %v3494_v13 = vld [vmem:[#allocation5 + $0x97] sm:$0xff] }
 0x576   : > { %3224 = vst.msk [vmem:[#allocation5 + $0xb0] sm:$0xff] %vm3185_vm13, %v3183_v59  ;;  %v3499_v2 = vpack.c.bf16 %v3494_v13, %v3231_v28  ;;  %v3252_v62 = vld [vmem:[#allocation5 + $0x98] sm:$0xff] }
 0x577   : > { %v3154_v48 = vpop.f32.mrf.mxu2  ;;  %v3402_v18 = vld [vmem:[#allocation5 + $0x99] sm:$0xff]  ;;  %v3592_v36 = vpack.c.bf16 %v3252_v62, %v6268_v29 }
 0x578   : > { %v3164_v54 = vadd.f32 %v3154_v48, %v3087_v10  ;;  %4686 = vmatmul.msk.bf16.gmra.mxu2 %vm3185_vm13, %v3499_v2  ;;  %v3685_v30 = vpack.c.bf16 %v3402_v18, %v6270_v8 }
 0x57a   : > { %v3176_v57 = vadd.f32 %v6142_v3, %v3164_v54  ;;  %v4880_v3 = vld [vmem:[%s6454_s15 + $0x110] sm:$0xff] }
 0x57b   : > { %4016 = vmatpush.bf16.msrb.mxu3 %v4880_v3 }
 0x57c   : > { %v3184_v52 = vmax.f32 %v3176_v57, 0.0 }
 0x57d   : > { %v3253_v14 = vld [vmem:[#allocation5 + $0xb0] sm:$0xff] }
 0x57e   : > { %v3233_v35 = vld [vmem:[#allocation5 + $0xaf] sm:$0xff]  ;;  %3225 = vst.msk [vmem:[#allocation5 + $0xc8] sm:$0xff] %vm3185_vm13, %v3184_v52  ;;  %v3257_v27 = vpack.c.bf16 %v3253_v14, %v3252_v62 }
 0x57f   : > { %v3403_v47 = vld [vmem:[#allocation5 + $0xb1] sm:$0xff]  ;;  %v3237_v7 = vpack.c.bf16 %v3233_v35, %v3494_v13  ;;  %4017 = vmatpush.bf16.msrb.mxu3 %v4879_v38 }
 0x580   : > { %v6303_v53 = vpack.c.bf16 %v3403_v47, %v3402_v18  ;;  %4627 = vmatmul.msk.bf16.gmra.mxu3 %vm3185_vm13, %v3257_v27 }
 0x581   : > { %4647 = vmatmul.msk.bf16.gmra.mxu0 %vm3185_vm13, %v3237_v7 }
 0x582   : > { %4667 = vmatmul.msk.bf16.gmra.mxu1 %vm3185_vm13, %v6303_v53 }
 0x583   : > { %4018 = vmatpush.bf16.msrb.mxu3 %v4878_v46 }
 0x585   : > { %v3496_v9 = vld [vmem:[#allocation5 + $0xc7] sm:$0xff] }
 0x586   : > { %v3500_v41 = vpack.c.bf16 %v3496_v9, %v3233_v35  ;;  %v3589_v55 = vld [vmem:[#allocation5 + $0xc8] sm:$0xff] }
 0x587   : > { %v3593_v49 = vpack.c.bf16 %v3589_v55, %v3253_v14  ;;  %v3873_v50 = vpack.c.bf16 %v3869_v11, %v3589_v55 }
 0x588   : > { %4687 = vmatmul.msk.bf16.gmra.mxu2 %vm3185_vm13, %v3500_v41 }
 0x590   : > { %4704 = vmatmul.msk.bf16.vlgmr.msra.gmra.mxu3 %vm3185_vm13, %v3590_v20 }
 0x591   : > { %4724 = vmatmul.msk.bf16.vlgmr.msrb.gmra.mxu0 %vm3185_vm13, %v3683_v23 }
 0x592   : > { %4744 = vmatmul.msk.bf16.vlgmr.msrb.gmra.mxu1 %vm3185_vm13, %v6210_v45  ;;  %v3776_v45 = vld [vmem:[#allocation5 + $0xdf] sm:$0xff] }
 0x593   : > { %v3780_v56 = vpack.c.bf16 %v3776_v45, %v3496_v9  ;;  %v3962_v9 = vld [vmem:[#allocation5 + $0xe1] sm:$0xff] }
 0x598   : > { %4764 = vmatmul.msk.bf16.vlgmr.msrb.gmra.mxu2 %vm3185_vm13, %v6208_v24  ;;  %v3682_v24 = vld [vmem:[#allocation5 + $0xc9] sm:$0xff] }
 0x599   : > { %v3686_v34 = vpack.c.bf16 %v3682_v24, %v3403_v47  ;;  %v3966_v38 = vpack.c.bf16 %v3962_v9, %v3682_v24 }
 0x5a0   : > { %4705 = vmatmul.msk.bf16.gmra.mxu3 %vm3185_vm13, %v3591_v0 }
 0x5a1   : > { %4725 = vmatmul.msk.bf16.gmra.mxu0 %vm3185_vm13, %v3684_v15 }
 0x5a2   : > { %4745 = vmatmul.msk.bf16.gmra.mxu1 %vm3185_vm13, %v3236_v63 }
 0x5a8   : > { %4765 = vmatmul.msk.bf16.gmra.mxu2 %vm3185_vm13, %v6275_v39 }
 0x5b0   : > { %4706 = vmatmul.msk.bf16.gmra.mxu3 %vm3185_vm13, %v3592_v36 }
 0x5b1   : > { %4726 = vmatmul.msk.bf16.gmra.mxu0 %vm3185_vm13, %v3685_v30 }
 0x5b2   : > { %4746 = vmatmul.msk.bf16.gmra.mxu1 %vm3185_vm13, %v3237_v7 }
 0x5b8   : > { %4766 = vmatmul.msk.bf16.gmra.mxu2 %vm3185_vm13, %v3257_v27 }
 0x5c0   : > { %4707 = vmatmul.msk.bf16.gmra.mxu3 %vm3185_vm13, %v3593_v49 }
 0x5c1   : > { %4727 = vmatmul.msk.bf16.gmra.mxu0 %vm3185_vm13, %v3686_v34 }
 0x5c2   : > { %4747 = vmatmul.msk.bf16.gmra.mxu1 %vm3185_vm13, %v3780_v56 }
 0x5c8   : > { %4767 = vmatmul.msk.bf16.gmra.mxu2 %vm3185_vm13, %v3873_v50 }
 0x5ce   : > { %v3376_v16 = vpop.f32.mrf.mxu0 }
 0x5cf   : > { %v3461_v29 = vpop.f32.mrf.mxu1 }
 0x5d0   : > { %4784 = vmatmul.msk.bf16.vlgmr.msrb.gmra.mxu3 %vm3185_vm13, %v6214_v1 }
 0x5d3   : > { %v3311_v28 = vpop.f32.mrf.mxu3 }
 0x5d4   : > { %v3377_v8 = vadd.f32 %v3376_v16, %v3311_v28 }
 0x5d6   : > { %v3378_v39 = vpop.f32.mrf.mxu0  ;;  %v3481_v33 = vadd.f32 %v3461_v29, %v3377_v8 }
 0x5d7   : > { %v3463_v63 = vpop.f32.mrf.mxu1 }
 0x5db   : > { %v3313_v26 = vpop.f32.mrf.mxu3  ;;  %v3554_v6 = vpop.f32.mrf.mxu2 }
 0x5dc   : > { %v3379_v17 = vadd.f32 %v3378_v39, %v3313_v26  ;;  %v3574_v40 = vadd.f32 %v3554_v6, %v3481_v33 }
 0x5de   : > { %v3381_v37 = vpop.f32.mrf.mxu0  ;;  %v3482_v44 = vadd.f32 %v3463_v63, %v3379_v17 }
 0x5df   : > { %v3466_v4 = vpop.f32.mrf.mxu1 }
 0x5e0   : > { %4785 = vmatmul.msk.bf16.gmra.mxu3 %vm3185_vm13, %v6279_v5 }
 0x5e3   : > { %v3316_v61 = vpop.f32.mrf.mxu3  ;;  %v3556_v43 = vpop.f32.mrf.mxu2 }
 0x5e4   : > { %v3382_v12 = vadd.f32 %v3381_v37, %v3316_v61  ;;  %v3575_v42 = vadd.f32 %v3556_v43, %v3482_v44 }
 0x5e6   : > { %v3383_v1 = vpop.f32.mrf.mxu0  ;;  %v3483_v59 = vadd.f32 %v3466_v4, %v3382_v12 }
 0x5e7   : > { %v3468_v13 = vpop.f32.mrf.mxu1 }
 0x5eb   : > { %v3318_v10 = vpop.f32.mrf.mxu3  ;;  %v3559_v2 = vpop.f32.mrf.mxu2 }
 0x5ec   : > { %v3384_v48 = vadd.f32 %v3383_v1, %v3318_v10  ;;  %v3576_v54 = vadd.f32 %v3559_v2, %v3483_v59 }
 0x5ee   : > { %v3484_v57 = vadd.f32 %v3468_v13, %v3384_v48  ;;  %v3386_v52 = vpop.f32.mrf.mxu0 }
 0x5ef   : > { %v3471_v62 = vpop.f32.mrf.mxu1 }
 0x5f0   : > { %4786 = vmatmul.msk.bf16.gmra.mxu3 %vm3185_vm13, %v6303_v53 }
 0x5f3   : > { %v3321_v18 = vpop.f32.mrf.mxu3  ;;  %v3561_v14 = vpop.f32.mrf.mxu2 }
 0x5f4   : > { %v3387_v5 = vadd.f32 %v3386_v52, %v3321_v18  ;;  %v3577_v35 = vadd.f32 %v3561_v14, %v3484_v57 }
 0x5f6   : > { %v3485_v47 = vadd.f32 %v3471_v62, %v3387_v5  ;;  %v3388_v27 = vpop.f32.mrf.mxu0 }
 0x5f7   : > { %v3473_v23 = vpop.f32.mrf.mxu1 }
 0x5fb   : > { %v3323_v7 = vpop.f32.mrf.mxu3  ;;  %v3564_v3 = vpop.f32.mrf.mxu2 }
 0x5fc   : > { %v3389_v41 = vadd.f32 %v3388_v27, %v3323_v7  ;;  %v3578_v20 = vadd.f32 %v3564_v3, %v3485_v47 }
 0x5fe   : > { %v3486_v0 = vadd.f32 %v3473_v23, %v3389_v41  ;;  %v3391_v11 = vpop.f32.mrf.mxu0 }
 0x5ff   : > { %v3476_v16 = vpop.f32.mrf.mxu1 }
 0x600   : > { %4787 = vmatmul.msk.bf16.gmra.mxu3 %vm3185_vm13, %v3966_v38 }
 0x603   : > { %v3326_v15 = vpop.f32.mrf.mxu3  ;;  %v3566_v46 = vpop.f32.mrf.mxu2 }
 0x604   : > { %v3579_v53 = vadd.f32 %v3566_v46, %v3486_v0 }
 0x606   : > { %v3393_v8 = vpop.f32.mrf.mxu0 }
 0x607   : > { %v3478_v63 = vpop.f32.mrf.mxu1 }
 0x60b   : > { %v3328_v36 = vpop.f32.mrf.mxu3  ;;  %v3569_v28 = vpop.f32.mrf.mxu2 }
 0x60c   : > { %v3394_v46 = vadd.f32 %v3393_v8, %v3328_v36  ;;  %v4904_v36 = vld [vmem:[%s6455_s16] ss:$0 sm:$0xff] }
 0x60e   : > { %v3740_v6 = vpop.f32.mrf.mxu0 }
 0x60f   : > { %v3834_v37 = vpop.f32.mrf.mxu1 }
 0x613   : > { %v3647_v30 = vpop.f32.mrf.mxu3  ;;  %v3571_v33 = vpop.f32.mrf.mxu2 }
 0x614   : > { %v3667_v55 = vadd.f32 %v3647_v30, %v3574_v40 }
 0x616   : > { %v3742_v44 = vpop.f32.mrf.mxu0  ;;  %v3760_v7 = vadd.f32 %v3740_v6, %v3667_v55  ;;  %v3488_v55 = vadd.f32 %v3478_v63, %v3394_v46 }
 0x617   : > { %v3836_v61 = vpop.f32.mrf.mxu1 }
 0x618   : > { %v3581_v8 = vadd.f32 %v3571_v33, %v3488_v55 }
 0x61b   : > { %v3649_v45 = vpop.f32.mrf.mxu3  ;;  %v3927_v4 = vpop.f32.mrf.mxu2 }
 0x61c   : > { %v3668_v49 = vadd.f32 %v3649_v45, %v3575_v42 }
 0x61e   : > { %v3745_v42 = vpop.f32.mrf.mxu0  ;;  %v3761_v47 = vadd.f32 %v3742_v44, %v3668_v49 }
 0x61f   : > { %v3839_v59 = vpop.f32.mrf.mxu1 }
 0x620   : > { %v3855_v0 = vadd.f32 %v3836_v61, %v3761_v47 }
 0x623   : > { %v3652_v34 = vpop.f32.mrf.mxu3  ;;  %v3929_v43 = vpop.f32.mrf.mxu2 }
 0x624   : > { %v3669_v56 = vadd.f32 %v3652_v34, %v3576_v54  ;;  %v3948_v30 = vadd.f32 %v3929_v43, %v3855_v0 }
 0x626   : > { %v3747_v10 = vpop.f32.mrf.mxu0 }
 0x627   : > { %v3841_v48 = vpop.f32.mrf.mxu1 }
 0x62b   : > { %v3654_v50 = vpop.f32.mrf.mxu3  ;;  %v3932_v13 = vpop.f32.mrf.mxu2 }
 0x62c   : > { %v3670_v29 = vadd.f32 %v3654_v50, %v3577_v35  ;;  %v3392_v35 = vadd.f32 %v3391_v11, %v3326_v15 }
 0x62e   : > { %v3750_v52 = vpop.f32.mrf.mxu0  ;;  %v3487_v41 = vadd.f32 %v3476_v16, %v3392_v35  ;;  %v3763_v23 = vadd.f32 %v3747_v10, %v3670_v29 }
 0x62f   : > { %v3844_v62 = vpop.f32.mrf.mxu1 }
 0x630   : > { %v3580_v38 = vadd.f32 %v3569_v28, %v3487_v41 }
 0x633   : > { %v3657_v24 = vpop.f32.mrf.mxu3  ;;  %v3934_v54 = vpop.f32.mrf.mxu2 }
 0x634   : > { %v3671_v39 = vadd.f32 %v3657_v24, %v3578_v20  ;;  %v3762_v20 = vadd.f32 %v3745_v42, %v3669_v56 }
 0x636   : > { %v3752_v5 = vpop.f32.mrf.mxu0  ;;  %v3856_v45 = vadd.f32 %v3839_v59, %v3762_v20  ;;  %v3764_v34 = vadd.f32 %v3750_v52, %v3671_v39 }
 0x637   : > { %v3846_v27 = vpop.f32.mrf.mxu1 }
 0x638   : > { %v3949_v49 = vadd.f32 %v3932_v13, %v3856_v45  ;;  %v3858_v16 = vadd.f32 %v3844_v62, %v3764_v34 }
 0x63b   : > { %v3659_v26 = vpop.f32.mrf.mxu3  ;;  %v3937_v18 = vpop.f32.mrf.mxu2 }
 0x63c   : > { %v3672_v17 = vadd.f32 %v3659_v26, %v3579_v53  ;;  %v3854_v53 = vadd.f32 %v3834_v37, %v3760_v7  ;;  %v3857_v26 = vadd.f32 %v3841_v48, %v3763_v23  ;;  %v3951_v61 = vadd.f32 %v3937_v18, %v3858_v16  ;;  %v4060_v16 = vld [vmem:[%s6458_s19] sm:$0xf] }
 0x63e   : > { %v3755_v50 = vpop.f32.mrf.mxu0  ;;  %v3765_v32 = vadd.f32 %v3752_v5, %v3672_v17  ;;  %v3947_v15 = vadd.f32 %v3927_v4, %v3854_v53  ;;  %v3950_v6 = vadd.f32 %v3934_v54, %v3857_v26 }
 0x63f   : > { %v3849_v39 = vpop.f32.mrf.mxu1 }
 0x640   : > { %v3859_v37 = vadd.f32 %v3846_v27, %v3765_v32 }
 0x643   : > { %v3662_v40 = vpop.f32.mrf.mxu3  ;;  %v3939_v3 = vpop.f32.mrf.mxu2 }
 0x644   : > { %v3673_v24 = vadd.f32 %v3662_v40, %v3580_v38  ;;  %v3952_v43 = vadd.f32 %v3939_v3, %v3859_v37  ;;  %v4061_v37 = vld [vmem:[%s6459_s20] sm:$0xf] }
 0x646   : > { %v3766_v56 = vadd.f32 %v3755_v50, %v3673_v24  ;;  %v3757_v10 = vpop.f32.mrf.mxu0 }
 0x647   : > { %v3851_v47 = vpop.f32.mrf.mxu1 }
 0x648   : > { %v3860_v42 = vadd.f32 %v3849_v39, %v3766_v56 }
 0x64b   : > { %v3664_v12 = vpop.f32.mrf.mxu3  ;;  %v3942_v40 = vpop.f32.mrf.mxu2 }
 0x64c   : > { %v3674_v63 = vadd.f32 %v3664_v12, %v3581_v8 }
 0x64e   : > { %v3767_v54 = vadd.f32 %v3757_v10, %v3674_v63 }
 0x650   : > { %v3861_v3 = vadd.f32 %v3851_v47, %v3767_v54 }
 0x653   : > { %v4020_v1 = vpop.f32.mrf.mxu3  ;;  %v3944_v27 = vpop.f32.mrf.mxu2 }
 0x654   : > { %v4040_v29 = vadd.f32 %v4020_v1, %v3947_v15  ;;  %v3954_v23 = vadd.f32 %v3944_v27, %v3861_v3  ;;  %v4063_v3 = vld [vmem:[%s6461_s22] sm:$0x1] }
 0x656   : > { %v6360_v59 = vadd.f32 %v4904_v36, %v4040_v29 }
 0x658   : > { %v4064_v52 = vsel %vm3185_vm13, %v6360_v59, 0.0 }
 0x65b   : > { %v4022_v2 = vpop.f32.mrf.mxu3 }
 0x65c   : > { %v4041_v11 = vadd.f32 %v4022_v2, %v3948_v30  ;;  %v3953_v2 = vadd.f32 %v3942_v40, %v3860_v42 }
 0x65e   : > { %v6358_v17 = vadd.f32 %v4904_v36, %v4041_v11 }
 0x660   : > { %v4065_v33 = vsel %vm3185_vm13, %v6358_v17, 0.0 }
 0x663   : > { %v4025_v57 = vpop.f32.mrf.mxu3 }
 0x664   : > { %v4042_v28 = vadd.f32 %v4025_v57, %v3949_v49 }
 0x666   : > { %v6362_v13 = vadd.f32 %v4904_v36, %v4042_v28 }
 0x668   : > { %v4067_v12 = vsel %vm3185_vm13, %v6362_v13, 0.0 }
 0x66b   : > { %v4027_v14 = vpop.f32.mrf.mxu3 }
 0x66c   : > { %v4043_v4 = vadd.f32 %v4027_v14, %v3950_v6  ;;  %v4066_v14 = vadd.f32 %v4065_v33, %v4064_v52 }
 0x66e   : > { %v6366_v48 = vadd.f32 %v4904_v36, %v4043_v4  ;;  %v4068_v7 = vadd.f32 %v4067_v12, %v4066_v14 }
 0x670   : > { %v4069_v5 = vsel %vm3185_vm13, %v6366_v48, 0.0 }
 0x671   : > { %v4070_v20 = vadd.f32 %v4069_v5, %v4068_v7 }
 0x673   : > { %v4030_v9 = vpop.f32.mrf.mxu3 }
 0x674   : > { %v4044_v1 = vadd.f32 %v4030_v9, %v3951_v61 }
 0x676   : > { %v6372_v62 = vadd.f32 %v4904_v36, %v4044_v1 }
 0x678   : > { %v4071_v9 = vsel %vm3185_vm13, %v6372_v62, 0.0 }
 0x679   : > { %v4072_v0 = vadd.f32 %v4071_v9, %v4070_v20 }
 0x67b   : > { %v4032_v44 = vpop.f32.mrf.mxu3 }
 0x67c   : > { %v4045_v32 = vadd.f32 %v4032_v44, %v3952_v43 }
 0x67e   : > { %v6376_v35 = vadd.f32 %v4904_v36, %v4045_v32 }
 0x680   : > { %v4073_v38 = vsel %vm3185_vm13, %v6376_v35, 0.0 }
 0x681   : > { %v4074_v45 = vadd.f32 %v4073_v38, %v4072_v0 }
 0x683   : > { %v4035_v57 = vpop.f32.mrf.mxu3 }
 0x684   : > { %v4046_v18 = vadd.f32 %v4035_v57, %v3953_v2  ;;  %v4062_v57 = vld [vmem:[%s6460_s21] sm:$0xf] }
 0x686   : > { %v6380_v41 = vadd.f32 %v4904_v36, %v4046_v18 }
 0x688   : > { %v4075_v53 = vsel %vm3185_vm13, %v6380_v41, 0.0 }
 0x689   : > { %v4076_v50 = vadd.f32 %v4075_v53, %v4074_v45 }
 0x68b   : > { %v4037_v46 = vpop.f32.mrf.mxu3 }
 0x68c   : > { %v4047_v30 = vadd.f32 %v4037_v46, %v3954_v23 }
 0x68e   : > { %v6386_v34 = vadd.f32 %v4904_v36, %v4047_v30 }
 0x690   : > { %v4077_v24 = vsel %vm3185_vm13, %v6386_v34, 0.0 }
 0x691   : > { %v4078_v26 = vadd.f32 %v4077_v24, %v4076_v50 }
 0x693   : > { %v4079_v15 = vrot.slane %v4078_v26, 4 }
 0x695   : > { %v4080_v49 = vadd.f32 %v4079_v15, %v4078_v26 }
 0x697   : > { %v4081_v11 = vrot.slane %v4080_v49, 2 }
 0x699   : > { %v4082_v55 = vadd.f32 %v4081_v11, %v4080_v49 }
 0x69b   : > { %v4083_v6 = vrot.slane %v4082_v55, 1 }
 0x69d   : > { %v4084_v44 = vadd.f32 %v4083_v6, %v4082_v55  ;;  %v4902_v55 = vld [vmem:[%s6457_s18] ss:$0 sm:$0xff] }
 0x69f   : > { %v4085_v56 = vmul.f32 %v4084_v44, %v5741_v58 }
 0x6a1   : > { %v4086_v29 = vmul.f32 %v4085_v56, %v4060_v16 }
 0x6a3   : > { %v4136_v36 = vsel %vm4135_vm15, %v4086_v29, 0.0  ;;  %v4100_v28 = vsel %vm4099_vm0, %v4086_v29, 0.0  ;;  %v4087_v8 = vsel %vm3188_vm14, %v4086_v29, 0.0  ;;  %v4118_v39 = vsel %vm4117_vm1, %v4086_v29, 0.0 }
 0x6a4   : > { %4137 = vadd.xlane.f32.xlu0 %v4136_v36  ;;  %4101 = vadd.xlane.f32.xlu2 %v4100_v28  ;;  %v2429_v29 = vadd.f32 %v4902_v55, %v5918_v60  ;;  %v2431_v36 = vadd.f32 %v4902_v55, %v5922_v31  ;;  %v2434_v28 = vadd.f32 %v4902_v55, %v5928_v22 }
 0x6a5   : > { %4088 = vadd.xlane.f32.xlu1 %v4087_v8 }
 0x6ac   : > { %4119 = vadd.xlane.f32.xlu2 %v4118_v39  ;;  %v2436_v39 = vadd.f32 %v4902_v55, %v5934_v25 }
 0x717   : > { %v4102_v40 = vpop.xlane.xlu2 %4101  ;;  %v4138_v2 = vpop.xlane.xlu0 %4137 }
 0x718   : > { %v4103_v61 = vadd.f32 %v4102_v40, %v4061_v37  ;;  %v4089_v58 = vpop.xlane.xlu1 %4088  ;;  %v4139_v33 = vadd.f32 %v4138_v2, %v4061_v37  ;;  %v2441_v40 = vadd.f32 %v4902_v55, %v5947_v19 }
 0x719   : > { %v4090_v4 = vadd.f32 %v4089_v58, %v4061_v37 }
 0x71a   : > { %v4104_v43 = vmax.f32 %v4103_v61, 0.0  ;;  %v4140_v32 = vmax.f32 %v4139_v33, 0.0  ;;  %v2444_v61 = vadd.f32 %v4902_v55, %v5954_v51 }
 0x71b   : > { %v4091_v63 = vmax.f32 %v4090_v4, 0.0 }
 0x71c   : > { %4107 = vperm.xlu0 %4897, %v4104_v43  }
 0x71d   : > { %4094 = vperm.xlu2 %4896, %v4091_v63  }
 0x71f   : > { %v4120_v42 = vpop.xlane.xlu2 %4119 }
 0x720   : > { %v4121_v1 = vadd.f32 %v4120_v42, %v4061_v37  ;;  %v2439_v37 = vadd.f32 %v4902_v55, %v5940_v21 }
 0x722   : > { %v4122_v10 = vmax.f32 %v4121_v1, 0.0  ;;  %v6502_v1 = vld [vmem:[#allocation7_spill] sm:$0xff] }
 0x725   : > { %4125 = vperm.xlu2 %4896, %v4122_v10  }
 0x72d   : > { %4143 = vperm.xlu2 %4896, %v4140_v32  }
 0x777   : > { %v4095_v54 = vpop.permute.xlu2 %4094 }
 0x778   : > { %v4097_v27 = vmul.f32 %v4095_v54, %v4062_v57 }
 0x77a   : > { %v4098_v20 = vadd.f32 %v4097_v27, %v4063_v3 }
 0x77f   : > { %v4126_v18 = vpop.permute.xlu2 %4125 }
 0x780   : > { %v4128_v14 = vmul.f32 %v4126_v18, %v4062_v57 }
 0x787   : > { %v4144_v47 = vpop.permute.xlu2 %4143 }
 0x788   : > { %v4146_v7 = vmul.f32 %v4144_v47, %v4062_v57 }
 0x78e   : > { %v4108_v52 = vpop.permute.xlu0 %4107 }
 0x78f   : > { %v4110_v12 = vmul.f32 %v4108_v52, %v4062_v57 }
 0x791   : > { %4112 = vst [vmem:[#allocation1] sm:$0xff] %v4110_v12 }
 0x798   : > { %v4114_v5 = vld [vmem:[#allocation1 + $0x1] ss:$9 sm:$0xff] }
 0x799   : > { %4130 = vst [vmem:[#allocation1] sm:$0xff] %v4128_v14  ;;  %v4116_v23 = vadd.f32 %v4114_v5, %v4098_v20 }
 0x7a0   : > { %v4132_v9 = vld [vmem:[#allocation1 + $0x2] ss:$9 sm:$0xff] }
 0x7a1   : > { %4148 = vst [vmem:[#allocation1] sm:$0xff] %v4146_v7  ;;  %v4134_v38 = vadd.f32 %v4132_v9, %v4116_v23 }
 0x7a8   : > { %v4150_v0 = vld [vmem:[#allocation1 + $0x3] ss:$9 sm:$0xff] }
 0x7a9   : > { %v4152_v46 = vadd.f32 %v4150_v0, %v4134_v38 }
 0x7ab   : > { %v4788_v53 = vmul.f32 -1.442695, %v4152_v46 }
 0x7ad   : > { %4911 = vpow2.f32 %v4788_v53 }
 0x7b3   : > { %v4912_v30 = vpop.eup %4911 }
 0x7b4   : > { %v4156_v45 = vadd.f32 1.0, %v4912_v30 }
 0x7b6   : > { %4913 = vrcp.f32 %v4156_v45  ;;  %v4168_v15 = vand.u32 2147483648, %v4156_v45  ;;  %v4166_v11 = vand.u32 2147483647, %v4156_v45  ;;  %vm4162_vm3 = vweird.f32 %v4156_v45 }
 0x7b8   : > { %v4169_v44 = vor.u32 1.1754944e-38, %v4168_v15  ;;  %vm4167_vm5 = vcmp.eq.f32.partialorder %v4166_v11, 8.507059e+37 }
 0x7bc   : > { %v4914_v50 = vpop.eup %4913 }
 0x7bd   : > { %v4158_v24 = vmul.f32 %v4914_v50, %v4156_v45  ;;  %vm4163_vm2 = vweird.f32 %v4914_v50 }
 0x7be   : > { %vm4164_vm4 = vmor %vm4162_vm3, %vm4163_vm2 }
 0x7bf   : > { %v4159_v26 = vsub.f32 1.0, %v4158_v24 }
 0x7c1   : > { %v4160_v49 = vmul.f32 %v4914_v50, %v4159_v26 }
 0x7c3   : > { %v4161_v6 = vadd.f32 %v4914_v50, %v4160_v49 }
 0x7c5   : > { %v4165_v16 = vsel %vm4164_vm4, %v4914_v50, %v4161_v6 }
 0x7c6   : > { %v4170_v56 = vsel %vm4167_vm5, %v4169_v44, %v4165_v16 }
 0x7c7   : > { %v4173_v8 = vperm.slane %v4170_v56, 0 }
 0x7c9   : > { %v4175_v58 = vmul.f32 %v4173_v8, %v6360_v59  ;;  %v4176_v4 = vmul.f32 %v4173_v8, %v6358_v17  ;;  %v4177_v60 = vmul.f32 %v4173_v8, %v6362_v13  ;;  %v4178_v31 = vmul.f32 %v4173_v8, %v6366_v48 }
 0x7ca   : > { %v4179_v22 = vmul.f32 %v4173_v8, %v6372_v62  ;;  %v4180_v43 = vmul.f32 %v4173_v8, %v6376_v35  ;;  %v4181_v25 = vmul.f32 %v4173_v8, %v6380_v41  ;;  %v4182_v21 = vmul.f32 %v4173_v8, %v6386_v34 }
 0x7cb   : > { %v4183_v19 = vadd.f32 %v4175_v58, %v2429_v29  ;;  %v4184_v63 = vadd.f32 %v4176_v4, %v2431_v36  ;;  %v4185_v51 = vadd.f32 %v4177_v60, %v2434_v28  ;;  %v4186_v42 = vadd.f32 %v4178_v31, %v2436_v39 }
 0x7cc   : > { %v2446_v59 = vadd.f32 %v4902_v55, %v6502_v1  ;;  %v4187_v17 = vadd.f32 %v4179_v22, %v2439_v37  ;;  %v4188_v13 = vadd.f32 %v4180_v43, %v2441_v40  ;;  %v4189_v48 = vadd.f32 %v4181_v25, %v2444_v61 }
 0x7cd   : > { %v4191_v62 = vmax.f32 %v4183_v19, 0.0  ;;  %v4192_v10 = vmax.f32 %v4184_v63, 0.0  ;;  %v4193_v35 = vmax.f32 %v4185_v51, 0.0  ;;  %v4194_v41 = vmax.f32 %v4186_v42, 0.0 }
 0x7ce   : > { %v4190_v2 = vadd.f32 %v4182_v21, %v2446_v59  ;;  %v4195_v33 = vmax.f32 %v4187_v17, 0.0  ;;  %v4196_v34 = vmax.f32 %v4188_v13, 0.0  ;;  %v4197_v32 = vmax.f32 %v4189_v48, 0.0 }
 0x7cf   : > { %4199 = vst.msk [vmem:[%s712_s1] sm:$0xff] %vm3185_vm13, %v4191_v62 }
 0x7d0   : > { %4200 = vst.msk [vmem:[%s712_s1 + $0x8] sm:$0xff] %vm3185_vm13, %v4192_v10  ;;  %v4198_v54 = vmax.f32 %v4190_v2, 0.0 }
 0x7d1   : > { %4201 = vst.msk [vmem:[%s712_s1 + $0x10] sm:$0xff] %vm3185_vm13, %v4193_v35 }
 0x7d2   : > { %4202 = vst.msk [vmem:[%s712_s1 + $0x18] sm:$0xff] %vm3185_vm13, %v4194_v41 }
 0x7d3   : > { %4203 = vst.msk [vmem:[%s712_s1 + $0x20] sm:$0xff] %vm3185_vm13, %v4195_v33 }
 0x7d4   : > { %4204 = vst.msk [vmem:[%s712_s1 + $0x28] sm:$0xff] %vm3185_vm13, %v4196_v34 }
 0x7d5   : > { %4205 = vst.msk [vmem:[%s712_s1 + $0x30] sm:$0xff] %vm3185_vm13, %v4197_v32 }
 0x7d6   : > { %4206 = vst.msk [vmem:[%s712_s1 + $0x38] sm:$0xff] %vm3185_vm13, %v4198_v54 }
 0x7d7 PF: > { %s33_s4 = sadd.s32 1, %s4921_s4  }
 0x7d8   : > { %p30_p5 = scmp.ge.s32.totalorder %s33_s4, 4  }
 0x7da   :  { %32 = sbr.rel (!%p30_p5) target bundleno = 9 (0x9), region = 154 }

</bundles_post_ra>
